<compile_context>
chip_gen: v6e
topology: v6e:2x2x1
jax: 0.10.0
libtpu: 0.0.40
codegen_flags: <defaults>
</compile_context>

<pallas_src>
import jax
import jax.numpy as jnp
from jax.experimental import pallas as pl
from jax.experimental.pallas import tpu as pltpu


# Explicit scoped-VMEM budget: fits v5e/v6e (128 MiB physical) and v7x (64 MiB).
_VMEM_LIMIT = 32 * 1024 * 1024


# ----------------------------------------------------------------------------
# Pallas kernel 1: fused 3x3 conv + bias + ReLU (FeatureExtractor2D).
# Input is the spatially padded image (no 9x im2col HBM expansion); the 3x3
# window is formed in-kernel via static slices and accumulated with C*9
# broadcast-FMAs on the VPU (K = C*9 < 32, MXU would be drain-dominated here).
# TODO(synk): for large images, tile rows (halo via Element-indexed blocks)
#             instead of loading the whole padded image per grid step.
# ----------------------------------------------------------------------------
def _conv3x3_relu_kernel(xp_ref, w_ref, b_ref, o_ref):
    c_in, hp, wp = xp_ref.shape
    h, w = hp - 2, wp - 2
    cf = o_ref.shape[0]
    acc = jnp.zeros((cf, h, w), jnp.float32)
    for dy in range(3):
        for dx in range(3):
            xs = xp_ref[:, dy:dy + h, dx:dx + w]          # (C, h, w) static slice
            for c in range(c_in):
                wv = w_ref[(dy * 3 + dx) * c_in + c]      # (Cf, 1, 1)
                acc = acc + wv * xs[c:c + 1]              # -> (Cf, h, w)
    o_ref[...] = jnp.maximum(acc + b_ref[...], 0.0)


def feature_extractor_2d(x_nchw, fe_w, fe_b):
    """x: (BN, C, h, w) f32; fe_w: (Cf, C, 3, 3); fe_b: (Cf,) -> (BN, Cf, h, w)."""
    bn, c, h, w = x_nchw.shape
    cf = fe_w.shape[0]
    xpad = jnp.pad(x_nchw, ((0, 0), (0, 0), (1, 1), (1, 1))).astype(jnp.float32)
    # (Cf, C, 3, 3) -> (3*3*C, Cf, 1, 1); row j = (dy*3 + dx)*C + c.
    wk = fe_w.transpose(2, 3, 1, 0).reshape(9 * c, cf)[:, :, None, None]
    bias = fe_b.reshape(cf, 1, 1)
    return pl.pallas_call(
        _conv3x3_relu_kernel,
        out_shape=jax.ShapeDtypeStruct((bn, cf, h, w), jnp.float32),
        grid_spec=pltpu.PrefetchScalarGridSpec(
            num_scalar_prefetch=0,
            grid=(bn,),
            in_specs=[
                pl.BlockSpec((None, c, h + 2, w + 2), lambda i: (i, 0, 0, 0)),
                pl.BlockSpec((9 * c, cf, 1, 1), lambda i: (0, 0, 0, 0)),
                pl.BlockSpec((cf, 1, 1), lambda i: (0, 0, 0)),
            ],
            out_specs=pl.BlockSpec((None, cf, h, w), lambda i: (i, 0, 0, 0)),
        ),
        compiler_params=pltpu.CompilerParams(
            dimension_semantics=("parallel",),
            vmem_limit_bytes=_VMEM_LIMIT),
    )(xpad, wk.astype(jnp.float32), bias.astype(jnp.float32))


# ----------------------------------------------------------------------------
# Pallas kernel 2: fused view-cost volume + DepthConvLSTM.
#
# Per grid step (b, pixel-tile) the kernel holds ALL depths and views of that
# pixel tile in VMEM (layout (N, D*Cf, TP), pixels on lanes) and:
#   * computes view_cost[n,d]      = sum_c F[n,c]*mean_m F[m,c]     (exact)
#            view_cost_mean[d]     = sum_c (mean_m F[m,c])^2        (exact)
#   * runs the ConvLSTM depth recurrence (unrolled over D) with 1x1-conv gates:
#       gates = Wg^T @ [F[n,d]; vc; vcm; h]   (MXU, bf16 -> f32)
#     state h/c stays in registers/VMEM, never touches HBM.
#   * projects to a logit with a VPU reduce (K = Ch < 32; no 1-column matmul)
#   * writes one lane-dense (N, D, TP) logits block per tile.
# ----------------------------------------------------------------------------
def _cost_lstm_kernel(wf_ref, wg_ref, bg_ref, ow_ref, ob_ref, out_ref):
    n_views, dcf, tp = wf_ref.shape
    four_ch, cin = wg_ref.shape
    ch = four_ch // 4
    cf = cin - 2 - ch
    nd = dcf // cf

    x_bf = wf_ref[...]                         # (N, D*Cf, TP) bf16
    x = x_bf.astype(jnp.float32)               # VPU cost math in f32 (v5e-safe)
    xm = x[0]
    for n in range(1, n_views):
        xm = xm + x[n]
    xm = xm * (1.0 / n_views)                  # (D*Cf, TP) mean feature over views
    prod = x * xm[None]                        # (N, D*Cf, TP)

    # view_cost_mean[d] = mean_m view_cost[m, d] = sum_c xm[d, c]^2 (exact identity).
    vcm_bf = []
    for d in range(nd):
        lo = d * cf
        xmd = xm[lo:lo + cf]
        vcm_bf.append(jnp.sum(xmd * xmd, axis=0, keepdims=True).astype(jnp.bfloat16))

    wg = wg_ref[...]                           # (4Ch, Cin) bf16
    bg = bg_ref[...]                           # (4Ch, 1)  f32
    ow = ow_ref[...]                           # (Ch, 1)   f32
    ob = ob_ref[...]                           # (1, 1)    f32

    rows = []
    for n in range(n_views):
        h_t = jnp.zeros((ch, tp), jnp.float32)
        c_t = jnp.zeros((ch, tp), jnp.float32)
        logits_d = []
        for d in range(nd):                    # depth recurrence, fully fused
            lo = d * cf
            vc_nd = jnp.sum(prod[n, lo:lo + cf], axis=0, keepdims=True)  # (1, TP)
            z = jnp.concatenate(
                [x_bf[n, lo:lo + cf],
                 vc_nd.astype(jnp.bfloat16),
                 vcm_bf[d],
                 h_t.astype(jnp.bfloat16)], axis=0)                      # (Cin, TP)
            gates = jnp.dot(wg, z, preferred_element_type=jnp.float32) + bg
            i_g = gates[0:ch]
            f_g = gates[ch:2 * ch]
            o_g = gates[2 * ch:3 * ch]
            g_g = gates[3 * ch:4 * ch]
            c_t = jax.nn.sigmoid(f_g) * c_t + jax.nn.sigmoid(i_g) * jnp.tanh(g_g)
            h_t = jax.nn.sigmoid(o_g) * jnp.tanh(c_t)
            logit = jnp.sum(h_t * ow, axis=0, keepdims=True) + ob        # (1, TP)
            logits_d.append(logit)
        rows.append(jnp.concatenate(logits_d, axis=0)[None])             # (1, D, TP)
    out_ref[...] = jnp.concatenate(rows, axis=0)                         # (N, D, TP)


def _pick_pixel_tile(hw):
    """Pixel lane-tile: whole image when small, else a large 128-multiple."""
    if hw <= 512:
        return hw, hw
    for tp in (512, 256, 128):
        if hw % tp == 0:
            return tp, hw
    return 512, ((hw + 511) // 512) * 512


def fused_cost_volume_lstm(warped_BNDCfhw, params):
    """warped: (B, N, D, Cf, h, w) f32 -> per-(view,depth,pixel) logits (B,N,D,h*w)."""
    B, N, D, Cf, h, w = warped_BNDCfhw.shape
    hw = h * w
    tp, p = _pick_pixel_tile(hw)

    # bf16 at the kernel boundary halves HBM DMA of the largest intermediate.
    wf = warped_BNDCfhw.astype(jnp.bfloat16).reshape(B, N, D * Cf, hw)
    if p != hw:
        wf = jnp.pad(wf, ((0, 0), (0, 0), (0, 0), (0, p - hw)))

    Wg = params["lstm_Wg"]                      # (Cf + 2 + Ch, 4*Ch)
    Ch = Wg.shape[1] // 4
    Cin = Wg.shape[0]
    wg_t = Wg.T.astype(jnp.bfloat16)            # (4Ch, Cin)
    bg = params["lstm_bg"].reshape(4 * Ch, 1).astype(jnp.float32)
    ow = params["out_W"].reshape(Ch, 1).astype(jnp.float32)
    ob = params["out_b"].reshape(1, 1).astype(jnp.float32)

    logits = pl.pallas_call(
        _cost_lstm_kernel,
        out_shape=jax.ShapeDtypeStruct((B, N, D, p), jnp.float32),
        grid_spec=pltpu.PrefetchScalarGridSpec(
            num_scalar_prefetch=0,
            grid=(B, p // tp),
            in_specs=[
                pl.BlockSpec((None, N, D * Cf, tp), lambda b, i: (b, 0, 0, i)),
                pl.BlockSpec((4 * Ch, Cin), lambda b, i: (0, 0)),
                pl.BlockSpec((4 * Ch, 1), lambda b, i: (0, 0)),
                pl.BlockSpec((Ch, 1), lambda b, i: (0, 0)),
                pl.BlockSpec((1, 1), lambda b, i: (0, 0)),
            ],
            out_specs=pl.BlockSpec((None, N, D, tp), lambda b, i: (b, 0, 0, i)),
        ),
        compiler_params=pltpu.CompilerParams(
            dimension_semantics=("parallel", "parallel"),
            vmem_limit_bytes=_VMEM_LIMIT),
    )(wf, wg_t, bg, ow, ob)
    return logits[..., :hw]                     # (B, N, D, hw)


# ----------------------------------------------------------------------------
# plane_sweep (JAX glue): homography warp of source features onto the target's
# fronto-parallel planes with bilinear sampling.  Emits (N, D, C, h, w) so the
# fused kernel consumes the layout directly (no wrapper transposes).
# TODO(synk): gather-based bilinear warp stays in plain JAX; a manual-DMA
#             Pallas gather kernel is the remaining large-scale win.
# ----------------------------------------------------------------------------
def _bilinear_sample(feat_chw, u, v):
    C, H_, W_ = feat_chw.shape
    u0 = jnp.floor(u)
    v0 = jnp.floor(v)
    du = u - u0
    dv = v - v0
    u0i = u0.astype(jnp.int32)
    v0i = v0.astype(jnp.int32)

    def gather(vi, ui):
        valid = (vi >= 0) & (vi < H_) & (ui >= 0) & (ui < W_)
        vc = jnp.clip(vi, 0, H_ - 1)
        uc = jnp.clip(ui, 0, W_ - 1)
        vals = feat_chw[:, vc, uc]                      # (C, h, w)
        return vals * valid.astype(feat_chw.dtype)[None]

    w00 = (1.0 - du) * (1.0 - dv)
    w01 = du * (1.0 - dv)
    w10 = (1.0 - du) * dv
    w11 = du * dv
    return (gather(v0i, u0i) * w00 + gather(v0i, u0i + 1) * w01 +
            gather(v0i + 1, u0i) * w10 + gather(v0i + 1, u0i + 1) * w11)


def plane_sweep_jax(feat_NChw, depths_D, poses_N44, Ksrc_N33, Ktgt_33, h, w):
    vs, us = jnp.meshgrid(jnp.arange(h, dtype=jnp.float32),
                          jnp.arange(w, dtype=jnp.float32), indexing="ij")
    pix = jnp.stack([us, vs, jnp.ones_like(us)], axis=0).reshape(3, -1)  # (3, hw)
    rays = jnp.linalg.inv(Ktgt_33) @ pix                                 # (3, hw)

    def warp_one(feat_chw, pose_44, Ksrc_33, depth):
        X_tgt = rays * depth
        R = pose_44[:3, :3]
        t = pose_44[:3, 3:4]
        X_src = R @ X_tgt + t
        p = Ksrc_33 @ X_src
        z = jnp.where(jnp.abs(p[2]) < 1e-6, 1e-6, p[2])
        u_s = (p[0] / z).reshape(h, w)
        v_s = (p[1] / z).reshape(h, w)
        return _bilinear_sample(feat_chw, u_s, v_s)      # (C, h, w)

    warp_depths = jax.vmap(warp_one, in_axes=(None, None, None, 0))  # over D
    warp_views = jax.vmap(warp_depths, in_axes=(0, 0, 0, None))      # over N
    return warp_views(feat_NChw, poses_N44, Ksrc_N33, depths_D)      # (N, D, C, h, w)


# ----------------------------------------------------------------------------
# DepthModel.forward
# ----------------------------------------------------------------------------
def depth_model_forward(src_images_BN3HW, src_cams_BN244, tgt_cam_B244,
                        depths_BD, params):
    B, N, C, H, W = src_images_BN3HW.shape
    D = depths_BD.shape[1]
    h, w = H // 2, W // 2

    # T.Resize((H//2, W//2)) bilinear (no antialias) on an exact /2 == 2x2 mean pool.
    x = src_images_BN3HW.reshape(B * N, C, H, W)
    x = x.reshape(B * N, C, h, 2, w, 2).mean(axis=(3, 5))            # (B*N, C, h, w)

    feats = feature_extractor_2d(x, params["fe_w"], params["fe_b"])  # (B*N, Cf, h, w)
    Cf = feats.shape[1]
    feats = feats.reshape(B, N, Cf, h, w)

    src_intrins_BN33 = src_cams_BN244[:, :, 0, :3, :3]
    tgt_intrins_B133 = tgt_cam_B244[:, 0:1, :3, :3]
    src_w2cs_BN44 = src_cams_BN244[:, :, 1, :4, :4]
    tgt_w2cs_B144 = tgt_cam_B244[:, 1:2, :4, :4]

    warped = []
    for i in range(B):
        src2tgt_N44 = jnp.matmul(src_w2cs_BN44[i], jnp.linalg.inv(tgt_w2cs_B144[i]))
        warped.append(plane_sweep_jax(feats[i], depths_BD[i], src2tgt_N44,
                                      src_intrins_BN33[i], tgt_intrins_B133[i, 0],
                                      h, w))
    warped = jnp.stack(warped, axis=0)           # (B, N, D, Cf, h, w) — no transpose

    # Fused cost volume + ConvLSTM over depth (single pallas_call).
    logits = fused_cost_volume_lstm(warped, params).reshape(B, N, D, h, w)

    # Nearest 2x upsample to full resolution, then heads (cheap XLA epilogue).
    logits_up = jnp.repeat(jnp.repeat(logits, 2, axis=-2), 2, axis=-1)  # (B,N,D,H,W)
    src_weight_BNDHW = jax.nn.sigmoid(logits_up)
    depth_logits_BDHW = jnp.mean(logits_up, axis=1)                     # (B, D, H, W)
    depth_probs_BD1HW = jax.nn.softmax(depth_logits_BDHW, axis=1)[:, :, None, :, :]
    return src_weight_BNDHW, depth_probs_BD1HW


# ----------------------------------------------------------------------------
# Deterministic parameter init and example inputs.
# ----------------------------------------------------------------------------
def init_params(key, Cimg=3, Cf=8, Ch=8):
    ks = jax.random.split(key, 4)
    s = 0.1
    return dict(
        fe_w=s * jax.random.normal(ks[0], (Cf, Cimg, 3, 3), jnp.float32),
        fe_b=s * jax.random.normal(ks[1], (Cf,), jnp.float32),
        lstm_Wg=s * jax.random.normal(ks[2], (Cf + 2 + Ch, 4 * Ch), jnp.float32),
        lstm_bg=jnp.zeros((4 * Ch,), jnp.float32),
        out_W=s * jax.random.normal(ks[3], (Ch, 1), jnp.float32),
        out_b=jnp.zeros((1,), jnp.float32),
    )


def build_cams(B, N, h, w):
    f = float(w)
    K33 = jnp.array([[f, 0.0, w / 2.0],
                     [0.0, f, h / 2.0],
                     [0.0, 0.0, 1.0]], jnp.float32)
    K44 = jnp.eye(4, dtype=jnp.float32).at[:3, :3].set(K33)
    src_cams = []
    for b in range(B):
        cams_n = []
        for n in range(N):
            t = jnp.array([0.15 * (n + 1) + 0.05 * b, -0.1 * (n + 1), 0.02 * b],
                          jnp.float32)
            w2c = jnp.eye(4, dtype=jnp.float32).at[:3, 3].set(t)
            cams_n.append(jnp.stack([K44, w2c], axis=0))
        src_cams.append(jnp.stack(cams_n, axis=0))
    src_cams_BN244 = jnp.stack(src_cams, axis=0)                 # (B, N, 2, 4, 4)
    tgt_cam_B244 = jnp.stack(
        [jnp.stack([K44, jnp.eye(4, dtype=jnp.float32)], axis=0) for _ in range(B)],
        axis=0)                                                  # (B, 2, 4, 4)
    return src_cams_BN244, tgt_cam_B244


if __name__ == "__main__":
    B, N, Cimg, H, W, D = 2, 2, 3, 16, 16, 8
    key = jax.random.PRNGKey(0)
    k_img, _ = jax.random.split(key)

    src_images_BN3HW = jax.random.normal(k_img, (B, N, Cimg, H, W), jnp.float32)
    src_cams_BN244, tgt_cam_B244 = build_cams(B, N, H // 2, W // 2)
    depths_BD = jnp.broadcast_to(jnp.linspace(1.0, 4.0, D, dtype=jnp.float32), (B, D))

    params = init_params(jax.random.PRNGKey(1))

    fwd = jax.jit(depth_model_forward)
    src_weight_BNDHW, depth_probs_BD1HW = fwd(
        src_images_BN3HW, src_cams_BN244, tgt_cam_B244, depths_BD, params)

    jax.block_until_ready(src_weight_BNDHW)
    jax.block_until_ready(depth_probs_BD1HW)

    assert src_weight_BNDHW.shape == (B, N, D, H, W)
    assert depth_probs_BD1HW.shape == (B, D, 1, H, W)
    assert bool(jnp.all(jnp.isfinite(src_weight_BNDHW)))
    assert bool(jnp.all(jnp.isfinite(depth_probs_BD1HW)))
    print("KERNEL_OK")
</pallas_src>

<mosaic_0001>
module attributes {stable_mosaic.version = 11 : i64} {
  func.func @_conv3x3_relu_kernel(%arg0: i32, %arg1: memref<1x3x10x10xf32, #tpu.memory_space<vmem>>, %arg2: memref<27x8x1x1xf32, #tpu.memory_space<vmem>>, %arg3: memref<8x1x1xf32, #tpu.memory_space<vmem>>, %arg4: memref<1x8x8x8xf32, #tpu.memory_space<vmem>>) attributes {dimension_semantics = [#tpu.dimension_semantics<parallel>], iteration_bounds = array<i64: 4>, scalar_prefetch = 0 : i64, scratch_operands = 0 : i64, tpu.core_type = #tpu.core_type<tc>, window_params = [{transform_indices = @transform_0, window_bounds = array<i64: 1, 3, 10, 10>}, {pipeline_mode = #tpu.pipeline_mode<synchronous>, transform_indices = @transform_1, window_bounds = array<i64: 27, 8, 1, 1>}, {pipeline_mode = #tpu.pipeline_mode<synchronous>, transform_indices = @transform_2, window_bounds = array<i64: 8, 1, 1>}, {transform_indices = @transform_3, window_bounds = array<i64: 1, 8, 8, 8>}]} {
    %cst = arith.constant 0.000000e+00 : f32
    %0 = vector.broadcast %cst : f32 to vector<8x8x8xf32>
    %c0 = arith.constant 0 : index
    %c0_0 = arith.constant 0 : index
    %c0_1 = arith.constant 0 : index
    %c0_2 = arith.constant 0 : index
    %1 = vector.load %arg1[%c0, %c0_0, %c0_1, %c0_2] : memref<1x3x10x10xf32, #tpu.memory_space<vmem>>, vector<1x3x8x8xf32>
    %2 = vector.shape_cast %1 : vector<1x3x8x8xf32> to vector<3x8x8xf32>
    %c0_3 = arith.constant 0 : index
    %c0_4 = arith.constant 0 : index
    %c0_5 = arith.constant 0 : index
    %c0_6 = arith.constant 0 : index
    %3 = vector.load %arg2[%c0_3, %c0_4, %c0_5, %c0_6] : memref<27x8x1x1xf32, #tpu.memory_space<vmem>>, vector<1x8x1x1xf32>
    %4 = vector.shape_cast %3 : vector<1x8x1x1xf32> to vector<8x1x1xf32>
    %5 = vector.extract_strided_slice %2 {offsets = [0, 0, 0], sizes = [1, 8, 8], strides = [1, 1, 1]} : vector<3x8x8xf32> to vector<1x8x8xf32>
    %6 = vector.broadcast %4 : vector<8x1x1xf32> to vector<8x8x8xf32>
    %7 = vector.broadcast %5 : vector<1x8x8xf32> to vector<8x8x8xf32>
    %8 = arith.mulf %6, %7 : vector<8x8x8xf32>
    %9 = arith.addf %0, %8 : vector<8x8x8xf32>
    %c1 = arith.constant 1 : index
    %c0_7 = arith.constant 0 : index
    %c0_8 = arith.constant 0 : index
    %c0_9 = arith.constant 0 : index
    %10 = vector.load %arg2[%c1, %c0_7, %c0_8, %c0_9] : memref<27x8x1x1xf32, #tpu.memory_space<vmem>>, vector<1x8x1x1xf32>
    %11 = vector.shape_cast %10 : vector<1x8x1x1xf32> to vector<8x1x1xf32>
    %12 = vector.extract_strided_slice %2 {offsets = [1, 0, 0], sizes = [1, 8, 8], strides = [1, 1, 1]} : vector<3x8x8xf32> to vector<1x8x8xf32>
    %13 = vector.broadcast %11 : vector<8x1x1xf32> to vector<8x8x8xf32>
    %14 = vector.broadcast %12 : vector<1x8x8xf32> to vector<8x8x8xf32>
    %15 = arith.mulf %13, %14 : vector<8x8x8xf32>
    %16 = arith.addf %9, %15 : vector<8x8x8xf32>
    %c2 = arith.constant 2 : index
    %c0_10 = arith.constant 0 : index
    %c0_11 = arith.constant 0 : index
    %c0_12 = arith.constant 0 : index
    %17 = vector.load %arg2[%c2, %c0_10, %c0_11, %c0_12] : memref<27x8x1x1xf32, #tpu.memory_space<vmem>>, vector<1x8x1x1xf32>
    %18 = vector.shape_cast %17 : vector<1x8x1x1xf32> to vector<8x1x1xf32>
    %19 = vector.extract_strided_slice %2 {offsets = [2, 0, 0], sizes = [1, 8, 8], strides = [1, 1, 1]} : vector<3x8x8xf32> to vector<1x8x8xf32>
    %20 = vector.broadcast %18 : vector<8x1x1xf32> to vector<8x8x8xf32>
    %21 = vector.broadcast %19 : vector<1x8x8xf32> to vector<8x8x8xf32>
    %22 = arith.mulf %20, %21 : vector<8x8x8xf32>
    %23 = arith.addf %16, %22 : vector<8x8x8xf32>
    %c0_13 = arith.constant 0 : index
    %c0_14 = arith.constant 0 : index
    %c0_15 = arith.constant 0 : index
    %c1_16 = arith.constant 1 : index
    %24 = vector.load %arg1[%c0_13, %c0_14, %c0_15, %c1_16] : memref<1x3x10x10xf32, #tpu.memory_space<vmem>>, vector<1x3x8x8xf32>
    %25 = vector.shape_cast %24 : vector<1x3x8x8xf32> to vector<3x8x8xf32>
    %c3 = arith.constant 3 : index
    %c0_17 = arith.constant 0 : index
    %c0_18 = arith.constant 0 : index
    %c0_19 = arith.constant 0 : index
    %26 = vector.load %arg2[%c3, %c0_17, %c0_18, %c0_19] : memref<27x8x1x1xf32, #tpu.memory_space<vmem>>, vector<1x8x1x1xf32>
    %27 = vector.shape_cast %26 : vector<1x8x1x1xf32> to vector<8x1x1xf32>
    %28 = vector.extract_strided_slice %25 {offsets = [0, 0, 0], sizes = [1, 8, 8], strides = [1, 1, 1]} : vector<3x8x8xf32> to vector<1x8x8xf32>
    %29 = vector.broadcast %27 : vector<8x1x1xf32> to vector<8x8x8xf32>
    %30 = vector.broadcast %28 : vector<1x8x8xf32> to vector<8x8x8xf32>
    %31 = arith.mulf %29, %30 : vector<8x8x8xf32>
    %32 = arith.addf %23, %31 : vector<8x8x8xf32>
    %c4 = arith.constant 4 : index
    %c0_20 = arith.constant 0 : index
    %c0_21 = arith.constant 0 : index
    %c0_22 = arith.constant 0 : index
    %33 = vector.load %arg2[%c4, %c0_20, %c0_21, %c0_22] : memref<27x8x1x1xf32, #tpu.memory_space<vmem>>, vector<1x8x1x1xf32>
    %34 = vector.shape_cast %33 : vector<1x8x1x1xf32> to vector<8x1x1xf32>
    %35 = vector.extract_strided_slice %25 {offsets = [1, 0, 0], sizes = [1, 8, 8], strides = [1, 1, 1]} : vector<3x8x8xf32> to vector<1x8x8xf32>
    %36 = vector.broadcast %34 : vector<8x1x1xf32> to vector<8x8x8xf32>
    %37 = vector.broadcast %35 : vector<1x8x8xf32> to vector<8x8x8xf32>
    %38 = arith.mulf %36, %37 : vector<8x8x8xf32>
    %39 = arith.addf %32, %38 : vector<8x8x8xf32>
    %c5 = arith.constant 5 : index
    %c0_23 = arith.constant 0 : index
    %c0_24 = arith.constant 0 : index
    %c0_25 = arith.constant 0 : index
    %40 = vector.load %arg2[%c5, %c0_23, %c0_24, %c0_25] : memref<27x8x1x1xf32, #tpu.memory_space<vmem>>, vector<1x8x1x1xf32>
    %41 = vector.shape_cast %40 : vector<1x8x1x1xf32> to vector<8x1x1xf32>
    %42 = vector.extract_strided_slice %25 {offsets = [2, 0, 0], sizes = [1, 8, 8], strides = [1, 1, 1]} : vector<3x8x8xf32> to vector<1x8x8xf32>
    %43 = vector.broadcast %41 : vector<8x1x1xf32> to vector<8x8x8xf32>
    %44 = vector.broadcast %42 : vector<1x8x8xf32> to vector<8x8x8xf32>
    %45 = arith.mulf %43, %44 : vector<8x8x8xf32>
    %46 = arith.addf %39, %45 : vector<8x8x8xf32>
    %c0_26 = arith.constant 0 : index
    %c0_27 = arith.constant 0 : index
    %c0_28 = arith.constant 0 : index
    %c2_29 = arith.constant 2 : index
    %47 = vector.load %arg1[%c0_26, %c0_27, %c0_28, %c2_29] : memref<1x3x10x10xf32, #tpu.memory_space<vmem>>, vector<1x3x8x8xf32>
    %48 = vector.shape_cast %47 : vector<1x3x8x8xf32> to vector<3x8x8xf32>
    %c6 = arith.constant 6 : index
    %c0_30 = arith.constant 0 : index
    %c0_31 = arith.constant 0 : index
    %c0_32 = arith.constant 0 : index
    %49 = vector.load %arg2[%c6, %c0_30, %c0_31, %c0_32] : memref<27x8x1x1xf32, #tpu.memory_space<vmem>>, vector<1x8x1x1xf32>
    %50 = vector.shape_cast %49 : vector<1x8x1x1xf32> to vector<8x1x1xf32>
    %51 = vector.extract_strided_slice %48 {offsets = [0, 0, 0], sizes = [1, 8, 8], strides = [1, 1, 1]} : vector<3x8x8xf32> to vector<1x8x8xf32>
    %52 = vector.broadcast %50 : vector<8x1x1xf32> to vector<8x8x8xf32>
    %53 = vector.broadcast %51 : vector<1x8x8xf32> to vector<8x8x8xf32>
    %54 = arith.mulf %52, %53 : vector<8x8x8xf32>
    %55 = arith.addf %46, %54 : vector<8x8x8xf32>
    %c7 = arith.constant 7 : index
    %c0_33 = arith.constant 0 : index
    %c0_34 = arith.constant 0 : index
    %c0_35 = arith.constant 0 : index
    %56 = vector.load %arg2[%c7, %c0_33, %c0_34, %c0_35] : memref<27x8x1x1xf32, #tpu.memory_space<vmem>>, vector<1x8x1x1xf32>
    %57 = vector.shape_cast %56 : vector<1x8x1x1xf32> to vector<8x1x1xf32>
    %58 = vector.extract_strided_slice %48 {offsets = [1, 0, 0], sizes = [1, 8, 8], strides = [1, 1, 1]} : vector<3x8x8xf32> to vector<1x8x8xf32>
    %59 = vector.broadcast %57 : vector<8x1x1xf32> to vector<8x8x8xf32>
    %60 = vector.broadcast %58 : vector<1x8x8xf32> to vector<8x8x8xf32>
    %61 = arith.mulf %59, %60 : vector<8x8x8xf32>
    %62 = arith.addf %55, %61 : vector<8x8x8xf32>
    %c8 = arith.constant 8 : index
    %c0_36 = arith.constant 0 : index
    %c0_37 = arith.constant 0 : index
    %c0_38 = arith.constant 0 : index
    %63 = vector.load %arg2[%c8, %c0_36, %c0_37, %c0_38] : memref<27x8x1x1xf32, #tpu.memory_space<vmem>>, vector<1x8x1x1xf32>
    %64 = vector.shape_cast %63 : vector<1x8x1x1xf32> to vector<8x1x1xf32>
    %65 = vector.extract_strided_slice %48 {offsets = [2, 0, 0], sizes = [1, 8, 8], strides = [1, 1, 1]} : vector<3x8x8xf32> to vector<1x8x8xf32>
    %66 = vector.broadcast %64 : vector<8x1x1xf32> to vector<8x8x8xf32>
    %67 = vector.broadcast %65 : vector<1x8x8xf32> to vector<8x8x8xf32>
    %68 = arith.mulf %66, %67 : vector<8x8x8xf32>
    %69 = arith.addf %62, %68 : vector<8x8x8xf32>
    %c0_39 = arith.constant 0 : index
    %c0_40 = arith.constant 0 : index
    %c1_41 = arith.constant 1 : index
    %c0_42 = arith.constant 0 : index
    %70 = vector.load %arg1[%c0_39, %c0_40, %c1_41, %c0_42] : memref<1x3x10x10xf32, #tpu.memory_space<vmem>>, vector<1x3x8x8xf32>
    %71 = vector.shape_cast %70 : vector<1x3x8x8xf32> to vector<3x8x8xf32>
    %c9 = arith.constant 9 : index
    %c0_43 = arith.constant 0 : index
    %c0_44 = arith.constant 0 : index
    %c0_45 = arith.constant 0 : index
    %72 = vector.load %arg2[%c9, %c0_43, %c0_44, %c0_45] : memref<27x8x1x1xf32, #tpu.memory_space<vmem>>, vector<1x8x1x1xf32>
    %73 = vector.shape_cast %72 : vector<1x8x1x1xf32> to vector<8x1x1xf32>
    %74 = vector.extract_strided_slice %71 {offsets = [0, 0, 0], sizes = [1, 8, 8], strides = [1, 1, 1]} : vector<3x8x8xf32> to vector<1x8x8xf32>
    %75 = vector.broadcast %73 : vector<8x1x1xf32> to vector<8x8x8xf32>
    %76 = vector.broadcast %74 : vector<1x8x8xf32> to vector<8x8x8xf32>
    %77 = arith.mulf %75, %76 : vector<8x8x8xf32>
    %78 = arith.addf %69, %77 : vector<8x8x8xf32>
    %c10 = arith.constant 10 : index
    %c0_46 = arith.constant 0 : index
    %c0_47 = arith.constant 0 : index
    %c0_48 = arith.constant 0 : index
    %79 = vector.load %arg2[%c10, %c0_46, %c0_47, %c0_48] : memref<27x8x1x1xf32, #tpu.memory_space<vmem>>, vector<1x8x1x1xf32>
    %80 = vector.shape_cast %79 : vector<1x8x1x1xf32> to vector<8x1x1xf32>
    %81 = vector.extract_strided_slice %71 {offsets = [1, 0, 0], sizes = [1, 8, 8], strides = [1, 1, 1]} : vector<3x8x8xf32> to vector<1x8x8xf32>
    %82 = vector.broadcast %80 : vector<8x1x1xf32> to vector<8x8x8xf32>
    %83 = vector.broadcast %81 : vector<1x8x8xf32> to vector<8x8x8xf32>
    %84 = arith.mulf %82, %83 : vector<8x8x8xf32>
    %85 = arith.addf %78, %84 : vector<8x8x8xf32>
    %c11 = arith.constant 11 : index
    %c0_49 = arith.constant 0 : index
    %c0_50 = arith.constant 0 : index
    %c0_51 = arith.constant 0 : index
    %86 = vector.load %arg2[%c11, %c0_49, %c0_50, %c0_51] : memref<27x8x1x1xf32, #tpu.memory_space<vmem>>, vector<1x8x1x1xf32>
    %87 = vector.shape_cast %86 : vector<1x8x1x1xf32> to vector<8x1x1xf32>
    %88 = vector.extract_strided_slice %71 {offsets = [2, 0, 0], sizes = [1, 8, 8], strides = [1, 1, 1]} : vector<3x8x8xf32> to vector<1x8x8xf32>
    %89 = vector.broadcast %87 : vector<8x1x1xf32> to vector<8x8x8xf32>
    %90 = vector.broadcast %88 : vector<1x8x8xf32> to vector<8x8x8xf32>
    %91 = arith.mulf %89, %90 : vector<8x8x8xf32>
    %92 = arith.addf %85, %91 : vector<8x8x8xf32>
    %c0_52 = arith.constant 0 : index
    %c0_53 = arith.constant 0 : index
    %c1_54 = arith.constant 1 : index
    %c1_55 = arith.constant 1 : index
    %93 = vector.load %arg1[%c0_52, %c0_53, %c1_54, %c1_55] : memref<1x3x10x10xf32, #tpu.memory_space<vmem>>, vector<1x3x8x8xf32>
    %94 = vector.shape_cast %93 : vector<1x3x8x8xf32> to vector<3x8x8xf32>
    %c12 = arith.constant 12 : index
    %c0_56 = arith.constant 0 : index
    %c0_57 = arith.constant 0 : index
    %c0_58 = arith.constant 0 : index
    %95 = vector.load %arg2[%c12, %c0_56, %c0_57, %c0_58] : memref<27x8x1x1xf32, #tpu.memory_space<vmem>>, vector<1x8x1x1xf32>
    %96 = vector.shape_cast %95 : vector<1x8x1x1xf32> to vector<8x1x1xf32>
    %97 = vector.extract_strided_slice %94 {offsets = [0, 0, 0], sizes = [1, 8, 8], strides = [1, 1, 1]} : vector<3x8x8xf32> to vector<1x8x8xf32>
    %98 = vector.broadcast %96 : vector<8x1x1xf32> to vector<8x8x8xf32>
    %99 = vector.broadcast %97 : vector<1x8x8xf32> to vector<8x8x8xf32>
    %100 = arith.mulf %98, %99 : vector<8x8x8xf32>
    %101 = arith.addf %92, %100 : vector<8x8x8xf32>
    %c13 = arith.constant 13 : index
    %c0_59 = arith.constant 0 : index
    %c0_60 = arith.constant 0 : index
    %c0_61 = arith.constant 0 : index
    %102 = vector.load %arg2[%c13, %c0_59, %c0_60, %c0_61] : memref<27x8x1x1xf32, #tpu.memory_space<vmem>>, vector<1x8x1x1xf32>
    %103 = vector.shape_cast %102 : vector<1x8x1x1xf32> to vector<8x1x1xf32>
    %104 = vector.extract_strided_slice %94 {offsets = [1, 0, 0], sizes = [1, 8, 8], strides = [1, 1, 1]} : vector<3x8x8xf32> to vector<1x8x8xf32>
    %105 = vector.broadcast %103 : vector<8x1x1xf32> to vector<8x8x8xf32>
    %106 = vector.broadcast %104 : vector<1x8x8xf32> to vector<8x8x8xf32>
    %107 = arith.mulf %105, %106 : vector<8x8x8xf32>
    %108 = arith.addf %101, %107 : vector<8x8x8xf32>
    %c14 = arith.constant 14 : index
    %c0_62 = arith.constant 0 : index
    %c0_63 = arith.constant 0 : index
    %c0_64 = arith.constant 0 : index
    %109 = vector.load %arg2[%c14, %c0_62, %c0_63, %c0_64] : memref<27x8x1x1xf32, #tpu.memory_space<vmem>>, vector<1x8x1x1xf32>
    %110 = vector.shape_cast %109 : vector<1x8x1x1xf32> to vector<8x1x1xf32>
    %111 = vector.extract_strided_slice %94 {offsets = [2, 0, 0], sizes = [1, 8, 8], strides = [1, 1, 1]} : vector<3x8x8xf32> to vector<1x8x8xf32>
    %112 = vector.broadcast %110 : vector<8x1x1xf32> to vector<8x8x8xf32>
    %113 = vector.broadcast %111 : vector<1x8x8xf32> to vector<8x8x8xf32>
    %114 = arith.mulf %112, %113 : vector<8x8x8xf32>
    %115 = arith.addf %108, %114 : vector<8x8x8xf32>
    %c0_65 = arith.constant 0 : index
    %c0_66 = arith.constant 0 : index
    %c1_67 = arith.constant 1 : index
    %c2_68 = arith.constant 2 : index
    %116 = vector.load %arg1[%c0_65, %c0_66, %c1_67, %c2_68] : memref<1x3x10x10xf32, #tpu.memory_space<vmem>>, vector<1x3x8x8xf32>
    %117 = vector.shape_cast %116 : vector<1x3x8x8xf32> to vector<3x8x8xf32>
    %c15 = arith.constant 15 : index
    %c0_69 = arith.constant 0 : index
    %c0_70 = arith.constant 0 : index
    %c0_71 = arith.constant 0 : index
    %118 = vector.load %arg2[%c15, %c0_69, %c0_70, %c0_71] : memref<27x8x1x1xf32, #tpu.memory_space<vmem>>, vector<1x8x1x1xf32>
    %119 = vector.shape_cast %118 : vector<1x8x1x1xf32> to vector<8x1x1xf32>
    %120 = vector.extract_strided_slice %117 {offsets = [0, 0, 0], sizes = [1, 8, 8], strides = [1, 1, 1]} : vector<3x8x8xf32> to vector<1x8x8xf32>
    %121 = vector.broadcast %119 : vector<8x1x1xf32> to vector<8x8x8xf32>
    %122 = vector.broadcast %120 : vector<1x8x8xf32> to vector<8x8x8xf32>
    %123 = arith.mulf %121, %122 : vector<8x8x8xf32>
    %124 = arith.addf %115, %123 : vector<8x8x8xf32>
    %c16 = arith.constant 16 : index
    %c0_72 = arith.constant 0 : index
    %c0_73 = arith.constant 0 : index
    %c0_74 = arith.constant 0 : index
    %125 = vector.load %arg2[%c16, %c0_72, %c0_73, %c0_74] : memref<27x8x1x1xf32, #tpu.memory_space<vmem>>, vector<1x8x1x1xf32>
    %126 = vector.shape_cast %125 : vector<1x8x1x1xf32> to vector<8x1x1xf32>
    %127 = vector.extract_strided_slice %117 {offsets = [1, 0, 0], sizes = [1, 8, 8], strides = [1, 1, 1]} : vector<3x8x8xf32> to vector<1x8x8xf32>
    %128 = vector.broadcast %126 : vector<8x1x1xf32> to vector<8x8x8xf32>
    %129 = vector.broadcast %127 : vector<1x8x8xf32> to vector<8x8x8xf32>
    %130 = arith.mulf %128, %129 : vector<8x8x8xf32>
    %131 = arith.addf %124, %130 : vector<8x8x8xf32>
    %c17 = arith.constant 17 : index
    %c0_75 = arith.constant 0 : index
    %c0_76 = arith.constant 0 : index
    %c0_77 = arith.constant 0 : index
    %132 = vector.load %arg2[%c17, %c0_75, %c0_76, %c0_77] : memref<27x8x1x1xf32, #tpu.memory_space<vmem>>, vector<1x8x1x1xf32>
    %133 = vector.shape_cast %132 : vector<1x8x1x1xf32> to vector<8x1x1xf32>
    %134 = vector.extract_strided_slice %117 {offsets = [2, 0, 0], sizes = [1, 8, 8], strides = [1, 1, 1]} : vector<3x8x8xf32> to vector<1x8x8xf32>
    %135 = vector.broadcast %133 : vector<8x1x1xf32> to vector<8x8x8xf32>
    %136 = vector.broadcast %134 : vector<1x8x8xf32> to vector<8x8x8xf32>
    %137 = arith.mulf %135, %136 : vector<8x8x8xf32>
    %138 = arith.addf %131, %137 : vector<8x8x8xf32>
    %c0_78 = arith.constant 0 : index
    %c0_79 = arith.constant 0 : index
    %c2_80 = arith.constant 2 : index
    %c0_81 = arith.constant 0 : index
    %139 = vector.load %arg1[%c0_78, %c0_79, %c2_80, %c0_81] : memref<1x3x10x10xf32, #tpu.memory_space<vmem>>, vector<1x3x8x8xf32>
    %140 = vector.shape_cast %139 : vector<1x3x8x8xf32> to vector<3x8x8xf32>
    %c18 = arith.constant 18 : index
    %c0_82 = arith.constant 0 : index
    %c0_83 = arith.constant 0 : index
    %c0_84 = arith.constant 0 : index
    %141 = vector.load %arg2[%c18, %c0_82, %c0_83, %c0_84] : memref<27x8x1x1xf32, #tpu.memory_space<vmem>>, vector<1x8x1x1xf32>
    %142 = vector.shape_cast %141 : vector<1x8x1x1xf32> to vector<8x1x1xf32>
    %143 = vector.extract_strided_slice %140 {offsets = [0, 0, 0], sizes = [1, 8, 8], strides = [1, 1, 1]} : vector<3x8x8xf32> to vector<1x8x8xf32>
    %144 = vector.broadcast %142 : vector<8x1x1xf32> to vector<8x8x8xf32>
    %145 = vector.broadcast %143 : vector<1x8x8xf32> to vector<8x8x8xf32>
    %146 = arith.mulf %144, %145 : vector<8x8x8xf32>
    %147 = arith.addf %138, %146 : vector<8x8x8xf32>
    %c19 = arith.constant 19 : index
    %c0_85 = arith.constant 0 : index
    %c0_86 = arith.constant 0 : index
    %c0_87 = arith.constant 0 : index
    %148 = vector.load %arg2[%c19, %c0_85, %c0_86, %c0_87] : memref<27x8x1x1xf32, #tpu.memory_space<vmem>>, vector<1x8x1x1xf32>
    %149 = vector.shape_cast %148 : vector<1x8x1x1xf32> to vector<8x1x1xf32>
    %150 = vector.extract_strided_slice %140 {offsets = [1, 0, 0], sizes = [1, 8, 8], strides = [1, 1, 1]} : vector<3x8x8xf32> to vector<1x8x8xf32>
    %151 = vector.broadcast %149 : vector<8x1x1xf32> to vector<8x8x8xf32>
    %152 = vector.broadcast %150 : vector<1x8x8xf32> to vector<8x8x8xf32>
    %153 = arith.mulf %151, %152 : vector<8x8x8xf32>
    %154 = arith.addf %147, %153 : vector<8x8x8xf32>
    %c20 = arith.constant 20 : index
    %c0_88 = arith.constant 0 : index
    %c0_89 = arith.constant 0 : index
    %c0_90 = arith.constant 0 : index
    %155 = vector.load %arg2[%c20, %c0_88, %c0_89, %c0_90] : memref<27x8x1x1xf32, #tpu.memory_space<vmem>>, vector<1x8x1x1xf32>
    %156 = vector.shape_cast %155 : vector<1x8x1x1xf32> to vector<8x1x1xf32>
    %157 = vector.extract_strided_slice %140 {offsets = [2, 0, 0], sizes = [1, 8, 8], strides = [1, 1, 1]} : vector<3x8x8xf32> to vector<1x8x8xf32>
    %158 = vector.broadcast %156 : vector<8x1x1xf32> to vector<8x8x8xf32>
    %159 = vector.broadcast %157 : vector<1x8x8xf32> to vector<8x8x8xf32>
    %160 = arith.mulf %158, %159 : vector<8x8x8xf32>
    %161 = arith.addf %154, %160 : vector<8x8x8xf32>
    %c0_91 = arith.constant 0 : index
    %c0_92 = arith.constant 0 : index
    %c2_93 = arith.constant 2 : index
    %c1_94 = arith.constant 1 : index
    %162 = vector.load %arg1[%c0_91, %c0_92, %c2_93, %c1_94] : memref<1x3x10x10xf32, #tpu.memory_space<vmem>>, vector<1x3x8x8xf32>
    %163 = vector.shape_cast %162 : vector<1x3x8x8xf32> to vector<3x8x8xf32>
    %c21 = arith.constant 21 : index
    %c0_95 = arith.constant 0 : index
    %c0_96 = arith.constant 0 : index
    %c0_97 = arith.constant 0 : index
    %164 = vector.load %arg2[%c21, %c0_95, %c0_96, %c0_97] : memref<27x8x1x1xf32, #tpu.memory_space<vmem>>, vector<1x8x1x1xf32>
    %165 = vector.shape_cast %164 : vector<1x8x1x1xf32> to vector<8x1x1xf32>
    %166 = vector.extract_strided_slice %163 {offsets = [0, 0, 0], sizes = [1, 8, 8], strides = [1, 1, 1]} : vector<3x8x8xf32> to vector<1x8x8xf32>
    %167 = vector.broadcast %165 : vector<8x1x1xf32> to vector<8x8x8xf32>
    %168 = vector.broadcast %166 : vector<1x8x8xf32> to vector<8x8x8xf32>
    %169 = arith.mulf %167, %168 : vector<8x8x8xf32>
    %170 = arith.addf %161, %169 : vector<8x8x8xf32>
    %c22 = arith.constant 22 : index
    %c0_98 = arith.constant 0 : index
    %c0_99 = arith.constant 0 : index
    %c0_100 = arith.constant 0 : index
    %171 = vector.load %arg2[%c22, %c0_98, %c0_99, %c0_100] : memref<27x8x1x1xf32, #tpu.memory_space<vmem>>, vector<1x8x1x1xf32>
    %172 = vector.shape_cast %171 : vector<1x8x1x1xf32> to vector<8x1x1xf32>
    %173 = vector.extract_strided_slice %163 {offsets = [1, 0, 0], sizes = [1, 8, 8], strides = [1, 1, 1]} : vector<3x8x8xf32> to vector<1x8x8xf32>
    %174 = vector.broadcast %172 : vector<8x1x1xf32> to vector<8x8x8xf32>
    %175 = vector.broadcast %173 : vector<1x8x8xf32> to vector<8x8x8xf32>
    %176 = arith.mulf %174, %175 : vector<8x8x8xf32>
    %177 = arith.addf %170, %176 : vector<8x8x8xf32>
    %c23 = arith.constant 23 : index
    %c0_101 = arith.constant 0 : index
    %c0_102 = arith.constant 0 : index
    %c0_103 = arith.constant 0 : index
    %178 = vector.load %arg2[%c23, %c0_101, %c0_102, %c0_103] : memref<27x8x1x1xf32, #tpu.memory_space<vmem>>, vector<1x8x1x1xf32>
    %179 = vector.shape_cast %178 : vector<1x8x1x1xf32> to vector<8x1x1xf32>
    %180 = vector.extract_strided_slice %163 {offsets = [2, 0, 0], sizes = [1, 8, 8], strides = [1, 1, 1]} : vector<3x8x8xf32> to vector<1x8x8xf32>
    %181 = vector.broadcast %179 : vector<8x1x1xf32> to vector<8x8x8xf32>
    %182 = vector.broadcast %180 : vector<1x8x8xf32> to vector<8x8x8xf32>
    %183 = arith.mulf %181, %182 : vector<8x8x8xf32>
    %184 = arith.addf %177, %183 : vector<8x8x8xf32>
    %c0_104 = arith.constant 0 : index
    %c0_105 = arith.constant 0 : index
    %c2_106 = arith.constant 2 : index
    %c2_107 = arith.constant 2 : index
    %185 = vector.load %arg1[%c0_104, %c0_105, %c2_106, %c2_107] : memref<1x3x10x10xf32, #tpu.memory_space<vmem>>, vector<1x3x8x8xf32>
    %186 = vector.shape_cast %185 : vector<1x3x8x8xf32> to vector<3x8x8xf32>
    %c24 = arith.constant 24 : index
    %c0_108 = arith.constant 0 : index
    %c0_109 = arith.constant 0 : index
    %c0_110 = arith.constant 0 : index
    %187 = vector.load %arg2[%c24, %c0_108, %c0_109, %c0_110] : memref<27x8x1x1xf32, #tpu.memory_space<vmem>>, vector<1x8x1x1xf32>
    %188 = vector.shape_cast %187 : vector<1x8x1x1xf32> to vector<8x1x1xf32>
    %189 = vector.extract_strided_slice %186 {offsets = [0, 0, 0], sizes = [1, 8, 8], strides = [1, 1, 1]} : vector<3x8x8xf32> to vector<1x8x8xf32>
    %190 = vector.broadcast %188 : vector<8x1x1xf32> to vector<8x8x8xf32>
    %191 = vector.broadcast %189 : vector<1x8x8xf32> to vector<8x8x8xf32>
    %192 = arith.mulf %190, %191 : vector<8x8x8xf32>
    %193 = arith.addf %184, %192 : vector<8x8x8xf32>
    %c25 = arith.constant 25 : index
    %c0_111 = arith.constant 0 : index
    %c0_112 = arith.constant 0 : index
    %c0_113 = arith.constant 0 : index
    %194 = vector.load %arg2[%c25, %c0_111, %c0_112, %c0_113] : memref<27x8x1x1xf32, #tpu.memory_space<vmem>>, vector<1x8x1x1xf32>
    %195 = vector.shape_cast %194 : vector<1x8x1x1xf32> to vector<8x1x1xf32>
    %196 = vector.extract_strided_slice %186 {offsets = [1, 0, 0], sizes = [1, 8, 8], strides = [1, 1, 1]} : vector<3x8x8xf32> to vector<1x8x8xf32>
    %197 = vector.broadcast %195 : vector<8x1x1xf32> to vector<8x8x8xf32>
    %198 = vector.broadcast %196 : vector<1x8x8xf32> to vector<8x8x8xf32>
    %199 = arith.mulf %197, %198 : vector<8x8x8xf32>
    %200 = arith.addf %193, %199 : vector<8x8x8xf32>
    %c26 = arith.constant 26 : index
    %c0_114 = arith.constant 0 : index
    %c0_115 = arith.constant 0 : index
    %c0_116 = arith.constant 0 : index
    %201 = vector.load %arg2[%c26, %c0_114, %c0_115, %c0_116] : memref<27x8x1x1xf32, #tpu.memory_space<vmem>>, vector<1x8x1x1xf32>
    %202 = vector.shape_cast %201 : vector<1x8x1x1xf32> to vector<8x1x1xf32>
    %203 = vector.extract_strided_slice %186 {offsets = [2, 0, 0], sizes = [1, 8, 8], strides = [1, 1, 1]} : vector<3x8x8xf32> to vector<1x8x8xf32>
    %204 = vector.broadcast %202 : vector<8x1x1xf32> to vector<8x8x8xf32>
    %205 = vector.broadcast %203 : vector<1x8x8xf32> to vector<8x8x8xf32>
    %206 = arith.mulf %204, %205 : vector<8x8x8xf32>
    %207 = arith.addf %200, %206 : vector<8x8x8xf32>
    %c0_117 = arith.constant 0 : index
    %c0_118 = arith.constant 0 : index
    %c0_119 = arith.constant 0 : index
    %208 = vector.load %arg3[%c0_117, %c0_118, %c0_119] : memref<8x1x1xf32, #tpu.memory_space<vmem>>, vector<8x1x1xf32>
    %209 = vector.broadcast %208 : vector<8x1x1xf32> to vector<8x8x8xf32>
    %210 = arith.addf %207, %209 : vector<8x8x8xf32>
    %cst_120 = arith.constant 0.000000e+00 : f32
    %211 = vector.broadcast %cst_120 : f32 to vector<8x8x8xf32>
    %212 = arith.maximumf %210, %211 : vector<8x8x8xf32>
    %c0_121 = arith.constant 0 : index
    %c0_122 = arith.constant 0 : index
    %c0_123 = arith.constant 0 : index
    %c0_124 = arith.constant 0 : index
    %213 = vector.load %arg4[%c0_121, %c0_122, %c0_123, %c0_124] : memref<1x8x8x8xf32, #tpu.memory_space<vmem>>, vector<1x8x8x8xf32>
    %214 = vector.shape_cast %213 : vector<1x8x8x8xf32> to vector<8x8x8xf32>
    %215 = vector.shape_cast %212 : vector<8x8x8xf32> to vector<1x8x8x8xf32>
    tpu.vector_store %arg4[%c0_121, %c0_122, %c0_123, %c0_124], %215 {strides = array<i32>} : memref<1x8x8x8xf32, #tpu.memory_space<vmem>>, vector<1x8x8x8xf32>,
    return
  }
  func.func @transform_0(%arg0: i32) -> (i32, i32, i32, i32) {
    %c0_i32 = arith.constant 0 : i32
    %c0_i32_0 = arith.constant 0 : i32
    %c0_i32_1 = arith.constant 0 : i32
    %c0_i32_2 = arith.constant 0 : i32
    return %arg0, %c0_i32, %c0_i32_0, %c0_i32_1 : i32, i32, i32, i32
  }
  func.func @transform_1(%arg0: i32) -> (i32, i32, i32, i32) {
    %c0_i32 = arith.constant 0 : i32
    %c0_i32_0 = arith.constant 0 : i32
    %c0_i32_1 = arith.constant 0 : i32
    %c0_i32_2 = arith.constant 0 : i32
    %c0_i32_3 = arith.constant 0 : i32
    return %c0_i32, %c0_i32_0, %c0_i32_1, %c0_i32_2 : i32, i32, i32, i32
  }
  func.func @transform_2(%arg0: i32) -> (i32, i32, i32) {
    %c0_i32 = arith.constant 0 : i32
    %c0_i32_0 = arith.constant 0 : i32
    %c0_i32_1 = arith.constant 0 : i32
    %c0_i32_2 = arith.constant 0 : i32
    return %c0_i32, %c0_i32_0, %c0_i32_1 : i32, i32, i32
  }
  func.func @transform_3(%arg0: i32) -> (i32, i32, i32, i32) {
    %c0_i32 = arith.constant 0 : i32
    %c0_i32_0 = arith.constant 0 : i32
    %c0_i32_1 = arith.constant 0 : i32
    %c0_i32_2 = arith.constant 0 : i32
    return %arg0, %c0_i32, %c0_i32_0, %c0_i32_1 : i32, i32, i32, i32
  }
}

module attributes {stable_mosaic.version = 11 : i64} {
  func.func @_cost_lstm_kernel(%arg0: i32, %arg1: i32, %arg2: memref<1x2x64x64xbf16, #tpu.memory_space<vmem>>, %arg3: memref<32x18xbf16, #tpu.memory_space<vmem>>, %arg4: memref<32x1xf32, #tpu.memory_space<vmem>>, %arg5: memref<8x1xf32, #tpu.memory_space<vmem>>, %arg6: memref<1x1xf32, #tpu.memory_space<vmem>>, %arg7: memref<1x2x8x64xf32, #tpu.memory_space<vmem>>) attributes {dimension_semantics = [#tpu.dimension_semantics<parallel>, #tpu.dimension_semantics<parallel>], iteration_bounds = array<i64: 2, 1>, scalar_prefetch = 0 : i64, scratch_operands = 0 : i64, tpu.core_type = #tpu.core_type<tc>, window_params = [{transform_indices = @transform_0, window_bounds = array<i64: 1, 2, 64, 64>}, {pipeline_mode = #tpu.pipeline_mode<synchronous>, transform_indices = @transform_1, window_bounds = array<i64: 32, 18>}, {pipeline_mode = #tpu.pipeline_mode<synchronous>, transform_indices = @transform_2, window_bounds = array<i64: 32, 1>}, {pipeline_mode = #tpu.pipeline_mode<synchronous>, transform_indices = @transform_3, window_bounds = array<i64: 8, 1>}, {pipeline_mode = #tpu.pipeline_mode<synchronous>, transform_indices = @transform_4, window_bounds = array<i64: 1, 1>}, {transform_indices = @transform_5, window_bounds = array<i64: 1, 2, 8, 64>}]} {
    %c0 = arith.constant 0 : index
    %c0_0 = arith.constant 0 : index
    %c0_1 = arith.constant 0 : index
    %c0_2 = arith.constant 0 : index
    %0 = vector.load %arg2[%c0, %c0_0, %c0_1, %c0_2] : memref<1x2x64x64xbf16, #tpu.memory_space<vmem>>, vector<1x2x64x64xbf16>
    %1 = vector.shape_cast %0 : vector<1x2x64x64xbf16> to vector<2x64x64xbf16>
    %2 = arith.extf %1 : vector<2x64x64xbf16> to vector<2x64x64xf32>
    %3 = vector.extract_strided_slice %2 {offsets = [0, 0, 0], sizes = [1, 64, 64], strides = [1, 1, 1]} : vector<2x64x64xf32> to vector<1x64x64xf32>
    %4 = vector.shape_cast %3 : vector<1x64x64xf32> to vector<64x64xf32>
    %5 = vector.extract_strided_slice %2 {offsets = [1, 0, 0], sizes = [1, 64, 64], strides = [1, 1, 1]} : vector<2x64x64xf32> to vector<1x64x64xf32>
    %6 = vector.shape_cast %5 : vector<1x64x64xf32> to vector<64x64xf32>
    %7 = arith.addf %4, %6 : vector<64x64xf32>
    %cst = arith.constant 5.000000e-01 : f32
    %8 = vector.broadcast %cst : f32 to vector<64x64xf32>
    %9 = arith.mulf %7, %8 : vector<64x64xf32>
    %10 = vector.shape_cast %9 : vector<64x64xf32> to vector<1x64x64xf32>
    %11 = vector.broadcast %10 : vector<1x64x64xf32> to vector<2x64x64xf32>
    %12 = arith.mulf %2, %11 : vector<2x64x64xf32>
    %13 = vector.extract_strided_slice %9 {offsets = [0, 0], sizes = [8, 64], strides = [1, 1]} : vector<64x64xf32> to vector<8x64xf32>
    %14 = arith.mulf %13, %13 : vector<8x64xf32>
    %cst_3 = arith.constant dense<0.000000e+00> : vector<64xf32>
    %15 = vector.multi_reduction <add>, %14, %cst_3 [0] : vector<8x64xf32> to vector<64xf32>
    %16 = vector.shape_cast %15 : vector<64xf32> to vector<1x64xf32>
    %17 = arith.truncf %16 : vector<1x64xf32> to vector<1x64xbf16>
    %18 = vector.extract_strided_slice %9 {offsets = [8, 0], sizes = [8, 64], strides = [1, 1]} : vector<64x64xf32> to vector<8x64xf32>
    %19 = arith.mulf %18, %18 : vector<8x64xf32>
    %cst_4 = arith.constant dense<0.000000e+00> : vector<64xf32>
    %20 = vector.multi_reduction <add>, %19, %cst_4 [0] : vector<8x64xf32> to vector<64xf32>
    %21 = vector.shape_cast %20 : vector<64xf32> to vector<1x64xf32>
    %22 = arith.truncf %21 : vector<1x64xf32> to vector<1x64xbf16>
    %23 = vector.extract_strided_slice %9 {offsets = [16, 0], sizes = [8, 64], strides = [1, 1]} : vector<64x64xf32> to vector<8x64xf32>
    %24 = arith.mulf %23, %23 : vector<8x64xf32>
    %cst_5 = arith.constant dense<0.000000e+00> : vector<64xf32>
    %25 = vector.multi_reduction <add>, %24, %cst_5 [0] : vector<8x64xf32> to vector<64xf32>
    %26 = vector.shape_cast %25 : vector<64xf32> to vector<1x64xf32>
    %27 = arith.truncf %26 : vector<1x64xf32> to vector<1x64xbf16>
    %28 = vector.extract_strided_slice %9 {offsets = [24, 0], sizes = [8, 64], strides = [1, 1]} : vector<64x64xf32> to vector<8x64xf32>
    %29 = arith.mulf %28, %28 : vector<8x64xf32>
    %cst_6 = arith.constant dense<0.000000e+00> : vector<64xf32>
    %30 = vector.multi_reduction <add>, %29, %cst_6 [0] : vector<8x64xf32> to vector<64xf32>
    %31 = vector.shape_cast %30 : vector<64xf32> to vector<1x64xf32>
    %32 = arith.truncf %31 : vector<1x64xf32> to vector<1x64xbf16>
    %33 = vector.extract_strided_slice %9 {offsets = [32, 0], sizes = [8, 64], strides = [1, 1]} : vector<64x64xf32> to vector<8x64xf32>
    %34 = arith.mulf %33, %33 : vector<8x64xf32>
    %cst_7 = arith.constant dense<0.000000e+00> : vector<64xf32>
    %35 = vector.multi_reduction <add>, %34, %cst_7 [0] : vector<8x64xf32> to vector<64xf32>
    %36 = vector.shape_cast %35 : vector<64xf32> to vector<1x64xf32>
    %37 = arith.truncf %36 : vector<1x64xf32> to vector<1x64xbf16>
    %38 = vector.extract_strided_slice %9 {offsets = [40, 0], sizes = [8, 64], strides = [1, 1]} : vector<64x64xf32> to vector<8x64xf32>
    %39 = arith.mulf %38, %38 : vector<8x64xf32>
    %cst_8 = arith.constant dense<0.000000e+00> : vector<64xf32>
    %40 = vector.multi_reduction <add>, %39, %cst_8 [0] : vector<8x64xf32> to vector<64xf32>
    %41 = vector.shape_cast %40 : vector<64xf32> to vector<1x64xf32>
    %42 = arith.truncf %41 : vector<1x64xf32> to vector<1x64xbf16>
    %43 = vector.extract_strided_slice %9 {offsets = [48, 0], sizes = [8, 64], strides = [1, 1]} : vector<64x64xf32> to vector<8x64xf32>
    %44 = arith.mulf %43, %43 : vector<8x64xf32>
    %cst_9 = arith.constant dense<0.000000e+00> : vector<64xf32>
    %45 = vector.multi_reduction <add>, %44, %cst_9 [0] : vector<8x64xf32> to vector<64xf32>
    %46 = vector.shape_cast %45 : vector<64xf32> to vector<1x64xf32>
    %47 = arith.truncf %46 : vector<1x64xf32> to vector<1x64xbf16>
    %48 = vector.extract_strided_slice %9 {offsets = [56, 0], sizes = [8, 64], strides = [1, 1]} : vector<64x64xf32> to vector<8x64xf32>
    %49 = arith.mulf %48, %48 : vector<8x64xf32>
    %cst_10 = arith.constant dense<0.000000e+00> : vector<64xf32>
    %50 = vector.multi_reduction <add>, %49, %cst_10 [0] : vector<8x64xf32> to vector<64xf32>
    %51 = vector.shape_cast %50 : vector<64xf32> to vector<1x64xf32>
    %52 = arith.truncf %51 : vector<1x64xf32> to vector<1x64xbf16>
    %c0_11 = arith.constant 0 : index
    %c0_12 = arith.constant 0 : index
    %53 = vector.load %arg3[%c0_11, %c0_12] : memref<32x18xbf16, #tpu.memory_space<vmem>>, vector<32x18xbf16>
    %c0_13 = arith.constant 0 : index
    %c0_14 = arith.constant 0 : index
    %54 = vector.load %arg4[%c0_13, %c0_14] : memref<32x1xf32, #tpu.memory_space<vmem>>, vector<32x1xf32>
    %c0_15 = arith.constant 0 : index
    %c0_16 = arith.constant 0 : index
    %55 = vector.load %arg5[%c0_15, %c0_16] : memref<8x1xf32, #tpu.memory_space<vmem>>, vector<8x1xf32>
    %c0_17 = arith.constant 0 : index
    %c0_18 = arith.constant 0 : index
    %56 = vector.load %arg6[%c0_17, %c0_18] : memref<1x1xf32, #tpu.memory_space<vmem>>, vector<1x1xf32>
    %cst_19 = arith.constant 0.000000e+00 : f32
    %57 = vector.broadcast %cst_19 : f32 to vector<8x64xf32>
    %cst_20 = arith.constant 0.000000e+00 : f32
    %58 = vector.broadcast %cst_20 : f32 to vector<8x64xf32>
    %59 = vector.extract_strided_slice %12 {offsets = [0, 0, 0], sizes = [1, 8, 64], strides = [1, 1, 1]} : vector<2x64x64xf32> to vector<1x8x64xf32>
    %60 = vector.shape_cast %59 : vector<1x8x64xf32> to vector<8x64xf32>
    %cst_21 = arith.constant dense<0.000000e+00> : vector<64xf32>
    %61 = vector.multi_reduction <add>, %60, %cst_21 [0] : vector<8x64xf32> to vector<64xf32>
    %62 = vector.shape_cast %61 : vector<64xf32> to vector<1x64xf32>
    %63 = vector.extract_strided_slice %1 {offsets = [0, 0, 0], sizes = [1, 8, 64], strides = [1, 1, 1]} : vector<2x64x64xbf16> to vector<1x8x64xbf16>
    %64 = vector.shape_cast %63 : vector<1x8x64xbf16> to vector<8x64xbf16>
    %65 = arith.truncf %62 : vector<1x64xf32> to vector<1x64xbf16>
    %66 = arith.truncf %57 : vector<8x64xf32> to vector<8x64xbf16>
    %67 = tpu.concatenate %64, %65, %17, %66 in 0 : vector<8x64xbf16>, vector<1x64xbf16>, vector<1x64xbf16>, vector<8x64xbf16> -> vector<18x64xbf16>
    %cst_22 = arith.constant dense<0.000000e+00> : vector<32x64xf32>
    %68 = tpu.matmul %53, %67, %cst_22 {dimension_numbers = #tpu.dot_dimension_numbers<[1], [0], [0], [1], [0, 0, 1, 1], [], []>} : vector<32x18xbf16>, vector<18x64xbf16>, vector<32x64xf32> -> vector<32x64xf32>
    %69 = vector.broadcast %54 : vector<32x1xf32> to vector<32x64xf32>
    %70 = arith.addf %68, %69 : vector<32x64xf32>
    %71 = vector.extract_strided_slice %70 {offsets = [0, 0], sizes = [8, 64], strides = [1, 1]} : vector<32x64xf32> to vector<8x64xf32>
    %72 = vector.extract_strided_slice %70 {offsets = [8, 0], sizes = [8, 64], strides = [1, 1]} : vector<32x64xf32> to vector<8x64xf32>
    %73 = vector.extract_strided_slice %70 {offsets = [16, 0], sizes = [8, 64], strides = [1, 1]} : vector<32x64xf32> to vector<8x64xf32>
    %74 = vector.extract_strided_slice %70 {offsets = [24, 0], sizes = [8, 64], strides = [1, 1]} : vector<32x64xf32> to vector<8x64xf32>
    %75 = arith.negf %72 : vector<8x64xf32>
    %76 = math.exp %75 : vector<8x64xf32>
    %cst_23 = arith.constant 1.000000e+00 : f32
    %77 = vector.broadcast %cst_23 : f32 to vector<8x64xf32>
    %78 = arith.addf %77, %76 : vector<8x64xf32>
    %79 = arith.divf %77, %78 : vector<8x64xf32>
    %80 = arith.mulf %79, %58 : vector<8x64xf32>
    %81 = arith.negf %71 : vector<8x64xf32>
    %82 = math.exp %81 : vector<8x64xf32>
    %cst_24 = arith.constant 1.000000e+00 : f32
    %83 = vector.broadcast %cst_24 : f32 to vector<8x64xf32>
    %84 = arith.addf %83, %82 : vector<8x64xf32>
    %85 = arith.divf %83, %84 : vector<8x64xf32>
    %86 = math.tanh %74 : vector<8x64xf32>
    %87 = arith.mulf %85, %86 : vector<8x64xf32>
    %88 = arith.addf %80, %87 : vector<8x64xf32>
    %89 = arith.negf %73 : vector<8x64xf32>
    %90 = math.exp %89 : vector<8x64xf32>
    %cst_25 = arith.constant 1.000000e+00 : f32
    %91 = vector.broadcast %cst_25 : f32 to vector<8x64xf32>
    %92 = arith.addf %91, %90 : vector<8x64xf32>
    %93 = arith.divf %91, %92 : vector<8x64xf32>
    %94 = math.tanh %88 : vector<8x64xf32>
    %95 = arith.mulf %93, %94 : vector<8x64xf32>
    %96 = vector.broadcast %55 : vector<8x1xf32> to vector<8x64xf32>
    %97 = arith.mulf %95, %96 : vector<8x64xf32>
    %cst_26 = arith.constant dense<0.000000e+00> : vector<64xf32>
    %98 = vector.multi_reduction <add>, %97, %cst_26 [0] : vector<8x64xf32> to vector<64xf32>
    %99 = vector.shape_cast %98 : vector<64xf32> to vector<1x64xf32>
    %100 = vector.broadcast %56 : vector<1x1xf32> to vector<1x64xf32>
    %101 = arith.addf %99, %100 : vector<1x64xf32>
    %102 = vector.extract_strided_slice %12 {offsets = [0, 8, 0], sizes = [1, 8, 64], strides = [1, 1, 1]} : vector<2x64x64xf32> to vector<1x8x64xf32>
    %103 = vector.shape_cast %102 : vector<1x8x64xf32> to vector<8x64xf32>
    %cst_27 = arith.constant dense<0.000000e+00> : vector<64xf32>
    %104 = vector.multi_reduction <add>, %103, %cst_27 [0] : vector<8x64xf32> to vector<64xf32>
    %105 = vector.shape_cast %104 : vector<64xf32> to vector<1x64xf32>
    %106 = vector.extract_strided_slice %1 {offsets = [0, 8, 0], sizes = [1, 8, 64], strides = [1, 1, 1]} : vector<2x64x64xbf16> to vector<1x8x64xbf16>
    %107 = vector.shape_cast %106 : vector<1x8x64xbf16> to vector<8x64xbf16>
    %108 = arith.truncf %105 : vector<1x64xf32> to vector<1x64xbf16>
    %109 = arith.truncf %95 : vector<8x64xf32> to vector<8x64xbf16>
    %110 = tpu.concatenate %107, %108, %22, %109 in 0 : vector<8x64xbf16>, vector<1x64xbf16>, vector<1x64xbf16>, vector<8x64xbf16> -> vector<18x64xbf16>
    %cst_28 = arith.constant dense<0.000000e+00> : vector<32x64xf32>
    %111 = tpu.matmul %53, %110, %cst_28 {dimension_numbers = #tpu.dot_dimension_numbers<[1], [0], [0], [1], [0, 0, 1, 1], [], []>} : vector<32x18xbf16>, vector<18x64xbf16>, vector<32x64xf32> -> vector<32x64xf32>
    %112 = vector.broadcast %54 : vector<32x1xf32> to vector<32x64xf32>
    %113 = arith.addf %111, %112 : vector<32x64xf32>
    %114 = vector.extract_strided_slice %113 {offsets = [0, 0], sizes = [8, 64], strides = [1, 1]} : vector<32x64xf32> to vector<8x64xf32>
    %115 = vector.extract_strided_slice %113 {offsets = [8, 0], sizes = [8, 64], strides = [1, 1]} : vector<32x64xf32> to vector<8x64xf32>
    %116 = vector.extract_strided_slice %113 {offsets = [16, 0], sizes = [8, 64], strides = [1, 1]} : vector<32x64xf32> to vector<8x64xf32>
    %117 = vector.extract_strided_slice %113 {offsets = [24, 0], sizes = [8, 64], strides = [1, 1]} : vector<32x64xf32> to vector<8x64xf32>
    %118 = arith.negf %115 : vector<8x64xf32>
    %119 = math.exp %118 : vector<8x64xf32>
    %cst_29 = arith.constant 1.000000e+00 : f32
    %120 = vector.broadcast %cst_29 : f32 to vector<8x64xf32>
    %121 = arith.addf %120, %119 : vector<8x64xf32>
    %122 = arith.divf %120, %121 : vector<8x64xf32>
    %123 = arith.mulf %122, %88 : vector<8x64xf32>
    %124 = arith.negf %114 : vector<8x64xf32>
    %125 = math.exp %124 : vector<8x64xf32>
    %cst_30 = arith.constant 1.000000e+00 : f32
    %126 = vector.broadcast %cst_30 : f32 to vector<8x64xf32>
    %127 = arith.addf %126, %125 : vector<8x64xf32>
    %128 = arith.divf %126, %127 : vector<8x64xf32>
    %129 = math.tanh %117 : vector<8x64xf32>
    %130 = arith.mulf %128, %129 : vector<8x64xf32>
    %131 = arith.addf %123, %130 : vector<8x64xf32>
    %132 = arith.negf %116 : vector<8x64xf32>
    %133 = math.exp %132 : vector<8x64xf32>
    %cst_31 = arith.constant 1.000000e+00 : f32
    %134 = vector.broadcast %cst_31 : f32 to vector<8x64xf32>
    %135 = arith.addf %134, %133 : vector<8x64xf32>
    %136 = arith.divf %134, %135 : vector<8x64xf32>
    %137 = math.tanh %131 : vector<8x64xf32>
    %138 = arith.mulf %136, %137 : vector<8x64xf32>
    %139 = vector.broadcast %55 : vector<8x1xf32> to vector<8x64xf32>
    %140 = arith.mulf %138, %139 : vector<8x64xf32>
    %cst_32 = arith.constant dense<0.000000e+00> : vector<64xf32>
    %141 = vector.multi_reduction <add>, %140, %cst_32 [0] : vector<8x64xf32> to vector<64xf32>
    %142 = vector.shape_cast %141 : vector<64xf32> to vector<1x64xf32>
    %143 = vector.broadcast %56 : vector<1x1xf32> to vector<1x64xf32>
    %144 = arith.addf %142, %143 : vector<1x64xf32>
    %145 = vector.extract_strided_slice %12 {offsets = [0, 16, 0], sizes = [1, 8, 64], strides = [1, 1, 1]} : vector<2x64x64xf32> to vector<1x8x64xf32>
    %146 = vector.shape_cast %145 : vector<1x8x64xf32> to vector<8x64xf32>
    %cst_33 = arith.constant dense<0.000000e+00> : vector<64xf32>
    %147 = vector.multi_reduction <add>, %146, %cst_33 [0] : vector<8x64xf32> to vector<64xf32>
    %148 = vector.shape_cast %147 : vector<64xf32> to vector<1x64xf32>
    %149 = vector.extract_strided_slice %1 {offsets = [0, 16, 0], sizes = [1, 8, 64], strides = [1, 1, 1]} : vector<2x64x64xbf16> to vector<1x8x64xbf16>
    %150 = vector.shape_cast %149 : vector<1x8x64xbf16> to vector<8x64xbf16>
    %151 = arith.truncf %148 : vector<1x64xf32> to vector<1x64xbf16>
    %152 = arith.truncf %138 : vector<8x64xf32> to vector<8x64xbf16>
    %153 = tpu.concatenate %150, %151, %27, %152 in 0 : vector<8x64xbf16>, vector<1x64xbf16>, vector<1x64xbf16>, vector<8x64xbf16> -> vector<18x64xbf16>
    %cst_34 = arith.constant dense<0.000000e+00> : vector<32x64xf32>
    %154 = tpu.matmul %53, %153, %cst_34 {dimension_numbers = #tpu.dot_dimension_numbers<[1], [0], [0], [1], [0, 0, 1, 1], [], []>} : vector<32x18xbf16>, vector<18x64xbf16>, vector<32x64xf32> -> vector<32x64xf32>
    %155 = vector.broadcast %54 : vector<32x1xf32> to vector<32x64xf32>
    %156 = arith.addf %154, %155 : vector<32x64xf32>
    %157 = vector.extract_strided_slice %156 {offsets = [0, 0], sizes = [8, 64], strides = [1, 1]} : vector<32x64xf32> to vector<8x64xf32>
    %158 = vector.extract_strided_slice %156 {offsets = [8, 0], sizes = [8, 64], strides = [1, 1]} : vector<32x64xf32> to vector<8x64xf32>
    %159 = vector.extract_strided_slice %156 {offsets = [16, 0], sizes = [8, 64], strides = [1, 1]} : vector<32x64xf32> to vector<8x64xf32>
    %160 = vector.extract_strided_slice %156 {offsets = [24, 0], sizes = [8, 64], strides = [1, 1]} : vector<32x64xf32> to vector<8x64xf32>
    %161 = arith.negf %158 : vector<8x64xf32>
    %162 = math.exp %161 : vector<8x64xf32>
    %cst_35 = arith.constant 1.000000e+00 : f32
    %163 = vector.broadcast %cst_35 : f32 to vector<8x64xf32>
    %164 = arith.addf %163, %162 : vector<8x64xf32>
    %165 = arith.divf %163, %164 : vector<8x64xf32>
    %166 = arith.mulf %165, %131 : vector<8x64xf32>
    %167 = arith.negf %157 : vector<8x64xf32>
    %168 = math.exp %167 : vector<8x64xf32>
    %cst_36 = arith.constant 1.000000e+00 : f32
    %169 = vector.broadcast %cst_36 : f32 to vector<8x64xf32>
    %170 = arith.addf %169, %168 : vector<8x64xf32>
    %171 = arith.divf %169, %170 : vector<8x64xf32>
    %172 = math.tanh %160 : vector<8x64xf32>
    %173 = arith.mulf %171, %172 : vector<8x64xf32>
    %174 = arith.addf %166, %173 : vector<8x64xf32>
    %175 = arith.negf %159 : vector<8x64xf32>
    %176 = math.exp %175 : vector<8x64xf32>
    %cst_37 = arith.constant 1.000000e+00 : f32
    %177 = vector.broadcast %cst_37 : f32 to vector<8x64xf32>
    %178 = arith.addf %177, %176 : vector<8x64xf32>
    %179 = arith.divf %177, %178 : vector<8x64xf32>
    %180 = math.tanh %174 : vector<8x64xf32>
    %181 = arith.mulf %179, %180 : vector<8x64xf32>
    %182 = vector.broadcast %55 : vector<8x1xf32> to vector<8x64xf32>
    %183 = arith.mulf %181, %182 : vector<8x64xf32>
    %cst_38 = arith.constant dense<0.000000e+00> : vector<64xf32>
    %184 = vector.multi_reduction <add>, %183, %cst_38 [0] : vector<8x64xf32> to vector<64xf32>
    %185 = vector.shape_cast %184 : vector<64xf32> to vector<1x64xf32>
    %186 = vector.broadcast %56 : vector<1x1xf32> to vector<1x64xf32>
    %187 = arith.addf %185, %186 : vector<1x64xf32>
    %188 = vector.extract_strided_slice %12 {offsets = [0, 24, 0], sizes = [1, 8, 64], strides = [1, 1, 1]} : vector<2x64x64xf32> to vector<1x8x64xf32>
    %189 = vector.shape_cast %188 : vector<1x8x64xf32> to vector<8x64xf32>
    %cst_39 = arith.constant dense<0.000000e+00> : vector<64xf32>
    %190 = vector.multi_reduction <add>, %189, %cst_39 [0] : vector<8x64xf32> to vector<64xf32>
    %191 = vector.shape_cast %190 : vector<64xf32> to vector<1x64xf32>
    %192 = vector.extract_strided_slice %1 {offsets = [0, 24, 0], sizes = [1, 8, 64], strides = [1, 1, 1]} : vector<2x64x64xbf16> to vector<1x8x64xbf16>
    %193 = vector.shape_cast %192 : vector<1x8x64xbf16> to vector<8x64xbf16>
    %194 = arith.truncf %191 : vector<1x64xf32> to vector<1x64xbf16>
    %195 = arith.truncf %181 : vector<8x64xf32> to vector<8x64xbf16>
    %196 = tpu.concatenate %193, %194, %32, %195 in 0 : vector<8x64xbf16>, vector<1x64xbf16>, vector<1x64xbf16>, vector<8x64xbf16> -> vector<18x64xbf16>
    %cst_40 = arith.constant dense<0.000000e+00> : vector<32x64xf32>
    %197 = tpu.matmul %53, %196, %cst_40 {dimension_numbers = #tpu.dot_dimension_numbers<[1], [0], [0], [1], [0, 0, 1, 1], [], []>} : vector<32x18xbf16>, vector<18x64xbf16>, vector<32x64xf32> -> vector<32x64xf32>
    %198 = vector.broadcast %54 : vector<32x1xf32> to vector<32x64xf32>
    %199 = arith.addf %197, %198 : vector<32x64xf32>
    %200 = vector.extract_strided_slice %199 {offsets = [0, 0], sizes = [8, 64], strides = [1, 1]} : vector<32x64xf32> to vector<8x64xf32>
    %201 = vector.extract_strided_slice %199 {offsets = [8, 0], sizes = [8, 64], strides = [1, 1]} : vector<32x64xf32> to vector<8x64xf32>
    %202 = vector.extract_strided_slice %199 {offsets = [16, 0], sizes = [8, 64], strides = [1, 1]} : vector<32x64xf32> to vector<8x64xf32>
    %203 = vector.extract_strided_slice %199 {offsets = [24, 0], sizes = [8, 64], strides = [1, 1]} : vector<32x64xf32> to vector<8x64xf32>
    %204 = arith.negf %201 : vector<8x64xf32>
    %205 = math.exp %204 : vector<8x64xf32>
    %cst_41 = arith.constant 1.000000e+00 : f32
    %206 = vector.broadcast %cst_41 : f32 to vector<8x64xf32>
    %207 = arith.addf %206, %205 : vector<8x64xf32>
    %208 = arith.divf %206, %207 : vector<8x64xf32>
    %209 = arith.mulf %208, %174 : vector<8x64xf32>
    %210 = arith.negf %200 : vector<8x64xf32>
    %211 = math.exp %210 : vector<8x64xf32>
    %cst_42 = arith.constant 1.000000e+00 : f32
    %212 = vector.broadcast %cst_42 : f32 to vector<8x64xf32>
    %213 = arith.addf %212, %211 : vector<8x64xf32>
    %214 = arith.divf %212, %213 : vector<8x64xf32>
    %215 = math.tanh %203 : vector<8x64xf32>
    %216 = arith.mulf %214, %215 : vector<8x64xf32>
    %217 = arith.addf %209, %216 : vector<8x64xf32>
    %218 = arith.negf %202 : vector<8x64xf32>
    %219 = math.exp %218 : vector<8x64xf32>
    %cst_43 = arith.constant 1.000000e+00 : f32
    %220 = vector.broadcast %cst_43 : f32 to vector<8x64xf32>
    %221 = arith.addf %220, %219 : vector<8x64xf32>
    %222 = arith.divf %220, %221 : vector<8x64xf32>
    %223 = math.tanh %217 : vector<8x64xf32>
    %224 = arith.mulf %222, %223 : vector<8x64xf32>
    %225 = vector.broadcast %55 : vector<8x1xf32> to vector<8x64xf32>
    %226 = arith.mulf %224, %225 : vector<8x64xf32>
    %cst_44 = arith.constant dense<0.000000e+00> : vector<64xf32>
    %227 = vector.multi_reduction <add>, %226, %cst_44 [0] : vector<8x64xf32> to vector<64xf32>
    %228 = vector.shape_cast %227 : vector<64xf32> to vector<1x64xf32>
    %229 = vector.broadcast %56 : vector<1x1xf32> to vector<1x64xf32>
    %230 = arith.addf %228, %229 : vector<1x64xf32>
    %231 = vector.extract_strided_slice %12 {offsets = [0, 32, 0], sizes = [1, 8, 64], strides = [1, 1, 1]} : vector<2x64x64xf32> to vector<1x8x64xf32>
    %232 = vector.shape_cast %231 : vector<1x8x64xf32> to vector<8x64xf32>
    %cst_45 = arith.constant dense<0.000000e+00> : vector<64xf32>
    %233 = vector.multi_reduction <add>, %232, %cst_45 [0] : vector<8x64xf32> to vector<64xf32>
    %234 = vector.shape_cast %233 : vector<64xf32> to vector<1x64xf32>
    %235 = vector.extract_strided_slice %1 {offsets = [0, 32, 0], sizes = [1, 8, 64], strides = [1, 1, 1]} : vector<2x64x64xbf16> to vector<1x8x64xbf16>
    %236 = vector.shape_cast %235 : vector<1x8x64xbf16> to vector<8x64xbf16>
    %237 = arith.truncf %234 : vector<1x64xf32> to vector<1x64xbf16>
    %238 = arith.truncf %224 : vector<8x64xf32> to vector<8x64xbf16>
    %239 = tpu.concatenate %236, %237, %37, %238 in 0 : vector<8x64xbf16>, vector<1x64xbf16>, vector<1x64xbf16>, vector<8x64xbf16> -> vector<18x64xbf16>
    %cst_46 = arith.constant dense<0.000000e+00> : vector<32x64xf32>
    %240 = tpu.matmul %53, %239, %cst_46 {dimension_numbers = #tpu.dot_dimension_numbers<[1], [0], [0], [1], [0, 0, 1, 1], [], []>} : vector<32x18xbf16>, vector<18x64xbf16>, vector<32x64xf32> -> vector<32x64xf32>
    %241 = vector.broadcast %54 : vector<32x1xf32> to vector<32x64xf32>
    %242 = arith.addf %240, %241 : vector<32x64xf32>
    %243 = vector.extract_strided_slice %242 {offsets = [0, 0], sizes = [8, 64], strides = [1, 1]} : vector<32x64xf32> to vector<8x64xf32>
    %244 = vector.extract_strided_slice %242 {offsets = [8, 0], sizes = [8, 64], strides = [1, 1]} : vector<32x64xf32> to vector<8x64xf32>
    %245 = vector.extract_strided_slice %242 {offsets = [16, 0], sizes = [8, 64], strides = [1, 1]} : vector<32x64xf32> to vector<8x64xf32>
    %246 = vector.extract_strided_slice %242 {offsets = [24, 0], sizes = [8, 64], strides = [1, 1]} : vector<32x64xf32> to vector<8x64xf32>
    %247 = arith.negf %244 : vector<8x64xf32>
    %248 = math.exp %247 : vector<8x64xf32>
    %cst_47 = arith.constant 1.000000e+00 : f32
    %249 = vector.broadcast %cst_47 : f32 to vector<8x64xf32>
    %250 = arith.addf %249, %248 : vector<8x64xf32>
    %251 = arith.divf %249, %250 : vector<8x64xf32>
    %252 = arith.mulf %251, %217 : vector<8x64xf32>
    %253 = arith.negf %243 : vector<8x64xf32>
    %254 = math.exp %253 : vector<8x64xf32>
    %cst_48 = arith.constant 1.000000e+00 : f32
    %255 = vector.broadcast %cst_48 : f32 to vector<8x64xf32>
    %256 = arith.addf %255, %254 : vector<8x64xf32>
    %257 = arith.divf %255, %256 : vector<8x64xf32>
    %258 = math.tanh %246 : vector<8x64xf32>
    %259 = arith.mulf %257, %258 : vector<8x64xf32>
    %260 = arith.addf %252, %259 : vector<8x64xf32>
    %261 = arith.negf %245 : vector<8x64xf32>
    %262 = math.exp %261 : vector<8x64xf32>
    %cst_49 = arith.constant 1.000000e+00 : f32
    %263 = vector.broadcast %cst_49 : f32 to vector<8x64xf32>
    %264 = arith.addf %263, %262 : vector<8x64xf32>
    %265 = arith.divf %263, %264 : vector<8x64xf32>
    %266 = math.tanh %260 : vector<8x64xf32>
    %267 = arith.mulf %265, %266 : vector<8x64xf32>
    %268 = vector.broadcast %55 : vector<8x1xf32> to vector<8x64xf32>
    %269 = arith.mulf %267, %268 : vector<8x64xf32>
    %cst_50 = arith.constant dense<0.000000e+00> : vector<64xf32>
    %270 = vector.multi_reduction <add>, %269, %cst_50 [0] : vector<8x64xf32> to vector<64xf32>
    %271 = vector.shape_cast %270 : vector<64xf32> to vector<1x64xf32>
    %272 = vector.broadcast %56 : vector<1x1xf32> to vector<1x64xf32>
    %273 = arith.addf %271, %272 : vector<1x64xf32>
    %274 = vector.extract_strided_slice %12 {offsets = [0, 40, 0], sizes = [1, 8, 64], strides = [1, 1, 1]} : vector<2x64x64xf32> to vector<1x8x64xf32>
    %275 = vector.shape_cast %274 : vector<1x8x64xf32> to vector<8x64xf32>
    %cst_51 = arith.constant dense<0.000000e+00> : vector<64xf32>
    %276 = vector.multi_reduction <add>, %275, %cst_51 [0] : vector<8x64xf32> to vector<64xf32>
    %277 = vector.shape_cast %276 : vector<64xf32> to vector<1x64xf32>
    %278 = vector.extract_strided_slice %1 {offsets = [0, 40, 0], sizes = [1, 8, 64], strides = [1, 1, 1]} : vector<2x64x64xbf16> to vector<1x8x64xbf16>
    %279 = vector.shape_cast %278 : vector<1x8x64xbf16> to vector<8x64xbf16>
    %280 = arith.truncf %277 : vector<1x64xf32> to vector<1x64xbf16>
    %281 = arith.truncf %267 : vector<8x64xf32> to vector<8x64xbf16>
    %282 = tpu.concatenate %279, %280, %42, %281 in 0 : vector<8x64xbf16>, vector<1x64xbf16>, vector<1x64xbf16>, vector<8x64xbf16> -> vector<18x64xbf16>
    %cst_52 = arith.constant dense<0.000000e+00> : vector<32x64xf32>
    %283 = tpu.matmul %53, %282, %cst_52 {dimension_numbers = #tpu.dot_dimension_numbers<[1], [0], [0], [1], [0, 0, 1, 1], [], []>} : vector<32x18xbf16>, vector<18x64xbf16>, vector<32x64xf32> -> vector<32x64xf32>
    %284 = vector.broadcast %54 : vector<32x1xf32> to vector<32x64xf32>
    %285 = arith.addf %283, %284 : vector<32x64xf32>
    %286 = vector.extract_strided_slice %285 {offsets = [0, 0], sizes = [8, 64], strides = [1, 1]} : vector<32x64xf32> to vector<8x64xf32>
    %287 = vector.extract_strided_slice %285 {offsets = [8, 0], sizes = [8, 64], strides = [1, 1]} : vector<32x64xf32> to vector<8x64xf32>
    %288 = vector.extract_strided_slice %285 {offsets = [16, 0], sizes = [8, 64], strides = [1, 1]} : vector<32x64xf32> to vector<8x64xf32>
    %289 = vector.extract_strided_slice %285 {offsets = [24, 0], sizes = [8, 64], strides = [1, 1]} : vector<32x64xf32> to vector<8x64xf32>
    %290 = arith.negf %287 : vector<8x64xf32>
    %291 = math.exp %290 : vector<8x64xf32>
    %cst_53 = arith.constant 1.000000e+00 : f32
    %292 = vector.broadcast %cst_53 : f32 to vector<8x64xf32>
    %293 = arith.addf %292, %291 : vector<8x64xf32>
    %294 = arith.divf %292, %293 : vector<8x64xf32>
    %295 = arith.mulf %294, %260 : vector<8x64xf32>
    %296 = arith.negf %286 : vector<8x64xf32>
    %297 = math.exp %296 : vector<8x64xf32>
    %cst_54 = arith.constant 1.000000e+00 : f32
    %298 = vector.broadcast %cst_54 : f32 to vector<8x64xf32>
    %299 = arith.addf %298, %297 : vector<8x64xf32>
    %300 = arith.divf %298, %299 : vector<8x64xf32>
    %301 = math.tanh %289 : vector<8x64xf32>
    %302 = arith.mulf %300, %301 : vector<8x64xf32>
    %303 = arith.addf %295, %302 : vector<8x64xf32>
    %304 = arith.negf %288 : vector<8x64xf32>
    %305 = math.exp %304 : vector<8x64xf32>
    %cst_55 = arith.constant 1.000000e+00 : f32
    %306 = vector.broadcast %cst_55 : f32 to vector<8x64xf32>
    %307 = arith.addf %306, %305 : vector<8x64xf32>
    %308 = arith.divf %306, %307 : vector<8x64xf32>
    %309 = math.tanh %303 : vector<8x64xf32>
    %310 = arith.mulf %308, %309 : vector<8x64xf32>
    %311 = vector.broadcast %55 : vector<8x1xf32> to vector<8x64xf32>
    %312 = arith.mulf %310, %311 : vector<8x64xf32>
    %cst_56 = arith.constant dense<0.000000e+00> : vector<64xf32>
    %313 = vector.multi_reduction <add>, %312, %cst_56 [0] : vector<8x64xf32> to vector<64xf32>
    %314 = vector.shape_cast %313 : vector<64xf32> to vector<1x64xf32>
    %315 = vector.broadcast %56 : vector<1x1xf32> to vector<1x64xf32>
    %316 = arith.addf %314, %315 : vector<1x64xf32>
    %317 = vector.extract_strided_slice %12 {offsets = [0, 48, 0], sizes = [1, 8, 64], strides = [1, 1, 1]} : vector<2x64x64xf32> to vector<1x8x64xf32>
    %318 = vector.shape_cast %317 : vector<1x8x64xf32> to vector<8x64xf32>
    %cst_57 = arith.constant dense<0.000000e+00> : vector<64xf32>
    %319 = vector.multi_reduction <add>, %318, %cst_57 [0] : vector<8x64xf32> to vector<64xf32>
    %320 = vector.shape_cast %319 : vector<64xf32> to vector<1x64xf32>
    %321 = vector.extract_strided_slice %1 {offsets = [0, 48, 0], sizes = [1, 8, 64], strides = [1, 1, 1]} : vector<2x64x64xbf16> to vector<1x8x64xbf16>
    %322 = vector.shape_cast %321 : vector<1x8x64xbf16> to vector<8x64xbf16>
    %323 = arith.truncf %320 : vector<1x64xf32> to vector<1x64xbf16>
    %324 = arith.truncf %310 : vector<8x64xf32> to vector<8x64xbf16>
    %325 = tpu.concatenate %322, %323, %47, %324 in 0 : vector<8x64xbf16>, vector<1x64xbf16>, vector<1x64xbf16>, vector<8x64xbf16> -> vector<18x64xbf16>
    %cst_58 = arith.constant dense<0.000000e+00> : vector<32x64xf32>
    %326 = tpu.matmul %53, %325, %cst_58 {dimension_numbers = #tpu.dot_dimension_numbers<[1], [0], [0], [1], [0, 0, 1, 1], [], []>} : vector<32x18xbf16>, vector<18x64xbf16>, vector<32x64xf32> -> vector<32x64xf32>
    %327 = vector.broadcast %54 : vector<32x1xf32> to vector<32x64xf32>
    %328 = arith.addf %326, %327 : vector<32x64xf32>
    %329 = vector.extract_strided_slice %328 {offsets = [0, 0], sizes = [8, 64], strides = [1, 1]} : vector<32x64xf32> to vector<8x64xf32>
    %330 = vector.extract_strided_slice %328 {offsets = [8, 0], sizes = [8, 64], strides = [1, 1]} : vector<32x64xf32> to vector<8x64xf32>
    %331 = vector.extract_strided_slice %328 {offsets = [16, 0], sizes = [8, 64], strides = [1, 1]} : vector<32x64xf32> to vector<8x64xf32>
    %332 = vector.extract_strided_slice %328 {offsets = [24, 0], sizes = [8, 64], strides = [1, 1]} : vector<32x64xf32> to vector<8x64xf32>
    %333 = arith.negf %330 : vector<8x64xf32>
    %334 = math.exp %333 : vector<8x64xf32>
    %cst_59 = arith.constant 1.000000e+00 : f32
    %335 = vector.broadcast %cst_59 : f32 to vector<8x64xf32>
    %336 = arith.addf %335, %334 : vector<8x64xf32>
    %337 = arith.divf %335, %336 : vector<8x64xf32>
    %338 = arith.mulf %337, %303 : vector<8x64xf32>
    %339 = arith.negf %329 : vector<8x64xf32>
    %340 = math.exp %339 : vector<8x64xf32>
    %cst_60 = arith.constant 1.000000e+00 : f32
    %341 = vector.broadcast %cst_60 : f32 to vector<8x64xf32>
    %342 = arith.addf %341, %340 : vector<8x64xf32>
    %343 = arith.divf %341, %342 : vector<8x64xf32>
    %344 = math.tanh %332 : vector<8x64xf32>
    %345 = arith.mulf %343, %344 : vector<8x64xf32>
    %346 = arith.addf %338, %345 : vector<8x64xf32>
    %347 = arith.negf %331 : vector<8x64xf32>
    %348 = math.exp %347 : vector<8x64xf32>
    %cst_61 = arith.constant 1.000000e+00 : f32
    %349 = vector.broadcast %cst_61 : f32 to vector<8x64xf32>
    %350 = arith.addf %349, %348 : vector<8x64xf32>
    %351 = arith.divf %349, %350 : vector<8x64xf32>
    %352 = math.tanh %346 : vector<8x64xf32>
    %353 = arith.mulf %351, %352 : vector<8x64xf32>
    %354 = vector.broadcast %55 : vector<8x1xf32> to vector<8x64xf32>
    %355 = arith.mulf %353, %354 : vector<8x64xf32>
    %cst_62 = arith.constant dense<0.000000e+00> : vector<64xf32>
    %356 = vector.multi_reduction <add>, %355, %cst_62 [0] : vector<8x64xf32> to vector<64xf32>
    %357 = vector.shape_cast %356 : vector<64xf32> to vector<1x64xf32>
    %358 = vector.broadcast %56 : vector<1x1xf32> to vector<1x64xf32>
    %359 = arith.addf %357, %358 : vector<1x64xf32>
    %360 = vector.extract_strided_slice %12 {offsets = [0, 56, 0], sizes = [1, 8, 64], strides = [1, 1, 1]} : vector<2x64x64xf32> to vector<1x8x64xf32>
    %361 = vector.shape_cast %360 : vector<1x8x64xf32> to vector<8x64xf32>
    %cst_63 = arith.constant dense<0.000000e+00> : vector<64xf32>
    %362 = vector.multi_reduction <add>, %361, %cst_63 [0] : vector<8x64xf32> to vector<64xf32>
    %363 = vector.shape_cast %362 : vector<64xf32> to vector<1x64xf32>
    %364 = vector.extract_strided_slice %1 {offsets = [0, 56, 0], sizes = [1, 8, 64], strides = [1, 1, 1]} : vector<2x64x64xbf16> to vector<1x8x64xbf16>
    %365 = vector.shape_cast %364 : vector<1x8x64xbf16> to vector<8x64xbf16>
    %366 = arith.truncf %363 : vector<1x64xf32> to vector<1x64xbf16>
    %367 = arith.truncf %353 : vector<8x64xf32> to vector<8x64xbf16>
    %368 = tpu.concatenate %365, %366, %52, %367 in 0 : vector<8x64xbf16>, vector<1x64xbf16>, vector<1x64xbf16>, vector<8x64xbf16> -> vector<18x64xbf16>
    %cst_64 = arith.constant dense<0.000000e+00> : vector<32x64xf32>
    %369 = tpu.matmul %53, %368, %cst_64 {dimension_numbers = #tpu.dot_dimension_numbers<[1], [0], [0], [1], [0, 0, 1, 1], [], []>} : vector<32x18xbf16>, vector<18x64xbf16>, vector<32x64xf32> -> vector<32x64xf32>
    %370 = vector.broadcast %54 : vector<32x1xf32> to vector<32x64xf32>
    %371 = arith.addf %369, %370 : vector<32x64xf32>
    %372 = vector.extract_strided_slice %371 {offsets = [0, 0], sizes = [8, 64], strides = [1, 1]} : vector<32x64xf32> to vector<8x64xf32>
    %373 = vector.extract_strided_slice %371 {offsets = [8, 0], sizes = [8, 64], strides = [1, 1]} : vector<32x64xf32> to vector<8x64xf32>
    %374 = vector.extract_strided_slice %371 {offsets = [16, 0], sizes = [8, 64], strides = [1, 1]} : vector<32x64xf32> to vector<8x64xf32>
    %375 = vector.extract_strided_slice %371 {offsets = [24, 0], sizes = [8, 64], strides = [1, 1]} : vector<32x64xf32> to vector<8x64xf32>
    %376 = arith.negf %373 : vector<8x64xf32>
    %377 = math.exp %376 : vector<8x64xf32>
    %cst_65 = arith.constant 1.000000e+00 : f32
    %378 = vector.broadcast %cst_65 : f32 to vector<8x64xf32>
    %379 = arith.addf %378, %377 : vector<8x64xf32>
    %380 = arith.divf %378, %379 : vector<8x64xf32>
    %381 = arith.mulf %380, %346 : vector<8x64xf32>
    %382 = arith.negf %372 : vector<8x64xf32>
    %383 = math.exp %382 : vector<8x64xf32>
    %cst_66 = arith.constant 1.000000e+00 : f32
    %384 = vector.broadcast %cst_66 : f32 to vector<8x64xf32>
    %385 = arith.addf %384, %383 : vector<8x64xf32>
    %386 = arith.divf %384, %385 : vector<8x64xf32>
    %387 = math.tanh %375 : vector<8x64xf32>
    %388 = arith.mulf %386, %387 : vector<8x64xf32>
    %389 = arith.addf %381, %388 : vector<8x64xf32>
    %390 = arith.negf %374 : vector<8x64xf32>
    %391 = math.exp %390 : vector<8x64xf32>
    %cst_67 = arith.constant 1.000000e+00 : f32
    %392 = vector.broadcast %cst_67 : f32 to vector<8x64xf32>
    %393 = arith.addf %392, %391 : vector<8x64xf32>
    %394 = arith.divf %392, %393 : vector<8x64xf32>
    %395 = math.tanh %389 : vector<8x64xf32>
    %396 = arith.mulf %394, %395 : vector<8x64xf32>
    %397 = vector.broadcast %55 : vector<8x1xf32> to vector<8x64xf32>
    %398 = arith.mulf %396, %397 : vector<8x64xf32>
    %cst_68 = arith.constant dense<0.000000e+00> : vector<64xf32>
    %399 = vector.multi_reduction <add>, %398, %cst_68 [0] : vector<8x64xf32> to vector<64xf32>
    %400 = vector.shape_cast %399 : vector<64xf32> to vector<1x64xf32>
    %401 = vector.broadcast %56 : vector<1x1xf32> to vector<1x64xf32>
    %402 = arith.addf %400, %401 : vector<1x64xf32>
    %403 = tpu.concatenate %101, %144, %187, %230, %273, %316, %359, %402 in 0 : vector<1x64xf32>, vector<1x64xf32>, vector<1x64xf32>, vector<1x64xf32>, vector<1x64xf32>, vector<1x64xf32>, vector<1x64xf32>, vector<1x64xf32> -> vector<8x64xf32>
    %404 = vector.shape_cast %403 : vector<8x64xf32> to vector<1x8x64xf32>
    %cst_69 = arith.constant 0.000000e+00 : f32
    %405 = vector.broadcast %cst_69 : f32 to vector<8x64xf32>
    %cst_70 = arith.constant 0.000000e+00 : f32
    %406 = vector.broadcast %cst_70 : f32 to vector<8x64xf32>
    %407 = vector.extract_strided_slice %12 {offsets = [1, 0, 0], sizes = [1, 8, 64], strides = [1, 1, 1]} : vector<2x64x64xf32> to vector<1x8x64xf32>
    %408 = vector.shape_cast %407 : vector<1x8x64xf32> to vector<8x64xf32>
    %cst_71 = arith.constant dense<0.000000e+00> : vector<64xf32>
    %409 = vector.multi_reduction <add>, %408, %cst_71 [0] : vector<8x64xf32> to vector<64xf32>
    %410 = vector.shape_cast %409 : vector<64xf32> to vector<1x64xf32>
    %411 = vector.extract_strided_slice %1 {offsets = [1, 0, 0], sizes = [1, 8, 64], strides = [1, 1, 1]} : vector<2x64x64xbf16> to vector<1x8x64xbf16>
    %412 = vector.shape_cast %411 : vector<1x8x64xbf16> to vector<8x64xbf16>
    %413 = arith.truncf %410 : vector<1x64xf32> to vector<1x64xbf16>
    %414 = arith.truncf %405 : vector<8x64xf32> to vector<8x64xbf16>
    %415 = tpu.concatenate %412, %413, %17, %414 in 0 : vector<8x64xbf16>, vector<1x64xbf16>, vector<1x64xbf16>, vector<8x64xbf16> -> vector<18x64xbf16>
    %cst_72 = arith.constant dense<0.000000e+00> : vector<32x64xf32>
    %416 = tpu.matmul %53, %415, %cst_72 {dimension_numbers = #tpu.dot_dimension_numbers<[1], [0], [0], [1], [0, 0, 1, 1], [], []>} : vector<32x18xbf16>, vector<18x64xbf16>, vector<32x64xf32> -> vector<32x64xf32>
    %417 = vector.broadcast %54 : vector<32x1xf32> to vector<32x64xf32>
    %418 = arith.addf %416, %417 : vector<32x64xf32>
    %419 = vector.extract_strided_slice %418 {offsets = [0, 0], sizes = [8, 64], strides = [1, 1]} : vector<32x64xf32> to vector<8x64xf32>
    %420 = vector.extract_strided_slice %418 {offsets = [8, 0], sizes = [8, 64], strides = [1, 1]} : vector<32x64xf32> to vector<8x64xf32>
    %421 = vector.extract_strided_slice %418 {offsets = [16, 0], sizes = [8, 64], strides = [1, 1]} : vector<32x64xf32> to vector<8x64xf32>
    %422 = vector.extract_strided_slice %418 {offsets = [24, 0], sizes = [8, 64], strides = [1, 1]} : vector<32x64xf32> to vector<8x64xf32>
    %423 = arith.negf %420 : vector<8x64xf32>
    %424 = math.exp %423 : vector<8x64xf32>
    %cst_73 = arith.constant 1.000000e+00 : f32
    %425 = vector.broadcast %cst_73 : f32 to vector<8x64xf32>
    %426 = arith.addf %425, %424 : vector<8x64xf32>
    %427 = arith.divf %425, %426 : vector<8x64xf32>
    %428 = arith.mulf %427, %406 : vector<8x64xf32>
    %429 = arith.negf %419 : vector<8x64xf32>
    %430 = math.exp %429 : vector<8x64xf32>
    %cst_74 = arith.constant 1.000000e+00 : f32
    %431 = vector.broadcast %cst_74 : f32 to vector<8x64xf32>
    %432 = arith.addf %431, %430 : vector<8x64xf32>
    %433 = arith.divf %431, %432 : vector<8x64xf32>
    %434 = math.tanh %422 : vector<8x64xf32>
    %435 = arith.mulf %433, %434 : vector<8x64xf32>
    %436 = arith.addf %428, %435 : vector<8x64xf32>
    %437 = arith.negf %421 : vector<8x64xf32>
    %438 = math.exp %437 : vector<8x64xf32>
    %cst_75 = arith.constant 1.000000e+00 : f32
    %439 = vector.broadcast %cst_75 : f32 to vector<8x64xf32>
    %440 = arith.addf %439, %438 : vector<8x64xf32>
    %441 = arith.divf %439, %440 : vector<8x64xf32>
    %442 = math.tanh %436 : vector<8x64xf32>
    %443 = arith.mulf %441, %442 : vector<8x64xf32>
    %444 = vector.broadcast %55 : vector<8x1xf32> to vector<8x64xf32>
    %445 = arith.mulf %443, %444 : vector<8x64xf32>
    %cst_76 = arith.constant dense<0.000000e+00> : vector<64xf32>
    %446 = vector.multi_reduction <add>, %445, %cst_76 [0] : vector<8x64xf32> to vector<64xf32>
    %447 = vector.shape_cast %446 : vector<64xf32> to vector<1x64xf32>
    %448 = vector.broadcast %56 : vector<1x1xf32> to vector<1x64xf32>
    %449 = arith.addf %447, %448 : vector<1x64xf32>
    %450 = vector.extract_strided_slice %12 {offsets = [1, 8, 0], sizes = [1, 8, 64], strides = [1, 1, 1]} : vector<2x64x64xf32> to vector<1x8x64xf32>
    %451 = vector.shape_cast %450 : vector<1x8x64xf32> to vector<8x64xf32>
    %cst_77 = arith.constant dense<0.000000e+00> : vector<64xf32>
    %452 = vector.multi_reduction <add>, %451, %cst_77 [0] : vector<8x64xf32> to vector<64xf32>
    %453 = vector.shape_cast %452 : vector<64xf32> to vector<1x64xf32>
    %454 = vector.extract_strided_slice %1 {offsets = [1, 8, 0], sizes = [1, 8, 64], strides = [1, 1, 1]} : vector<2x64x64xbf16> to vector<1x8x64xbf16>
    %455 = vector.shape_cast %454 : vector<1x8x64xbf16> to vector<8x64xbf16>
    %456 = arith.truncf %453 : vector<1x64xf32> to vector<1x64xbf16>
    %457 = arith.truncf %443 : vector<8x64xf32> to vector<8x64xbf16>
    %458 = tpu.concatenate %455, %456, %22, %457 in 0 : vector<8x64xbf16>, vector<1x64xbf16>, vector<1x64xbf16>, vector<8x64xbf16> -> vector<18x64xbf16>
    %cst_78 = arith.constant dense<0.000000e+00> : vector<32x64xf32>
    %459 = tpu.matmul %53, %458, %cst_78 {dimension_numbers = #tpu.dot_dimension_numbers<[1], [0], [0], [1], [0, 0, 1, 1], [], []>} : vector<32x18xbf16>, vector<18x64xbf16>, vector<32x64xf32> -> vector<32x64xf32>
    %460 = vector.broadcast %54 : vector<32x1xf32> to vector<32x64xf32>
    %461 = arith.addf %459, %460 : vector<32x64xf32>
    %462 = vector.extract_strided_slice %461 {offsets = [0, 0], sizes = [8, 64], strides = [1, 1]} : vector<32x64xf32> to vector<8x64xf32>
    %463 = vector.extract_strided_slice %461 {offsets = [8, 0], sizes = [8, 64], strides = [1, 1]} : vector<32x64xf32> to vector<8x64xf32>
    %464 = vector.extract_strided_slice %461 {offsets = [16, 0], sizes = [8, 64], strides = [1, 1]} : vector<32x64xf32> to vector<8x64xf32>
    %465 = vector.extract_strided_slice %461 {offsets = [24, 0], sizes = [8, 64], strides = [1, 1]} : vector<32x64xf32> to vector<8x64xf32>
    %466 = arith.negf %463 : vector<8x64xf32>
    %467 = math.exp %466 : vector<8x64xf32>
    %cst_79 = arith.constant 1.000000e+00 : f32
    %468 = vector.broadcast %cst_79 : f32 to vector<8x64xf32>
    %469 = arith.addf %468, %467 : vector<8x64xf32>
    %470 = arith.divf %468, %469 : vector<8x64xf32>
    %471 = arith.mulf %470, %436 : vector<8x64xf32>
    %472 = arith.negf %462 : vector<8x64xf32>
    %473 = math.exp %472 : vector<8x64xf32>
    %cst_80 = arith.constant 1.000000e+00 : f32
    %474 = vector.broadcast %cst_80 : f32 to vector<8x64xf32>
    %475 = arith.addf %474, %473 : vector<8x64xf32>
    %476 = arith.divf %474, %475 : vector<8x64xf32>
    %477 = math.tanh %465 : vector<8x64xf32>
    %478 = arith.mulf %476, %477 : vector<8x64xf32>
    %479 = arith.addf %471, %478 : vector<8x64xf32>
    %480 = arith.negf %464 : vector<8x64xf32>
    %481 = math.exp %480 : vector<8x64xf32>
    %cst_81 = arith.constant 1.000000e+00 : f32
    %482 = vector.broadcast %cst_81 : f32 to vector<8x64xf32>
    %483 = arith.addf %482, %481 : vector<8x64xf32>
    %484 = arith.divf %482, %483 : vector<8x64xf32>
    %485 = math.tanh %479 : vector<8x64xf32>
    %486 = arith.mulf %484, %485 : vector<8x64xf32>
    %487 = vector.broadcast %55 : vector<8x1xf32> to vector<8x64xf32>
    %488 = arith.mulf %486, %487 : vector<8x64xf32>
    %cst_82 = arith.constant dense<0.000000e+00> : vector<64xf32>
    %489 = vector.multi_reduction <add>, %488, %cst_82 [0] : vector<8x64xf32> to vector<64xf32>
    %490 = vector.shape_cast %489 : vector<64xf32> to vector<1x64xf32>
    %491 = vector.broadcast %56 : vector<1x1xf32> to vector<1x64xf32>
    %492 = arith.addf %490, %491 : vector<1x64xf32>
    %493 = vector.extract_strided_slice %12 {offsets = [1, 16, 0], sizes = [1, 8, 64], strides = [1, 1, 1]} : vector<2x64x64xf32> to vector<1x8x64xf32>
    %494 = vector.shape_cast %493 : vector<1x8x64xf32> to vector<8x64xf32>
    %cst_83 = arith.constant dense<0.000000e+00> : vector<64xf32>
    %495 = vector.multi_reduction <add>, %494, %cst_83 [0] : vector<8x64xf32> to vector<64xf32>
    %496 = vector.shape_cast %495 : vector<64xf32> to vector<1x64xf32>
    %497 = vector.extract_strided_slice %1 {offsets = [1, 16, 0], sizes = [1, 8, 64], strides = [1, 1, 1]} : vector<2x64x64xbf16> to vector<1x8x64xbf16>
    %498 = vector.shape_cast %497 : vector<1x8x64xbf16> to vector<8x64xbf16>
    %499 = arith.truncf %496 : vector<1x64xf32> to vector<1x64xbf16>
    %500 = arith.truncf %486 : vector<8x64xf32> to vector<8x64xbf16>
    %501 = tpu.concatenate %498, %499, %27, %500 in 0 : vector<8x64xbf16>, vector<1x64xbf16>, vector<1x64xbf16>, vector<8x64xbf16> -> vector<18x64xbf16>
    %cst_84 = arith.constant dense<0.000000e+00> : vector<32x64xf32>
    %502 = tpu.matmul %53, %501, %cst_84 {dimension_numbers = #tpu.dot_dimension_numbers<[1], [0], [0], [1], [0, 0, 1, 1], [], []>} : vector<32x18xbf16>, vector<18x64xbf16>, vector<32x64xf32> -> vector<32x64xf32>
    %503 = vector.broadcast %54 : vector<32x1xf32> to vector<32x64xf32>
    %504 = arith.addf %502, %503 : vector<32x64xf32>
    %505 = vector.extract_strided_slice %504 {offsets = [0, 0], sizes = [8, 64], strides = [1, 1]} : vector<32x64xf32> to vector<8x64xf32>
    %506 = vector.extract_strided_slice %504 {offsets = [8, 0], sizes = [8, 64], strides = [1, 1]} : vector<32x64xf32> to vector<8x64xf32>
    %507 = vector.extract_strided_slice %504 {offsets = [16, 0], sizes = [8, 64], strides = [1, 1]} : vector<32x64xf32> to vector<8x64xf32>
    %508 = vector.extract_strided_slice %504 {offsets = [24, 0], sizes = [8, 64], strides = [1, 1]} : vector<32x64xf32> to vector<8x64xf32>
    %509 = arith.negf %506 : vector<8x64xf32>
    %510 = math.exp %509 : vector<8x64xf32>
    %cst_85 = arith.constant 1.000000e+00 : f32
    %511 = vector.broadcast %cst_85 : f32 to vector<8x64xf32>
    %512 = arith.addf %511, %510 : vector<8x64xf32>
    %513 = arith.divf %511, %512 : vector<8x64xf32>
    %514 = arith.mulf %513, %479 : vector<8x64xf32>
    %515 = arith.negf %505 : vector<8x64xf32>
    %516 = math.exp %515 : vector<8x64xf32>
    %cst_86 = arith.constant 1.000000e+00 : f32
    %517 = vector.broadcast %cst_86 : f32 to vector<8x64xf32>
    %518 = arith.addf %517, %516 : vector<8x64xf32>
    %519 = arith.divf %517, %518 : vector<8x64xf32>
    %520 = math.tanh %508 : vector<8x64xf32>
    %521 = arith.mulf %519, %520 : vector<8x64xf32>
    %522 = arith.addf %514, %521 : vector<8x64xf32>
    %523 = arith.negf %507 : vector<8x64xf32>
    %524 = math.exp %523 : vector<8x64xf32>
    %cst_87 = arith.constant 1.000000e+00 : f32
    %525 = vector.broadcast %cst_87 : f32 to vector<8x64xf32>
    %526 = arith.addf %525, %524 : vector<8x64xf32>
    %527 = arith.divf %525, %526 : vector<8x64xf32>
    %528 = math.tanh %522 : vector<8x64xf32>
    %529 = arith.mulf %527, %528 : vector<8x64xf32>
    %530 = vector.broadcast %55 : vector<8x1xf32> to vector<8x64xf32>
    %531 = arith.mulf %529, %530 : vector<8x64xf32>
    %cst_88 = arith.constant dense<0.000000e+00> : vector<64xf32>
    %532 = vector.multi_reduction <add>, %531, %cst_88 [0] : vector<8x64xf32> to vector<64xf32>
    %533 = vector.shape_cast %532 : vector<64xf32> to vector<1x64xf32>
    %534 = vector.broadcast %56 : vector<1x1xf32> to vector<1x64xf32>
    %535 = arith.addf %533, %534 : vector<1x64xf32>
    %536 = vector.extract_strided_slice %12 {offsets = [1, 24, 0], sizes = [1, 8, 64], strides = [1, 1, 1]} : vector<2x64x64xf32> to vector<1x8x64xf32>
    %537 = vector.shape_cast %536 : vector<1x8x64xf32> to vector<8x64xf32>
    %cst_89 = arith.constant dense<0.000000e+00> : vector<64xf32>
    %538 = vector.multi_reduction <add>, %537, %cst_89 [0] : vector<8x64xf32> to vector<64xf32>
    %539 = vector.shape_cast %538 : vector<64xf32> to vector<1x64xf32>
    %540 = vector.extract_strided_slice %1 {offsets = [1, 24, 0], sizes = [1, 8, 64], strides = [1, 1, 1]} : vector<2x64x64xbf16> to vector<1x8x64xbf16>
    %541 = vector.shape_cast %540 : vector<1x8x64xbf16> to vector<8x64xbf16>
    %542 = arith.truncf %539 : vector<1x64xf32> to vector<1x64xbf16>
    %543 = arith.truncf %529 : vector<8x64xf32> to vector<8x64xbf16>
    %544 = tpu.concatenate %541, %542, %32, %543 in 0 : vector<8x64xbf16>, vector<1x64xbf16>, vector<1x64xbf16>, vector<8x64xbf16> -> vector<18x64xbf16>
    %cst_90 = arith.constant dense<0.000000e+00> : vector<32x64xf32>
    %545 = tpu.matmul %53, %544, %cst_90 {dimension_numbers = #tpu.dot_dimension_numbers<[1], [0], [0], [1], [0, 0, 1, 1], [], []>} : vector<32x18xbf16>, vector<18x64xbf16>, vector<32x64xf32> -> vector<32x64xf32>
    %546 = vector.broadcast %54 : vector<32x1xf32> to vector<32x64xf32>
    %547 = arith.addf %545, %546 : vector<32x64xf32>
    %548 = vector.extract_strided_slice %547 {offsets = [0, 0], sizes = [8, 64], strides = [1, 1]} : vector<32x64xf32> to vector<8x64xf32>
    %549 = vector.extract_strided_slice %547 {offsets = [8, 0], sizes = [8, 64], strides = [1, 1]} : vector<32x64xf32> to vector<8x64xf32>
    %550 = vector.extract_strided_slice %547 {offsets = [16, 0], sizes = [8, 64], strides = [1, 1]} : vector<32x64xf32> to vector<8x64xf32>
    %551 = vector.extract_strided_slice %547 {offsets = [24, 0], sizes = [8, 64], strides = [1, 1]} : vector<32x64xf32> to vector<8x64xf32>
    %552 = arith.negf %549 : vector<8x64xf32>
    %553 = math.exp %552 : vector<8x64xf32>
    %cst_91 = arith.constant 1.000000e+00 : f32
    %554 = vector.broadcast %cst_91 : f32 to vector<8x64xf32>
    %555 = arith.addf %554, %553 : vector<8x64xf32>
    %556 = arith.divf %554, %555 : vector<8x64xf32>
    %557 = arith.mulf %556, %522 : vector<8x64xf32>
    %558 = arith.negf %548 : vector<8x64xf32>
    %559 = math.exp %558 : vector<8x64xf32>
    %cst_92 = arith.constant 1.000000e+00 : f32
    %560 = vector.broadcast %cst_92 : f32 to vector<8x64xf32>
    %561 = arith.addf %560, %559 : vector<8x64xf32>
    %562 = arith.divf %560, %561 : vector<8x64xf32>
    %563 = math.tanh %551 : vector<8x64xf32>
    %564 = arith.mulf %562, %563 : vector<8x64xf32>
    %565 = arith.addf %557, %564 : vector<8x64xf32>
    %566 = arith.negf %550 : vector<8x64xf32>
    %567 = math.exp %566 : vector<8x64xf32>
    %cst_93 = arith.constant 1.000000e+00 : f32
    %568 = vector.broadcast %cst_93 : f32 to vector<8x64xf32>
    %569 = arith.addf %568, %567 : vector<8x64xf32>
    %570 = arith.divf %568, %569 : vector<8x64xf32>
    %571 = math.tanh %565 : vector<8x64xf32>
    %572 = arith.mulf %570, %571 : vector<8x64xf32>
    %573 = vector.broadcast %55 : vector<8x1xf32> to vector<8x64xf32>
    %574 = arith.mulf %572, %573 : vector<8x64xf32>
    %cst_94 = arith.constant dense<0.000000e+00> : vector<64xf32>
    %575 = vector.multi_reduction <add>, %574, %cst_94 [0] : vector<8x64xf32> to vector<64xf32>
    %576 = vector.shape_cast %575 : vector<64xf32> to vector<1x64xf32>
    %577 = vector.broadcast %56 : vector<1x1xf32> to vector<1x64xf32>
    %578 = arith.addf %576, %577 : vector<1x64xf32>
    %579 = vector.extract_strided_slice %12 {offsets = [1, 32, 0], sizes = [1, 8, 64], strides = [1, 1, 1]} : vector<2x64x64xf32> to vector<1x8x64xf32>
    %580 = vector.shape_cast %579 : vector<1x8x64xf32> to vector<8x64xf32>
    %cst_95 = arith.constant dense<0.000000e+00> : vector<64xf32>
    %581 = vector.multi_reduction <add>, %580, %cst_95 [0] : vector<8x64xf32> to vector<64xf32>
    %582 = vector.shape_cast %581 : vector<64xf32> to vector<1x64xf32>
    %583 = vector.extract_strided_slice %1 {offsets = [1, 32, 0], sizes = [1, 8, 64], strides = [1, 1, 1]} : vector<2x64x64xbf16> to vector<1x8x64xbf16>
    %584 = vector.shape_cast %583 : vector<1x8x64xbf16> to vector<8x64xbf16>
    %585 = arith.truncf %582 : vector<1x64xf32> to vector<1x64xbf16>
    %586 = arith.truncf %572 : vector<8x64xf32> to vector<8x64xbf16>
    %587 = tpu.concatenate %584, %585, %37, %586 in 0 : vector<8x64xbf16>, vector<1x64xbf16>, vector<1x64xbf16>, vector<8x64xbf16> -> vector<18x64xbf16>
    %cst_96 = arith.constant dense<0.000000e+00> : vector<32x64xf32>
    %588 = tpu.matmul %53, %587, %cst_96 {dimension_numbers = #tpu.dot_dimension_numbers<[1], [0], [0], [1], [0, 0, 1, 1], [], []>} : vector<32x18xbf16>, vector<18x64xbf16>, vector<32x64xf32> -> vector<32x64xf32>
    %589 = vector.broadcast %54 : vector<32x1xf32> to vector<32x64xf32>
    %590 = arith.addf %588, %589 : vector<32x64xf32>
    %591 = vector.extract_strided_slice %590 {offsets = [0, 0], sizes = [8, 64], strides = [1, 1]} : vector<32x64xf32> to vector<8x64xf32>
    %592 = vector.extract_strided_slice %590 {offsets = [8, 0], sizes = [8, 64], strides = [1, 1]} : vector<32x64xf32> to vector<8x64xf32>
    %593 = vector.extract_strided_slice %590 {offsets = [16, 0], sizes = [8, 64], strides = [1, 1]} : vector<32x64xf32> to vector<8x64xf32>
    %594 = vector.extract_strided_slice %590 {offsets = [24, 0], sizes = [8, 64], strides = [1, 1]} : vector<32x64xf32> to vector<8x64xf32>
    %595 = arith.negf %592 : vector<8x64xf32>
    %596 = math.exp %595 : vector<8x64xf32>
    %cst_97 = arith.constant 1.000000e+00 : f32
    %597 = vector.broadcast %cst_97 : f32 to vector<8x64xf32>
    %598 = arith.addf %597, %596 : vector<8x64xf32>
    %599 = arith.divf %597, %598 : vector<8x64xf32>
    %600 = arith.mulf %599, %565 : vector<8x64xf32>
    %601 = arith.negf %591 : vector<8x64xf32>
    %602 = math.exp %601 : vector<8x64xf32>
    %cst_98 = arith.constant 1.000000e+00 : f32
    %603 = vector.broadcast %cst_98 : f32 to vector<8x64xf32>
    %604 = arith.addf %603, %602 : vector<8x64xf32>
    %605 = arith.divf %603, %604 : vector<8x64xf32>
    %606 = math.tanh %594 : vector<8x64xf32>
    %607 = arith.mulf %605, %606 : vector<8x64xf32>
    %608 = arith.addf %600, %607 : vector<8x64xf32>
    %609 = arith.negf %593 : vector<8x64xf32>
    %610 = math.exp %609 : vector<8x64xf32>
    %cst_99 = arith.constant 1.000000e+00 : f32
    %611 = vector.broadcast %cst_99 : f32 to vector<8x64xf32>
    %612 = arith.addf %611, %610 : vector<8x64xf32>
    %613 = arith.divf %611, %612 : vector<8x64xf32>
    %614 = math.tanh %608 : vector<8x64xf32>
    %615 = arith.mulf %613, %614 : vector<8x64xf32>
    %616 = vector.broadcast %55 : vector<8x1xf32> to vector<8x64xf32>
    %617 = arith.mulf %615, %616 : vector<8x64xf32>
    %cst_100 = arith.constant dense<0.000000e+00> : vector<64xf32>
    %618 = vector.multi_reduction <add>, %617, %cst_100 [0] : vector<8x64xf32> to vector<64xf32>
    %619 = vector.shape_cast %618 : vector<64xf32> to vector<1x64xf32>
    %620 = vector.broadcast %56 : vector<1x1xf32> to vector<1x64xf32>
    %621 = arith.addf %619, %620 : vector<1x64xf32>
    %622 = vector.extract_strided_slice %12 {offsets = [1, 40, 0], sizes = [1, 8, 64], strides = [1, 1, 1]} : vector<2x64x64xf32> to vector<1x8x64xf32>
    %623 = vector.shape_cast %622 : vector<1x8x64xf32> to vector<8x64xf32>
    %cst_101 = arith.constant dense<0.000000e+00> : vector<64xf32>
    %624 = vector.multi_reduction <add>, %623, %cst_101 [0] : vector<8x64xf32> to vector<64xf32>
    %625 = vector.shape_cast %624 : vector<64xf32> to vector<1x64xf32>
    %626 = vector.extract_strided_slice %1 {offsets = [1, 40, 0], sizes = [1, 8, 64], strides = [1, 1, 1]} : vector<2x64x64xbf16> to vector<1x8x64xbf16>
    %627 = vector.shape_cast %626 : vector<1x8x64xbf16> to vector<8x64xbf16>
    %628 = arith.truncf %625 : vector<1x64xf32> to vector<1x64xbf16>
    %629 = arith.truncf %615 : vector<8x64xf32> to vector<8x64xbf16>
    %630 = tpu.concatenate %627, %628, %42, %629 in 0 : vector<8x64xbf16>, vector<1x64xbf16>, vector<1x64xbf16>, vector<8x64xbf16> -> vector<18x64xbf16>
    %cst_102 = arith.constant dense<0.000000e+00> : vector<32x64xf32>
    %631 = tpu.matmul %53, %630, %cst_102 {dimension_numbers = #tpu.dot_dimension_numbers<[1], [0], [0], [1], [0, 0, 1, 1], [], []>} : vector<32x18xbf16>, vector<18x64xbf16>, vector<32x64xf32> -> vector<32x64xf32>
    %632 = vector.broadcast %54 : vector<32x1xf32> to vector<32x64xf32>
    %633 = arith.addf %631, %632 : vector<32x64xf32>
    %634 = vector.extract_strided_slice %633 {offsets = [0, 0], sizes = [8, 64], strides = [1, 1]} : vector<32x64xf32> to vector<8x64xf32>
    %635 = vector.extract_strided_slice %633 {offsets = [8, 0], sizes = [8, 64], strides = [1, 1]} : vector<32x64xf32> to vector<8x64xf32>
    %636 = vector.extract_strided_slice %633 {offsets = [16, 0], sizes = [8, 64], strides = [1, 1]} : vector<32x64xf32> to vector<8x64xf32>
    %637 = vector.extract_strided_slice %633 {offsets = [24, 0], sizes = [8, 64], strides = [1, 1]} : vector<32x64xf32> to vector<8x64xf32>
    %638 = arith.negf %635 : vector<8x64xf32>
    %639 = math.exp %638 : vector<8x64xf32>
    %cst_103 = arith.constant 1.000000e+00 : f32
    %640 = vector.broadcast %cst_103 : f32 to vector<8x64xf32>
    %641 = arith.addf %640, %639 : vector<8x64xf32>
    %642 = arith.divf %640, %641 : vector<8x64xf32>
    %643 = arith.mulf %642, %608 : vector<8x64xf32>
    %644 = arith.negf %634 : vector<8x64xf32>
    %645 = math.exp %644 : vector<8x64xf32>
    %cst_104 = arith.constant 1.000000e+00 : f32
    %646 = vector.broadcast %cst_104 : f32 to vector<8x64xf32>
    %647 = arith.addf %646, %645 : vector<8x64xf32>
    %648 = arith.divf %646, %647 : vector<8x64xf32>
    %649 = math.tanh %637 : vector<8x64xf32>
    %650 = arith.mulf %648, %649 : vector<8x64xf32>
    %651 = arith.addf %643, %650 : vector<8x64xf32>
    %652 = arith.negf %636 : vector<8x64xf32>
    %653 = math.exp %652 : vector<8x64xf32>
    %cst_105 = arith.constant 1.000000e+00 : f32
    %654 = vector.broadcast %cst_105 : f32 to vector<8x64xf32>
    %655 = arith.addf %654, %653 : vector<8x64xf32>
    %656 = arith.divf %654, %655 : vector<8x64xf32>
    %657 = math.tanh %651 : vector<8x64xf32>
    %658 = arith.mulf %656, %657 : vector<8x64xf32>
    %659 = vector.broadcast %55 : vector<8x1xf32> to vector<8x64xf32>
    %660 = arith.mulf %658, %659 : vector<8x64xf32>
    %cst_106 = arith.constant dense<0.000000e+00> : vector<64xf32>
    %661 = vector.multi_reduction <add>, %660, %cst_106 [0] : vector<8x64xf32> to vector<64xf32>
    %662 = vector.shape_cast %661 : vector<64xf32> to vector<1x64xf32>
    %663 = vector.broadcast %56 : vector<1x1xf32> to vector<1x64xf32>
    %664 = arith.addf %662, %663 : vector<1x64xf32>
    %665 = vector.extract_strided_slice %12 {offsets = [1, 48, 0], sizes = [1, 8, 64], strides = [1, 1, 1]} : vector<2x64x64xf32> to vector<1x8x64xf32>
    %666 = vector.shape_cast %665 : vector<1x8x64xf32> to vector<8x64xf32>
    %cst_107 = arith.constant dense<0.000000e+00> : vector<64xf32>
    %667 = vector.multi_reduction <add>, %666, %cst_107 [0] : vector<8x64xf32> to vector<64xf32>
    %668 = vector.shape_cast %667 : vector<64xf32> to vector<1x64xf32>
    %669 = vector.extract_strided_slice %1 {offsets = [1, 48, 0], sizes = [1, 8, 64], strides = [1, 1, 1]} : vector<2x64x64xbf16> to vector<1x8x64xbf16>
    %670 = vector.shape_cast %669 : vector<1x8x64xbf16> to vector<8x64xbf16>
    %671 = arith.truncf %668 : vector<1x64xf32> to vector<1x64xbf16>
    %672 = arith.truncf %658 : vector<8x64xf32> to vector<8x64xbf16>
    %673 = tpu.concatenate %670, %671, %47, %672 in 0 : vector<8x64xbf16>, vector<1x64xbf16>, vector<1x64xbf16>, vector<8x64xbf16> -> vector<18x64xbf16>
    %cst_108 = arith.constant dense<0.000000e+00> : vector<32x64xf32>
    %674 = tpu.matmul %53, %673, %cst_108 {dimension_numbers = #tpu.dot_dimension_numbers<[1], [0], [0], [1], [0, 0, 1, 1], [], []>} : vector<32x18xbf16>, vector<18x64xbf16>, vector<32x64xf32> -> vector<32x64xf32>
    %675 = vector.broadcast %54 : vector<32x1xf32> to vector<32x64xf32>
    %676 = arith.addf %674, %675 : vector<32x64xf32>
    %677 = vector.extract_strided_slice %676 {offsets = [0, 0], sizes = [8, 64], strides = [1, 1]} : vector<32x64xf32> to vector<8x64xf32>
    %678 = vector.extract_strided_slice %676 {offsets = [8, 0], sizes = [8, 64], strides = [1, 1]} : vector<32x64xf32> to vector<8x64xf32>
    %679 = vector.extract_strided_slice %676 {offsets = [16, 0], sizes = [8, 64], strides = [1, 1]} : vector<32x64xf32> to vector<8x64xf32>
    %680 = vector.extract_strided_slice %676 {offsets = [24, 0], sizes = [8, 64], strides = [1, 1]} : vector<32x64xf32> to vector<8x64xf32>
    %681 = arith.negf %678 : vector<8x64xf32>
    %682 = math.exp %681 : vector<8x64xf32>
    %cst_109 = arith.constant 1.000000e+00 : f32
    %683 = vector.broadcast %cst_109 : f32 to vector<8x64xf32>
    %684 = arith.addf %683, %682 : vector<8x64xf32>
    %685 = arith.divf %683, %684 : vector<8x64xf32>
    %686 = arith.mulf %685, %651 : vector<8x64xf32>
    %687 = arith.negf %677 : vector<8x64xf32>
    %688 = math.exp %687 : vector<8x64xf32>
    %cst_110 = arith.constant 1.000000e+00 : f32
    %689 = vector.broadcast %cst_110 : f32 to vector<8x64xf32>
    %690 = arith.addf %689, %688 : vector<8x64xf32>
    %691 = arith.divf %689, %690 : vector<8x64xf32>
    %692 = math.tanh %680 : vector<8x64xf32>
    %693 = arith.mulf %691, %692 : vector<8x64xf32>
    %694 = arith.addf %686, %693 : vector<8x64xf32>
    %695 = arith.negf %679 : vector<8x64xf32>
    %696 = math.exp %695 : vector<8x64xf32>
    %cst_111 = arith.constant 1.000000e+00 : f32
    %697 = vector.broadcast %cst_111 : f32 to vector<8x64xf32>
    %698 = arith.addf %697, %696 : vector<8x64xf32>
    %699 = arith.divf %697, %698 : vector<8x64xf32>
    %700 = math.tanh %694 : vector<8x64xf32>
    %701 = arith.mulf %699, %700 : vector<8x64xf32>
    %702 = vector.broadcast %55 : vector<8x1xf32> to vector<8x64xf32>
    %703 = arith.mulf %701, %702 : vector<8x64xf32>
    %cst_112 = arith.constant dense<0.000000e+00> : vector<64xf32>
    %704 = vector.multi_reduction <add>, %703, %cst_112 [0] : vector<8x64xf32> to vector<64xf32>
    %705 = vector.shape_cast %704 : vector<64xf32> to vector<1x64xf32>
    %706 = vector.broadcast %56 : vector<1x1xf32> to vector<1x64xf32>
    %707 = arith.addf %705, %706 : vector<1x64xf32>
    %708 = vector.extract_strided_slice %12 {offsets = [1, 56, 0], sizes = [1, 8, 64], strides = [1, 1, 1]} : vector<2x64x64xf32> to vector<1x8x64xf32>
    %709 = vector.shape_cast %708 : vector<1x8x64xf32> to vector<8x64xf32>
    %cst_113 = arith.constant dense<0.000000e+00> : vector<64xf32>
    %710 = vector.multi_reduction <add>, %709, %cst_113 [0] : vector<8x64xf32> to vector<64xf32>
    %711 = vector.shape_cast %710 : vector<64xf32> to vector<1x64xf32>
    %712 = vector.extract_strided_slice %1 {offsets = [1, 56, 0], sizes = [1, 8, 64], strides = [1, 1, 1]} : vector<2x64x64xbf16> to vector<1x8x64xbf16>
    %713 = vector.shape_cast %712 : vector<1x8x64xbf16> to vector<8x64xbf16>
    %714 = arith.truncf %711 : vector<1x64xf32> to vector<1x64xbf16>
    %715 = arith.truncf %701 : vector<8x64xf32> to vector<8x64xbf16>
    %716 = tpu.concatenate %713, %714, %52, %715 in 0 : vector<8x64xbf16>, vector<1x64xbf16>, vector<1x64xbf16>, vector<8x64xbf16> -> vector<18x64xbf16>
    %cst_114 = arith.constant dense<0.000000e+00> : vector<32x64xf32>
    %717 = tpu.matmul %53, %716, %cst_114 {dimension_numbers = #tpu.dot_dimension_numbers<[1], [0], [0], [1], [0, 0, 1, 1], [], []>} : vector<32x18xbf16>, vector<18x64xbf16>, vector<32x64xf32> -> vector<32x64xf32>
    %718 = vector.broadcast %54 : vector<32x1xf32> to vector<32x64xf32>
    %719 = arith.addf %717, %718 : vector<32x64xf32>
    %720 = vector.extract_strided_slice %719 {offsets = [0, 0], sizes = [8, 64], strides = [1, 1]} : vector<32x64xf32> to vector<8x64xf32>
    %721 = vector.extract_strided_slice %719 {offsets = [8, 0], sizes = [8, 64], strides = [1, 1]} : vector<32x64xf32> to vector<8x64xf32>
    %722 = vector.extract_strided_slice %719 {offsets = [16, 0], sizes = [8, 64], strides = [1, 1]} : vector<32x64xf32> to vector<8x64xf32>
    %723 = vector.extract_strided_slice %719 {offsets = [24, 0], sizes = [8, 64], strides = [1, 1]} : vector<32x64xf32> to vector<8x64xf32>
    %724 = arith.negf %721 : vector<8x64xf32>
    %725 = math.exp %724 : vector<8x64xf32>
    %cst_115 = arith.constant 1.000000e+00 : f32
    %726 = vector.broadcast %cst_115 : f32 to vector<8x64xf32>
    %727 = arith.addf %726, %725 : vector<8x64xf32>
    %728 = arith.divf %726, %727 : vector<8x64xf32>
    %729 = arith.mulf %728, %694 : vector<8x64xf32>
    %730 = arith.negf %720 : vector<8x64xf32>
    %731 = math.exp %730 : vector<8x64xf32>
    %cst_116 = arith.constant 1.000000e+00 : f32
    %732 = vector.broadcast %cst_116 : f32 to vector<8x64xf32>
    %733 = arith.addf %732, %731 : vector<8x64xf32>
    %734 = arith.divf %732, %733 : vector<8x64xf32>
    %735 = math.tanh %723 : vector<8x64xf32>
    %736 = arith.mulf %734, %735 : vector<8x64xf32>
    %737 = arith.addf %729, %736 : vector<8x64xf32>
    %738 = arith.negf %722 : vector<8x64xf32>
    %739 = math.exp %738 : vector<8x64xf32>
    %cst_117 = arith.constant 1.000000e+00 : f32
    %740 = vector.broadcast %cst_117 : f32 to vector<8x64xf32>
    %741 = arith.addf %740, %739 : vector<8x64xf32>
    %742 = arith.divf %740, %741 : vector<8x64xf32>
    %743 = math.tanh %737 : vector<8x64xf32>
    %744 = arith.mulf %742, %743 : vector<8x64xf32>
    %745 = vector.broadcast %55 : vector<8x1xf32> to vector<8x64xf32>
    %746 = arith.mulf %744, %745 : vector<8x64xf32>
    %cst_118 = arith.constant dense<0.000000e+00> : vector<64xf32>
    %747 = vector.multi_reduction <add>, %746, %cst_118 [0] : vector<8x64xf32> to vector<64xf32>
    %748 = vector.shape_cast %747 : vector<64xf32> to vector<1x64xf32>
    %749 = vector.broadcast %56 : vector<1x1xf32> to vector<1x64xf32>
    %750 = arith.addf %748, %749 : vector<1x64xf32>
    %751 = tpu.concatenate %449, %492, %535, %578, %621, %664, %707, %750 in 0 : vector<1x64xf32>, vector<1x64xf32>, vector<1x64xf32>, vector<1x64xf32>, vector<1x64xf32>, vector<1x64xf32>, vector<1x64xf32>, vector<1x64xf32> -> vector<8x64xf32>
    %752 = vector.shape_cast %751 : vector<8x64xf32> to vector<1x8x64xf32>
    %753 = tpu.concatenate %404, %752 in 0 : vector<1x8x64xf32>, vector<1x8x64xf32> -> vector<2x8x64xf32>
    %c0_119 = arith.constant 0 : index
    %c0_120 = arith.constant 0 : index
    %c0_121 = arith.constant 0 : index
    %c0_122 = arith.constant 0 : index
    %754 = vector.load %arg7[%c0_119, %c0_120, %c0_121, %c0_122] : memref<1x2x8x64xf32, #tpu.memory_space<vmem>>, vector<1x2x8x64xf32>
    %755 = vector.shape_cast %754 : vector<1x2x8x64xf32> to vector<2x8x64xf32>
    %756 = vector.shape_cast %753 : vector<2x8x64xf32> to vector<1x2x8x64xf32>
    tpu.vector_store %arg7[%c0_119, %c0_120, %c0_121, %c0_122], %756 {strides = array<i32>} : memref<1x2x8x64xf32, #tpu.memory_space<vmem>>, vector<1x2x8x64xf32>,
    return
  }
  func.func @transform_0(%arg0: i32, %arg1: i32) -> (i32, i32, i32, i32) {
    %c0_i32 = arith.constant 0 : i32
    %c0_i32_0 = arith.constant 0 : i32
    %c0_i32_1 = arith.constant 0 : i32
    return %arg0, %c0_i32, %c0_i32_0, %arg1 : i32, i32, i32, i32
  }
  func.func @transform_1(%arg0: i32, %arg1: i32) -> (i32, i32) {
    %c0_i32 = arith.constant 0 : i32
    %c0_i32_0 = arith.constant 0 : i32
    %c0_i32_1 = arith.constant 0 : i32
    return %c0_i32, %c0_i32_0 : i32, i32
  }
  func.func @transform_2(%arg0: i32, %arg1: i32) -> (i32, i32) {
    %c0_i32 = arith.constant 0 : i32
    %c0_i32_0 = arith.constant 0 : i32
    %c0_i32_1 = arith.constant 0 : i32
    return %c0_i32, %c0_i32_0 : i32, i32
  }
  func.func @transform_3(%arg0: i32, %arg1: i32) -> (i32, i32) {
    %c0_i32 = arith.constant 0 : i32
    %c0_i32_0 = arith.constant 0 : i32
    %c0_i32_1 = arith.constant 0 : i32
    return %c0_i32, %c0_i32_0 : i32, i32
  }
  func.func @transform_4(%arg0: i32, %arg1: i32) -> (i32, i32) {
    %c0_i32 = arith.constant 0 : i32
    %c0_i32_0 = arith.constant 0 : i32
    %c0_i32_1 = arith.constant 0 : i32
    return %c0_i32, %c0_i32_0 : i32, i32
  }
  func.func @transform_5(%arg0: i32, %arg1: i32) -> (i32, i32, i32, i32) {
    %c0_i32 = arith.constant 0 : i32
    %c0_i32_0 = arith.constant 0 : i32
    %c0_i32_1 = arith.constant 0 : i32
    return %arg0, %c0_i32, %c0_i32_0, %arg1 : i32, i32, i32, i32
  }
}

</mosaic_0001>

<bundles_post_ra>
// kernel: custom-call.50
= control target key start
LH: loop header
LB: loop body
LE: loop exit
PB: predicated region body
PF: predicated region fallthrough
CT: control target
= control target key end

     0   :  { %5 = vsyncpa [#allocation6], 0  ;;  %v77_v1 = vlaneseq  ;;  %v534_v2 = vmov 0   ;;  %s563_s14 = smov 0   ;;  %s604_s0 = inlined_call_operand.vmem [shape: f32[4,4], index: 0, kind: input, shape index: {}]   ;;  %s605_s1 = inlined_call_operand.vmem [shape: f32[4,4], index: 1, kind: output, shape index: {0}]   ;;  %s606_s2 = inlined_call_operand.hbm [shape: s32[4], index: 2, kind: output, shape index: {1}]   ;;  %s607_s3 = inlined_call_operand.vmem [shape: s32[4], index: 3, kind: output, shape index: {2}]  }
   0x1   :  { %v67_v0 = vld [vmem:[%s604_s0] sm:$0xf]  ;;  %76 = vst [vmem:[#allocation4] sm:$0x1] %v534_v2 }
   0x2   :  { %68 = vst [vmem:[#allocation1] sm:$0xf] %v67_v0  ;;  %v560_v3 = vshrl.u32 %v77_v1, 7 }
   0x4   :  { %81 = vst [vmem:[#allocation9] sm:$0xff] %v560_v3 }
   0x9   :  { %v72_v4 = vld [vmem:[#allocation1] sm:$0xf] }
   0xa   :  { %73 = vst [vmem:[#allocation0] sm:$0xf] %v72_v4 }
  0x11   :  { %v74_v5 = vld [vmem:[#allocation0] sm:$0xff] }
  0x12   :  { %75 = vst [vmem:[#allocation2] sm:$0xff] %v74_v5 }
  0x13 LB: > { %vm97_vm0 = vcmp.lt.s32.totalorder %v560_v3, 4  ;;  %v570_v8 = vstv %s532_s14  ;;  %s138_s0 = ssub.s32 128, %s532_s14  ;;  %v144_v38 = vand.u32 127, %v77_v1  ;;  %v147_v40 = vld [vmem:[#allocation4] ss:$0 sm:$0xff]  ;;  %s150_s15 = scalar_lea.vmem [#allocation2], %s532_s14  ;;  %s532_s14 = sphi %s563_s14, %s87_s14  }
  0x14   : > { %vm96_vm1 = vcmp.ge.s32.totalorder %v560_v3, %v570_v8  ;;  %s156_s17 = scalar_lea.vmem [#allocation9], %s532_s14  ;;  %vm176_vm15 = vcmp.gt.s32.totalorder %v560_v3, %v570_v8  ;;  %s87_s14 = sadd.s32 1, %s532_s14  }
  0x15   : > { %vm98_vm3 = vmand %vm96_vm1, %vm97_vm0  ;;  %vm168_vm12 = vcmp.gt.s32.totalorder %v144_v38, %v570_v8  ;;  %vm145_vm13 = vcmp.eq.s32.totalorder %v144_v38, %v570_v8  ;;  %v158_v42 = vld [vmem:[%s156_s17] ss:$0 sm:$0xff]  ;;  %p84_p0 = scmp.ge.s32.totalorder %s87_s14, 4  }
  0x16   : > { %vm180_vm1 = vmand %vm176_vm15, %vm145_vm13  ;;  %s535_s20 = smov (%p84_p0), [#allocation5]  }
  0x17   :  { %s328_s21 = sshll.u32 (%p84_p0), %s535_s20, 4  ;;  %s329_s21 = int_to_ptr.vmem [resolvable:$true] %s328_s21 }
  0x18   :  { %s504_s24 = scalar_lea.vmem (%p84_p0), %s329_s21, 16  ;;  %s508_s25 = scalar_lea.vmem (%p84_p0), %s329_s21, 32 }
  0x19   : > { %v92_v6 = vld [vmem:[#allocation2] sm:$0xff]  ;;  %v152_v41 = vld [vmem:[%s150_s15] ss:$0 sm:$0xff]  ;;  %p505_p1 = scmp.ne.s32.totalorder (%p84_p0), %s329_s21, %s504_s24  ;;  %p509_p2 = scmp.lt.s32.totalorder (%p84_p0), %s329_s21, %s329_s21 }
  0x1a   : > { %v93_v7 = vand.u32 2147483647, %v92_v6  ;;  %p510_p3 = scmp.lt.s32.totalorder (%p84_p0), %s508_s25, %s504_s24 }
  0x1c   : > { %vm483_vm2 = vcmp.gt.f32.partialorder %v93_v7, -inf  ;;  %p511_p4 = por (%p84_p0), %p510_p3, %p509_p2 }
  0x1d   : > { %vm100_vm4 = vmand %vm98_vm3, %vm483_vm2 }
  0x1e   : > { %v101_v9 = vsel %vm100_vm4, %v560_v3, %v570_v8  ;;  %v102_v10 = vsel %vm100_vm4, %v93_v7, -inf  ;;  %p512_p5 = pnand (%p84_p0), %p511_p4, %p505_p1 }
  0x1f   : > { %v103_v11 = vrot.slane %v102_v10, 1  ;;  %v104_v12 = vrot.slane %v101_v9, 1 }
  0x21   : > { %vm105_vm5 = vcmp.ge.f32.partialorder %v103_v11, %v102_v10  ;;  %v108_v13 = vrot.slane %v103_v11, 1  ;;  %v109_v14 = vrot.slane %v104_v12, 1 }
  0x22   : > { %v106_v15 = vsel %vm105_vm5, %v103_v11, %v102_v10  ;;  %v107_v16 = vsel %vm105_vm5, %v104_v12, %v101_v9 }
  0x23   : > { %vm110_vm6 = vcmp.ge.f32.partialorder %v108_v13, %v106_v15  ;;  %v113_v17 = vrot.slane %v108_v13, 1  ;;  %v114_v18 = vrot.slane %v109_v14, 1 }
  0x24   : > { %v111_v19 = vsel %vm110_vm6, %v108_v13, %v106_v15  ;;  %v112_v20 = vsel %vm110_vm6, %v109_v14, %v107_v16 }
  0x25   : > { %vm115_vm7 = vcmp.ge.f32.partialorder %v113_v17, %v111_v19  ;;  %v118_v21 = vrot.slane %v113_v17, 1  ;;  %v119_v22 = vrot.slane %v114_v18, 1 }
  0x26   : > { %v116_v23 = vsel %vm115_vm7, %v113_v17, %v111_v19  ;;  %v117_v24 = vsel %vm115_vm7, %v114_v18, %v112_v20 }
  0x27   : > { %vm120_vm8 = vcmp.ge.f32.partialorder %v118_v21, %v116_v23  ;;  %v123_v25 = vrot.slane %v118_v21, 1  ;;  %v124_v26 = vrot.slane %v119_v22, 1 }
  0x28   : > { %v121_v27 = vsel %vm120_vm8, %v118_v21, %v116_v23  ;;  %v122_v28 = vsel %vm120_vm8, %v119_v22, %v117_v24 }
  0x29   : > { %vm125_vm9 = vcmp.ge.f32.partialorder %v123_v25, %v121_v27  ;;  %v128_v29 = vrot.slane %v123_v25, 1  ;;  %v129_v30 = vrot.slane %v124_v26, 1 }
  0x2a   : > { %v126_v31 = vsel %vm125_vm9, %v123_v25, %v121_v27  ;;  %v127_v32 = vsel %vm125_vm9, %v124_v26, %v122_v28 }
  0x2b   : > { %vm130_vm10 = vcmp.ge.f32.partialorder %v128_v29, %v126_v31  ;;  %v133_v33 = vrot.slane %v128_v29, 1  ;;  %v134_v34 = vrot.slane %v129_v30, 1 }
  0x2c   : > { %v131_v35 = vsel %vm130_vm10, %v128_v29, %v126_v31  ;;  %v132_v36 = vsel %vm130_vm10, %v129_v30, %v127_v32 }
  0x2d   : > { %vm135_vm11 = vcmp.ge.f32.partialorder %v133_v33, %v131_v35 }
  0x2e   : > { %v137_v37 = vsel %vm135_vm11, %v134_v34, %v132_v36 }
  0x2f   : > { %139 = vrot.lane.b32.xlu0 %v137_v37, %s138_s0 }
  0xa1   : > { %v140_v39 = vpop.permute.xlu0 %139 }
  0xa2   : > { %490 = vpush %v140_v39 }
  0xd3   : > { %s491_s16 = spop %490 }
  0xd4   : > { %v146_v43 = vstv %s491_s16  ;;  %s151_s18 = scalar_lea.vmem [#allocation2], %s491_s16  ;;  %s157_s19 = scalar_lea.vmem [#allocation9], %s491_s16 }
  0xd5   : > { %v153_v44 = vld [vmem:[%s151_s18] ss:$0 sm:$0xff]  ;;  %v148_v46 = vsel %vm145_vm13, %v146_v43, %v147_v40 }
  0xd6   : > { %v159_v45 = vld [vmem:[%s157_s19] ss:$0 sm:$0xff]  ;;  %154 = vst [vmem:[%s151_s18] sm:$0x1] %v152_v41  ;;  %vm162_vm14 = vcmp.ne.f32.partialorder %v153_v44, 0.0  ;;  %149 = vst [vmem:[#allocation4] sm:$0x1] %v148_v46 }
  0xd7   : > { %160 = vst [vmem:[%s157_s19] sm:$0x1] %v158_v42  ;;  %155 = vst [vmem:[%s150_s15] sm:$0x1] %v153_v44  ;;  %v169_v53 = vsel %vm168_vm12, %v153_v44, 0.0 }
  0xd8   : > { %161 = vst [vmem:[%s156_s17] sm:$0x1] %v159_v45  ;;  %vm163_vm0 = vmand %vm145_vm13, %vm162_vm14 }
  0xd9   : > { %v164_v47 = vsel %vm163_vm0, %v153_v44, 1.0 }
  0xda   : > { %v177_v48 = vsel %vm176_vm15, %v164_v47, 1.0 }
  0xdb   : > { %502 = vrcp.f32 %v177_v48 }
  0xdd   :  { %v248_v59 = vld [vmem:[#allocation4] sm:$0x1] (%p84_p0) }
  0xde   : > { %v173_v50 = vld [vmem:[#allocation2] sm:$0xff]  ;;  %251 = vst [vmem:[#allocation5] sm:$0x1] (%p84_p0), %v248_v59 }
  0xdf   :  { %v187_v57 = vld [vmem:[#allocation9] sm:$0xff] (%p84_p0) }
  0xe8   : > { %v503_v49 = vpop.eup %502 }
  0xe9   : > { %v179_v51 = vmul.f32 %v503_v49, %v173_v50 }
  0xeb   : > { %v181_v52 = vsel %vm180_vm1, %v179_v51, 0.0 }
  0xec   : > { %182 = vadd.xlane.f32.xlu0 %v181_v52 }
 0x119   :  { %203 = vxpose.xlu0.b32.start.end [1/1] (short) (narrow) (%p84_p0), %v187_v57, 8 }
 0x175   : > { %v183_v54 = vpop.xlane.xlu0 %182 }
 0x176   : > { %v184_v55 = vmul.f32 %v183_v54, %v169_v53  ;;  %86 = sbr.rel (!%p84_p0) target bundleno = 19 (0x13), region = 163 }
 0x178   : > { %v185_v56 = vsub.f32 %v179_v51, %v184_v55 }
 0x17a   : > { %186 = vst [vmem:[#allocation2] sm:$0xff] %v185_v56 }
 0x181   :  { %v240_v58 = vld [vmem:[#allocation2] sm:$0xf] }
 0x182   :  { %243 = vst [vmem:[#allocation3] sm:$0xf] %v240_v58 }
 0x189   :  { %v321_v60 = vld [vmem:[#allocation3] sm:$0xf] }
 0x18a   :  { %322 = vst [vmem:[%s605_s1] sm:$0xf] %v321_v60 }
 0x18b   :  { %515 = shalt.err (!%p512_p5)
}
 0x18c   :  { %331 = dma.vmem_to_hbm [thread:$0]  %s329_s21, 16, %s606_s2, [#allocation6]  }
 0x195   :  { %v219_v61 = vpop.trf.xlu0 }
 0x196   :  { %235 = vst [vmem:[#allocation7] sm:$0x1] %v219_v61 }
 0x19d   :  { %v256_v62 = vld [vmem:[#allocation7] sm:$0x1] }
 0x19e   :  { %259 = vst [vmem:[#allocation8] sm:$0x1] %v256_v62 }
 0x1a5   :  { %v395_v63 = vld [vmem:[#allocation8] sm:$0x1] }
 0x1a6   :  { %396 = vst [vmem:[%s607_s3] sm:$0x1] %v395_v63 }
 0x1a7   :  { %528 = dma.done.wait [#allocation6], 16  }
 0x1a8   :  { %529 = vsyncadd [#allocation6], 4294967280 }
 0x1a9   :  { %402 = vsyncpa [#allocation6], 1 }

// kernel: custom-call.52
= control target key start
LH: loop header
LB: loop body
LE: loop exit
PB: predicated region body
PF: predicated region fallthrough
CT: control target
= control target key end

     0   :  { %v40_v1 = vlaneseq  ;;  %v155_v11 = vmov -1.0   ;;  %s172_s0 = inlined_call_operand.vmem [shape: f32[1,4,4], index: 0, kind: input, shape index: {}]   ;;  %s173_s1 = inlined_call_operand.vmem [shape: f32[1,4,4], index: 1, kind: output, shape index: {}]  }
   0x1   :  { %v18_v0 = vld [vmem:[%s172_s0] sm:$0xf] }
   0x2   :  { %19 = vst [vmem:[#allocation1] sm:$0xf] %v18_v0  ;;  %v41_v3 = vand.u32 127, %v40_v1  ;;  %v44_v4 = vshrl.u32 %v40_v1, 7 }
   0x4   :  { %vm42_vm0 = vcmp.lt.s32.totalorder %v41_v3, 4  ;;  %vm51_vm1 = vcmp.ge.s32.totalorder %v44_v4, %v41_v3  ;;  %vm46_vm2 = vcmp.eq.s32.totalorder %v44_v4, %v41_v3  ;;  %vm65_vm4 = vcmp.eq.s32.totalorder %v41_v3, 0 }
   0x5   :  { %vm52_vm3 = vmand %vm51_vm1, %vm42_vm0  ;;  %vm62_vm5 = vcmp.eq.s32.totalorder %v41_v3, %v44_v4  ;;  %v66_v12 = vsel %vm65_vm4, 1.0, %v155_v11  ;;  %vm73_vm6 = vcmp.eq.s32.totalorder %v41_v3, 1  ;;  %vm83_vm7 = vcmp.eq.s32.totalorder %v41_v3, 2 }
   0x6   :  { %v67_v13 = vsel %vm62_vm5, %v66_v12, 0.0  ;;  %vm93_vm8 = vcmp.eq.s32.totalorder %v41_v3, 3 }
   0x9   :  { %v38_v2 = vld [vmem:[#allocation1] sm:$0xf] }
   0xa   :  { %39 = vst [vmem:[#allocation0] sm:$0xf] %v38_v2 }
  0x11   :  { %v47_v5 = vld [vmem:[#allocation0] sm:$0xff] }
  0x12   :  { %v48_v6 = vsel %vm46_vm2, %v47_v5, 0.0  ;;  %v53_v7 = vsel %vm52_vm3, %v47_v5, 0.0 }
  0x13   :  { %49 = vadd.xlane.f32.xlu0 %v48_v6 }
  0x9c   :  { %v50_v8 = vpop.xlane.xlu0 %49 }
  0x9d   :  { %153 = vrcp.f32 %v50_v8  ;;  %vm100_vm9 = vweird.f32 %v50_v8 }
  0xaa   :  { %v154_v9 = vpop.eup %153 }
  0xab   :  { %v55_v10 = vmul.f32 %v154_v9, %v53_v7 }
  0xad   :  { %56 = vst [vmem:[#allocation4] sm:$0xff] %v55_v10 }
  0xb4   :  { %v69_v14 = vld [vmem:[#allocation4 + $0x1] ss:$0 sm:$0xff]  ;;  %v79_v17 = vld [vmem:[#allocation4 + $0x2] ss:$0 sm:$0xff]  ;;  %v89_v22 = vld [vmem:[#allocation4 + $0x3] ss:$0 sm:$0xff] }
  0xb5   :  { %v70_v15 = vxor.u32 2147483648, %v69_v14  ;;  %v80_v19 = vxor.u32 2147483648, %v79_v17  ;;  %v90_v24 = vxor.u32 2147483648, %v89_v22 }
  0xb7   :  { %v74_v16 = vmul.f32 %v70_v15, %v67_v13 }
  0xb9   :  { %75 = vadd.xlane.f32.xlu0 %v74_v16 }
 0x142   :  { %v76_v18 = vpop.xlane.xlu0 %75 }
 0x143   :  { %v77_v20 = vsel %vm73_vm6, %v76_v18, %v67_v13 }
 0x144   :  { %v84_v21 = vmul.f32 %v80_v19, %v77_v20 }
 0x146   :  { %85 = vadd.xlane.f32.xlu1 %v84_v21 }
 0x1cf   :  { %v86_v23 = vpop.xlane.xlu1 %85 }
 0x1d0   :  { %v87_v25 = vsel %vm83_vm7, %v86_v23, %v77_v20 }
 0x1d1   :  { %v94_v26 = vmul.f32 %v90_v24, %v87_v25 }
 0x1d3   :  { %95 = vadd.xlane.f32.xlu1 %v94_v26 }
 0x25c   :  { %v96_v27 = vpop.xlane.xlu1 %95 }
 0x25d   :  { %v97_v28 = vsel %vm93_vm8, %v96_v27, %v87_v25 }
 0x25e   :  { %v99_v29 = vmul.f32 %v154_v9, %v97_v28 }
 0x260   :  { %v101_v30 = vsel %vm100_vm9, %v97_v28, %v99_v29 }
 0x261   :  { %102 = vst [vmem:[#allocation2] sm:$0xff] %v101_v30 }
 0x268   :  { %v107_v31 = vld [vmem:[#allocation2] sm:$0xf] }
 0x269   :  { %110 = vst [vmem:[#allocation3] sm:$0xf] %v107_v31 }
 0x270   :  { %v127_v32 = vld [vmem:[#allocation3] sm:$0xf] }
 0x271   :  { %128 = vst [vmem:[%s173_s1] sm:$0xf] %v127_v32 }

// kernel: custom-call.51
= control target key start
LH: loop header
LB: loop body
LE: loop exit
PB: predicated region body
PF: predicated region fallthrough
CT: control target
= control target key end

     0   :  { %v40_v1 = vlaneseq  ;;  %v154_v11 = vmov -1.0   ;;  %s171_s0 = inlined_call_operand.vmem [shape: f32[1,4,4], index: 0, kind: input, shape index: {}]   ;;  %s172_s1 = inlined_call_operand.vmem [shape: f32[1,4,4], index: 1, kind: output, shape index: {}]  }
   0x1   :  { %v18_v0 = vld [vmem:[%s171_s0] sm:$0xf] }
   0x2   :  { %19 = vst [vmem:[#allocation1] sm:$0xf] %v18_v0  ;;  %v41_v3 = vand.u32 127, %v40_v1  ;;  %v44_v4 = vshrl.u32 %v40_v1, 7 }
   0x4   :  { %vm42_vm0 = vcmp.lt.s32.totalorder %v41_v3, 4  ;;  %vm51_vm1 = vcmp.le.s32.totalorder %v44_v4, %v41_v3  ;;  %vm46_vm2 = vcmp.eq.s32.totalorder %v44_v4, %v41_v3  ;;  %vm65_vm4 = vcmp.eq.s32.totalorder %v41_v3, 3 }
   0x5   :  { %vm52_vm3 = vmand %vm51_vm1, %vm42_vm0  ;;  %vm62_vm5 = vcmp.eq.s32.totalorder %v41_v3, %v44_v4  ;;  %v66_v12 = vsel %vm65_vm4, 1.0, %v154_v11  ;;  %vm73_vm6 = vcmp.eq.s32.totalorder %v41_v3, 2  ;;  %vm83_vm7 = vcmp.eq.s32.totalorder %v41_v3, 1 }
   0x6   :  { %v67_v13 = vsel %vm62_vm5, %v66_v12, 0.0  ;;  %vm92_vm8 = vcmp.eq.s32.totalorder %v41_v3, 0 }
   0x9   :  { %v38_v2 = vld [vmem:[#allocation1] sm:$0xf] }
   0xa   :  { %39 = vst [vmem:[#allocation0] sm:$0xf] %v38_v2 }
  0x11   :  { %v47_v5 = vld [vmem:[#allocation0] sm:$0xff] }
  0x12   :  { %v48_v6 = vsel %vm46_vm2, %v47_v5, 0.0  ;;  %v53_v7 = vsel %vm52_vm3, %v47_v5, 0.0 }
  0x13   :  { %49 = vadd.xlane.f32.xlu0 %v48_v6 }
  0x9c   :  { %v50_v8 = vpop.xlane.xlu0 %49 }
  0x9d   :  { %152 = vrcp.f32 %v50_v8  ;;  %vm99_vm9 = vweird.f32 %v50_v8 }
  0xaa   :  { %v153_v9 = vpop.eup %152 }
  0xab   :  { %v55_v10 = vmul.f32 %v153_v9, %v53_v7 }
  0xad   :  { %56 = vst [vmem:[#allocation4] sm:$0xff] %v55_v10 }
  0xb4   :  { %v69_v14 = vld [vmem:[#allocation4 + $0x2] ss:$0 sm:$0xff]  ;;  %v79_v17 = vld [vmem:[#allocation4 + $0x1] ss:$0 sm:$0xff]  ;;  %v88_v22 = vld [vmem:[#allocation4] ss:$0 sm:$0xff] }
  0xb5   :  { %v70_v15 = vxor.u32 2147483648, %v69_v14  ;;  %v80_v19 = vxor.u32 2147483648, %v79_v17  ;;  %v89_v24 = vxor.u32 2147483648, %v88_v22 }
  0xb7   :  { %v74_v16 = vmul.f32 %v70_v15, %v67_v13 }
  0xb9   :  { %75 = vadd.xlane.f32.xlu0 %v74_v16 }
 0x142   :  { %v76_v18 = vpop.xlane.xlu0 %75 }
 0x143   :  { %v77_v20 = vsel %vm73_vm6, %v76_v18, %v67_v13 }
 0x144   :  { %v84_v21 = vmul.f32 %v80_v19, %v77_v20 }
 0x146   :  { %85 = vadd.xlane.f32.xlu1 %v84_v21 }
 0x1cf   :  { %v86_v23 = vpop.xlane.xlu1 %85 }
 0x1d0   :  { %v87_v25 = vsel %vm83_vm7, %v86_v23, %v77_v20 }
 0x1d1   :  { %v93_v26 = vmul.f32 %v89_v24, %v87_v25 }
 0x1d3   :  { %94 = vadd.xlane.f32.xlu1 %v93_v26 }
 0x25c   :  { %v95_v27 = vpop.xlane.xlu1 %94 }
 0x25d   :  { %v96_v28 = vsel %vm92_vm8, %v95_v27, %v87_v25 }
 0x25e   :  { %v98_v29 = vmul.f32 %v153_v9, %v96_v28 }
 0x260   :  { %v100_v30 = vsel %vm99_vm9, %v96_v28, %v98_v29 }
 0x261   :  { %101 = vst [vmem:[#allocation2] sm:$0xff] %v100_v30 }
 0x268   :  { %v106_v31 = vld [vmem:[#allocation2] sm:$0xf] }
 0x269   :  { %109 = vst [vmem:[#allocation3] sm:$0xf] %v106_v31 }
 0x270   :  { %v126_v32 = vld [vmem:[#allocation3] sm:$0xf] }
 0x271   :  { %127 = vst [vmem:[%s172_s1] sm:$0xf] %v126_v32 }

// kernel: custom-call.53
= control target key start
LH: loop header
LB: loop body
LE: loop exit
PB: predicated region body
PF: predicated region fallthrough
CT: control target
= control target key end

     0   :  { %5 = vsyncpa [#allocation6], 0  ;;  %v77_v1 = vlaneseq  ;;  %v534_v2 = vmov 0   ;;  %s563_s14 = smov 0   ;;  %s604_s0 = inlined_call_operand.vmem [shape: f32[3,3], index: 0, kind: input, shape index: {}]   ;;  %s605_s1 = inlined_call_operand.vmem [shape: f32[3,3], index: 1, kind: output, shape index: {0}]   ;;  %s606_s2 = inlined_call_operand.hbm [shape: s32[3], index: 2, kind: output, shape index: {1}]   ;;  %s607_s3 = inlined_call_operand.vmem [shape: s32[3], index: 3, kind: output, shape index: {2}]  }
   0x1   :  { %v67_v0 = vld [vmem:[%s604_s0] sm:$0xf]  ;;  %76 = vst [vmem:[#allocation4] sm:$0x1] %v534_v2 }
   0x2   :  { %68 = vst [vmem:[#allocation1] sm:$0xf] %v67_v0  ;;  %v560_v3 = vshrl.u32 %v77_v1, 7 }
   0x4   :  { %81 = vst [vmem:[#allocation9] sm:$0xff] %v560_v3 }
   0x9   :  { %v72_v4 = vld [vmem:[#allocation1] sm:$0xf] }
   0xa   :  { %73 = vst [vmem:[#allocation0] sm:$0xf] %v72_v4 }
  0x11   :  { %v74_v5 = vld [vmem:[#allocation0] sm:$0xff] }
  0x12   :  { %75 = vst [vmem:[#allocation2] sm:$0xff] %v74_v5 }
  0x13 LB: > { %vm97_vm0 = vcmp.lt.s32.totalorder %v560_v3, 3  ;;  %v570_v8 = vstv %s532_s14  ;;  %s138_s0 = ssub.s32 128, %s532_s14  ;;  %v144_v38 = vand.u32 127, %v77_v1  ;;  %v147_v40 = vld [vmem:[#allocation4] ss:$0 sm:$0xff]  ;;  %s150_s15 = scalar_lea.vmem [#allocation2], %s532_s14  ;;  %s532_s14 = sphi %s563_s14, %s87_s14  }
  0x14   : > { %vm96_vm1 = vcmp.ge.s32.totalorder %v560_v3, %v570_v8  ;;  %s156_s17 = scalar_lea.vmem [#allocation9], %s532_s14  ;;  %vm176_vm15 = vcmp.gt.s32.totalorder %v560_v3, %v570_v8  ;;  %s87_s14 = sadd.s32 1, %s532_s14  }
  0x15   : > { %vm98_vm3 = vmand %vm96_vm1, %vm97_vm0  ;;  %vm168_vm12 = vcmp.gt.s32.totalorder %v144_v38, %v570_v8  ;;  %vm145_vm13 = vcmp.eq.s32.totalorder %v144_v38, %v570_v8  ;;  %v158_v42 = vld [vmem:[%s156_s17] ss:$0 sm:$0xff]  ;;  %p84_p0 = scmp.ge.s32.totalorder %s87_s14, 3  }
  0x16   : > { %vm180_vm1 = vmand %vm176_vm15, %vm145_vm13  ;;  %s535_s20 = smov (%p84_p0), [#allocation5]  }
  0x17   :  { %s328_s21 = sshll.u32 (%p84_p0), %s535_s20, 4  ;;  %s329_s21 = int_to_ptr.vmem [resolvable:$true] %s328_s21 }
  0x18   :  { %s504_s24 = scalar_lea.vmem (%p84_p0), %s329_s21, 16  ;;  %s508_s25 = scalar_lea.vmem (%p84_p0), %s329_s21, 32 }
  0x19   : > { %v92_v6 = vld [vmem:[#allocation2] sm:$0xff]  ;;  %v152_v41 = vld [vmem:[%s150_s15] ss:$0 sm:$0xff]  ;;  %p505_p1 = scmp.ne.s32.totalorder (%p84_p0), %s329_s21, %s504_s24  ;;  %p509_p2 = scmp.lt.s32.totalorder (%p84_p0), %s329_s21, %s329_s21 }
  0x1a   : > { %v93_v7 = vand.u32 2147483647, %v92_v6  ;;  %p510_p3 = scmp.lt.s32.totalorder (%p84_p0), %s508_s25, %s504_s24 }
  0x1c   : > { %vm483_vm2 = vcmp.gt.f32.partialorder %v93_v7, -inf  ;;  %p511_p4 = por (%p84_p0), %p510_p3, %p509_p2 }
  0x1d   : > { %vm100_vm4 = vmand %vm98_vm3, %vm483_vm2 }
  0x1e   : > { %v101_v9 = vsel %vm100_vm4, %v560_v3, %v570_v8  ;;  %v102_v10 = vsel %vm100_vm4, %v93_v7, -inf  ;;  %p512_p5 = pnand (%p84_p0), %p511_p4, %p505_p1 }
  0x1f   : > { %v103_v11 = vrot.slane %v102_v10, 1  ;;  %v104_v12 = vrot.slane %v101_v9, 1 }
  0x21   : > { %vm105_vm5 = vcmp.ge.f32.partialorder %v103_v11, %v102_v10  ;;  %v108_v13 = vrot.slane %v103_v11, 1  ;;  %v109_v14 = vrot.slane %v104_v12, 1 }
  0x22   : > { %v106_v15 = vsel %vm105_vm5, %v103_v11, %v102_v10  ;;  %v107_v16 = vsel %vm105_vm5, %v104_v12, %v101_v9 }
  0x23   : > { %vm110_vm6 = vcmp.ge.f32.partialorder %v108_v13, %v106_v15  ;;  %v113_v17 = vrot.slane %v108_v13, 1  ;;  %v114_v18 = vrot.slane %v109_v14, 1 }
  0x24   : > { %v111_v19 = vsel %vm110_vm6, %v108_v13, %v106_v15  ;;  %v112_v20 = vsel %vm110_vm6, %v109_v14, %v107_v16 }
  0x25   : > { %vm115_vm7 = vcmp.ge.f32.partialorder %v113_v17, %v111_v19  ;;  %v118_v21 = vrot.slane %v113_v17, 1  ;;  %v119_v22 = vrot.slane %v114_v18, 1 }
  0x26   : > { %v116_v23 = vsel %vm115_vm7, %v113_v17, %v111_v19  ;;  %v117_v24 = vsel %vm115_vm7, %v114_v18, %v112_v20 }
  0x27   : > { %vm120_vm8 = vcmp.ge.f32.partialorder %v118_v21, %v116_v23  ;;  %v123_v25 = vrot.slane %v118_v21, 1  ;;  %v124_v26 = vrot.slane %v119_v22, 1 }
  0x28   : > { %v121_v27 = vsel %vm120_vm8, %v118_v21, %v116_v23  ;;  %v122_v28 = vsel %vm120_vm8, %v119_v22, %v117_v24 }
  0x29   : > { %vm125_vm9 = vcmp.ge.f32.partialorder %v123_v25, %v121_v27  ;;  %v128_v29 = vrot.slane %v123_v25, 1  ;;  %v129_v30 = vrot.slane %v124_v26, 1 }
  0x2a   : > { %v126_v31 = vsel %vm125_vm9, %v123_v25, %v121_v27  ;;  %v127_v32 = vsel %vm125_vm9, %v124_v26, %v122_v28 }
  0x2b   : > { %vm130_vm10 = vcmp.ge.f32.partialorder %v128_v29, %v126_v31  ;;  %v133_v33 = vrot.slane %v128_v29, 1  ;;  %v134_v34 = vrot.slane %v129_v30, 1 }
  0x2c   : > { %v131_v35 = vsel %vm130_vm10, %v128_v29, %v126_v31  ;;  %v132_v36 = vsel %vm130_vm10, %v129_v30, %v127_v32 }
  0x2d   : > { %vm135_vm11 = vcmp.ge.f32.partialorder %v133_v33, %v131_v35 }
  0x2e   : > { %v137_v37 = vsel %vm135_vm11, %v134_v34, %v132_v36 }
  0x2f   : > { %139 = vrot.lane.b32.xlu0 %v137_v37, %s138_s0 }
  0xa1   : > { %v140_v39 = vpop.permute.xlu0 %139 }
  0xa2   : > { %490 = vpush %v140_v39 }
  0xd3   : > { %s491_s16 = spop %490 }
  0xd4   : > { %v146_v43 = vstv %s491_s16  ;;  %s151_s18 = scalar_lea.vmem [#allocation2], %s491_s16  ;;  %s157_s19 = scalar_lea.vmem [#allocation9], %s491_s16 }
  0xd5   : > { %v153_v44 = vld [vmem:[%s151_s18] ss:$0 sm:$0xff]  ;;  %v148_v46 = vsel %vm145_vm13, %v146_v43, %v147_v40 }
  0xd6   : > { %v159_v45 = vld [vmem:[%s157_s19] ss:$0 sm:$0xff]  ;;  %154 = vst [vmem:[%s151_s18] sm:$0x1] %v152_v41  ;;  %vm162_vm14 = vcmp.ne.f32.partialorder %v153_v44, 0.0  ;;  %149 = vst [vmem:[#allocation4] sm:$0x1] %v148_v46 }
  0xd7   : > { %160 = vst [vmem:[%s157_s19] sm:$0x1] %v158_v42  ;;  %155 = vst [vmem:[%s150_s15] sm:$0x1] %v153_v44  ;;  %v169_v53 = vsel %vm168_vm12, %v153_v44, 0.0 }
  0xd8   : > { %161 = vst [vmem:[%s156_s17] sm:$0x1] %v159_v45  ;;  %vm163_vm0 = vmand %vm145_vm13, %vm162_vm14 }
  0xd9   : > { %v164_v47 = vsel %vm163_vm0, %v153_v44, 1.0 }
  0xda   : > { %v177_v48 = vsel %vm176_vm15, %v164_v47, 1.0 }
  0xdb   : > { %502 = vrcp.f32 %v177_v48 }
  0xdd   :  { %v248_v59 = vld [vmem:[#allocation4] sm:$0x1] (%p84_p0) }
  0xde   : > { %v173_v50 = vld [vmem:[#allocation2] sm:$0xff]  ;;  %251 = vst [vmem:[#allocation5] sm:$0x1] (%p84_p0), %v248_v59 }
  0xdf   :  { %v187_v57 = vld [vmem:[#allocation9] sm:$0xff] (%p84_p0) }
  0xe8   : > { %v503_v49 = vpop.eup %502 }
  0xe9   : > { %v179_v51 = vmul.f32 %v503_v49, %v173_v50 }
  0xeb   : > { %v181_v52 = vsel %vm180_vm1, %v179_v51, 0.0 }
  0xec   : > { %182 = vadd.xlane.f32.xlu0 %v181_v52 }
 0x119   :  { %203 = vxpose.xlu0.b32.start.end [1/1] (short) (narrow) (%p84_p0), %v187_v57, 8 }
 0x175   : > { %v183_v54 = vpop.xlane.xlu0 %182 }
 0x176   : > { %v184_v55 = vmul.f32 %v183_v54, %v169_v53  ;;  %86 = sbr.rel (!%p84_p0) target bundleno = 19 (0x13), region = 163 }
 0x178   : > { %v185_v56 = vsub.f32 %v179_v51, %v184_v55 }
 0x17a   : > { %186 = vst [vmem:[#allocation2] sm:$0xff] %v185_v56 }
 0x181   :  { %v240_v58 = vld [vmem:[#allocation2] sm:$0xf] }
 0x182   :  { %243 = vst [vmem:[#allocation3] sm:$0xf] %v240_v58 }
 0x189   :  { %v321_v60 = vld [vmem:[#allocation3] sm:$0xf] }
 0x18a   :  { %322 = vst [vmem:[%s605_s1] sm:$0xf] %v321_v60 }
 0x18b   :  { %515 = shalt.err (!%p512_p5)
}
 0x18c   :  { %331 = dma.vmem_to_hbm [thread:$0]  %s329_s21, 16, %s606_s2, [#allocation6]  }
 0x195   :  { %v219_v61 = vpop.trf.xlu0 }
 0x196   :  { %235 = vst [vmem:[#allocation7] sm:$0x1] %v219_v61 }
 0x19d   :  { %v256_v62 = vld [vmem:[#allocation7] sm:$0x1] }
 0x19e   :  { %259 = vst [vmem:[#allocation8] sm:$0x1] %v256_v62 }
 0x1a5   :  { %v395_v63 = vld [vmem:[#allocation8] sm:$0x1] }
 0x1a6   :  { %396 = vst [vmem:[%s607_s3] sm:$0x1] %v395_v63 }
 0x1a7   :  { %528 = dma.done.wait [#allocation6], 16  }
 0x1a8   :  { %529 = vsyncadd [#allocation6], 4294967280 }
 0x1a9   :  { %402 = vsyncpa [#allocation6], 1 }

// kernel: custom-call.55
= control target key start
LH: loop header
LB: loop body
LE: loop exit
PB: predicated region body
PF: predicated region fallthrough
CT: control target
= control target key end

     0   :  { %v40_v1 = vlaneseq  ;;  %v145_v11 = vmov -1.0   ;;  %s162_s0 = inlined_call_operand.vmem [shape: f32[1,3,3], index: 0, kind: input, shape index: {}]   ;;  %s163_s1 = inlined_call_operand.vmem [shape: f32[1,3,3], index: 1, kind: output, shape index: {}]  }
   0x1   :  { %v18_v0 = vld [vmem:[%s162_s0] sm:$0xf] }
   0x2   :  { %19 = vst [vmem:[#allocation1] sm:$0xf] %v18_v0  ;;  %v41_v3 = vand.u32 127, %v40_v1  ;;  %v44_v4 = vshrl.u32 %v40_v1, 7 }
   0x4   :  { %vm42_vm0 = vcmp.lt.s32.totalorder %v41_v3, 3  ;;  %vm51_vm1 = vcmp.ge.s32.totalorder %v44_v4, %v41_v3  ;;  %vm46_vm2 = vcmp.eq.s32.totalorder %v44_v4, %v41_v3  ;;  %vm65_vm4 = vcmp.eq.s32.totalorder %v41_v3, 0 }
   0x5   :  { %vm52_vm3 = vmand %vm51_vm1, %vm42_vm0  ;;  %vm62_vm5 = vcmp.eq.s32.totalorder %v41_v3, %v44_v4  ;;  %v66_v12 = vsel %vm65_vm4, 1.0, %v145_v11  ;;  %vm73_vm6 = vcmp.eq.s32.totalorder %v41_v3, 1  ;;  %vm83_vm7 = vcmp.eq.s32.totalorder %v41_v3, 2 }
   0x6   :  { %v67_v13 = vsel %vm62_vm5, %v66_v12, 0.0 }
   0x9   :  { %v38_v2 = vld [vmem:[#allocation1] sm:$0xf] }
   0xa   :  { %39 = vst [vmem:[#allocation0] sm:$0xf] %v38_v2 }
  0x11   :  { %v47_v5 = vld [vmem:[#allocation0] sm:$0xff] }
  0x12   :  { %v48_v6 = vsel %vm46_vm2, %v47_v5, 0.0  ;;  %v53_v7 = vsel %vm52_vm3, %v47_v5, 0.0 }
  0x13   :  { %49 = vadd.xlane.f32.xlu0 %v48_v6 }
  0x9c   :  { %v50_v8 = vpop.xlane.xlu0 %49 }
  0x9d   :  { %143 = vrcp.f32 %v50_v8  ;;  %vm90_vm8 = vweird.f32 %v50_v8 }
  0xaa   :  { %v144_v9 = vpop.eup %143 }
  0xab   :  { %v55_v10 = vmul.f32 %v144_v9, %v53_v7 }
  0xad   :  { %56 = vst [vmem:[#allocation4] sm:$0xff] %v55_v10 }
  0xb4   :  { %v69_v14 = vld [vmem:[#allocation4 + $0x1] ss:$0 sm:$0xff]  ;;  %v79_v17 = vld [vmem:[#allocation4 + $0x2] ss:$0 sm:$0xff] }
  0xb5   :  { %v70_v15 = vxor.u32 2147483648, %v69_v14  ;;  %v80_v19 = vxor.u32 2147483648, %v79_v17 }
  0xb7   :  { %v74_v16 = vmul.f32 %v70_v15, %v67_v13 }
  0xb9   :  { %75 = vadd.xlane.f32.xlu0 %v74_v16 }
 0x142   :  { %v76_v18 = vpop.xlane.xlu0 %75 }
 0x143   :  { %v77_v20 = vsel %vm73_vm6, %v76_v18, %v67_v13 }
 0x144   :  { %v84_v21 = vmul.f32 %v80_v19, %v77_v20 }
 0x146   :  { %85 = vadd.xlane.f32.xlu1 %v84_v21 }
 0x1cf   :  { %v86_v22 = vpop.xlane.xlu1 %85 }
 0x1d0   :  { %v87_v23 = vsel %vm83_vm7, %v86_v22, %v77_v20 }
 0x1d1   :  { %v89_v24 = vmul.f32 %v144_v9, %v87_v23 }
 0x1d3   :  { %v91_v25 = vsel %vm90_vm8, %v87_v23, %v89_v24 }
 0x1d4   :  { %92 = vst [vmem:[#allocation2] sm:$0xff] %v91_v25 }
 0x1db   :  { %v97_v26 = vld [vmem:[#allocation2] sm:$0xf] }
 0x1dc   :  { %100 = vst [vmem:[#allocation3] sm:$0xf] %v97_v26 }
 0x1e3   :  { %v117_v27 = vld [vmem:[#allocation3] sm:$0xf] }
 0x1e4   :  { %118 = vst [vmem:[%s163_s1] sm:$0xf] %v117_v27 }

// kernel: custom-call.54
= control target key start
LH: loop header
LB: loop body
LE: loop exit
PB: predicated region body
PF: predicated region fallthrough
CT: control target
= control target key end

     0   :  { %v40_v1 = vlaneseq  ;;  %v144_v11 = vmov -1.0   ;;  %s161_s0 = inlined_call_operand.vmem [shape: f32[1,3,3], index: 0, kind: input, shape index: {}]   ;;  %s162_s1 = inlined_call_operand.vmem [shape: f32[1,3,3], index: 1, kind: output, shape index: {}]  }
   0x1   :  { %v18_v0 = vld [vmem:[%s161_s0] sm:$0xf] }
   0x2   :  { %19 = vst [vmem:[#allocation1] sm:$0xf] %v18_v0  ;;  %v41_v3 = vand.u32 127, %v40_v1  ;;  %v44_v4 = vshrl.u32 %v40_v1, 7 }
   0x4   :  { %vm42_vm0 = vcmp.lt.s32.totalorder %v41_v3, 3  ;;  %vm51_vm1 = vcmp.le.s32.totalorder %v44_v4, %v41_v3  ;;  %vm46_vm2 = vcmp.eq.s32.totalorder %v44_v4, %v41_v3  ;;  %vm65_vm4 = vcmp.eq.s32.totalorder %v41_v3, 2 }
   0x5   :  { %vm52_vm3 = vmand %vm51_vm1, %vm42_vm0  ;;  %vm62_vm5 = vcmp.eq.s32.totalorder %v41_v3, %v44_v4  ;;  %v66_v12 = vsel %vm65_vm4, 1.0, %v144_v11  ;;  %vm73_vm6 = vcmp.eq.s32.totalorder %v41_v3, 1  ;;  %vm82_vm7 = vcmp.eq.s32.totalorder %v41_v3, 0 }
   0x6   :  { %v67_v13 = vsel %vm62_vm5, %v66_v12, 0.0 }
   0x9   :  { %v38_v2 = vld [vmem:[#allocation1] sm:$0xf] }
   0xa   :  { %39 = vst [vmem:[#allocation0] sm:$0xf] %v38_v2 }
  0x11   :  { %v47_v5 = vld [vmem:[#allocation0] sm:$0xff] }
  0x12   :  { %v48_v6 = vsel %vm46_vm2, %v47_v5, 0.0  ;;  %v53_v7 = vsel %vm52_vm3, %v47_v5, 0.0 }
  0x13   :  { %49 = vadd.xlane.f32.xlu0 %v48_v6 }
  0x9c   :  { %v50_v8 = vpop.xlane.xlu0 %49 }
  0x9d   :  { %142 = vrcp.f32 %v50_v8  ;;  %vm89_vm8 = vweird.f32 %v50_v8 }
  0xaa   :  { %v143_v9 = vpop.eup %142 }
  0xab   :  { %v55_v10 = vmul.f32 %v143_v9, %v53_v7 }
  0xad   :  { %56 = vst [vmem:[#allocation4] sm:$0xff] %v55_v10 }
  0xb4   :  { %v69_v14 = vld [vmem:[#allocation4 + $0x1] ss:$0 sm:$0xff]  ;;  %v78_v17 = vld [vmem:[#allocation4] ss:$0 sm:$0xff] }
  0xb5   :  { %v70_v15 = vxor.u32 2147483648, %v69_v14  ;;  %v79_v19 = vxor.u32 2147483648, %v78_v17 }
  0xb7   :  { %v74_v16 = vmul.f32 %v70_v15, %v67_v13 }
  0xb9   :  { %75 = vadd.xlane.f32.xlu0 %v74_v16 }
 0x142   :  { %v76_v18 = vpop.xlane.xlu0 %75 }
 0x143   :  { %v77_v20 = vsel %vm73_vm6, %v76_v18, %v67_v13 }
 0x144   :  { %v83_v21 = vmul.f32 %v79_v19, %v77_v20 }
 0x146   :  { %84 = vadd.xlane.f32.xlu1 %v83_v21 }
 0x1cf   :  { %v85_v22 = vpop.xlane.xlu1 %84 }
 0x1d0   :  { %v86_v23 = vsel %vm82_vm7, %v85_v22, %v77_v20 }
 0x1d1   :  { %v88_v24 = vmul.f32 %v143_v9, %v86_v23 }
 0x1d3   :  { %v90_v25 = vsel %vm89_vm8, %v86_v23, %v88_v24 }
 0x1d4   :  { %91 = vst [vmem:[#allocation2] sm:$0xff] %v90_v25 }
 0x1db   :  { %v96_v26 = vld [vmem:[#allocation2] sm:$0xf] }
 0x1dc   :  { %99 = vst [vmem:[#allocation3] sm:$0xf] %v96_v26 }
 0x1e3   :  { %v116_v27 = vld [vmem:[#allocation3] sm:$0xf] }
 0x1e4   :  { %117 = vst [vmem:[%s162_s1] sm:$0xf] %v116_v27 }

// kernel: depth_model_forward.2
= control target key start
LH: loop header
LB: loop body
LE: loop exit
PB: predicated region body
PF: predicated region fallthrough
CT: control target
= control target key end

     0   :  { %s4027_s12 = smov 0   ;;  %s5685_s0 = inlined_call_operand.vmem [shape: f32[4,3,10,10], index: 0, kind: input, shape index: {}]   ;;  %s5686_s1 = inlined_call_operand.vmem [shape: f32[27,8,1,1], index: 1, kind: input, shape index: {}]   ;;  %s5687_s2 = inlined_call_operand.vmem [shape: f32[8,1,1], index: 2, kind: input, shape index: {}]   ;;  %s5688_s3 = inlined_call_operand.vmem [shape: f32[4,8,8,8], index: 3, kind: output, shape index: {}]  }
   0x1 LB: > { %s3534_s13 = sadd.s32 4294967295, %s4002_s12   ;;  %p3538_p0 = scmp.ge.s32.totalorder %s4002_s12, 1  ;;  %s4002_s12 = sphi %s4027_s12, %s13_s12  }
   0x2   : > { %p137_p1 = scmp.lt.s32.totalorder %s4002_s12, 5 }
   0x4   : > { %p138_p2 = pnand %p3538_p0, %p137_p1 }
   0x6   : > { %141 = sbr.rel (%p138_p2) target bundleno = 2453 (0x995), region = 32 }
   0xb   : > { %v3544_v0 = vld [vmem:[%s5686_s1 + $0x2] ss:$0 sm:$0xff]  ;;  %v3542_v1 = vld [vmem:[%s5686_s1] ss:$0 sm:$0xff]  ;;  %v4004_v2 = vmov 0   ;;  %p161_p3 = scmp.lt.s32.totalorder %s3534_s13, 3 }
   0xc   : > { %3990 = vset.pattern.permute.xlu1 %v4004_v2  ;;  %3989 = vset.pattern.permute.xlu0 %v4004_v2  ;;  %v3545_v3 = vld [vmem:[%s5686_s1 + $0x3] ss:$0 sm:$0xff]  ;;  %v3543_v4 = vld [vmem:[%s5686_s1 + $0x1] ss:$0 sm:$0xff]  ;;  %v3547_v5 = vld [vmem:[%s5686_s1 + $0x5] ss:$0 sm:$0xff] }
   0xd   : > { %231 = vperm.xlu1 %3990, %v3544_v0   ;;  %223 = vperm.xlu0 %3989, %v3542_v1   ;;  %v3546_v6 = vld [vmem:[%s5686_s1 + $0x4] ss:$0 sm:$0xff]  ;;  %v3549_v7 = vld [vmem:[%s5686_s1 + $0x7] ss:$0 sm:$0xff]  ;;  %v3548_v8 = vld [vmem:[%s5686_s1 + $0x6] ss:$0 sm:$0xff] }
   0xe   : > { %v3559_v9 = vld [vmem:[%s5686_s1 + $0x9] ss:$0 sm:$0xff]  ;;  %v3558_v10 = vld [vmem:[%s5686_s1 + $0x8] ss:$0 sm:$0xff]  ;;  %v3561_v11 = vld [vmem:[%s5686_s1 + $0xb] ss:$0 sm:$0xff] }
   0xf   : > { %v3560_v12 = vld [vmem:[%s5686_s1 + $0xa] ss:$0 sm:$0xff]  ;;  %v3563_v13 = vld [vmem:[%s5686_s1 + $0xd] ss:$0 sm:$0xff]  ;;  %v3562_v14 = vld [vmem:[%s5686_s1 + $0xc] ss:$0 sm:$0xff] }
  0x10   : > { %v3565_v15 = vld [vmem:[%s5686_s1 + $0xf] ss:$0 sm:$0xff]  ;;  %v3564_v16 = vld [vmem:[%s5686_s1 + $0xe] ss:$0 sm:$0xff]  ;;  %v3575_v17 = vld [vmem:[%s5686_s1 + $0x11] ss:$0 sm:$0xff] }
  0x11   : > { %235 = vperm.xlu1 %3990, %v3545_v3   ;;  %227 = vperm.xlu0 %3989, %v3543_v4   ;;  %v3574_v18 = vld [vmem:[%s5686_s1 + $0x10] ss:$0 sm:$0xff]  ;;  %v3577_v19 = vld [vmem:[%s5686_s1 + $0x13] ss:$0 sm:$0xff]  ;;  %v3576_v20 = vld [vmem:[%s5686_s1 + $0x12] ss:$0 sm:$0xff] }
  0x12   : > { %v3579_v21 = vld [vmem:[%s5686_s1 + $0x15] ss:$0 sm:$0xff]  ;;  %v3578_v22 = vld [vmem:[%s5686_s1 + $0x14] ss:$0 sm:$0xff]  ;;  %v3581_v23 = vld [vmem:[%s5686_s1 + $0x17] ss:$0 sm:$0xff] }
  0x13   : > { %v3580_v24 = vld [vmem:[%s5686_s1 + $0x16] ss:$0 sm:$0xff]  ;;  %v3591_v25 = vld [vmem:[%s5686_s1 + $0x19] ss:$0 sm:$0xff]  ;;  %v3590_v26 = vld [vmem:[%s5686_s1 + $0x18] ss:$0 sm:$0xff] }
  0x14   : > { %v3593_v27 = vld [vmem:[%s5686_s1 + $0x1b] ss:$0 sm:$0xff]  ;;  %v3592_v28 = vld [vmem:[%s5686_s1 + $0x1a] ss:$0 sm:$0xff]  ;;  %v3595_v29 = vld [vmem:[%s5686_s1 + $0x1d] ss:$0 sm:$0xff] }
  0x15   : > { %243 = vperm.xlu1 %3990, %v3547_v5   ;;  %239 = vperm.xlu0 %3989, %v3546_v6   ;;  %v3594_v30 = vld [vmem:[%s5686_s1 + $0x1c] ss:$0 sm:$0xff]  ;;  %v3597_v31 = vld [vmem:[%s5686_s1 + $0x1f] ss:$0 sm:$0xff]  ;;  %v3596_v32 = vld [vmem:[%s5686_s1 + $0x1e] ss:$0 sm:$0xff] }
  0x16   : > { %v3607_v33 = vld [vmem:[%s5686_s1 + $0x21] ss:$0 sm:$0xff]  ;;  %v3606_v34 = vld [vmem:[%s5686_s1 + $0x20] ss:$0 sm:$0xff]  ;;  %v3609_v35 = vld [vmem:[%s5686_s1 + $0x23] ss:$0 sm:$0xff] }
  0x17   : > { %v3608_v36 = vld [vmem:[%s5686_s1 + $0x22] ss:$0 sm:$0xff]  ;;  %v3611_v37 = vld [vmem:[%s5686_s1 + $0x25] ss:$0 sm:$0xff]  ;;  %v3610_v38 = vld [vmem:[%s5686_s1 + $0x24] ss:$0 sm:$0xff] }
  0x18   : > { %v3613_v39 = vld [vmem:[%s5686_s1 + $0x27] ss:$0 sm:$0xff]  ;;  %v3612_v40 = vld [vmem:[%s5686_s1 + $0x26] ss:$0 sm:$0xff]  ;;  %v3623_v41 = vld [vmem:[%s5686_s1 + $0x29] ss:$0 sm:$0xff] }
  0x19   : > { %251 = vperm.xlu1 %3990, %v3549_v7   ;;  %247 = vperm.xlu0 %3989, %v3548_v8   ;;  %v3622_v42 = vld [vmem:[%s5686_s1 + $0x28] ss:$0 sm:$0xff]  ;;  %v3625_v43 = vld [vmem:[%s5686_s1 + $0x2b] ss:$0 sm:$0xff]  ;;  %v3624_v44 = vld [vmem:[%s5686_s1 + $0x2a] ss:$0 sm:$0xff] }
  0x1a   : > { %v3627_v45 = vld [vmem:[%s5686_s1 + $0x2d] ss:$0 sm:$0xff]  ;;  %v3626_v46 = vld [vmem:[%s5686_s1 + $0x2c] ss:$0 sm:$0xff]  ;;  %v3629_v47 = vld [vmem:[%s5686_s1 + $0x2f] ss:$0 sm:$0xff] }
  0x1b   : > { %v3628_v48 = vld [vmem:[%s5686_s1 + $0x2e] ss:$0 sm:$0xff]  ;;  %s5968_s13 = smov (!%p161_p3, %s3534_s13), 3  ;;  %s4005_s14 = smov 127   ;;  %vm3470_vm0 = vcmask 64512  }
  0x1c   : > { %s3977_s8 = smul.u32 48, %s5968_s13  ;;  %s4006_s4 = smov 126  }
  0x1d   : > { %324 = vperm.xlu1 %3990, %v3559_v9   ;;  %320 = vperm.xlu0 %3989, %v3558_v10  }
  0x1e   : > { %s4237_s11 = scalar_lea.vmem %s5685_s0, %s3977_s8 }
  0x1f   : > { %v4240_v9 = vld [vmem:[%s4237_s11] sm:$0xff] }
  0x21   : > { %332 = vperm.xlu1 %3990, %v3561_v11   ;;  %328 = vperm.xlu0 %3989, %v3560_v12  }
  0x25   : > { %340 = vperm.xlu1 %3990, %v3563_v13   ;;  %336 = vperm.xlu0 %3989, %v3562_v14  }
  0x29   : > { %348 = vperm.xlu1 %3990, %v3565_v15   ;;  %344 = vperm.xlu0 %3989, %v3564_v16  }
  0x2d   : > { %421 = vperm.xlu1 %3990, %v3575_v17   ;;  %417 = vperm.xlu0 %3989, %v3574_v18  }
  0x31   : > { %429 = vperm.xlu1 %3990, %v3577_v19   ;;  %425 = vperm.xlu0 %3989, %v3576_v20  }
  0x35   : > { %437 = vperm.xlu1 %3990, %v3579_v21   ;;  %433 = vperm.xlu0 %3989, %v3578_v22  }
  0x39   : > { %445 = vperm.xlu1 %3990, %v3581_v23   ;;  %441 = vperm.xlu0 %3989, %v3580_v24  }
  0x3d   : > { %518 = vperm.xlu1 %3990, %v3591_v25   ;;  %514 = vperm.xlu0 %3989, %v3590_v26   ;;  %v4259_v26 = vld [vmem:[%s4237_s11 + $0x10] sm:$0xff] }
  0x41   : > { %526 = vperm.xlu1 %3990, %v3593_v27   ;;  %522 = vperm.xlu0 %3989, %v3592_v28  }
  0x45   : > { %534 = vperm.xlu1 %3990, %v3595_v29   ;;  %530 = vperm.xlu0 %3989, %v3594_v30  }
  0x49   : > { %542 = vperm.xlu1 %3990, %v3597_v31   ;;  %538 = vperm.xlu0 %3989, %v3596_v32  }
  0x4d   : > { %647 = vperm.xlu1 %3990, %v3607_v33   ;;  %643 = vperm.xlu0 %3989, %v3606_v34  }
  0x51   : > { %655 = vperm.xlu1 %3990, %v3609_v35   ;;  %651 = vperm.xlu0 %3989, %v3608_v36  }
  0x55   : > { %663 = vperm.xlu1 %3990, %v3611_v37   ;;  %659 = vperm.xlu0 %3989, %v3610_v38  }
  0x59   : > { %671 = vperm.xlu1 %3990, %v3613_v39   ;;  %667 = vperm.xlu0 %3989, %v3612_v40  }
  0x5d   : > { %776 = vperm.xlu1 %3990, %v3623_v41   ;;  %772 = vperm.xlu0 %3989, %v3622_v42  }
  0x61   : > { %784 = vperm.xlu1 %3990, %v3625_v43   ;;  %780 = vperm.xlu0 %3989, %v3624_v44   ;;  %v4278_v43 = vld [vmem:[%s4237_s11 + $0x20] sm:$0xff] }
  0x65   : > { %792 = vperm.xlu1 %3990, %v3627_v45   ;;  %788 = vperm.xlu0 %3989, %v3626_v46  }
  0x69   : > { %800 = vperm.xlu1 %3990, %v3629_v47   ;;  %796 = vperm.xlu0 %3989, %v3628_v48  }
  0x88   : > { %v4179_v49 = vpop.permute.xlu1 %231  ;;  %v4181_v50 = vpop.permute.xlu0 %223 }
  0x8c   : > { %v4183_v51 = vpop.permute.xlu1 %235  ;;  %v4185_v52 = vpop.permute.xlu0 %227 }
  0x90   : > { %v4187_v53 = vpop.permute.xlu1 %243  ;;  %v4189_v54 = vpop.permute.xlu0 %239 }
  0x94   : > { %v4191_v55 = vpop.permute.xlu1 %251  ;;  %v4193_v56 = vpop.permute.xlu0 %247 }
  0x98   : > { %v4195_v57 = vpop.permute.xlu1 %324  ;;  %v4197_v58 = vpop.permute.xlu0 %320 }
  0x9c   : > { %v4199_v59 = vpop.permute.xlu1 %332  ;;  %v4201_v60 = vpop.permute.xlu0 %328 }
  0xa0   : > { %v4203_v61 = vpop.permute.xlu1 %340  ;;  %v4205_v62 = vpop.permute.xlu0 %336 }
  0xa4   : > { %v4207_v63 = vpop.permute.xlu1 %348  ;;  %v4209_v0 = vpop.permute.xlu0 %344 }
  0xa8   : > { %v4211_v1 = vpop.permute.xlu1 %421  ;;  %v4213_v2 = vpop.permute.xlu0 %417 }
  0xac   : > { %v4217_v3 = vpop.permute.xlu1 %429  ;;  %v4219_v4 = vpop.permute.xlu0 %425 }
  0xb0   : > { %v4225_v5 = vpop.permute.xlu1 %437  ;;  %v4227_v6 = vpop.permute.xlu0 %433 }
  0xb4   : > { %v4230_v7 = vpop.permute.xlu1 %445  ;;  %v4232_v8 = vpop.permute.xlu0 %441 }
  0xb8   : > { %v519_v10 = vpop.permute.xlu1 %518  ;;  %v515_v11 = vpop.permute.xlu0 %514 }
  0xb9   : > { %v546_v12 = vmul.f32 %v519_v10, %v4240_v9  ;;  %v545_v13 = vmul.f32 %v515_v11, %v4240_v9 }
  0xbb   : > { %563 = vrot.lane.b32.xlu1 %v546_v12, %s4005_s14  ;;  %561 = vrot.lane.b32.xlu0 %v545_v13, %s4005_s14 }
  0xbc   : > { %v527_v14 = vpop.permute.xlu1 %526  ;;  %v523_v15 = vpop.permute.xlu0 %522 }
  0xbd   : > { %v548_v16 = vmul.f32 %v527_v14, %v4240_v9  ;;  %v547_v17 = vmul.f32 %v523_v15, %v4240_v9 }
  0xbf   : > { %567 = vrot.lane.b32.xlu1 %v548_v16, %s4005_s14  ;;  %565 = vrot.lane.b32.xlu0 %v547_v17, %s4005_s14 }
  0xc0   : > { %v535_v18 = vpop.permute.xlu1 %534  ;;  %v531_v19 = vpop.permute.xlu0 %530 }
  0xc1   : > { %v550_v20 = vmul.f32 %v535_v18, %v4240_v9  ;;  %v549_v21 = vmul.f32 %v531_v19, %v4240_v9 }
  0xc3   : > { %571 = vrot.lane.b32.xlu1 %v550_v20, %s4005_s14  ;;  %569 = vrot.lane.b32.xlu0 %v549_v21, %s4005_s14  ;;  %v3639_v21 = vld [vmem:[%s5686_s1 + $0x31] ss:$0 sm:$0xff] }
  0xc4   : > { %v543_v22 = vpop.permute.xlu1 %542  ;;  %v539_v23 = vpop.permute.xlu0 %538 }
  0xc5   : > { %v552_v24 = vmul.f32 %v543_v22, %v4240_v9  ;;  %v551_v25 = vmul.f32 %v539_v23, %v4240_v9  ;;  %v3638_v22 = vld [vmem:[%s5686_s1 + $0x30] ss:$0 sm:$0xff]  ;;  %v3641_v23 = vld [vmem:[%s5686_s1 + $0x33] ss:$0 sm:$0xff] }
  0xc7   : > { %575 = vrot.lane.b32.xlu1 %v552_v24, %s4005_s14  ;;  %573 = vrot.lane.b32.xlu0 %v551_v25, %s4005_s14  ;;  %v3640_v24 = vld [vmem:[%s5686_s1 + $0x32] ss:$0 sm:$0xff]  ;;  %v3643_v25 = vld [vmem:[%s5686_s1 + $0x35] ss:$0 sm:$0xff] }
  0xc8   : > { %v648_v27 = vpop.permute.xlu1 %647  ;;  %v644_v28 = vpop.permute.xlu0 %643 }
  0xc9   : > { %v675_v29 = vmul.f32 %v648_v27, %v4259_v26  ;;  %v674_v30 = vmul.f32 %v644_v28, %v4259_v26  ;;  %v3642_v27 = vld [vmem:[%s5686_s1 + $0x34] ss:$0 sm:$0xff]  ;;  %v3645_v28 = vld [vmem:[%s5686_s1 + $0x37] ss:$0 sm:$0xff] }
  0xcb   : > { %692 = vrot.lane.b32.xlu1 %v675_v29, %s4005_s14  ;;  %690 = vrot.lane.b32.xlu0 %v674_v30, %s4005_s14  ;;  %v3644_v29 = vld [vmem:[%s5686_s1 + $0x36] ss:$0 sm:$0xff] }
  0xcc   : > { %v656_v31 = vpop.permute.xlu1 %655  ;;  %v652_v32 = vpop.permute.xlu0 %651 }
  0xcd   : > { %v677_v33 = vmul.f32 %v656_v31, %v4259_v26  ;;  %v676_v34 = vmul.f32 %v652_v32, %v4259_v26 }
  0xcf   : > { %696 = vrot.lane.b32.xlu1 %v677_v33, %s4005_s14  ;;  %694 = vrot.lane.b32.xlu0 %v676_v34, %s4005_s14 }
  0xd0   : > { %v664_v35 = vpop.permute.xlu1 %663  ;;  %v660_v36 = vpop.permute.xlu0 %659 }
  0xd1   : > { %v679_v37 = vmul.f32 %v664_v35, %v4259_v26  ;;  %v678_v38 = vmul.f32 %v660_v36, %v4259_v26 }
  0xd3   : > { %700 = vrot.lane.b32.xlu1 %v679_v37, %s4005_s14  ;;  %698 = vrot.lane.b32.xlu0 %v678_v38, %s4005_s14 }
  0xd4   : > { %v672_v39 = vpop.permute.xlu1 %671  ;;  %v668_v40 = vpop.permute.xlu0 %667 }
  0xd5   : > { %v681_v41 = vmul.f32 %v672_v39, %v4259_v26  ;;  %v680_v42 = vmul.f32 %v668_v40, %v4259_v26 }
  0xd7   : > { %704 = vrot.lane.b32.xlu1 %v681_v41, %s4005_s14  ;;  %702 = vrot.lane.b32.xlu0 %v680_v42, %s4005_s14 }
  0xd8   : > { %v777_v44 = vpop.permute.xlu1 %776  ;;  %v773_v45 = vpop.permute.xlu0 %772 }
  0xd9   : > { %v804_v46 = vmul.f32 %v777_v44, %v4278_v43  ;;  %v803_v47 = vmul.f32 %v773_v45, %v4278_v43 }
  0xdb   : > { %821 = vrot.lane.b32.xlu1 %v804_v46, %s4005_s14  ;;  %819 = vrot.lane.b32.xlu0 %v803_v47, %s4005_s14 }
  0xdc   : > { %v785_v48 = vpop.permute.xlu1 %784  ;;  %v781_v10 = vpop.permute.xlu0 %780 }
  0xdd   : > { %v806_v11 = vmul.f32 %v785_v48, %v4278_v43  ;;  %v805_v12 = vmul.f32 %v781_v10, %v4278_v43 }
  0xdf   : > { %825 = vrot.lane.b32.xlu1 %v806_v11, %s4005_s14  ;;  %823 = vrot.lane.b32.xlu0 %v805_v12, %s4005_s14 }
  0xe0   : > { %v793_v13 = vpop.permute.xlu1 %792  ;;  %v789_v14 = vpop.permute.xlu0 %788 }
  0xe1   : > { %v808_v15 = vmul.f32 %v793_v13, %v4278_v43  ;;  %v807_v16 = vmul.f32 %v789_v14, %v4278_v43 }
  0xe3   : > { %829 = vrot.lane.b32.xlu1 %v808_v15, %s4005_s14  ;;  %827 = vrot.lane.b32.xlu0 %v807_v16, %s4005_s14 }
  0xe4   : > { %v801_v17 = vpop.permute.xlu1 %800  ;;  %v797_v18 = vpop.permute.xlu0 %796 }
  0xe5   : > { %v810_v19 = vmul.f32 %v801_v17, %v4278_v43  ;;  %v809_v20 = vmul.f32 %v797_v18, %v4278_v43 }
  0xe7   : > { %833 = vrot.lane.b32.xlu1 %v810_v19, %s4005_s14  ;;  %831 = vrot.lane.b32.xlu0 %v809_v20, %s4005_s14 }
  0xeb   : > { %905 = vperm.xlu1 %3990, %v3639_v21   ;;  %901 = vperm.xlu0 %3989, %v3638_v22  }
  0xef   : > { %913 = vperm.xlu1 %3990, %v3641_v23   ;;  %909 = vperm.xlu0 %3989, %v3640_v24  }
  0xf3   : > { %921 = vperm.xlu1 %3990, %v3643_v25   ;;  %917 = vperm.xlu0 %3989, %v3642_v27  }
  0xf7   : > { %929 = vperm.xlu1 %3990, %v3645_v28   ;;  %925 = vperm.xlu0 %3989, %v3644_v29  }
 0x12d   : > { %v4320_v30 = vpop.permute.xlu1 %563  ;;  %v4322_v31 = vpop.permute.xlu0 %561 }
 0x131   : > { %v4324_v32 = vpop.permute.xlu1 %567  ;;  %v4326_v33 = vpop.permute.xlu0 %565 }
 0x135   : > { %v4328_v34 = vpop.permute.xlu1 %571  ;;  %v4330_v35 = vpop.permute.xlu0 %569 }
 0x139   : > { %v4332_v36 = vpop.permute.xlu1 %575  ;;  %v4334_v37 = vpop.permute.xlu0 %573 }
 0x13d   : > { %v4336_v38 = vpop.permute.xlu1 %692  ;;  %v4338_v39 = vpop.permute.xlu0 %690 }
 0x141   : > { %v4340_v40 = vpop.permute.xlu1 %696  ;;  %v4342_v41 = vpop.permute.xlu0 %694 }
 0x145   : > { %v4344_v42 = vpop.permute.xlu1 %700  ;;  %v4346_v44 = vpop.permute.xlu0 %698 }
 0x149   : > { %v4348_v45 = vpop.permute.xlu1 %704  ;;  %v4350_v46 = vpop.permute.xlu0 %702 }
 0x14d   : > { %v4352_v47 = vpop.permute.xlu1 %821  ;;  %v4354_v48 = vpop.permute.xlu0 %819 }
 0x151   : > { %v4356_v10 = vpop.permute.xlu1 %825  ;;  %v4358_v11 = vpop.permute.xlu0 %823 }
 0x155   : > { %v4360_v12 = vpop.permute.xlu1 %829  ;;  %v4362_v13 = vpop.permute.xlu0 %827 }
 0x156   : > { %5697 = vst [vmem:[#allocation2_spill] sm:$0xff] %v4362_v13 }
 0x159   : > { %v4364_v14 = vpop.permute.xlu1 %833  ;;  %v4366_v15 = vpop.permute.xlu0 %831 }
 0x15a   : > { %5698 = vst [vmem:[#allocation3_spill] sm:$0xff] %v4364_v14  ;;  %5699 = vst [vmem:[#allocation4_spill] sm:$0xff] %v4366_v15 }
 0x166   : > { %v906_v16 = vpop.permute.xlu1 %905  ;;  %v902_v17 = vpop.permute.xlu0 %901 }
 0x167   : > { %v933_v18 = vmul.f32 %v906_v16, %v4240_v9  ;;  %v932_v19 = vmul.f32 %v902_v17, %v4240_v9 }
 0x169   : > { %950 = vrot.lane.b32.xlu1 %v933_v18, %s4006_s4  ;;  %948 = vrot.lane.b32.xlu0 %v932_v19, %s4006_s4  ;;  %v3655_v19 = vld [vmem:[%s5686_s1 + $0x39] ss:$0 sm:$0xff] }
 0x16a   : > { %v914_v20 = vpop.permute.xlu1 %913  ;;  %v910_v21 = vpop.permute.xlu0 %909 }
 0x16b   : > { %v935_v22 = vmul.f32 %v914_v20, %v4240_v9  ;;  %v934_v23 = vmul.f32 %v910_v21, %v4240_v9  ;;  %v3654_v20 = vld [vmem:[%s5686_s1 + $0x38] ss:$0 sm:$0xff]  ;;  %v3657_v21 = vld [vmem:[%s5686_s1 + $0x3b] ss:$0 sm:$0xff] }
 0x16d   : > { %954 = vrot.lane.b32.xlu1 %v935_v22, %s4006_s4  ;;  %952 = vrot.lane.b32.xlu0 %v934_v23, %s4006_s4  ;;  %v3659_v22 = vld [vmem:[%s5686_s1 + $0x3d] ss:$0 sm:$0xff]  ;;  %v3658_v23 = vld [vmem:[%s5686_s1 + $0x3c] ss:$0 sm:$0xff] }
 0x16e   : > { %v922_v24 = vpop.permute.xlu1 %921  ;;  %v918_v25 = vpop.permute.xlu0 %917 }
 0x16f   : > { %v937_v27 = vmul.f32 %v922_v24, %v4240_v9  ;;  %v936_v28 = vmul.f32 %v918_v25, %v4240_v9  ;;  %v3661_v24 = vld [vmem:[%s5686_s1 + $0x3f] ss:$0 sm:$0xff]  ;;  %v3660_v25 = vld [vmem:[%s5686_s1 + $0x3e] ss:$0 sm:$0xff] }
 0x171   : > { %958 = vrot.lane.b32.xlu1 %v937_v27, %s4006_s4  ;;  %956 = vrot.lane.b32.xlu0 %v936_v28, %s4006_s4 }
 0x172   : > { %v930_v29 = vpop.permute.xlu1 %929  ;;  %v926_v16 = vpop.permute.xlu0 %925 }
 0x173   : > { %v939_v17 = vmul.f32 %v930_v29, %v4240_v9  ;;  %v938_v18 = vmul.f32 %v926_v16, %v4240_v9  ;;  %v3656_v9 = vld [vmem:[%s5686_s1 + $0x3a] ss:$0 sm:$0xff] }
 0x175   : > { %962 = vrot.lane.b32.xlu1 %v939_v17, %s4006_s4  ;;  %960 = vrot.lane.b32.xlu0 %v938_v18, %s4006_s4 }
 0x179   : > { %1034 = vperm.xlu1 %3990, %v3655_v19   ;;  %1030 = vperm.xlu0 %3989, %v3654_v20  }
 0x17d   : > { %1042 = vperm.xlu1 %3990, %v3657_v21   ;;  %1038 = vperm.xlu0 %3989, %v3656_v9  }
 0x181   : > { %1050 = vperm.xlu1 %3990, %v3659_v22   ;;  %1046 = vperm.xlu0 %3989, %v3658_v23  }
 0x185   : > { %1058 = vperm.xlu1 %3990, %v3661_v24   ;;  %1054 = vperm.xlu0 %3989, %v3660_v25  }
 0x1db   : > { %v4408_v27 = vpop.permute.xlu1 %950  ;;  %v4410_v28 = vpop.permute.xlu0 %948 }
 0x1dc   : > { %5700 = vst [vmem:[#allocation5_spill] sm:$0xff] %v4408_v27  ;;  %5701 = vst [vmem:[#allocation6_spill] sm:$0xff] %v4410_v28 }
 0x1df   : > { %v4412_v29 = vpop.permute.xlu1 %954  ;;  %v4414_v16 = vpop.permute.xlu0 %952 }
 0x1e0   : > { %5702 = vst [vmem:[#allocation7_spill] sm:$0xff] %v4412_v29  ;;  %5703 = vst [vmem:[#allocation8_spill] sm:$0xff] %v4414_v16 }
 0x1e3   : > { %v4416_v17 = vpop.permute.xlu1 %958  ;;  %v4418_v18 = vpop.permute.xlu0 %956 }
 0x1e4   : > { %5704 = vst [vmem:[#allocation9_spill] sm:$0xff] %v4416_v17  ;;  %5705 = vst [vmem:[#allocation10_spill] sm:$0xff] %v4418_v18 }
 0x1e7   : > { %v4420_v19 = vpop.permute.xlu1 %962  ;;  %v4422_v20 = vpop.permute.xlu0 %960 }
 0x1e8   : > { %5706 = vst [vmem:[#allocation11_spill] sm:$0xff] %v4420_v19  ;;  %5707 = vst [vmem:[#allocation12_spill] sm:$0xff] %v4422_v20 }
 0x1f4   : > { %v1035_v21 = vpop.permute.xlu1 %1034  ;;  %v1031_v9 = vpop.permute.xlu0 %1030 }
 0x1f5   : > { %v1062_v22 = vmul.f32 %v1035_v21, %v4259_v26  ;;  %v1061_v23 = vmul.f32 %v1031_v9, %v4259_v26 }
 0x1f7   : > { %1079 = vrot.lane.b32.xlu1 %v1062_v22, %s4006_s4  ;;  %1077 = vrot.lane.b32.xlu0 %v1061_v23, %s4006_s4 }
 0x1f8   : > { %v1043_v24 = vpop.permute.xlu1 %1042  ;;  %v1039_v25 = vpop.permute.xlu0 %1038 }
 0x1f9   : > { %v1064_v17 = vmul.f32 %v1043_v24, %v4259_v26  ;;  %v1063_v18 = vmul.f32 %v1039_v25, %v4259_v26 }
 0x1fb   : > { %1083 = vrot.lane.b32.xlu1 %v1064_v17, %s4006_s4  ;;  %1081 = vrot.lane.b32.xlu0 %v1063_v18, %s4006_s4  ;;  %v3671_v17 = vld [vmem:[%s5686_s1 + $0x41] ss:$0 sm:$0xff]  ;;  %v3670_v18 = vld [vmem:[%s5686_s1 + $0x40] ss:$0 sm:$0xff] }
 0x1fc   : > { %v1051_v20 = vpop.permute.xlu1 %1050  ;;  %v1047_v19 = vpop.permute.xlu0 %1046 }
 0x1fd   : > { %v1066_v21 = vmul.f32 %v1051_v20, %v4259_v26  ;;  %v1065_v9 = vmul.f32 %v1047_v19, %v4259_v26  ;;  %v3673_v19 = vld [vmem:[%s5686_s1 + $0x43] ss:$0 sm:$0xff]  ;;  %v3675_v20 = vld [vmem:[%s5686_s1 + $0x45] ss:$0 sm:$0xff] }
 0x1ff   : > { %1087 = vrot.lane.b32.xlu1 %v1066_v21, %s4006_s4  ;;  %1085 = vrot.lane.b32.xlu0 %v1065_v9, %s4006_s4  ;;  %v3674_v21 = vld [vmem:[%s5686_s1 + $0x44] ss:$0 sm:$0xff]  ;;  %v3677_v9 = vld [vmem:[%s5686_s1 + $0x47] ss:$0 sm:$0xff] }
 0x200   : > { %v1059_v22 = vpop.permute.xlu1 %1058  ;;  %v1055_v23 = vpop.permute.xlu0 %1054 }
 0x201   : > { %v1068_v24 = vmul.f32 %v1059_v22, %v4259_v26  ;;  %v1067_v25 = vmul.f32 %v1055_v23, %v4259_v26  ;;  %v3672_v26 = vld [vmem:[%s5686_s1 + $0x42] ss:$0 sm:$0xff]  ;;  %v3676_v22 = vld [vmem:[%s5686_s1 + $0x46] ss:$0 sm:$0xff] }
 0x203   : > { %1091 = vrot.lane.b32.xlu1 %v1068_v24, %s4006_s4  ;;  %1089 = vrot.lane.b32.xlu0 %v1067_v25, %s4006_s4 }
 0x207   : > { %1163 = vperm.xlu1 %3990, %v3671_v17   ;;  %1159 = vperm.xlu0 %3989, %v3670_v18  }
 0x20b   : > { %1171 = vperm.xlu1 %3990, %v3673_v19   ;;  %1167 = vperm.xlu0 %3989, %v3672_v26  }
 0x20f   : > { %1179 = vperm.xlu1 %3990, %v3675_v20   ;;  %1175 = vperm.xlu0 %3989, %v3674_v21  }
 0x213   : > { %1187 = vperm.xlu1 %3990, %v3677_v9   ;;  %1183 = vperm.xlu0 %3989, %v3676_v22  }
 0x269   : > { %v4464_v23 = vpop.permute.xlu1 %1079  ;;  %v4466_v24 = vpop.permute.xlu0 %1077 }
 0x26a   : > { %5708 = vst [vmem:[#allocation13_spill] sm:$0xff] %v4464_v23  ;;  %5709 = vst [vmem:[#allocation14_spill] sm:$0xff] %v4466_v24  ;;  %v4716_v24 = vld [vmem:[%s4237_s11 + $0x11] sm:$0xff]  ;;  %v4775_v23 = vld [vmem:[%s4237_s11 + $0x21] sm:$0xff] }
 0x26b   : > { %5756 = vst [vmem:[#allocation61_spill] sm:$0xff] %v4716_v24  ;;  %5765 = vst [vmem:[#allocation70_spill] sm:$0xff] %v4775_v23 }
 0x26d   : > { %v4468_v25 = vpop.permute.xlu1 %1083  ;;  %v4470_v17 = vpop.permute.xlu0 %1081 }
 0x26e   : > { %5710 = vst [vmem:[#allocation15_spill] sm:$0xff] %v4468_v25  ;;  %5711 = vst [vmem:[#allocation16_spill] sm:$0xff] %v4470_v17 }
 0x271   : > { %v4472_v18 = vpop.permute.xlu1 %1087  ;;  %v4474_v19 = vpop.permute.xlu0 %1085 }
 0x272   : > { %5712 = vst [vmem:[#allocation17_spill] sm:$0xff] %v4472_v18  ;;  %5713 = vst [vmem:[#allocation18_spill] sm:$0xff] %v4474_v19 }
 0x275   : > { %v4476_v26 = vpop.permute.xlu1 %1091  ;;  %v4478_v20 = vpop.permute.xlu0 %1089 }
 0x276   : > { %5714 = vst [vmem:[#allocation19_spill] sm:$0xff] %v4476_v26  ;;  %5715 = vst [vmem:[#allocation20_spill] sm:$0xff] %v4478_v20 }
 0x282   : > { %v1164_v21 = vpop.permute.xlu1 %1163  ;;  %v1160_v16 = vpop.permute.xlu0 %1159 }
 0x283   : > { %v1191_v9 = vmul.f32 %v1164_v21, %v4278_v43  ;;  %v1190_v22 = vmul.f32 %v1160_v16, %v4278_v43 }
 0x285   : > { %1208 = vrot.lane.b32.xlu1 %v1191_v9, %s4006_s4  ;;  %1206 = vrot.lane.b32.xlu0 %v1190_v22, %s4006_s4 }
 0x286   : > { %v1172_v25 = vpop.permute.xlu1 %1171  ;;  %v1168_v17 = vpop.permute.xlu0 %1167 }
 0x287   : > { %v1193_v18 = vmul.f32 %v1172_v25, %v4278_v43  ;;  %v1192_v19 = vmul.f32 %v1168_v17, %v4278_v43 }
 0x289   : > { %1212 = vrot.lane.b32.xlu1 %v1193_v18, %s4006_s4  ;;  %1210 = vrot.lane.b32.xlu0 %v1192_v19, %s4006_s4  ;;  %v3687_v18 = vld [vmem:[%s5686_s1 + $0x49] ss:$0 sm:$0xff]  ;;  %v3686_v19 = vld [vmem:[%s5686_s1 + $0x48] ss:$0 sm:$0xff] }
 0x28a   : > { %v1180_v20 = vpop.permute.xlu1 %1179  ;;  %v1176_v26 = vpop.permute.xlu0 %1175 }
 0x28b   : > { %v1195_v21 = vmul.f32 %v1180_v20, %v4278_v43  ;;  %v1194_v16 = vmul.f32 %v1176_v26, %v4278_v43  ;;  %v3689_v26 = vld [vmem:[%s5686_s1 + $0x4b] ss:$0 sm:$0xff]  ;;  %v3691_v20 = vld [vmem:[%s5686_s1 + $0x4d] ss:$0 sm:$0xff] }
 0x28d   : > { %1216 = vrot.lane.b32.xlu1 %v1195_v21, %s4006_s4  ;;  %1214 = vrot.lane.b32.xlu0 %v1194_v16, %s4006_s4  ;;  %v3690_v21 = vld [vmem:[%s5686_s1 + $0x4c] ss:$0 sm:$0xff]  ;;  %v3693_v16 = vld [vmem:[%s5686_s1 + $0x4f] ss:$0 sm:$0xff] }
 0x28e   : > { %v1188_v9 = vpop.permute.xlu1 %1187  ;;  %v1184_v22 = vpop.permute.xlu0 %1183 }
 0x28f   : > { %v1197_v25 = vmul.f32 %v1188_v9, %v4278_v43  ;;  %v1196_v17 = vmul.f32 %v1184_v22, %v4278_v43  ;;  %v3688_v43 = vld [vmem:[%s5686_s1 + $0x4a] ss:$0 sm:$0xff]  ;;  %v3692_v9 = vld [vmem:[%s5686_s1 + $0x4e] ss:$0 sm:$0xff]  ;;  %v3703_v22 = vld [vmem:[%s5686_s1 + $0x51] ss:$0 sm:$0xff] }
 0x291   : > { %1220 = vrot.lane.b32.xlu1 %v1197_v25, %s4006_s4  ;;  %1218 = vrot.lane.b32.xlu0 %v1196_v17, %s4006_s4  ;;  %v3702_v25 = vld [vmem:[%s5686_s1 + $0x50] ss:$0 sm:$0xff]  ;;  %v3705_v17 = vld [vmem:[%s5686_s1 + $0x53] ss:$0 sm:$0xff] }
 0x295   : > { %1295 = vperm.xlu1 %3990, %v3687_v18   ;;  %1291 = vperm.xlu0 %3989, %v3686_v19   ;;  %v3704_v18 = vld [vmem:[%s5686_s1 + $0x52] ss:$0 sm:$0xff]  ;;  %v3707_v19 = vld [vmem:[%s5686_s1 + $0x55] ss:$0 sm:$0xff] }
 0x299   : > { %1303 = vperm.xlu1 %3990, %v3689_v26   ;;  %1299 = vperm.xlu0 %3989, %v3688_v43   ;;  %v3706_v26 = vld [vmem:[%s5686_s1 + $0x54] ss:$0 sm:$0xff]  ;;  %v3709_v43 = vld [vmem:[%s5686_s1 + $0x57] ss:$0 sm:$0xff] }
 0x29d   : > { %1311 = vperm.xlu1 %3990, %v3691_v20   ;;  %1307 = vperm.xlu0 %3989, %v3690_v21   ;;  %v3708_v20 = vld [vmem:[%s5686_s1 + $0x56] ss:$0 sm:$0xff]  ;;  %v3719_v21 = vld [vmem:[%s5686_s1 + $0x59] ss:$0 sm:$0xff] }
 0x2a1   : > { %1319 = vperm.xlu1 %3990, %v3693_v16   ;;  %1315 = vperm.xlu0 %3989, %v3692_v9   ;;  %v3718_v16 = vld [vmem:[%s5686_s1 + $0x58] ss:$0 sm:$0xff]  ;;  %v3721_v9 = vld [vmem:[%s5686_s1 + $0x5b] ss:$0 sm:$0xff] }
 0x2a5   : > { %1392 = vperm.xlu1 %3990, %v3703_v22   ;;  %1388 = vperm.xlu0 %3989, %v3702_v25   ;;  %v3720_v22 = vld [vmem:[%s5686_s1 + $0x5a] ss:$0 sm:$0xff]  ;;  %v3723_v25 = vld [vmem:[%s5686_s1 + $0x5d] ss:$0 sm:$0xff] }
 0x2a9   : > { %1400 = vperm.xlu1 %3990, %v3705_v17   ;;  %1396 = vperm.xlu0 %3989, %v3704_v18   ;;  %v3722_v17 = vld [vmem:[%s5686_s1 + $0x5c] ss:$0 sm:$0xff]  ;;  %v3725_v18 = vld [vmem:[%s5686_s1 + $0x5f] ss:$0 sm:$0xff] }
 0x2ad   : > { %1408 = vperm.xlu1 %3990, %v3707_v19   ;;  %1404 = vperm.xlu0 %3989, %v3706_v26   ;;  %v3724_v19 = vld [vmem:[%s5686_s1 + $0x5e] ss:$0 sm:$0xff]  ;;  %v3735_v26 = vld [vmem:[%s5686_s1 + $0x61] ss:$0 sm:$0xff] }
 0x2b1   : > { %1416 = vperm.xlu1 %3990, %v3709_v43   ;;  %1412 = vperm.xlu0 %3989, %v3708_v20   ;;  %v3734_v43 = vld [vmem:[%s5686_s1 + $0x60] ss:$0 sm:$0xff]  ;;  %v3737_v20 = vld [vmem:[%s5686_s1 + $0x63] ss:$0 sm:$0xff] }
 0x2b5   : > { %1489 = vperm.xlu1 %3990, %v3719_v21   ;;  %1485 = vperm.xlu0 %3989, %v3718_v16   ;;  %v3736_v21 = vld [vmem:[%s5686_s1 + $0x62] ss:$0 sm:$0xff]  ;;  %v3739_v16 = vld [vmem:[%s5686_s1 + $0x65] ss:$0 sm:$0xff] }
 0x2b9   : > { %1497 = vperm.xlu1 %3990, %v3721_v9   ;;  %1493 = vperm.xlu0 %3989, %v3720_v22   ;;  %v3738_v9 = vld [vmem:[%s5686_s1 + $0x64] ss:$0 sm:$0xff]  ;;  %v3741_v22 = vld [vmem:[%s5686_s1 + $0x67] ss:$0 sm:$0xff] }
 0x2bd   : > { %1505 = vperm.xlu1 %3990, %v3723_v25   ;;  %1501 = vperm.xlu0 %3989, %v3722_v17   ;;  %v3740_v25 = vld [vmem:[%s5686_s1 + $0x66] ss:$0 sm:$0xff] }
 0x2c1   : > { %1513 = vperm.xlu1 %3990, %v3725_v18   ;;  %1509 = vperm.xlu0 %3989, %v3724_v19  }
 0x2c5   : > { %1586 = vperm.xlu1 %3990, %v3735_v26   ;;  %1582 = vperm.xlu0 %3989, %v3734_v43  }
 0x2c9   : > { %1594 = vperm.xlu1 %3990, %v3737_v20   ;;  %1590 = vperm.xlu0 %3989, %v3736_v21  }
 0x2cd   : > { %1602 = vperm.xlu1 %3990, %v3739_v16   ;;  %1598 = vperm.xlu0 %3989, %v3738_v9  }
 0x2d1   : > { %1610 = vperm.xlu1 %3990, %v3741_v22   ;;  %1606 = vperm.xlu0 %3989, %v3740_v25  }
 0x2f7   : > { %v4592_v17 = vpop.permute.xlu1 %1208  ;;  %v4594_v18 = vpop.permute.xlu0 %1206 }
 0x2f8   : > { %5716 = vst [vmem:[#allocation21_spill] sm:$0xff] %v4592_v17  ;;  %5717 = vst [vmem:[#allocation22_spill] sm:$0xff] %v4594_v18 }
 0x2fb   : > { %v4596_v19 = vpop.permute.xlu1 %1212  ;;  %v4598_v26 = vpop.permute.xlu0 %1210 }
 0x2fc   : > { %5718 = vst [vmem:[#allocation23_spill] sm:$0xff] %v4596_v19  ;;  %5719 = vst [vmem:[#allocation24_spill] sm:$0xff] %v4598_v26 }
 0x2ff   : > { %v4600_v43 = vpop.permute.xlu1 %1216  ;;  %v4602_v20 = vpop.permute.xlu0 %1214 }
 0x300   : > { %5720 = vst [vmem:[#allocation25_spill] sm:$0xff] %v4600_v43  ;;  %5721 = vst [vmem:[#allocation26_spill] sm:$0xff] %v4602_v20 }
 0x303   : > { %v4604_v21 = vpop.permute.xlu1 %1220  ;;  %v4606_v16 = vpop.permute.xlu0 %1218 }
 0x304   : > { %5722 = vst [vmem:[#allocation27_spill] sm:$0xff] %v4604_v21  ;;  %5723 = vst [vmem:[#allocation28_spill] sm:$0xff] %v4606_v16 }
 0x310   : > { %v4608_v9 = vpop.permute.xlu1 %1295  ;;  %v4610_v22 = vpop.permute.xlu0 %1291 }
 0x311   : > { %5724 = vst [vmem:[#allocation29_spill] sm:$0xff] %v4608_v9  ;;  %5725 = vst [vmem:[#allocation30_spill] sm:$0xff] %v4610_v22 }
 0x314   : > { %v4612_v25 = vpop.permute.xlu1 %1303  ;;  %v4614_v17 = vpop.permute.xlu0 %1299 }
 0x315   : > { %5726 = vst [vmem:[#allocation31_spill] sm:$0xff] %v4612_v25  ;;  %5727 = vst [vmem:[#allocation32_spill] sm:$0xff] %v4614_v17 }
 0x318   : > { %v4616_v18 = vpop.permute.xlu1 %1311  ;;  %v4618_v19 = vpop.permute.xlu0 %1307 }
 0x319   : > { %5728 = vst [vmem:[#allocation33_spill] sm:$0xff] %v4616_v18  ;;  %5729 = vst [vmem:[#allocation34_spill] sm:$0xff] %v4618_v19 }
 0x31c   : > { %v4620_v26 = vpop.permute.xlu1 %1319  ;;  %v4622_v43 = vpop.permute.xlu0 %1315 }
 0x31d   : > { %5730 = vst [vmem:[#allocation35_spill] sm:$0xff] %v4620_v26  ;;  %5731 = vst [vmem:[#allocation36_spill] sm:$0xff] %v4622_v43 }
 0x320   : > { %v4624_v20 = vpop.permute.xlu1 %1392  ;;  %v4626_v16 = vpop.permute.xlu0 %1388 }
 0x321   : > { %5732 = vst [vmem:[#allocation37_spill] sm:$0xff] %v4624_v20  ;;  %5733 = vst [vmem:[#allocation38_spill] sm:$0xff] %v4626_v16 }
 0x324   : > { %v4628_v21 = vpop.permute.xlu1 %1400  ;;  %v4630_v22 = vpop.permute.xlu0 %1396 }
 0x325   : > { %5734 = vst [vmem:[#allocation39_spill] sm:$0xff] %v4628_v21  ;;  %5735 = vst [vmem:[#allocation40_spill] sm:$0xff] %v4630_v22 }
 0x328   : > { %v4632_v25 = vpop.permute.xlu1 %1408  ;;  %v4634_v17 = vpop.permute.xlu0 %1404 }
 0x329   : > { %5736 = vst [vmem:[#allocation41_spill] sm:$0xff] %v4632_v25  ;;  %5737 = vst [vmem:[#allocation42_spill] sm:$0xff] %v4634_v17  ;;  %v4657_v17 = vld [vmem:[%s4237_s11 + $0x1] sm:$0xff] }
 0x32c   : > { %v4636_v18 = vpop.permute.xlu1 %1416  ;;  %v4638_v19 = vpop.permute.xlu0 %1412 }
 0x32d   : > { %5738 = vst [vmem:[#allocation43_spill] sm:$0xff] %v4636_v18  ;;  %5739 = vst [vmem:[#allocation44_spill] sm:$0xff] %v4638_v19 }
 0x330   : > { %v4640_v26 = vpop.permute.xlu1 %1489  ;;  %v4642_v43 = vpop.permute.xlu0 %1485 }
 0x331   : > { %5740 = vst [vmem:[#allocation45_spill] sm:$0xff] %v4640_v26  ;;  %5741 = vst [vmem:[#allocation46_spill] sm:$0xff] %v4642_v43 }
 0x334   : > { %v4644_v20 = vpop.permute.xlu1 %1497  ;;  %v4646_v9 = vpop.permute.xlu0 %1493 }
 0x335   : > { %5742 = vst [vmem:[#allocation47_spill] sm:$0xff] %v4644_v20  ;;  %5743 = vst [vmem:[#allocation48_spill] sm:$0xff] %v4646_v9 }
 0x338   : > { %v4648_v16 = vpop.permute.xlu1 %1505  ;;  %v4650_v21 = vpop.permute.xlu0 %1501 }
 0x339   : > { %5744 = vst [vmem:[#allocation49_spill] sm:$0xff] %v4648_v16  ;;  %5745 = vst [vmem:[#allocation50_spill] sm:$0xff] %v4650_v21 }
 0x33c   : > { %v4652_v22 = vpop.permute.xlu1 %1513  ;;  %v4654_v25 = vpop.permute.xlu0 %1509 }
 0x33d   : > { %5746 = vst [vmem:[#allocation51_spill] sm:$0xff] %v4652_v22  ;;  %5747 = vst [vmem:[#allocation52_spill] sm:$0xff] %v4654_v25 }
 0x340   : > { %v1587_v18 = vpop.permute.xlu1 %1586  ;;  %v1583_v19 = vpop.permute.xlu0 %1582 }
 0x341   : > { %v1614_v26 = vmul.f32 %v1587_v18, %v4657_v17  ;;  %v1613_v43 = vmul.f32 %v1583_v19, %v4657_v17 }
 0x343   : > { %1631 = vrot.lane.b32.xlu1 %v1614_v26, %s4005_s14  ;;  %1629 = vrot.lane.b32.xlu0 %v1613_v43, %s4005_s14 }
 0x344   : > { %v1595_v9 = vpop.permute.xlu1 %1594  ;;  %v1591_v16 = vpop.permute.xlu0 %1590 }
 0x345   : > { %v1616_v21 = vmul.f32 %v1595_v9, %v4657_v17  ;;  %v1615_v22 = vmul.f32 %v1591_v16, %v4657_v17 }
 0x347   : > { %1635 = vrot.lane.b32.xlu1 %v1616_v21, %s4005_s14  ;;  %1633 = vrot.lane.b32.xlu0 %v1615_v22, %s4005_s14  ;;  %v3751_v21 = vld [vmem:[%s5686_s1 + $0x69] ss:$0 sm:$0xff]  ;;  %v3753_v22 = vld [vmem:[%s5686_s1 + $0x6b] ss:$0 sm:$0xff] }
 0x348   : > { %v1603_v25 = vpop.permute.xlu1 %1602  ;;  %v1599_v20 = vpop.permute.xlu0 %1598 }
 0x349   : > { %v1618_v18 = vmul.f32 %v1603_v25, %v4657_v17  ;;  %v1617_v19 = vmul.f32 %v1599_v20, %v4657_v17  ;;  %v3750_v20 = vld [vmem:[%s5686_s1 + $0x68] ss:$0 sm:$0xff]  ;;  %v3752_v25 = vld [vmem:[%s5686_s1 + $0x6a] ss:$0 sm:$0xff] }
 0x34b   : > { %1639 = vrot.lane.b32.xlu1 %v1618_v18, %s4005_s14  ;;  %1637 = vrot.lane.b32.xlu0 %v1617_v19, %s4005_s14  ;;  %v3755_v18 = vld [vmem:[%s5686_s1 + $0x6d] ss:$0 sm:$0xff]  ;;  %v3754_v19 = vld [vmem:[%s5686_s1 + $0x6c] ss:$0 sm:$0xff] }
 0x34c   : > { %v1611_v26 = vpop.permute.xlu1 %1610  ;;  %v1607_v43 = vpop.permute.xlu0 %1606 }
 0x34d   : > { %v1620_v9 = vmul.f32 %v1611_v26, %v4657_v17  ;;  %v1619_v16 = vmul.f32 %v1607_v43, %v4657_v17  ;;  %v3757_v26 = vld [vmem:[%s5686_s1 + $0x6f] ss:$0 sm:$0xff]  ;;  %v3756_v43 = vld [vmem:[%s5686_s1 + $0x6e] ss:$0 sm:$0xff] }
 0x34f   : > { %1643 = vrot.lane.b32.xlu1 %v1620_v9, %s4005_s14  ;;  %1641 = vrot.lane.b32.xlu0 %v1619_v16, %s4005_s14 }
 0x353   : > { %1715 = vperm.xlu1 %3990, %v3751_v21   ;;  %1711 = vperm.xlu0 %3989, %v3750_v20  }
 0x357   : > { %1723 = vperm.xlu1 %3990, %v3753_v22   ;;  %1719 = vperm.xlu0 %3989, %v3752_v25  }
 0x35b   : > { %1731 = vperm.xlu1 %3990, %v3755_v18   ;;  %1727 = vperm.xlu0 %3989, %v3754_v19  }
 0x35f   : > { %1739 = vperm.xlu1 %3990, %v3757_v26   ;;  %1735 = vperm.xlu0 %3989, %v3756_v43  }
 0x3b5   : > { %v4699_v9 = vpop.permute.xlu1 %1631  ;;  %v4701_v16 = vpop.permute.xlu0 %1629 }
 0x3b6   : > { %5748 = vst [vmem:[#allocation53_spill] sm:$0xff] %v4699_v9  ;;  %5749 = vst [vmem:[#allocation54_spill] sm:$0xff] %v4701_v16 }
 0x3b9   : > { %v4703_v21 = vpop.permute.xlu1 %1635  ;;  %v4705_v20 = vpop.permute.xlu0 %1633 }
 0x3ba   : > { %5750 = vst [vmem:[#allocation55_spill] sm:$0xff] %v4703_v21  ;;  %5751 = vst [vmem:[#allocation56_spill] sm:$0xff] %v4705_v20 }
 0x3bd   : > { %v4707_v22 = vpop.permute.xlu1 %1639  ;;  %v4709_v25 = vpop.permute.xlu0 %1637 }
 0x3be   : > { %5752 = vst [vmem:[#allocation57_spill] sm:$0xff] %v4707_v22  ;;  %5753 = vst [vmem:[#allocation58_spill] sm:$0xff] %v4709_v25 }
 0x3c1   : > { %v4711_v18 = vpop.permute.xlu1 %1643  ;;  %v4713_v19 = vpop.permute.xlu0 %1641 }
 0x3c2   : > { %5754 = vst [vmem:[#allocation59_spill] sm:$0xff] %v4711_v18  ;;  %5755 = vst [vmem:[#allocation60_spill] sm:$0xff] %v4713_v19 }
 0x3ce   : > { %v1716_v26 = vpop.permute.xlu1 %1715  ;;  %v1712_v43 = vpop.permute.xlu0 %1711 }
 0x3cf   : > { %v1743_v9 = vmul.f32 %v1716_v26, %v4716_v24  ;;  %v1742_v16 = vmul.f32 %v1712_v43, %v4716_v24 }
 0x3d1   : > { %1760 = vrot.lane.b32.xlu1 %v1743_v9, %s4005_s14  ;;  %1758 = vrot.lane.b32.xlu0 %v1742_v16, %s4005_s14 }
 0x3d2   : > { %v1724_v20 = vpop.permute.xlu1 %1723  ;;  %v1720_v22 = vpop.permute.xlu0 %1719 }
 0x3d3   : > { %v1745_v25 = vmul.f32 %v1724_v20, %v4716_v24  ;;  %v1744_v18 = vmul.f32 %v1720_v22, %v4716_v24 }
 0x3d5   : > { %1764 = vrot.lane.b32.xlu1 %v1745_v25, %s4005_s14  ;;  %1762 = vrot.lane.b32.xlu0 %v1744_v18, %s4005_s14  ;;  %v3767_v25 = vld [vmem:[%s5686_s1 + $0x71] ss:$0 sm:$0xff]  ;;  %v3769_v18 = vld [vmem:[%s5686_s1 + $0x73] ss:$0 sm:$0xff] }
 0x3d6   : > { %v1732_v19 = vpop.permute.xlu1 %1731  ;;  %v1728_v21 = vpop.permute.xlu0 %1727 }
 0x3d7   : > { %v1747_v26 = vmul.f32 %v1732_v19, %v4716_v24  ;;  %v1746_v43 = vmul.f32 %v1728_v21, %v4716_v24  ;;  %v3766_v21 = vld [vmem:[%s5686_s1 + $0x70] ss:$0 sm:$0xff]  ;;  %v3768_v19 = vld [vmem:[%s5686_s1 + $0x72] ss:$0 sm:$0xff] }
 0x3d9   : > { %1768 = vrot.lane.b32.xlu1 %v1747_v26, %s4005_s14  ;;  %1766 = vrot.lane.b32.xlu0 %v1746_v43, %s4005_s14  ;;  %v3771_v26 = vld [vmem:[%s5686_s1 + $0x75] ss:$0 sm:$0xff]  ;;  %v3770_v43 = vld [vmem:[%s5686_s1 + $0x74] ss:$0 sm:$0xff] }
 0x3da   : > { %v1740_v9 = vpop.permute.xlu1 %1739  ;;  %v1736_v16 = vpop.permute.xlu0 %1735 }
 0x3db   : > { %v1749_v20 = vmul.f32 %v1740_v9, %v4716_v24  ;;  %v1748_v22 = vmul.f32 %v1736_v16, %v4716_v24  ;;  %v3773_v9 = vld [vmem:[%s5686_s1 + $0x77] ss:$0 sm:$0xff]  ;;  %v3772_v16 = vld [vmem:[%s5686_s1 + $0x76] ss:$0 sm:$0xff] }
 0x3dd   : > { %1772 = vrot.lane.b32.xlu1 %v1749_v20, %s4005_s14  ;;  %1770 = vrot.lane.b32.xlu0 %v1748_v22, %s4005_s14 }
 0x3e1   : > { %1844 = vperm.xlu1 %3990, %v3767_v25   ;;  %1840 = vperm.xlu0 %3989, %v3766_v21  }
 0x3e5   : > { %1852 = vperm.xlu1 %3990, %v3769_v18   ;;  %1848 = vperm.xlu0 %3989, %v3768_v19  }
 0x3e9   : > { %1860 = vperm.xlu1 %3990, %v3771_v26   ;;  %1856 = vperm.xlu0 %3989, %v3770_v43  }
 0x3ed   : > { %1868 = vperm.xlu1 %3990, %v3773_v9   ;;  %1864 = vperm.xlu0 %3989, %v3772_v16  }
 0x443   : > { %v4758_v20 = vpop.permute.xlu1 %1760  ;;  %v4760_v22 = vpop.permute.xlu0 %1758 }
 0x444   : > { %5757 = vst [vmem:[#allocation62_spill] sm:$0xff] %v4758_v20  ;;  %5758 = vst [vmem:[#allocation63_spill] sm:$0xff] %v4760_v22 }
 0x447   : > { %v4762_v25 = vpop.permute.xlu1 %1764  ;;  %v4764_v21 = vpop.permute.xlu0 %1762 }
 0x448   : > { %5759 = vst [vmem:[#allocation64_spill] sm:$0xff] %v4762_v25  ;;  %5760 = vst [vmem:[#allocation65_spill] sm:$0xff] %v4764_v21 }
 0x44b   : > { %v4766_v18 = vpop.permute.xlu1 %1768  ;;  %v4768_v19 = vpop.permute.xlu0 %1766 }
 0x44c   : > { %5761 = vst [vmem:[#allocation66_spill] sm:$0xff] %v4766_v18  ;;  %5762 = vst [vmem:[#allocation67_spill] sm:$0xff] %v4768_v19 }
 0x44f   : > { %v4770_v26 = vpop.permute.xlu1 %1772  ;;  %v4772_v43 = vpop.permute.xlu0 %1770 }
 0x450   : > { %5763 = vst [vmem:[#allocation68_spill] sm:$0xff] %v4770_v26  ;;  %5764 = vst [vmem:[#allocation69_spill] sm:$0xff] %v4772_v43 }
 0x45c   : > { %v1845_v9 = vpop.permute.xlu1 %1844  ;;  %v1841_v16 = vpop.permute.xlu0 %1840 }
 0x45d   : > { %v1872_v20 = vmul.f32 %v1845_v9, %v4775_v23  ;;  %v1871_v22 = vmul.f32 %v1841_v16, %v4775_v23 }
 0x45f   : > { %1889 = vrot.lane.b32.xlu1 %v1872_v20, %s4005_s14  ;;  %1887 = vrot.lane.b32.xlu0 %v1871_v22, %s4005_s14 }
 0x460   : > { %v1853_v21 = vpop.permute.xlu1 %1852  ;;  %v1849_v18 = vpop.permute.xlu0 %1848 }
 0x461   : > { %v1874_v19 = vmul.f32 %v1853_v21, %v4775_v23  ;;  %v1873_v26 = vmul.f32 %v1849_v18, %v4775_v23 }
 0x463   : > { %1893 = vrot.lane.b32.xlu1 %v1874_v19, %s4005_s14  ;;  %1891 = vrot.lane.b32.xlu0 %v1873_v26, %s4005_s14  ;;  %v3783_v19 = vld [vmem:[%s5686_s1 + $0x79] ss:$0 sm:$0xff]  ;;  %v3785_v26 = vld [vmem:[%s5686_s1 + $0x7b] ss:$0 sm:$0xff] }
 0x464   : > { %v1861_v43 = vpop.permute.xlu1 %1860  ;;  %v1857_v25 = vpop.permute.xlu0 %1856 }
 0x465   : > { %v1876_v9 = vmul.f32 %v1861_v43, %v4775_v23  ;;  %v1875_v16 = vmul.f32 %v1857_v25, %v4775_v23  ;;  %v3782_v25 = vld [vmem:[%s5686_s1 + $0x78] ss:$0 sm:$0xff]  ;;  %v3784_v43 = vld [vmem:[%s5686_s1 + $0x7a] ss:$0 sm:$0xff] }
 0x467   : > { %1897 = vrot.lane.b32.xlu1 %v1876_v9, %s4005_s14  ;;  %1895 = vrot.lane.b32.xlu0 %v1875_v16, %s4005_s14  ;;  %v3787_v9 = vld [vmem:[%s5686_s1 + $0x7d] ss:$0 sm:$0xff]  ;;  %v3786_v16 = vld [vmem:[%s5686_s1 + $0x7c] ss:$0 sm:$0xff] }
 0x468   : > { %v1869_v20 = vpop.permute.xlu1 %1868  ;;  %v1865_v22 = vpop.permute.xlu0 %1864 }
 0x469   : > { %v1878_v21 = vmul.f32 %v1869_v20, %v4775_v23  ;;  %v1877_v18 = vmul.f32 %v1865_v22, %v4775_v23  ;;  %v3789_v20 = vld [vmem:[%s5686_s1 + $0x7f] ss:$0 sm:$0xff]  ;;  %v3788_v22 = vld [vmem:[%s5686_s1 + $0x7e] ss:$0 sm:$0xff] }
 0x46b   : > { %1901 = vrot.lane.b32.xlu1 %v1878_v21, %s4005_s14  ;;  %1899 = vrot.lane.b32.xlu0 %v1877_v18, %s4005_s14 }
 0x46f   : > { %1973 = vperm.xlu1 %3990, %v3783_v19   ;;  %1969 = vperm.xlu0 %3989, %v3782_v25  }
 0x473   : > { %1981 = vperm.xlu1 %3990, %v3785_v26   ;;  %1977 = vperm.xlu0 %3989, %v3784_v43  }
 0x477   : > { %1989 = vperm.xlu1 %3990, %v3787_v9   ;;  %1985 = vperm.xlu0 %3989, %v3786_v16  }
 0x47b   : > { %1997 = vperm.xlu1 %3990, %v3789_v20   ;;  %1993 = vperm.xlu0 %3989, %v3788_v22  }
 0x4d1   : > { %v4817_v21 = vpop.permute.xlu1 %1889  ;;  %v4819_v18 = vpop.permute.xlu0 %1887 }
 0x4d2   : > { %5766 = vst [vmem:[#allocation71_spill] sm:$0xff] %v4817_v21  ;;  %5767 = vst [vmem:[#allocation72_spill] sm:$0xff] %v4819_v18 }
 0x4d5   : > { %v4821_v19 = vpop.permute.xlu1 %1893  ;;  %v4823_v25 = vpop.permute.xlu0 %1891 }
 0x4d6   : > { %5768 = vst [vmem:[#allocation73_spill] sm:$0xff] %v4821_v19  ;;  %5769 = vst [vmem:[#allocation74_spill] sm:$0xff] %v4823_v25 }
 0x4d9   : > { %v4825_v26 = vpop.permute.xlu1 %1897  ;;  %v4827_v43 = vpop.permute.xlu0 %1895 }
 0x4da   : > { %5770 = vst [vmem:[#allocation75_spill] sm:$0xff] %v4825_v26  ;;  %5771 = vst [vmem:[#allocation76_spill] sm:$0xff] %v4827_v43 }
 0x4dd   : > { %v4829_v9 = vpop.permute.xlu1 %1901  ;;  %v4831_v16 = vpop.permute.xlu0 %1899 }
 0x4de   : > { %5772 = vst [vmem:[#allocation77_spill] sm:$0xff] %v4829_v9  ;;  %5773 = vst [vmem:[#allocation78_spill] sm:$0xff] %v4831_v16 }
 0x4ea   : > { %v1974_v29 = vpop.permute.xlu1 %1973  ;;  %v1970_v28 = vpop.permute.xlu0 %1969 }
 0x4eb   : > { %v2001_v20 = vmul.f32 %v1974_v29, %v4657_v17  ;;  %v2000_v22 = vmul.f32 %v1970_v28, %v4657_v17 }
 0x4ed   : > { %2018 = vrot.lane.b32.xlu1 %v2001_v20, %s4006_s4  ;;  %2016 = vrot.lane.b32.xlu0 %v2000_v22, %s4006_s4 }
 0x4ee   : > { %v1982_v19 = vpop.permute.xlu1 %1981  ;;  %v1978_v25 = vpop.permute.xlu0 %1977 }
 0x4ef   : > { %v2003_v26 = vmul.f32 %v1982_v19, %v4657_v17  ;;  %v2002_v43 = vmul.f32 %v1978_v25, %v4657_v17 }
 0x4f1   : > { %2022 = vrot.lane.b32.xlu1 %v2003_v26, %s4006_s4  ;;  %2020 = vrot.lane.b32.xlu0 %v2002_v43, %s4006_s4  ;;  %v3799_v26 = vld [vmem:[%s5686_s1 + $0x81] ss:$0 sm:$0xff]  ;;  %v3798_v43 = vld [vmem:[%s5686_s1 + $0x80] ss:$0 sm:$0xff] }
 0x4f2   : > { %v1990_v16 = vpop.permute.xlu1 %1989  ;;  %v1986_v9 = vpop.permute.xlu0 %1985 }
 0x4f3   : > { %v2005_v29 = vmul.f32 %v1990_v16, %v4657_v17  ;;  %v2004_v28 = vmul.f32 %v1986_v9, %v4657_v17  ;;  %v3801_v9 = vld [vmem:[%s5686_s1 + $0x83] ss:$0 sm:$0xff]  ;;  %v3803_v16 = vld [vmem:[%s5686_s1 + $0x85] ss:$0 sm:$0xff] }
 0x4f5   : > { %2026 = vrot.lane.b32.xlu1 %v2005_v29, %s4006_s4  ;;  %2024 = vrot.lane.b32.xlu0 %v2004_v28, %s4006_s4  ;;  %v3802_v29 = vld [vmem:[%s5686_s1 + $0x84] ss:$0 sm:$0xff]  ;;  %v3805_v28 = vld [vmem:[%s5686_s1 + $0x87] ss:$0 sm:$0xff] }
 0x4f6   : > { %v1998_v20 = vpop.permute.xlu1 %1997  ;;  %v1994_v22 = vpop.permute.xlu0 %1993 }
 0x4f7   : > { %v2007_v19 = vmul.f32 %v1998_v20, %v4657_v17  ;;  %v2006_v25 = vmul.f32 %v1994_v22, %v4657_v17  ;;  %v3800_v17 = vld [vmem:[%s5686_s1 + $0x82] ss:$0 sm:$0xff]  ;;  %v3804_v20 = vld [vmem:[%s5686_s1 + $0x86] ss:$0 sm:$0xff] }
 0x4f9   : > { %2030 = vrot.lane.b32.xlu1 %v2007_v19, %s4006_s4  ;;  %2028 = vrot.lane.b32.xlu0 %v2006_v25, %s4006_s4 }
 0x4fd   : > { %2102 = vperm.xlu1 %3990, %v3799_v26   ;;  %2098 = vperm.xlu0 %3989, %v3798_v43  }
 0x501   : > { %2110 = vperm.xlu1 %3990, %v3801_v9   ;;  %2106 = vperm.xlu0 %3989, %v3800_v17  }
 0x505   : > { %2118 = vperm.xlu1 %3990, %v3803_v16   ;;  %2114 = vperm.xlu0 %3989, %v3802_v29  }
 0x509   : > { %2126 = vperm.xlu1 %3990, %v3805_v28   ;;  %2122 = vperm.xlu0 %3989, %v3804_v20  }
 0x55f   : > { %v4873_v22 = vpop.permute.xlu1 %2018  ;;  %v4875_v19 = vpop.permute.xlu0 %2016 }
 0x560   : > { %5774 = vst [vmem:[#allocation79_spill] sm:$0xff] %v4873_v22  ;;  %5775 = vst [vmem:[#allocation80_spill] sm:$0xff] %v4875_v19 }
 0x563   : > { %v4877_v25 = vpop.permute.xlu1 %2022  ;;  %v4879_v26 = vpop.permute.xlu0 %2020 }
 0x564   : > { %5776 = vst [vmem:[#allocation81_spill] sm:$0xff] %v4877_v25  ;;  %5777 = vst [vmem:[#allocation82_spill] sm:$0xff] %v4879_v26 }
 0x567   : > { %v4881_v43 = vpop.permute.xlu1 %2026  ;;  %v4883_v9 = vpop.permute.xlu0 %2024 }
 0x568   : > { %5778 = vst [vmem:[#allocation83_spill] sm:$0xff] %v4881_v43  ;;  %5779 = vst [vmem:[#allocation84_spill] sm:$0xff] %v4883_v9 }
 0x56b   : > { %v4885_v17 = vpop.permute.xlu1 %2030  ;;  %v4887_v16 = vpop.permute.xlu0 %2028 }
 0x56c   : > { %5780 = vst [vmem:[#allocation85_spill] sm:$0xff] %v4885_v17  ;;  %5781 = vst [vmem:[#allocation86_spill] sm:$0xff] %v4887_v16 }
 0x578   : > { %v2103_v29 = vpop.permute.xlu1 %2102  ;;  %v2099_v18 = vpop.permute.xlu0 %2098 }
 0x579   : > { %v2130_v28 = vmul.f32 %v2103_v29, %v4716_v24  ;;  %v2129_v20 = vmul.f32 %v2099_v18, %v4716_v24 }
 0x57b   : > { %2147 = vrot.lane.b32.xlu1 %v2130_v28, %s4006_s4  ;;  %2145 = vrot.lane.b32.xlu0 %v2129_v20, %s4006_s4 }
 0x57c   : > { %v2111_v25 = vpop.permute.xlu1 %2110  ;;  %v2107_v26 = vpop.permute.xlu0 %2106 }
 0x57d   : > { %v2132_v43 = vmul.f32 %v2111_v25, %v4716_v24  ;;  %v2131_v9 = vmul.f32 %v2107_v26, %v4716_v24 }
 0x57f   : > { %2151 = vrot.lane.b32.xlu1 %v2132_v43, %s4006_s4  ;;  %2149 = vrot.lane.b32.xlu0 %v2131_v9, %s4006_s4  ;;  %v3815_v43 = vld [vmem:[%s5686_s1 + $0x89] ss:$0 sm:$0xff]  ;;  %v3814_v9 = vld [vmem:[%s5686_s1 + $0x88] ss:$0 sm:$0xff] }
 0x580   : > { %v2119_v16 = vpop.permute.xlu1 %2118  ;;  %v2115_v17 = vpop.permute.xlu0 %2114 }
 0x581   : > { %v2134_v29 = vmul.f32 %v2119_v16, %v4716_v24  ;;  %v2133_v18 = vmul.f32 %v2115_v17, %v4716_v24  ;;  %v3817_v17 = vld [vmem:[%s5686_s1 + $0x8b] ss:$0 sm:$0xff]  ;;  %v3816_v16 = vld [vmem:[%s5686_s1 + $0x8a] ss:$0 sm:$0xff] }
 0x583   : > { %2155 = vrot.lane.b32.xlu1 %v2134_v29, %s4006_s4  ;;  %2153 = vrot.lane.b32.xlu0 %v2133_v18, %s4006_s4  ;;  %v3819_v29 = vld [vmem:[%s5686_s1 + $0x8d] ss:$0 sm:$0xff]  ;;  %v3818_v18 = vld [vmem:[%s5686_s1 + $0x8c] ss:$0 sm:$0xff] }
 0x584   : > { %v2127_v28 = vpop.permute.xlu1 %2126  ;;  %v2123_v20 = vpop.permute.xlu0 %2122 }
 0x585   : > { %v2136_v25 = vmul.f32 %v2127_v28, %v4716_v24  ;;  %v2135_v26 = vmul.f32 %v2123_v20, %v4716_v24  ;;  %v3821_v28 = vld [vmem:[%s5686_s1 + $0x8f] ss:$0 sm:$0xff]  ;;  %v3820_v20 = vld [vmem:[%s5686_s1 + $0x8e] ss:$0 sm:$0xff] }
 0x587   : > { %2159 = vrot.lane.b32.xlu1 %v2136_v25, %s4006_s4  ;;  %2157 = vrot.lane.b32.xlu0 %v2135_v26, %s4006_s4 }
 0x58b   : > { %2231 = vperm.xlu1 %3990, %v3815_v43   ;;  %2227 = vperm.xlu0 %3989, %v3814_v9  }
 0x58f   : > { %2239 = vperm.xlu1 %3990, %v3817_v17   ;;  %2235 = vperm.xlu0 %3989, %v3816_v16  }
 0x593   : > { %2247 = vperm.xlu1 %3990, %v3819_v29   ;;  %2243 = vperm.xlu0 %3989, %v3818_v18  }
 0x597   : > { %2255 = vperm.xlu1 %3990, %v3821_v28   ;;  %2251 = vperm.xlu0 %3989, %v3820_v20  }
 0x5ed   : > { %v4929_v25 = vpop.permute.xlu1 %2147  ;;  %v4931_v26 = vpop.permute.xlu0 %2145 }
 0x5ee   : > { %5782 = vst [vmem:[#allocation87_spill] sm:$0xff] %v4929_v25  ;;  %5783 = vst [vmem:[#allocation88_spill] sm:$0xff] %v4931_v26 }
 0x5f1   : > { %v4933_v43 = vpop.permute.xlu1 %2151  ;;  %v4935_v9 = vpop.permute.xlu0 %2149 }
 0x5f2   : > { %5784 = vst [vmem:[#allocation89_spill] sm:$0xff] %v4933_v43  ;;  %5785 = vst [vmem:[#allocation90_spill] sm:$0xff] %v4935_v9 }
 0x5f5   : > { %v4937_v17 = vpop.permute.xlu1 %2155  ;;  %v4939_v16 = vpop.permute.xlu0 %2153 }
 0x5f6   : > { %5786 = vst [vmem:[#allocation91_spill] sm:$0xff] %v4937_v17  ;;  %5787 = vst [vmem:[#allocation92_spill] sm:$0xff] %v4939_v16 }
 0x5f9   : > { %v4941_v29 = vpop.permute.xlu1 %2159  ;;  %v4943_v18 = vpop.permute.xlu0 %2157 }
 0x5fa   : > { %5788 = vst [vmem:[#allocation93_spill] sm:$0xff] %v4941_v29  ;;  %5789 = vst [vmem:[#allocation94_spill] sm:$0xff] %v4943_v18 }
 0x606   : > { %v2232_v19 = vpop.permute.xlu1 %2231  ;;  %v2228_v22 = vpop.permute.xlu0 %2227 }
 0x607   : > { %v2259_v28 = vmul.f32 %v2232_v19, %v4775_v23  ;;  %v2258_v20 = vmul.f32 %v2228_v22, %v4775_v23 }
 0x609   : > { %2276 = vrot.lane.b32.xlu1 %v2259_v28, %s4006_s4  ;;  %2274 = vrot.lane.b32.xlu0 %v2258_v20, %s4006_s4 }
 0x60a   : > { %v2240_v43 = vpop.permute.xlu1 %2239  ;;  %v2236_v9 = vpop.permute.xlu0 %2235 }
 0x60b   : > { %v2261_v17 = vmul.f32 %v2240_v43, %v4775_v23  ;;  %v2260_v16 = vmul.f32 %v2236_v9, %v4775_v23 }
 0x60d   : > { %2280 = vrot.lane.b32.xlu1 %v2261_v17, %s4006_s4  ;;  %2278 = vrot.lane.b32.xlu0 %v2260_v16, %s4006_s4  ;;  %v3831_v17 = vld [vmem:[%s5686_s1 + $0x91] ss:$0 sm:$0xff]  ;;  %v3830_v16 = vld [vmem:[%s5686_s1 + $0x90] ss:$0 sm:$0xff] }
 0x60e   : > { %v2248_v18 = vpop.permute.xlu1 %2247  ;;  %v2244_v29 = vpop.permute.xlu0 %2243 }
 0x60f   : > { %v2263_v19 = vmul.f32 %v2248_v18, %v4775_v23  ;;  %v2262_v22 = vmul.f32 %v2244_v29, %v4775_v23  ;;  %v3833_v29 = vld [vmem:[%s5686_s1 + $0x93] ss:$0 sm:$0xff]  ;;  %v3832_v18 = vld [vmem:[%s5686_s1 + $0x92] ss:$0 sm:$0xff] }
 0x611   : > { %2284 = vrot.lane.b32.xlu1 %v2263_v19, %s4006_s4  ;;  %2282 = vrot.lane.b32.xlu0 %v2262_v22, %s4006_s4  ;;  %v3835_v19 = vld [vmem:[%s5686_s1 + $0x95] ss:$0 sm:$0xff]  ;;  %v3834_v22 = vld [vmem:[%s5686_s1 + $0x94] ss:$0 sm:$0xff] }
 0x612   : > { %v2256_v28 = vpop.permute.xlu1 %2255  ;;  %v2252_v20 = vpop.permute.xlu0 %2251 }
 0x613   : > { %v2265_v43 = vmul.f32 %v2256_v28, %v4775_v23  ;;  %v2264_v9 = vmul.f32 %v2252_v20, %v4775_v23  ;;  %v3837_v28 = vld [vmem:[%s5686_s1 + $0x97] ss:$0 sm:$0xff]  ;;  %v3836_v20 = vld [vmem:[%s5686_s1 + $0x96] ss:$0 sm:$0xff] }
 0x615   : > { %2288 = vrot.lane.b32.xlu1 %v2265_v43, %s4006_s4  ;;  %2286 = vrot.lane.b32.xlu0 %v2264_v9, %s4006_s4  ;;  %v3847_v43 = vld [vmem:[%s5686_s1 + $0x99] ss:$0 sm:$0xff]  ;;  %v3846_v9 = vld [vmem:[%s5686_s1 + $0x98] ss:$0 sm:$0xff] }
 0x619   : > { %2363 = vperm.xlu1 %3990, %v3831_v17   ;;  %2359 = vperm.xlu0 %3989, %v3830_v16   ;;  %v3849_v17 = vld [vmem:[%s5686_s1 + $0x9b] ss:$0 sm:$0xff]  ;;  %v3848_v16 = vld [vmem:[%s5686_s1 + $0x9a] ss:$0 sm:$0xff] }
 0x61d   : > { %2371 = vperm.xlu1 %3990, %v3833_v29   ;;  %2367 = vperm.xlu0 %3989, %v3832_v18   ;;  %v3851_v29 = vld [vmem:[%s5686_s1 + $0x9d] ss:$0 sm:$0xff]  ;;  %v3850_v18 = vld [vmem:[%s5686_s1 + $0x9c] ss:$0 sm:$0xff] }
 0x621   : > { %2379 = vperm.xlu1 %3990, %v3835_v19   ;;  %2375 = vperm.xlu0 %3989, %v3834_v22   ;;  %v3853_v19 = vld [vmem:[%s5686_s1 + $0x9f] ss:$0 sm:$0xff]  ;;  %v3852_v22 = vld [vmem:[%s5686_s1 + $0x9e] ss:$0 sm:$0xff] }
 0x625   : > { %2387 = vperm.xlu1 %3990, %v3837_v28   ;;  %2383 = vperm.xlu0 %3989, %v3836_v20   ;;  %v3863_v28 = vld [vmem:[%s5686_s1 + $0xa1] ss:$0 sm:$0xff]  ;;  %v3862_v20 = vld [vmem:[%s5686_s1 + $0xa0] ss:$0 sm:$0xff] }
 0x629   : > { %2460 = vperm.xlu1 %3990, %v3847_v43   ;;  %2456 = vperm.xlu0 %3989, %v3846_v9   ;;  %v3865_v43 = vld [vmem:[%s5686_s1 + $0xa3] ss:$0 sm:$0xff]  ;;  %v3864_v9 = vld [vmem:[%s5686_s1 + $0xa2] ss:$0 sm:$0xff] }
 0x62d   : > { %2468 = vperm.xlu1 %3990, %v3849_v17   ;;  %2464 = vperm.xlu0 %3989, %v3848_v16   ;;  %v3867_v17 = vld [vmem:[%s5686_s1 + $0xa5] ss:$0 sm:$0xff]  ;;  %v3866_v16 = vld [vmem:[%s5686_s1 + $0xa4] ss:$0 sm:$0xff] }
 0x631   : > { %2476 = vperm.xlu1 %3990, %v3851_v29   ;;  %2472 = vperm.xlu0 %3989, %v3850_v18   ;;  %v3869_v29 = vld [vmem:[%s5686_s1 + $0xa7] ss:$0 sm:$0xff]  ;;  %v3868_v18 = vld [vmem:[%s5686_s1 + $0xa6] ss:$0 sm:$0xff] }
 0x635   : > { %2484 = vperm.xlu1 %3990, %v3853_v19   ;;  %2480 = vperm.xlu0 %3989, %v3852_v22   ;;  %v3879_v19 = vld [vmem:[%s5686_s1 + $0xa9] ss:$0 sm:$0xff]  ;;  %v3878_v22 = vld [vmem:[%s5686_s1 + $0xa8] ss:$0 sm:$0xff] }
 0x639   : > { %2557 = vperm.xlu1 %3990, %v3863_v28   ;;  %2553 = vperm.xlu0 %3989, %v3862_v20   ;;  %v3881_v28 = vld [vmem:[%s5686_s1 + $0xab] ss:$0 sm:$0xff]  ;;  %v3880_v20 = vld [vmem:[%s5686_s1 + $0xaa] ss:$0 sm:$0xff] }
 0x63d   : > { %2565 = vperm.xlu1 %3990, %v3865_v43   ;;  %2561 = vperm.xlu0 %3989, %v3864_v9   ;;  %v3883_v43 = vld [vmem:[%s5686_s1 + $0xad] ss:$0 sm:$0xff]  ;;  %v3882_v9 = vld [vmem:[%s5686_s1 + $0xac] ss:$0 sm:$0xff] }
 0x641   : > { %2573 = vperm.xlu1 %3990, %v3867_v17   ;;  %2569 = vperm.xlu0 %3989, %v3866_v16   ;;  %v3885_v17 = vld [vmem:[%s5686_s1 + $0xaf] ss:$0 sm:$0xff]  ;;  %v3884_v16 = vld [vmem:[%s5686_s1 + $0xae] ss:$0 sm:$0xff] }
 0x645   : > { %2581 = vperm.xlu1 %3990, %v3869_v29   ;;  %2577 = vperm.xlu0 %3989, %v3868_v18  }
 0x649   : > { %2654 = vperm.xlu1 %3990, %v3879_v19   ;;  %2650 = vperm.xlu0 %3989, %v3878_v22  }
 0x64d   : > { %2662 = vperm.xlu1 %3990, %v3881_v28   ;;  %2658 = vperm.xlu0 %3989, %v3880_v20  }
 0x651   : > { %2670 = vperm.xlu1 %3990, %v3883_v43   ;;  %2666 = vperm.xlu0 %3989, %v3882_v9  }
 0x655   : > { %2678 = vperm.xlu1 %3990, %v3885_v17   ;;  %2674 = vperm.xlu0 %3989, %v3884_v16  }
 0x67b   : > { %v5057_v29 = vpop.permute.xlu1 %2276  ;;  %v5059_v18 = vpop.permute.xlu0 %2274 }
 0x67c   : > { %5790 = vst [vmem:[#allocation95_spill] sm:$0xff] %v5057_v29  ;;  %5791 = vst [vmem:[#allocation96_spill] sm:$0xff] %v5059_v18 }
 0x67f   : > { %v5061_v19 = vpop.permute.xlu1 %2280  ;;  %v5063_v22 = vpop.permute.xlu0 %2278 }
 0x680   : > { %5792 = vst [vmem:[#allocation97_spill] sm:$0xff] %v5061_v19  ;;  %5793 = vst [vmem:[#allocation98_spill] sm:$0xff] %v5063_v22 }
 0x683   : > { %v5065_v28 = vpop.permute.xlu1 %2284  ;;  %v5067_v20 = vpop.permute.xlu0 %2282 }
 0x684   : > { %5794 = vst [vmem:[#allocation99_spill] sm:$0xff] %v5065_v28  ;;  %5795 = vst [vmem:[#allocation100_spill] sm:$0xff] %v5067_v20 }
 0x687   : > { %v5069_v43 = vpop.permute.xlu1 %2288  ;;  %v5071_v9 = vpop.permute.xlu0 %2286 }
 0x688   : > { %5796 = vst [vmem:[#allocation101_spill] sm:$0xff] %v5069_v43  ;;  %5797 = vst [vmem:[#allocation102_spill] sm:$0xff] %v5071_v9 }
 0x694   : > { %v5073_v26 = vpop.permute.xlu1 %2363  ;;  %v5075_v17 = vpop.permute.xlu0 %2359 }
 0x695   : > { %5798 = vst [vmem:[#allocation103_spill] sm:$0xff] %v5073_v26  ;;  %5799 = vst [vmem:[#allocation104_spill] sm:$0xff] %v5075_v17 }
 0x698   : > { %v5077_v16 = vpop.permute.xlu1 %2371  ;;  %v5079_v29 = vpop.permute.xlu0 %2367 }
 0x699   : > { %5800 = vst [vmem:[#allocation105_spill] sm:$0xff] %v5077_v16  ;;  %5801 = vst [vmem:[#allocation106_spill] sm:$0xff] %v5079_v29 }
 0x69c   : > { %v5081_v18 = vpop.permute.xlu1 %2379  ;;  %v5083_v19 = vpop.permute.xlu0 %2375 }
 0x69d   : > { %5802 = vst [vmem:[#allocation107_spill] sm:$0xff] %v5081_v18  ;;  %5803 = vst [vmem:[#allocation108_spill] sm:$0xff] %v5083_v19 }
 0x6a0   : > { %v5085_v22 = vpop.permute.xlu1 %2387  ;;  %v5087_v28 = vpop.permute.xlu0 %2383 }
 0x6a1   : > { %5804 = vst [vmem:[#allocation109_spill] sm:$0xff] %v5085_v22  ;;  %5805 = vst [vmem:[#allocation110_spill] sm:$0xff] %v5087_v28 }
 0x6a4   : > { %v5089_v20 = vpop.permute.xlu1 %2460  ;;  %v5091_v9 = vpop.permute.xlu0 %2456 }
 0x6a5   : > { %5806 = vst [vmem:[#allocation111_spill] sm:$0xff] %v5089_v20  ;;  %5807 = vst [vmem:[#allocation112_spill] sm:$0xff] %v5091_v9 }
 0x6a8   : > { %v5093_v43 = vpop.permute.xlu1 %2468  ;;  %v5095_v17 = vpop.permute.xlu0 %2464 }
 0x6a9   : > { %5808 = vst [vmem:[#allocation113_spill] sm:$0xff] %v5093_v43  ;;  %5809 = vst [vmem:[#allocation114_spill] sm:$0xff] %v5095_v17 }
 0x6ac   : > { %v5097_v16 = vpop.permute.xlu1 %2476  ;;  %v5099_v29 = vpop.permute.xlu0 %2472 }
 0x6ad   : > { %5810 = vst [vmem:[#allocation115_spill] sm:$0xff] %v5097_v16  ;;  %5811 = vst [vmem:[#allocation116_spill] sm:$0xff] %v5099_v29  ;;  %v5122_v29 = vld [vmem:[%s4237_s11 + $0x2] sm:$0xff] }
 0x6ae   : > { %5822 = vst [vmem:[#allocation127_spill] sm:$0xff] %v5122_v29 }
 0x6b0   : > { %v5101_v18 = vpop.permute.xlu1 %2484  ;;  %v5103_v19 = vpop.permute.xlu0 %2480 }
 0x6b1   : > { %5812 = vst [vmem:[#allocation117_spill] sm:$0xff] %v5101_v18  ;;  %5813 = vst [vmem:[#allocation118_spill] sm:$0xff] %v5103_v19 }
 0x6b4   : > { %v5105_v22 = vpop.permute.xlu1 %2557  ;;  %v5107_v28 = vpop.permute.xlu0 %2553 }
 0x6b5   : > { %5814 = vst [vmem:[#allocation119_spill] sm:$0xff] %v5105_v22  ;;  %5815 = vst [vmem:[#allocation120_spill] sm:$0xff] %v5107_v28 }
 0x6b8   : > { %v5109_v20 = vpop.permute.xlu1 %2565  ;;  %v5111_v26 = vpop.permute.xlu0 %2561 }
 0x6b9   : > { %5816 = vst [vmem:[#allocation121_spill] sm:$0xff] %v5109_v20  ;;  %5817 = vst [vmem:[#allocation122_spill] sm:$0xff] %v5111_v26 }
 0x6bc   : > { %v5113_v9 = vpop.permute.xlu1 %2573  ;;  %v5115_v43 = vpop.permute.xlu0 %2569 }
 0x6bd   : > { %5818 = vst [vmem:[#allocation123_spill] sm:$0xff] %v5113_v9  ;;  %5819 = vst [vmem:[#allocation124_spill] sm:$0xff] %v5115_v43 }
 0x6c0   : > { %v5117_v17 = vpop.permute.xlu1 %2581  ;;  %v5119_v16 = vpop.permute.xlu0 %2577 }
 0x6c1   : > { %5820 = vst [vmem:[#allocation125_spill] sm:$0xff] %v5117_v17  ;;  %5821 = vst [vmem:[#allocation126_spill] sm:$0xff] %v5119_v16 }
 0x6c4   : > { %v2655_v18 = vpop.permute.xlu1 %2654  ;;  %v2651_v19 = vpop.permute.xlu0 %2650 }
 0x6c5   : > { %v2682_v22 = vmul.f32 %v2655_v18, %v5122_v29  ;;  %v2681_v28 = vmul.f32 %v2651_v19, %v5122_v29 }
 0x6c7   : > { %2699 = vrot.lane.b32.xlu1 %v2682_v22, %s4005_s14  ;;  %2697 = vrot.lane.b32.xlu0 %v2681_v28, %s4005_s14 }
 0x6c8   : > { %v2663_v26 = vpop.permute.xlu1 %2662  ;;  %v2659_v9 = vpop.permute.xlu0 %2658 }
 0x6c9   : > { %v2684_v43 = vmul.f32 %v2663_v26, %v5122_v29  ;;  %v2683_v17 = vmul.f32 %v2659_v9, %v5122_v29 }
 0x6cb   : > { %2703 = vrot.lane.b32.xlu1 %v2684_v43, %s4005_s14  ;;  %2701 = vrot.lane.b32.xlu0 %v2683_v17, %s4005_s14  ;;  %v3895_v43 = vld [vmem:[%s5686_s1 + $0xb1] ss:$0 sm:$0xff]  ;;  %v3897_v17 = vld [vmem:[%s5686_s1 + $0xb3] ss:$0 sm:$0xff] }
 0x6cc   : > { %v2671_v16 = vpop.permute.xlu1 %2670  ;;  %v2667_v20 = vpop.permute.xlu0 %2666 }
 0x6cd   : > { %v2686_v18 = vmul.f32 %v2671_v16, %v5122_v29  ;;  %v2685_v19 = vmul.f32 %v2667_v20, %v5122_v29  ;;  %v3894_v20 = vld [vmem:[%s5686_s1 + $0xb0] ss:$0 sm:$0xff]  ;;  %v3896_v16 = vld [vmem:[%s5686_s1 + $0xb2] ss:$0 sm:$0xff] }
 0x6cf   : > { %2707 = vrot.lane.b32.xlu1 %v2686_v18, %s4005_s14  ;;  %2705 = vrot.lane.b32.xlu0 %v2685_v19, %s4005_s14  ;;  %v3899_v18 = vld [vmem:[%s5686_s1 + $0xb5] ss:$0 sm:$0xff]  ;;  %v3898_v19 = vld [vmem:[%s5686_s1 + $0xb4] ss:$0 sm:$0xff] }
 0x6d0   : > { %v2679_v22 = vpop.permute.xlu1 %2678  ;;  %v2675_v28 = vpop.permute.xlu0 %2674 }
 0x6d1   : > { %v2688_v26 = vmul.f32 %v2679_v22, %v5122_v29  ;;  %v2687_v9 = vmul.f32 %v2675_v28, %v5122_v29  ;;  %v3901_v22 = vld [vmem:[%s5686_s1 + $0xb7] ss:$0 sm:$0xff]  ;;  %v3900_v28 = vld [vmem:[%s5686_s1 + $0xb6] ss:$0 sm:$0xff] }
 0x6d2   : > { %v5181_v29 = vld [vmem:[%s4237_s11 + $0x12] sm:$0xff] }
 0x6d3   : > { %2711 = vrot.lane.b32.xlu1 %v2688_v26, %s4005_s14  ;;  %2709 = vrot.lane.b32.xlu0 %v2687_v9, %s4005_s14  ;;  %5831 = vst [vmem:[#allocation136_spill] sm:$0xff] %v5181_v29 }
 0x6d7   : > { %2783 = vperm.xlu1 %3990, %v3895_v43   ;;  %2779 = vperm.xlu0 %3989, %v3894_v20  }
 0x6db   : > { %2791 = vperm.xlu1 %3990, %v3897_v17   ;;  %2787 = vperm.xlu0 %3989, %v3896_v16  }
 0x6df   : > { %2799 = vperm.xlu1 %3990, %v3899_v18   ;;  %2795 = vperm.xlu0 %3989, %v3898_v19  }
 0x6e3   : > { %2807 = vperm.xlu1 %3990, %v3901_v22   ;;  %2803 = vperm.xlu0 %3989, %v3900_v28  }
 0x739   : > { %v5164_v26 = vpop.permute.xlu1 %2699  ;;  %v5166_v9 = vpop.permute.xlu0 %2697 }
 0x73a   : > { %5823 = vst [vmem:[#allocation128_spill] sm:$0xff] %v5164_v26  ;;  %5824 = vst [vmem:[#allocation129_spill] sm:$0xff] %v5166_v9 }
 0x73d   : > { %v5168_v43 = vpop.permute.xlu1 %2703  ;;  %v5170_v20 = vpop.permute.xlu0 %2701 }
 0x73e   : > { %5825 = vst [vmem:[#allocation130_spill] sm:$0xff] %v5168_v43  ;;  %5826 = vst [vmem:[#allocation131_spill] sm:$0xff] %v5170_v20 }
 0x741   : > { %v5172_v17 = vpop.permute.xlu1 %2707  ;;  %v5174_v16 = vpop.permute.xlu0 %2705 }
 0x742   : > { %5827 = vst [vmem:[#allocation132_spill] sm:$0xff] %v5172_v17  ;;  %5828 = vst [vmem:[#allocation133_spill] sm:$0xff] %v5174_v16 }
 0x745   : > { %v5176_v18 = vpop.permute.xlu1 %2711  ;;  %v5178_v19 = vpop.permute.xlu0 %2709 }
 0x746   : > { %5829 = vst [vmem:[#allocation134_spill] sm:$0xff] %v5176_v18  ;;  %5830 = vst [vmem:[#allocation135_spill] sm:$0xff] %v5178_v19 }
 0x752   : > { %v2784_v22 = vpop.permute.xlu1 %2783  ;;  %v2780_v28 = vpop.permute.xlu0 %2779 }
 0x753   : > { %v2811_v26 = vmul.f32 %v2784_v22, %v5181_v29  ;;  %v2810_v9 = vmul.f32 %v2780_v28, %v5181_v29 }
 0x755   : > { %2828 = vrot.lane.b32.xlu1 %v2811_v26, %s4005_s14  ;;  %2826 = vrot.lane.b32.xlu0 %v2810_v9, %s4005_s14 }
 0x756   : > { %v2792_v20 = vpop.permute.xlu1 %2791  ;;  %v2788_v17 = vpop.permute.xlu0 %2787 }
 0x757   : > { %v2813_v16 = vmul.f32 %v2792_v20, %v5181_v29  ;;  %v2812_v18 = vmul.f32 %v2788_v17, %v5181_v29 }
 0x759   : > { %2832 = vrot.lane.b32.xlu1 %v2813_v16, %s4005_s14  ;;  %2830 = vrot.lane.b32.xlu0 %v2812_v18, %s4005_s14  ;;  %v3911_v16 = vld [vmem:[%s5686_s1 + $0xb9] ss:$0 sm:$0xff]  ;;  %v3913_v18 = vld [vmem:[%s5686_s1 + $0xbb] ss:$0 sm:$0xff] }
 0x75a   : > { %v2800_v19 = vpop.permute.xlu1 %2799  ;;  %v2796_v43 = vpop.permute.xlu0 %2795 }
 0x75b   : > { %v2815_v22 = vmul.f32 %v2800_v19, %v5181_v29  ;;  %v2814_v28 = vmul.f32 %v2796_v43, %v5181_v29  ;;  %v3910_v43 = vld [vmem:[%s5686_s1 + $0xb8] ss:$0 sm:$0xff]  ;;  %v3912_v19 = vld [vmem:[%s5686_s1 + $0xba] ss:$0 sm:$0xff] }
 0x75d   : > { %2836 = vrot.lane.b32.xlu1 %v2815_v22, %s4005_s14  ;;  %2834 = vrot.lane.b32.xlu0 %v2814_v28, %s4005_s14  ;;  %v3915_v22 = vld [vmem:[%s5686_s1 + $0xbd] ss:$0 sm:$0xff]  ;;  %v3914_v28 = vld [vmem:[%s5686_s1 + $0xbc] ss:$0 sm:$0xff] }
 0x75e   : > { %v2808_v26 = vpop.permute.xlu1 %2807  ;;  %v2804_v9 = vpop.permute.xlu0 %2803 }
 0x75f   : > { %v2817_v20 = vmul.f32 %v2808_v26, %v5181_v29  ;;  %v2816_v17 = vmul.f32 %v2804_v9, %v5181_v29  ;;  %v3917_v26 = vld [vmem:[%s5686_s1 + $0xbf] ss:$0 sm:$0xff]  ;;  %v3916_v9 = vld [vmem:[%s5686_s1 + $0xbe] ss:$0 sm:$0xff] }
 0x761   : > { %2840 = vrot.lane.b32.xlu1 %v2817_v20, %s4005_s14  ;;  %2838 = vrot.lane.b32.xlu0 %v2816_v17, %s4005_s14  ;;  %v3991_v20 = vld [vmem:[%s4237_s11] sm:$0xff] }
 0x762   : > { %v256_v17 = vmul.f32 %v3991_v20, %v4179_v49  ;;  %v260_v29 = vmul.f32 %v3991_v20, %v4193_v56 }
 0x765   : > { %2912 = vperm.xlu1 %3990, %v3911_v16   ;;  %2908 = vperm.xlu0 %3989, %v3910_v43   ;;  %v254_v16 = vmul.f32 %v3991_v20, %v4181_v50  ;;  %v257_v43 = vmul.f32 %v3991_v20, %v4183_v51 }
 0x769   : > { %2920 = vperm.xlu1 %3990, %v3913_v18   ;;  %2916 = vperm.xlu0 %3989, %v3912_v19   ;;  %v255_v18 = vmul.f32 %v3991_v20, %v4185_v52  ;;  %v259_v19 = vmul.f32 %v3991_v20, %v4187_v53 }
 0x76d   : > { %2928 = vperm.xlu1 %3990, %v3915_v22   ;;  %2924 = vperm.xlu0 %3989, %v3914_v28   ;;  %v258_v22 = vmul.f32 %v3991_v20, %v4189_v54  ;;  %v261_v28 = vmul.f32 %v3991_v20, %v4191_v55  ;;  %v3993_v55 = vld [vmem:[%s4237_s11 + $0x20] sm:$0xff] }
 0x76e   : > { %v449_v56 = vmul.f32 %v3993_v55, %v4211_v1  ;;  %v448_v20 = vmul.f32 %v3993_v55, %v4213_v2 }
 0x771   : > { %2936 = vperm.xlu1 %3990, %v3917_v26   ;;  %2932 = vperm.xlu0 %3989, %v3916_v9   ;;  %v3992_v26 = vld [vmem:[%s4237_s11 + $0x10] sm:$0xff] }
 0x772   : > { %v352_v9 = vmul.f32 %v3992_v26, %v4195_v57  ;;  %v351_v49 = vmul.f32 %v3992_v26, %v4197_v58  ;;  %v354_v50 = vmul.f32 %v3992_v26, %v4199_v59  ;;  %v353_v25 = vmul.f32 %v3992_v26, %v4201_v60 }
 0x773   : > { %v356_v51 = vmul.f32 %v3992_v26, %v4203_v61  ;;  %v355_v52 = vmul.f32 %v3992_v26, %v4205_v62  ;;  %v358_v53 = vmul.f32 %v3992_v26, %v4207_v63  ;;  %v357_v54 = vmul.f32 %v3992_v26, %v4209_v0 }
 0x774   : > { %v451_v57 = vmul.f32 %v3993_v55, %v4217_v3  ;;  %v450_v58 = vmul.f32 %v3993_v55, %v4219_v4  ;;  %v453_v59 = vmul.f32 %v3993_v55, %v4225_v5  ;;  %v452_v60 = vmul.f32 %v3993_v55, %v4227_v6 }
 0x775   : > { %v455_v61 = vmul.f32 %v3993_v55, %v4230_v7  ;;  %v454_v62 = vmul.f32 %v3993_v55, %v4232_v8  ;;  %v360_v63 = vadd.f32 %v352_v9, %v255_v18  ;;  %v359_v21 = vadd.f32 %v351_v49, %v254_v16  ;;  %v5836_v18 = vld [vmem:[#allocation6_spill] sm:$0xff] }
 0x776   : > { %v362_v0 = vadd.f32 %v354_v50, %v257_v43  ;;  %v361_v26 = vadd.f32 %v353_v25, %v256_v17  ;;  %v364_v23 = vadd.f32 %v356_v51, %v259_v19  ;;  %v363_v1 = vadd.f32 %v355_v52, %v258_v22  ;;  %v5842_v50 = vld [vmem:[#allocation12_spill] sm:$0xff]  ;;  %v5843_v52 = vld [vmem:[#allocation13_spill] sm:$0xff] }
 0x777   : > { %v366_v24 = vadd.f32 %v358_v53, %v261_v28  ;;  %v365_v2 = vadd.f32 %v357_v54, %v260_v29  ;;  %v457_v27 = vadd.f32 %v449_v56, %v360_v63  ;;  %v456_v3 = vadd.f32 %v448_v20, %v359_v21  ;;  %v5844_v54 = vld [vmem:[#allocation14_spill] sm:$0xff]  ;;  %v5845_v56 = vld [vmem:[#allocation15_spill] sm:$0xff] }
 0x778   : > { %v459_v15 = vadd.f32 %v451_v57, %v362_v0  ;;  %v458_v4 = vadd.f32 %v450_v58, %v361_v26  ;;  %v461_v14 = vadd.f32 %v453_v59, %v364_v23  ;;  %v460_v5 = vadd.f32 %v452_v60, %v363_v1  ;;  %v5846_v57 = vld [vmem:[#allocation16_spill] sm:$0xff]  ;;  %v5847_v59 = vld [vmem:[#allocation17_spill] sm:$0xff]  ;;  %v5849_v63 = vld [vmem:[#allocation19_spill] sm:$0xff] }
 0x779   : > { %v463_v13 = vadd.f32 %v455_v61, %v366_v24  ;;  %v462_v6 = vadd.f32 %v454_v62, %v365_v2  ;;  %v586_v7 = vadd.f32 %v4320_v30, %v457_v27  ;;  %v585_v8 = vadd.f32 %v4322_v31, %v456_v3  ;;  %v5835_v27 = vld [vmem:[#allocation5_spill] sm:$0xff]  ;;  %v5848_v61 = vld [vmem:[#allocation18_spill] sm:$0xff]  ;;  %v5850_v26 = vld [vmem:[#allocation20_spill] sm:$0xff] }
 0x77a   : > { %v588_v16 = vadd.f32 %v4324_v32, %v459_v15  ;;  %v587_v25 = vadd.f32 %v4326_v33, %v458_v4  ;;  %v590_v17 = vadd.f32 %v4328_v34, %v461_v14  ;;  %v589_v29 = vadd.f32 %v4330_v35, %v460_v5  ;;  %v5833_v14 = vld [vmem:[#allocation3_spill] sm:$0xff]  ;;  %v5834_v15 = vld [vmem:[#allocation4_spill] sm:$0xff]  ;;  %v5851_v3 = vld [vmem:[#allocation29_spill] sm:$0xff] }
 0x77b   : > { %v592_v21 = vadd.f32 %v4332_v36, %v463_v13  ;;  %v591_v43 = vadd.f32 %v4334_v37, %v462_v6  ;;  %v715_v23 = vadd.f32 %v4336_v38, %v586_v7  ;;  %v714_v24 = vadd.f32 %v4338_v39, %v585_v8  ;;  %v5832_v13 = vld [vmem:[#allocation2_spill] sm:$0xff]  ;;  %v5853_v7 = vld [vmem:[#allocation31_spill] sm:$0xff] }
 0x77c   : > { %v717_v30 = vadd.f32 %v4340_v40, %v588_v16  ;;  %v716_v31 = vadd.f32 %v4342_v41, %v587_v25  ;;  %v719_v32 = vadd.f32 %v4344_v42, %v590_v17  ;;  %v718_v33 = vadd.f32 %v4346_v44, %v589_v29  ;;  %v3994_v2 = vld [vmem:[%s4237_s11 + $0x1] sm:$0xff]  ;;  %v5854_v16 = vld [vmem:[#allocation32_spill] sm:$0xff]  ;;  %v5855_v17 = vld [vmem:[#allocation33_spill] sm:$0xff] }
 0x77d   : > { %v721_v34 = vadd.f32 %v4348_v45, %v592_v21  ;;  %v720_v35 = vadd.f32 %v4350_v46, %v591_v43  ;;  %v844_v36 = vadd.f32 %v4352_v47, %v715_v23  ;;  %v843_v37 = vadd.f32 %v4354_v48, %v714_v24  ;;  %v5837_v47 = vld [vmem:[#allocation7_spill] sm:$0xff]  ;;  %v5838_v48 = vld [vmem:[#allocation8_spill] sm:$0xff]  ;;  %v5852_v5 = vld [vmem:[#allocation30_spill] sm:$0xff] }
 0x77e   : > { %v846_v38 = vadd.f32 %v4356_v10, %v717_v30  ;;  %v845_v39 = vadd.f32 %v4358_v11, %v716_v31  ;;  %v848_v40 = vadd.f32 %v4360_v12, %v719_v32  ;;  %v847_v41 = vadd.f32 %v5832_v13, %v718_v33  ;;  %v5839_v10 = vld [vmem:[#allocation9_spill] sm:$0xff]  ;;  %v5840_v11 = vld [vmem:[#allocation10_spill] sm:$0xff]  ;;  %v5841_v12 = vld [vmem:[#allocation11_spill] sm:$0xff] }
 0x77f   : > { %v850_v42 = vadd.f32 %v5833_v14, %v721_v34  ;;  %v849_v44 = vadd.f32 %v5834_v15, %v720_v35  ;;  %v973_v45 = vadd.f32 %v5835_v27, %v844_v36  ;;  %v972_v46 = vadd.f32 %v5836_v18, %v843_v37  ;;  %v5856_v21 = vld [vmem:[#allocation34_spill] sm:$0xff]  ;;  %v5857_v23 = vld [vmem:[#allocation35_spill] sm:$0xff]  ;;  %v5858_v30 = vld [vmem:[#allocation36_spill] sm:$0xff] }
 0x780   : > { %v975_v19 = vadd.f32 %v5837_v47, %v846_v38  ;;  %v974_v22 = vadd.f32 %v5838_v48, %v845_v39  ;;  %v977_v28 = vadd.f32 %v5839_v10, %v848_v40  ;;  %v976_v9 = vadd.f32 %v5840_v11, %v847_v41  ;;  %v5859_v32 = vld [vmem:[#allocation21_spill] sm:$0xff]  ;;  %v5860_v34 = vld [vmem:[#allocation22_spill] sm:$0xff]  ;;  %v5861_v36 = vld [vmem:[#allocation23_spill] sm:$0xff] }
 0x781   : > { %v979_v49 = vadd.f32 %v5841_v12, %v850_v42  ;;  %v978_v51 = vadd.f32 %v5842_v50, %v849_v44  ;;  %v1102_v53 = vadd.f32 %v5843_v52, %v973_v45  ;;  %v1101_v55 = vadd.f32 %v5844_v54, %v972_v46  ;;  %v5862_v38 = vld [vmem:[#allocation24_spill] sm:$0xff]  ;;  %v5863_v40 = vld [vmem:[#allocation25_spill] sm:$0xff]  ;;  %v5864_v41 = vld [vmem:[#allocation26_spill] sm:$0xff] }
 0x782   : > { %v1104_v20 = vadd.f32 %v5845_v56, %v975_v19  ;;  %v1103_v58 = vadd.f32 %v5846_v57, %v974_v22  ;;  %v1106_v60 = vadd.f32 %v5847_v59, %v977_v28  ;;  %v1105_v62 = vadd.f32 %v5848_v61, %v976_v9  ;;  %v5865_v42 = vld [vmem:[#allocation27_spill] sm:$0xff]  ;;  %v5866_v44 = vld [vmem:[#allocation28_spill] sm:$0xff]  ;;  %v5867_v28 = vld [vmem:[#allocation61_spill] sm:$0xff] }
 0x783   : > { %v1108_v0 = vadd.f32 %v5849_v63, %v979_v49  ;;  %v1107_v1 = vadd.f32 %v5850_v26, %v978_v51  ;;  %v1323_v4 = vmul.f32 %v3994_v2, %v5851_v3  ;;  %v1322_v6 = vmul.f32 %v3994_v2, %v5852_v5  ;;  %v5868_v11 = vld [vmem:[#allocation37_spill] sm:$0xff]  ;;  %v5869_v12 = vld [vmem:[#allocation38_spill] sm:$0xff]  ;;  %v5870_v50 = vld [vmem:[#allocation39_spill] sm:$0xff] }
 0x784   : > { %v1325_v8 = vmul.f32 %v3994_v2, %v5853_v7  ;;  %v1324_v25 = vmul.f32 %v3994_v2, %v5854_v16  ;;  %v1327_v29 = vmul.f32 %v3994_v2, %v5855_v17  ;;  %v1326_v43 = vmul.f32 %v3994_v2, %v5856_v21  ;;  %v5871_v52 = vld [vmem:[#allocation40_spill] sm:$0xff]  ;;  %v5877_v63 = vld [vmem:[#allocation45_spill] sm:$0xff]  ;;  %v5878_v26 = vld [vmem:[#allocation46_spill] sm:$0xff] }
 0x785   : > { %v1329_v24 = vmul.f32 %v3994_v2, %v5857_v23  ;;  %v1328_v31 = vmul.f32 %v3994_v2, %v5858_v30  ;;  %v1231_v33 = vadd.f32 %v5859_v32, %v1102_v53  ;;  %v1230_v35 = vadd.f32 %v5860_v34, %v1101_v55  ;;  %v3995_v54 = vld [vmem:[%s4237_s11 + $0x11] sm:$0xff]  ;;  %v5879_v2 = vld [vmem:[#allocation47_spill] sm:$0xff] }
 0x786   : > { %v1233_v37 = vadd.f32 %v5861_v36, %v1104_v20  ;;  %v1232_v39 = vadd.f32 %v5862_v38, %v1103_v58  ;;  %v1235_v13 = vadd.f32 %v5863_v40, %v1106_v60  ;;  %v1234_v14 = vadd.f32 %v5864_v41, %v1105_v62  ;;  %v5872_v55 = vld [vmem:[#allocation41_spill] sm:$0xff]  ;;  %v5873_v20 = vld [vmem:[#allocation42_spill] sm:$0xff]  ;;  %v5874_v58 = vld [vmem:[#allocation43_spill] sm:$0xff] }
 0x787   : > { %v1237_v15 = vadd.f32 %v5865_v42, %v1108_v0  ;;  %v1236_v27 = vadd.f32 %v5866_v44, %v1107_v1  ;;  %v1331_v45 = vadd.f32 %v1323_v4, %v1231_v33  ;;  %v1330_v18 = vadd.f32 %v1322_v6, %v1230_v35  ;;  %v5875_v60 = vld [vmem:[#allocation44_spill] sm:$0xff]  ;;  %v5876_v62 = vld [vmem:[#allocation70_spill] sm:$0xff]  ;;  %v5881_v6 = vld [vmem:[#allocation49_spill] sm:$0xff] }
 0x788   : > { %v1333_v46 = vadd.f32 %v1325_v8, %v1233_v37  ;;  %v1332_v47 = vadd.f32 %v1324_v25, %v1232_v39  ;;  %v1335_v19 = vadd.f32 %v1327_v29, %v1235_v13  ;;  %v1334_v48 = vadd.f32 %v1326_v43, %v1234_v14  ;;  %v5880_v4 = vld [vmem:[#allocation48_spill] sm:$0xff]  ;;  %v5882_v8 = vld [vmem:[#allocation50_spill] sm:$0xff]  ;;  %v5883_v25 = vld [vmem:[#allocation51_spill] sm:$0xff] }
 0x789   : > { %v1337_v22 = vadd.f32 %v1329_v24, %v1237_v15  ;;  %v1336_v10 = vadd.f32 %v1328_v31, %v1236_v27  ;;  %v1420_v9 = vmul.f32 %v5868_v11, %v5867_v28  ;;  %v1419_v49 = vmul.f32 %v5869_v12, %v5867_v28  ;;  %v5884_v29 = vld [vmem:[#allocation52_spill] sm:$0xff]  ;;  %v5885_v14 = vld [vmem:[#allocation53_spill] sm:$0xff]  ;;  %v5886_v15 = vld [vmem:[#allocation54_spill] sm:$0xff] }
 0x78a   : > { %v1422_v51 = vmul.f32 %v5870_v50, %v5867_v28  ;;  %v1421_v53 = vmul.f32 %v5871_v52, %v5867_v28  ;;  %v1424_v56 = vmul.f32 %v3995_v54, %v5872_v55  ;;  %v1423_v57 = vmul.f32 %v3995_v54, %v5873_v20  ;;  %v5887_v27 = vld [vmem:[#allocation55_spill] sm:$0xff]  ;;  %v5892_v11 = vld [vmem:[#allocation60_spill] sm:$0xff]  ;;  %v5893_v12 = vld [vmem:[#allocation62_spill] sm:$0xff] }
 0x78b   : > { %v1426_v59 = vmul.f32 %v3995_v54, %v5874_v58  ;;  %v1425_v61 = vmul.f32 %v3995_v54, %v5875_v60  ;;  %v1517_v0 = vmul.f32 %v5877_v63, %v5876_v62  ;;  %v1516_v1 = vmul.f32 %v5878_v26, %v5876_v62  ;;  %v5894_v50 = vld [vmem:[#allocation63_spill] sm:$0xff]  ;;  %v5895_v52 = vld [vmem:[#allocation64_spill] sm:$0xff]  ;;  %v5896_v54 = vld [vmem:[#allocation65_spill] sm:$0xff] }
 0x78c   : > { %v1519_v3 = vmul.f32 %v5879_v2, %v5876_v62  ;;  %v1518_v5 = vmul.f32 %v5880_v4, %v5876_v62  ;;  %v1521_v7 = vmul.f32 %v5881_v6, %v5876_v62  ;;  %v1520_v16 = vmul.f32 %v5882_v8, %v5876_v62  ;;  %v5901_v63 = vld [vmem:[#allocation71_spill] sm:$0xff]  ;;  %v5902_v26 = vld [vmem:[#allocation72_spill] sm:$0xff]  ;;  %v5903_v2 = vld [vmem:[#allocation73_spill] sm:$0xff] }
 0x78d   : > { %v1523_v17 = vmul.f32 %v5883_v25, %v5876_v62  ;;  %v1522_v21 = vmul.f32 %v5884_v29, %v5876_v62  ;;  %v1428_v43 = vadd.f32 %v1420_v9, %v1331_v45  ;;  %v1427_v23 = vadd.f32 %v1419_v49, %v1330_v18  ;;  %v5888_v18 = vld [vmem:[#allocation56_spill] sm:$0xff]  ;;  %v5904_v4 = vld [vmem:[#allocation74_spill] sm:$0xff]  ;;  %v5905_v6 = vld [vmem:[#allocation75_spill] sm:$0xff] }
 0x78e   : > { %v1430_v24 = vadd.f32 %v1422_v51, %v1333_v46  ;;  %v1429_v30 = vadd.f32 %v1421_v53, %v1332_v47  ;;  %v1432_v31 = vadd.f32 %v1424_v56, %v1335_v19  ;;  %v1431_v32 = vadd.f32 %v1423_v57, %v1334_v48  ;;  %v5889_v47 = vld [vmem:[#allocation57_spill] sm:$0xff]  ;;  %v5890_v48 = vld [vmem:[#allocation58_spill] sm:$0xff]  ;;  %v5898_v57 = vld [vmem:[#allocation67_spill] sm:$0xff] }
 0x78f   : > { %v1434_v33 = vadd.f32 %v1426_v59, %v1337_v22  ;;  %v1433_v34 = vadd.f32 %v1425_v61, %v1336_v10  ;;  %v1525_v35 = vadd.f32 %v1517_v0, %v1428_v43  ;;  %v1524_v36 = vadd.f32 %v1516_v1, %v1427_v23  ;;  %v5891_v10 = vld [vmem:[#allocation59_spill] sm:$0xff]  ;;  %v5897_v56 = vld [vmem:[#allocation66_spill] sm:$0xff]  ;;  %v5899_v59 = vld [vmem:[#allocation68_spill] sm:$0xff] }
 0x790   : > { %v1527_v37 = vadd.f32 %v1519_v3, %v1430_v24  ;;  %v1526_v38 = vadd.f32 %v1518_v5, %v1429_v30  ;;  %v1529_v39 = vadd.f32 %v1521_v7, %v1432_v31  ;;  %v1528_v40 = vadd.f32 %v1520_v16, %v1431_v32  ;;  %v5900_v61 = vld [vmem:[#allocation69_spill] sm:$0xff]  ;;  %v5906_v8 = vld [vmem:[#allocation76_spill] sm:$0xff]  ;;  %v5908_v29 = vld [vmem:[#allocation78_spill] sm:$0xff] }
 0x791   : > { %v1531_v13 = vadd.f32 %v1523_v17, %v1434_v33  ;;  %v1530_v41 = vadd.f32 %v1522_v21, %v1433_v34  ;;  %v1654_v42 = vadd.f32 %v5885_v14, %v1525_v35  ;;  %v1653_v44 = vadd.f32 %v5886_v15, %v1524_v36  ;;  %v5907_v25 = vld [vmem:[#allocation77_spill] sm:$0xff]  ;;  %v5909_v43 = vld [vmem:[#allocation79_spill] sm:$0xff]  ;;  %v5910_v24 = vld [vmem:[#allocation80_spill] sm:$0xff] }
 0x792   : > { %v1656_v45 = vadd.f32 %v5887_v27, %v1527_v37  ;;  %v1655_v46 = vadd.f32 %v5888_v18, %v1526_v38  ;;  %v1658_v19 = vadd.f32 %v5889_v47, %v1529_v39  ;;  %v1657_v22 = vadd.f32 %v5890_v48, %v1528_v40  ;;  %v5911_v31 = vld [vmem:[#allocation81_spill] sm:$0xff]  ;;  %v5912_v33 = vld [vmem:[#allocation82_spill] sm:$0xff]  ;;  %v5913_v35 = vld [vmem:[#allocation83_spill] sm:$0xff] }
 0x793   : > { %v1660_v28 = vadd.f32 %v5891_v10, %v1531_v13  ;;  %v1659_v9 = vadd.f32 %v5892_v11, %v1530_v41  ;;  %v1783_v49 = vadd.f32 %v5893_v12, %v1654_v42  ;;  %v1782_v51 = vadd.f32 %v5894_v50, %v1653_v44  ;;  %v5914_v37 = vld [vmem:[#allocation84_spill] sm:$0xff]  ;;  %v5915_v39 = vld [vmem:[#allocation85_spill] sm:$0xff]  ;;  %v5916_v13 = vld [vmem:[#allocation86_spill] sm:$0xff] }
 0x794   : > { %v1785_v53 = vadd.f32 %v5895_v52, %v1656_v45  ;;  %v1784_v55 = vadd.f32 %v5896_v54, %v1655_v46  ;;  %v1787_v20 = vadd.f32 %v5897_v56, %v1658_v19  ;;  %v1786_v58 = vadd.f32 %v5898_v57, %v1657_v22  ;;  %v5917_v14 = vld [vmem:[#allocation87_spill] sm:$0xff]  ;;  %v5918_v15 = vld [vmem:[#allocation88_spill] sm:$0xff]  ;;  %v5922_v19 = vld [vmem:[#allocation89_spill] sm:$0xff] }
 0x795   : > { %v1789_v60 = vadd.f32 %v5899_v59, %v1660_v28  ;;  %v1788_v62 = vadd.f32 %v5900_v61, %v1659_v9  ;;  %v1912_v0 = vadd.f32 %v5901_v63, %v1783_v49  ;;  %v1911_v1 = vadd.f32 %v5902_v26, %v1782_v51  ;;  %v5919_v27 = vld [vmem:[#allocation127_spill] sm:$0xff]  ;;  %v5921_v46 = vld [vmem:[#allocation104_spill] sm:$0xff]  ;;  %v5923_v22 = vld [vmem:[#allocation90_spill] sm:$0xff] }
 0x796   : > { %v1914_v3 = vadd.f32 %v5903_v2, %v1785_v53  ;;  %v1913_v5 = vadd.f32 %v5904_v4, %v1784_v55  ;;  %v1916_v7 = vadd.f32 %v5905_v6, %v1787_v20  ;;  %v1915_v16 = vadd.f32 %v5906_v8, %v1786_v58  ;;  %v5920_v45 = vld [vmem:[#allocation103_spill] sm:$0xff]  ;;  %v5925_v9 = vld [vmem:[#allocation92_spill] sm:$0xff]  ;;  %v5931_v58 = vld [vmem:[#allocation93_spill] sm:$0xff] }
 0x797   : > { %v1918_v17 = vadd.f32 %v5907_v25, %v1789_v60  ;;  %v1917_v21 = vadd.f32 %v5908_v29, %v1788_v62  ;;  %v2041_v23 = vadd.f32 %v5909_v43, %v1912_v0  ;;  %v2040_v30 = vadd.f32 %v5910_v24, %v1911_v1  ;;  %v5924_v28 = vld [vmem:[#allocation91_spill] sm:$0xff]  ;;  %v5927_v52 = vld [vmem:[#allocation96_spill] sm:$0xff]  ;;  %v5932_v60 = vld [vmem:[#allocation94_spill] sm:$0xff] }
 0x798   : > { %v2043_v32 = vadd.f32 %v5911_v31, %v1914_v3  ;;  %v2042_v34 = vadd.f32 %v5912_v33, %v1913_v5  ;;  %v2045_v36 = vadd.f32 %v5913_v35, %v1916_v7  ;;  %v2044_v38 = vadd.f32 %v5914_v37, %v1915_v16  ;;  %v5379_v49 = vld [vmem:[%s4237_s11 + $0x22] sm:$0xff]  ;;  %v5928_v54 = vld [vmem:[#allocation136_spill] sm:$0xff]  ;;  %v5933_v62 = vld [vmem:[#allocation105_spill] sm:$0xff] }
 0x799   : > { %v2047_v40 = vadd.f32 %v5915_v39, %v1918_v17  ;;  %v2046_v41 = vadd.f32 %v5916_v13, %v1917_v21  ;;  %v2170_v42 = vadd.f32 %v5917_v14, %v2041_v23  ;;  %v2169_v44 = vadd.f32 %v5918_v15, %v2040_v30  ;;  %v5926_v50 = vld [vmem:[#allocation95_spill] sm:$0xff]  ;;  %v5930_v20 = vld [vmem:[#allocation112_spill] sm:$0xff]  ;;  %v5934_v0 = vld [vmem:[#allocation106_spill] sm:$0xff] }
 0x79a   : > { %v2391_v18 = vmul.f32 %v5920_v45, %v5919_v27  ;;  %v2390_v47 = vmul.f32 %v5921_v46, %v5919_v27  ;;  %v2172_v48 = vadd.f32 %v5922_v19, %v2043_v32  ;;  %v2171_v10 = vadd.f32 %v5923_v22, %v2042_v34  ;;  %v5929_v55 = vld [vmem:[#allocation111_spill] sm:$0xff]  ;;  %v5936_v5 = vld [vmem:[#allocation120_spill] sm:$0xff]  ;;  %v5937_v7 = vld [vmem:[#allocation97_spill] sm:$0xff] }
 0x79b   : > { %v2174_v11 = vadd.f32 %v5924_v28, %v2045_v36  ;;  %v2173_v12 = vadd.f32 %v5925_v9, %v2044_v38  ;;  %v2299_v51 = vadd.f32 %v5926_v50, %v2170_v42  ;;  %v2298_v53 = vadd.f32 %v5927_v52, %v2169_v44  ;;  %v5935_v3 = vld [vmem:[#allocation119_spill] sm:$0xff]  ;;  %v5938_v16 = vld [vmem:[#allocation98_spill] sm:$0xff]  ;;  %v5940_v21 = vld [vmem:[#allocation108_spill] sm:$0xff] }
 0x79c   : > { %v2488_v56 = vmul.f32 %v5929_v55, %v5928_v54  ;;  %v2487_v57 = vmul.f32 %v5930_v20, %v5928_v54  ;;  %v2176_v59 = vadd.f32 %v5931_v58, %v2047_v40  ;;  %v2175_v61 = vadd.f32 %v5932_v60, %v2046_v41  ;;  %v5939_v17 = vld [vmem:[#allocation107_spill] sm:$0xff]  ;;  %v5941_v30 = vld [vmem:[#allocation113_spill] sm:$0xff]  ;;  %v5942_v32 = vld [vmem:[#allocation114_spill] sm:$0xff] }
 0x79d   : > { %v2393_v63 = vmul.f32 %v5933_v62, %v5919_v27  ;;  %v2392_v26 = vmul.f32 %v5934_v0, %v5919_v27  ;;  %v2399_v1 = vadd.f32 %v2391_v18, %v2299_v51  ;;  %v2398_v2 = vadd.f32 %v2390_v47, %v2298_v53  ;;  %v5943_v34 = vld [vmem:[#allocation99_spill] sm:$0xff]  ;;  %v5944_v36 = vld [vmem:[#allocation100_spill] sm:$0xff]  ;;  %v5945_v40 = vld [vmem:[#allocation121_spill] sm:$0xff] }
 0x79e   : > { %v2585_v4 = vmul.f32 %v5935_v3, %v5379_v49  ;;  %v2584_v6 = vmul.f32 %v5936_v5, %v5379_v49  ;;  %v2301_v8 = vadd.f32 %v5937_v7, %v2172_v48  ;;  %v2300_v25 = vadd.f32 %v5938_v16, %v2171_v10  ;;  %v5946_v41 = vld [vmem:[#allocation122_spill] sm:$0xff]  ;;  %v5947_v18 = vld [vmem:[#allocation115_spill] sm:$0xff]  ;;  %v5948_v47 = vld [vmem:[#allocation116_spill] sm:$0xff] }
 0x79f   : > { %v2395_v29 = vmul.f32 %v5939_v17, %v5919_v27  ;;  %v2394_v43 = vmul.f32 %v5940_v21, %v5919_v27  ;;  %v2496_v23 = vadd.f32 %v2488_v56, %v2399_v1  ;;  %v2495_v24 = vadd.f32 %v2487_v57, %v2398_v2  ;;  %v5949_v10 = vld [vmem:[#allocation128_spill] sm:$0xff]  ;;  %v5952_v51 = vld [vmem:[#allocation110_spill] sm:$0xff]  ;;  %v5953_v53 = vld [vmem:[#allocation123_spill] sm:$0xff] }
 0x7a0   : > { %v2490_v31 = vmul.f32 %v5941_v30, %v5928_v54  ;;  %v2489_v33 = vmul.f32 %v5942_v32, %v5928_v54  ;;  %v2303_v35 = vadd.f32 %v5943_v34, %v2174_v11  ;;  %v2302_v37 = vadd.f32 %v5944_v36, %v2173_v12  ;;  %v5950_v11 = vld [vmem:[#allocation129_spill] sm:$0xff]  ;;  %v5954_v56 = vld [vmem:[#allocation124_spill] sm:$0xff]  ;;  %v5956_v2 = vld [vmem:[#allocation102_spill] sm:$0xff] }
 0x7a1   : > { %v2401_v38 = vadd.f32 %v2393_v63, %v2301_v8  ;;  %v2400_v39 = vadd.f32 %v2392_v26, %v2300_v25  ;;  %v2587_v13 = vmul.f32 %v5945_v40, %v5379_v49  ;;  %v2586_v14 = vmul.f32 %v5946_v41, %v5379_v49  ;;  %v5951_v12 = vld [vmem:[#allocation109_spill] sm:$0xff]  ;;  %v5958_v8 = vld [vmem:[#allocation118_spill] sm:$0xff] }
 0x7a2   : > { %v2593_v42 = vadd.f32 %v2585_v4, %v2496_v23  ;;  %v2592_v15 = vadd.f32 %v2584_v6, %v2495_v24  ;;  %v2403_v44 = vadd.f32 %v2395_v29, %v2303_v35  ;;  %v2402_v45 = vadd.f32 %v2394_v43, %v2302_v37  ;;  %v5955_v26 = vld [vmem:[#allocation101_spill] sm:$0xff]  ;;  %v5959_v25 = vld [vmem:[#allocation130_spill] sm:$0xff]  ;;  %v5960_v29 = vld [vmem:[#allocation131_spill] sm:$0xff] }
 0x7a3   : > { %v2492_v46 = vmul.f32 %v5947_v18, %v5928_v54  ;;  %v2491_v19 = vmul.f32 %v5948_v47, %v5928_v54  ;;  %v2498_v48 = vadd.f32 %v2490_v31, %v2401_v38  ;;  %v2497_v22 = vadd.f32 %v2489_v33, %v2400_v39  ;;  %v5957_v6 = vld [vmem:[#allocation117_spill] sm:$0xff]  ;;  %v5962_v33 = vld [vmem:[#allocation126_spill] sm:$0xff]  ;;  %v5963_v39 = vld [vmem:[#allocation132_spill] sm:$0xff] }
 0x7a4   : > { %v2722_v28 = vadd.f32 %v5949_v10, %v2593_v42  ;;  %v2721_v9 = vadd.f32 %v5950_v11, %v2592_v15  ;;  %v2397_v50 = vmul.f32 %v5951_v12, %v5919_v27  ;;  %v2396_v52 = vmul.f32 %v5952_v51, %v5919_v27 }
 0x7a5   : > { %v2589_v55 = vmul.f32 %v5953_v53, %v5379_v49  ;;  %v2588_v20 = vmul.f32 %v5954_v56, %v5379_v49  ;;  %v2595_v60 = vadd.f32 %v2587_v13, %v2498_v48  ;;  %v2594_v62 = vadd.f32 %v2586_v14, %v2497_v22  ;;  %v5964_v13 = vld [vmem:[#allocation133_spill] sm:$0xff] }
 0x7a6   : > { %v2305_v1 = vadd.f32 %v5955_v26, %v2176_v59  ;;  %v2304_v3 = vadd.f32 %v5956_v2, %v2175_v61  ;;  %v2500_v4 = vadd.f32 %v2492_v46, %v2403_v44  ;;  %v2499_v5 = vadd.f32 %v2491_v19, %v2402_v45  ;;  %v5961_v61 = vld [vmem:[#allocation125_spill] sm:$0xff]  ;;  %v5965_v46 = vld [vmem:[#allocation134_spill] sm:$0xff]  ;;  %v5966_v19 = vld [vmem:[#allocation135_spill] sm:$0xff] }
 0x7a7   : > { %v2494_v7 = vmul.f32 %v5957_v6, %v5928_v54  ;;  %v2493_v16 = vmul.f32 %v5958_v8, %v5928_v54  ;;  %v2724_v17 = vadd.f32 %v5959_v25, %v2595_v60  ;;  %v2723_v21 = vadd.f32 %v5960_v29, %v2594_v62  ;;  %v3928_v6 = vld [vmem:[%s5686_s1 + $0xc2] ss:$0 sm:$0xff]  ;;  %v3930_v8 = vld [vmem:[%s5686_s1 + $0xc4] ss:$0 sm:$0xff]  ;;  %v3932_v25 = vld [vmem:[%s5686_s1 + $0xc6] ss:$0 sm:$0xff] }
 0x7a8   : > { %v2405_v43 = vadd.f32 %v2397_v50, %v2305_v1  ;;  %v2404_v23 = vadd.f32 %v2396_v52, %v2304_v3  ;;  %v2597_v24 = vadd.f32 %v2589_v55, %v2500_v4  ;;  %v2596_v30 = vadd.f32 %v2588_v20, %v2499_v5  ;;  %v3927_v3 = vld [vmem:[%s5686_s1 + $0xc1] ss:$0 sm:$0xff]  ;;  %v3926_v4 = vld [vmem:[%s5686_s1 + $0xc0] ss:$0 sm:$0xff]  ;;  %v3929_v5 = vld [vmem:[%s5686_s1 + $0xc3] ss:$0 sm:$0xff] }
 0x7a9   : > { %v2591_v32 = vmul.f32 %v5961_v61, %v5379_v49  ;;  %v2590_v34 = vmul.f32 %v5962_v33, %v5379_v49 }
 0x7aa   : > { %v2502_v37 = vadd.f32 %v2494_v7, %v2405_v43  ;;  %v2501_v38 = vadd.f32 %v2493_v16, %v2404_v23  ;;  %v2726_v40 = vadd.f32 %v5963_v39, %v2597_v24  ;;  %v2725_v41 = vadd.f32 %v5964_v13, %v2596_v30  ;;  %v3931_v7 = vld [vmem:[%s5686_s1 + $0xc5] ss:$0 sm:$0xff]  ;;  %v3933_v16 = vld [vmem:[%s5686_s1 + $0xc7] ss:$0 sm:$0xff] }
 0x7ac   : > { %v2599_v15 = vadd.f32 %v2591_v32, %v2502_v37  ;;  %v2598_v44 = vadd.f32 %v2590_v34, %v2501_v38 }
 0x7ae   : > { %v2728_v47 = vadd.f32 %v5965_v46, %v2599_v15  ;;  %v2727_v48 = vadd.f32 %v5966_v19, %v2598_v44  ;;  %v3942_v46 = vld [vmem:[%s5686_s1 + $0xc8] ss:$0 sm:$0xff]  ;;  %v3944_v19 = vld [vmem:[%s5686_s1 + $0xca] ss:$0 sm:$0xff] }
 0x7c7   : > { %v2829_v57 = vpop.permute.xlu1 %2828  ;;  %v2827_v58 = vpop.permute.xlu0 %2826 }
 0x7c8   : > { %v5427_v63 = vadd.f32 %v2829_v57, %v2722_v28  ;;  %v5429_v0 = vadd.f32 %v2827_v58, %v2721_v9 }
 0x7cb   : > { %v2833_v31 = vpop.permute.xlu1 %2832  ;;  %v2831_v59 = vpop.permute.xlu0 %2830 }
 0x7cc   : > { %v5443_v35 = vadd.f32 %v2833_v31, %v2724_v17  ;;  %v5445_v36 = vadd.f32 %v2831_v59, %v2723_v21 }
 0x7cf   : > { %v2837_v14 = vpop.permute.xlu1 %2836  ;;  %v2835_v42 = vpop.permute.xlu0 %2834 }
 0x7d0   : > { %v2855_v45 = vadd.f32 %v2837_v14, %v2726_v40  ;;  %v2854_v18 = vadd.f32 %v2835_v42, %v2725_v41 }
 0x7d3   : > { %v2841_v22 = vpop.permute.xlu1 %2840  ;;  %v2839_v10 = vpop.permute.xlu0 %2838 }
 0x7d4   : > { %v2857_v28 = vadd.f32 %v2841_v22, %v2728_v47  ;;  %v2856_v11 = vadd.f32 %v2839_v10, %v2727_v48  ;;  %v3943_v48 = vld [vmem:[%s5686_s1 + $0xc9] ss:$0 sm:$0xff]  ;;  %v3946_v22 = vld [vmem:[%s5686_s1 + $0xcc] ss:$0 sm:$0xff]  ;;  %v3945_v10 = vld [vmem:[%s5686_s1 + $0xcb] ss:$0 sm:$0xff] }
 0x7e0   : > { %v2913_v9 = vpop.permute.xlu1 %2912  ;;  %v2909_v12 = vpop.permute.xlu0 %2908 }
 0x7e1   : > { %v2940_v50 = vmul.f32 %v2913_v9, %v5379_v49  ;;  %v2939_v51 = vmul.f32 %v2909_v12, %v5379_v49  ;;  %v3958_v9 = vld [vmem:[%s5686_s1 + $0xd0] ss:$0 sm:$0xff]  ;;  %v3949_v12 = vld [vmem:[%s5686_s1 + $0xcf] ss:$0 sm:$0xff] }
 0x7e3   : > { %2957 = vrot.lane.b32.xlu1 %v2940_v50, %s4005_s14  ;;  %2955 = vrot.lane.b32.xlu0 %v2939_v51, %s4005_s14  ;;  %v3960_v50 = vld [vmem:[%s5686_s1 + $0xd2] ss:$0 sm:$0xff]  ;;  %v3959_v51 = vld [vmem:[%s5686_s1 + $0xd1] ss:$0 sm:$0xff] }
 0x7e4   : > { %v2921_v52 = vpop.permute.xlu1 %2920  ;;  %v2917_v53 = vpop.permute.xlu0 %2916 }
 0x7e5   : > { %v2942_v55 = vmul.f32 %v2921_v52, %v5379_v49  ;;  %v2941_v56 = vmul.f32 %v2917_v53, %v5379_v49  ;;  %v3962_v52 = vld [vmem:[%s5686_s1 + $0xd4] ss:$0 sm:$0xff]  ;;  %v3961_v53 = vld [vmem:[%s5686_s1 + $0xd3] ss:$0 sm:$0xff] }
 0x7e7   : > { %2961 = vrot.lane.b32.xlu1 %v2942_v55, %s4005_s14  ;;  %2959 = vrot.lane.b32.xlu0 %v2941_v56, %s4005_s14  ;;  %v3964_v55 = vld [vmem:[%s5686_s1 + $0xd6] ss:$0 sm:$0xff]  ;;  %v3963_v56 = vld [vmem:[%s5686_s1 + $0xd5] ss:$0 sm:$0xff] }
 0x7e8   : > { %v2929_v20 = vpop.permute.xlu1 %2928  ;;  %v2925_v57 = vpop.permute.xlu0 %2924 }
 0x7e9   : > { %v2944_v58 = vmul.f32 %v2929_v20, %v5379_v49  ;;  %v2943_v60 = vmul.f32 %v2925_v57, %v5379_v49  ;;  %v3965_v57 = vld [vmem:[%s5686_s1 + $0xd7] ss:$0 sm:$0xff] }
 0x7eb   : > { %2965 = vrot.lane.b32.xlu1 %v2944_v58, %s4005_s14  ;;  %2963 = vrot.lane.b32.xlu0 %v2943_v60, %s4005_s14  ;;  %v3967_v60 = vld [vmem:[%s5687_s2 + $0x1] ss:$0 sm:$0xff] }
 0x7ec   : > { %v2937_v62 = vpop.permute.xlu1 %2936  ;;  %v2933_v26 = vpop.permute.xlu0 %2932 }
 0x7ed   : > { %v2946_v1 = vmul.f32 %v2937_v62, %v5379_v49  ;;  %v2945_v2 = vmul.f32 %v2933_v26, %v5379_v49  ;;  %v3966_v62 = vld [vmem:[%s5687_s2] ss:$0 sm:$0xff]  ;;  %v3969_v26 = vld [vmem:[%s5687_s2 + $0x3] ss:$0 sm:$0xff] }
 0x7ef   : > { %2969 = vrot.lane.b32.xlu1 %v2946_v1, %s4005_s14  ;;  %2967 = vrot.lane.b32.xlu0 %v2945_v2, %s4005_s14  ;;  %v3971_v1 = vld [vmem:[%s5687_s2 + $0x5] ss:$0 sm:$0xff]  ;;  %v3970_v2 = vld [vmem:[%s5687_s2 + $0x4] ss:$0 sm:$0xff] }
 0x7f3   : > { %3041 = vperm.xlu1 %3990, %v3927_v3   ;;  %3037 = vperm.xlu0 %3989, %v3926_v4   ;;  %v3973_v3 = vld [vmem:[%s5687_s2 + $0x7] ss:$0 sm:$0xff]  ;;  %v3972_v4 = vld [vmem:[%s5687_s2 + $0x6] ss:$0 sm:$0xff] }
 0x7f7   : > { %3049 = vperm.xlu1 %3990, %v3929_v5   ;;  %3045 = vperm.xlu0 %3989, %v3928_v6  }
 0x7fb   : > { %3057 = vperm.xlu1 %3990, %v3931_v7   ;;  %3053 = vperm.xlu0 %3989, %v3930_v8  }
 0x7ff   : > { %3065 = vperm.xlu1 %3990, %v3933_v16   ;;  %3061 = vperm.xlu0 %3989, %v3932_v25  }
 0x855   : > { %v2958_v17 = vpop.permute.xlu1 %2957  ;;  %v2956_v29 = vpop.permute.xlu0 %2955 }
 0x856   : > { %v5492_v21 = vadd.f32 %v2958_v17, %v5427_v63  ;;  %v5495_v43 = vadd.f32 %v2956_v29, %v5429_v0 }
 0x859   : > { %v2962_v23 = vpop.permute.xlu1 %2961  ;;  %v2960_v24 = vpop.permute.xlu0 %2959 }
 0x85a   : > { %v5498_v30 = vadd.f32 %v2962_v23, %v5443_v35  ;;  %v5501_v31 = vadd.f32 %v2960_v24, %v5445_v36 }
 0x85d   : > { %v2966_v59 = vpop.permute.xlu1 %2965  ;;  %v2964_v61 = vpop.permute.xlu0 %2963 }
 0x85e   : > { %v5503_v32 = vadd.f32 %v2966_v59, %v2855_v45  ;;  %v5505_v33 = vadd.f32 %v2964_v61, %v2854_v18 }
 0x861   : > { %v2970_v34 = vpop.permute.xlu1 %2969  ;;  %v2968_v63 = vpop.permute.xlu0 %2967 }
 0x862   : > { %v5507_v37 = vadd.f32 %v2970_v34, %v2857_v28  ;;  %v5509_v0 = vadd.f32 %v2968_v63, %v2856_v11  ;;  %v3948_v28 = vld [vmem:[%s5686_s1 + $0xce] ss:$0 sm:$0xff]  ;;  %v3947_v11 = vld [vmem:[%s5686_s1 + $0xcd] ss:$0 sm:$0xff] }
 0x86e   : > { %v3042_v38 = vpop.permute.xlu1 %3041  ;;  %v3038_v39 = vpop.permute.xlu0 %3037 }
 0x86f   : > { %v3069_v35 = vmul.f32 %v3042_v38, %v5919_v27  ;;  %v3068_v40 = vmul.f32 %v3038_v39, %v5919_v27 }
 0x871   : > { %3086 = vrot.lane.b32.xlu1 %v3069_v35, %s4006_s4  ;;  %3084 = vrot.lane.b32.xlu0 %v3068_v40, %s4006_s4 }
 0x872   : > { %v3050_v36 = vpop.permute.xlu1 %3049  ;;  %v3046_v13 = vpop.permute.xlu0 %3045 }
 0x873   : > { %v3071_v41 = vmul.f32 %v3050_v36, %v5919_v27  ;;  %v3070_v14 = vmul.f32 %v3046_v13, %v5919_v27 }
 0x875   : > { %3090 = vrot.lane.b32.xlu1 %v3071_v41, %s4006_s4  ;;  %3088 = vrot.lane.b32.xlu0 %v3070_v14, %s4006_s4 }
 0x876   : > { %v3058_v42 = vpop.permute.xlu1 %3057  ;;  %v3054_v15 = vpop.permute.xlu0 %3053 }
 0x877   : > { %v3073_v44 = vmul.f32 %v3058_v42, %v5919_v27  ;;  %v3072_v45 = vmul.f32 %v3054_v15, %v5919_v27 }
 0x879   : > { %3094 = vrot.lane.b32.xlu1 %v3073_v44, %s4006_s4  ;;  %3092 = vrot.lane.b32.xlu0 %v3072_v45, %s4006_s4 }
 0x87a   : > { %v3062_v18 = vpop.permute.xlu0 %3061  ;;  %v3066_v20 = vpop.permute.xlu1 %3065 }
 0x87b   : > { %v3074_v47 = vmul.f32 %v3062_v18, %v5919_v27  ;;  %v3075_v58 = vmul.f32 %v3066_v20, %v5919_v27  ;;  %v3968_v27 = vld [vmem:[%s5687_s2 + $0x2] ss:$0 sm:$0xff] }
 0x87d   : > { %3166 = vperm.xlu1 %3990, %v3942_v46   ;;  %3096 = vrot.lane.b32.xlu0 %v3074_v47, %s4006_s4 }
 0x881   : > { %3174 = vperm.xlu1 %3990, %v3944_v19   ;;  %3170 = vperm.xlu0 %3989, %v3943_v48  }
 0x885   : > { %3182 = vperm.xlu1 %3990, %v3946_v22   ;;  %3178 = vperm.xlu0 %3989, %v3945_v10  }
 0x889   : > { %3190 = vperm.xlu1 %3990, %v3948_v28   ;;  %3186 = vperm.xlu0 %3989, %v3947_v11  }
 0x88d   : > { %3295 = vperm.xlu1 %3990, %v3958_v9   ;;  %3194 = vperm.xlu0 %3989, %v3949_v12  }
 0x891   : > { %3303 = vperm.xlu1 %3990, %v3960_v50   ;;  %3299 = vperm.xlu0 %3989, %v3959_v51  }
 0x895   : > { %3311 = vperm.xlu1 %3990, %v3962_v52   ;;  %3307 = vperm.xlu0 %3989, %v3961_v53  }
 0x899   : > { %3319 = vperm.xlu1 %3990, %v3964_v55   ;;  %3315 = vperm.xlu0 %3989, %v3963_v56  }
 0x89d   : > { %3098 = vrot.lane.b32.xlu1 %v3075_v58, %s4006_s4  ;;  %3323 = vperm.xlu0 %3989, %v3965_v57  }
 0x8a1   : > { %3427 = vperm.xlu1 %3990, %v3967_v60   ;;  %3423 = vperm.xlu0 %3989, %v3966_v62  }
 0x8a5   : > { %3435 = vperm.xlu1 %3990, %v3969_v26   ;;  %3431 = vperm.xlu0 %3989, %v3968_v27  }
 0x8a9   : > { %3443 = vperm.xlu1 %3990, %v3971_v1   ;;  %3439 = vperm.xlu0 %3989, %v3970_v2  }
 0x8ad   : > { %3451 = vperm.xlu1 %3990, %v3973_v3   ;;  %3447 = vperm.xlu0 %3989, %v3972_v4  }
 0x8e3   : > { %v3087_v5 = vpop.permute.xlu1 %3086  ;;  %v3085_v6 = vpop.permute.xlu0 %3084 }
 0x8e4   : > { %v5600_v7 = vadd.f32 %v3087_v5, %v5492_v21  ;;  %v5603_v8 = vadd.f32 %v3085_v6, %v5495_v43 }
 0x8e7   : > { %v3091_v16 = vpop.permute.xlu1 %3090  ;;  %v3089_v25 = vpop.permute.xlu0 %3088 }
 0x8e8   : > { %v5606_v17 = vadd.f32 %v3091_v16, %v5498_v30  ;;  %v5609_v29 = vadd.f32 %v3089_v25, %v5501_v31 }
 0x8eb   : > { %v3095_v23 = vpop.permute.xlu1 %3094  ;;  %v3093_v24 = vpop.permute.xlu0 %3092 }
 0x8ec   : > { %v5612_v59 = vadd.f32 %v3095_v23, %v5503_v32  ;;  %v5615_v61 = vadd.f32 %v3093_v24, %v5505_v33 }
 0x8ef   : > { %v3097_v21 = vpop.permute.xlu0 %3096 }
 0x8f0   : > { %v5618_v43 = vadd.f32 %v3097_v21, %v5509_v0 }
 0x8f8   : > { %v3167_v34 = vpop.permute.xlu1 %3166 }
 0x8f9   : > { %v3197_v63 = vmul.f32 %v3167_v34, %v5928_v54 }
 0x8fb   : > { %3213 = vrot.lane.b32.xlu0 %v3197_v63, %s4006_s4 }
 0x8fc   : > { %v3175_v30 = vpop.permute.xlu1 %3174  ;;  %v3171_v31 = vpop.permute.xlu0 %3170 }
 0x8fd   : > { %v3199_v38 = vmul.f32 %v3175_v30, %v5928_v54  ;;  %v3198_v39 = vmul.f32 %v3171_v31, %v5928_v54 }
 0x8ff   : > { %3217 = vrot.lane.b32.xlu0 %v3199_v38, %s4006_s4  ;;  %3215 = vrot.lane.b32.xlu1 %v3198_v39, %s4006_s4 }
 0x900   : > { %v3183_v32 = vpop.permute.xlu1 %3182  ;;  %v3179_v33 = vpop.permute.xlu0 %3178 }
 0x901   : > { %v3201_v0 = vmul.f32 %v3183_v32, %v5928_v54  ;;  %v3200_v35 = vmul.f32 %v3179_v33, %v5928_v54 }
 0x903   : > { %3221 = vrot.lane.b32.xlu0 %v3201_v0, %s4006_s4  ;;  %3219 = vrot.lane.b32.xlu1 %v3200_v35, %s4006_s4 }
 0x904   : > { %v3191_v40 = vpop.permute.xlu1 %3190  ;;  %v3187_v36 = vpop.permute.xlu0 %3186 }
 0x905   : > { %v3203_v13 = vmul.f32 %v3191_v40, %v5928_v54  ;;  %v3202_v41 = vmul.f32 %v3187_v36, %v5928_v54 }
 0x907   : > { %3225 = vrot.lane.b32.xlu0 %v3203_v13, %s4006_s4  ;;  %3223 = vrot.lane.b32.xlu1 %v3202_v41, %s4006_s4 }
 0x908   : > { %v3296_v14 = vpop.permute.xlu1 %3295  ;;  %v3195_v42 = vpop.permute.xlu0 %3194 }
 0x909   : > { %v3326_v15 = vmul.f32 %v3296_v14, %v5379_v49  ;;  %v3204_v44 = vmul.f32 %v3195_v42, %v5928_v54 }
 0x90b   : > { %3342 = vrot.lane.b32.xlu0 %v3326_v15, %s4006_s4  ;;  %3227 = vrot.lane.b32.xlu1 %v3204_v44, %s4006_s4 }
 0x90c   : > { %v3304_v45 = vpop.permute.xlu1 %3303  ;;  %v3300_v18 = vpop.permute.xlu0 %3299 }
 0x90d   : > { %v3328_v46 = vmul.f32 %v3304_v45, %v5379_v49  ;;  %v3327_v47 = vmul.f32 %v3300_v18, %v5379_v49 }
 0x90f   : > { %3346 = vrot.lane.b32.xlu0 %v3328_v46, %s4006_s4  ;;  %3344 = vrot.lane.b32.xlu1 %v3327_v47, %s4006_s4 }
 0x910   : > { %v3312_v19 = vpop.permute.xlu1 %3311  ;;  %v3308_v48 = vpop.permute.xlu0 %3307 }
 0x911   : > { %v3330_v22 = vmul.f32 %v3312_v19, %v5379_v49  ;;  %v3329_v54 = vmul.f32 %v3308_v48, %v5379_v49 }
 0x913   : > { %3350 = vrot.lane.b32.xlu0 %v3330_v22, %s4006_s4  ;;  %3348 = vrot.lane.b32.xlu1 %v3329_v54, %s4006_s4 }
 0x914   : > { %v3320_v10 = vpop.permute.xlu1 %3319  ;;  %v3316_v28 = vpop.permute.xlu0 %3315 }
 0x915   : > { %v3332_v11 = vmul.f32 %v3320_v10, %v5379_v49  ;;  %v3331_v9 = vmul.f32 %v3316_v28, %v5379_v49 }
 0x917   : > { %3354 = vrot.lane.b32.xlu0 %v3332_v11, %s4006_s4  ;;  %3352 = vrot.lane.b32.xlu1 %v3331_v9, %s4006_s4 }
 0x918   : > { %v3324_v12 = vpop.permute.xlu0 %3323  ;;  %v3099_v51 = vpop.permute.xlu1 %3098 }
 0x919   : > { %v3333_v50 = vmul.f32 %v3324_v12, %v5379_v49  ;;  %v3115_v41 = vadd.f32 %v3099_v51, %v5507_v37 }
 0x91b   : > { %3356 = vrot.lane.b32.xlu1 %v3333_v50, %s4006_s4  ;;  %s3976_s4 = sshll.u32 %s5968_s13, 6 }
 0x91c   : > { %v3424_v52 = vpop.permute.xlu0 %3423  ;;  %v3428_v53 = vpop.permute.xlu1 %3427  ;;  %s5659_s7 = scalar_lea.vmem %s5688_s3, %s3976_s4 }
 0x920   : > { %v3432_v55 = vpop.permute.xlu0 %3431  ;;  %v3436_v56 = vpop.permute.xlu1 %3435 }
 0x924   : > { %v3440_v20 = vpop.permute.xlu0 %3439  ;;  %v3444_v57 = vpop.permute.xlu1 %3443 }
 0x928   : > { %v3448_v58 = vpop.permute.xlu0 %3447  ;;  %v3452_v60 = vpop.permute.xlu1 %3451 }
 0x96d   : > { %v3214_v62 = vpop.permute.xlu0 %3213 }
 0x96e   : > { %v3237_v49 = vadd.f32 %v3214_v62, %v5603_v8 }
 0x971   : > { %v3216_v26 = vpop.permute.xlu1 %3215  ;;  %v3218_v27 = vpop.permute.xlu0 %3217 }
 0x972   : > { %v3238_v25 = vadd.f32 %v3216_v26, %v5600_v7  ;;  %v3239_v23 = vadd.f32 %v3218_v27, %v5609_v29 }
 0x975   : > { %v3220_v1 = vpop.permute.xlu1 %3219  ;;  %v3222_v2 = vpop.permute.xlu0 %3221 }
 0x976   : > { %v3240_v31 = vadd.f32 %v3220_v1, %v5606_v17  ;;  %v3241_v7 = vadd.f32 %v3222_v2, %v5615_v61 }
 0x979   : > { %v3224_v3 = vpop.permute.xlu1 %3223  ;;  %v3226_v4 = vpop.permute.xlu0 %3225 }
 0x97a   : > { %v3242_v36 = vadd.f32 %v3224_v3, %v5612_v59  ;;  %v3243_v13 = vadd.f32 %v3226_v4, %v5618_v43 }
 0x97d   : > { %v3228_v5 = vpop.permute.xlu1 %3227  ;;  %v3343_v6 = vpop.permute.xlu0 %3342 }
 0x97e   : > { %v3366_v16 = vadd.f32 %v3343_v6, %v3237_v49  ;;  %v3244_v59 = vadd.f32 %v3228_v5, %v3115_v41 }
 0x980   : > { %v3454_v24 = vadd.f32 %v3424_v52, %v3366_v16 }
 0x981   : > { %v3345_v21 = vpop.permute.xlu1 %3344  ;;  %v3347_v34 = vpop.permute.xlu0 %3346 }
 0x982   : > { %v3462_v63 = vmax.f32 %v3454_v24, 0.0  ;;  %v3367_v8 = vadd.f32 %v3345_v21, %v3238_v25  ;;  %v3368_v30 = vadd.f32 %v3347_v34, %v3239_v23 }
 0x984   : > { %3471 = vst.msk [vmem:[%s5659_s7] sm:$0xff] %vm3470_vm0, %v3462_v63  ;;  %v3455_v29 = vadd.f32 %v3428_v53, %v3367_v8  ;;  %v3456_v38 = vadd.f32 %v3432_v55, %v3368_v30 }
 0x985   : > { %v3349_v39 = vpop.permute.xlu1 %3348  ;;  %v3351_v32 = vpop.permute.xlu0 %3350 }
 0x986   : > { %v3463_v33 = vmax.f32 %v3455_v29, 0.0  ;;  %v3464_v0 = vmax.f32 %v3456_v38, 0.0  ;;  %v3369_v35 = vadd.f32 %v3349_v39, %v3240_v31  ;;  %v3370_v40 = vadd.f32 %v3351_v32, %v3241_v7 }
 0x988   : > { %3472 = vst.msk [vmem:[%s5659_s7 + $0x8] sm:$0xff] %vm3470_vm0, %v3463_v33  ;;  %3473 = vst.msk [vmem:[%s5659_s7 + $0x10] sm:$0xff] %vm3470_vm0, %v3464_v0  ;;  %v3457_v17 = vadd.f32 %v3436_v56, %v3369_v35  ;;  %v3458_v61 = vadd.f32 %v3440_v20, %v3370_v40 }
 0x989   : > { %v3353_v14 = vpop.permute.xlu1 %3352  ;;  %v3355_v42 = vpop.permute.xlu0 %3354 }
 0x98a   : > { %v3465_v15 = vmax.f32 %v3457_v17, 0.0  ;;  %v3466_v44 = vmax.f32 %v3458_v61, 0.0  ;;  %v3371_v45 = vadd.f32 %v3353_v14, %v3242_v36  ;;  %v3372_v18 = vadd.f32 %v3355_v42, %v3243_v13 }
 0x98c   : > { %3474 = vst.msk [vmem:[%s5659_s7 + $0x18] sm:$0xff] %vm3470_vm0, %v3465_v15  ;;  %3475 = vst.msk [vmem:[%s5659_s7 + $0x20] sm:$0xff] %vm3470_vm0, %v3466_v44  ;;  %v3459_v43 = vadd.f32 %v3444_v57, %v3371_v45  ;;  %v3460_v46 = vadd.f32 %v3448_v58, %v3372_v18 }
 0x98d   : > { %v3357_v47 = vpop.permute.xlu1 %3356 }
 0x98e   : > { %v3467_v19 = vmax.f32 %v3459_v43, 0.0  ;;  %v3468_v48 = vmax.f32 %v3460_v46, 0.0  ;;  %v3373_v37 = vadd.f32 %v3357_v47, %v3244_v59 }
 0x990   : > { %3476 = vst.msk [vmem:[%s5659_s7 + $0x28] sm:$0xff] %vm3470_vm0, %v3467_v19  ;;  %3477 = vst.msk [vmem:[%s5659_s7 + $0x30] sm:$0xff] %vm3470_vm0, %v3468_v48  ;;  %v3461_v22 = vadd.f32 %v3452_v60, %v3373_v37 }
 0x992   : > { %v3469_v54 = vmax.f32 %v3461_v22, 0.0 }
 0x994   : > { %3478 = vst.msk [vmem:[%s5659_s7 + $0x38] sm:$0xff] %vm3470_vm0, %v3469_v54 }
 0x995 PF: > { %s13_s12 = sadd.s32 1, %s4002_s12  }
 0x996   : > { %p10_p4 = scmp.ge.s32.totalorder %s13_s12, 6  }
 0x998   :  { %12 = sbr.rel (!%p10_p4) target bundleno = 1 (0x1), region = 88 }

// kernel: depth_model_forward.3
= control target key start
LH: loop header
LB: loop body
LE: loop exit
PB: predicated region body
PF: predicated region fallthrough
CT: control target
= control target key end

     0   :  { %s2872_s20 = smov 0   ;;  %s2874_s21 = smov 0   ;;  %s3470_s0 = inlined_call_operand.vmem [shape: bf16[2,2,64,64], index: 0, kind: input, shape index: {}]   ;;  %s3471_s1 = inlined_call_operand.vmem [shape: bf16[32,18], index: 1, kind: input, shape index: {}]   ;;  %s3472_s2 = inlined_call_operand.vmem [shape: f32[32,1], index: 2, kind: input, shape index: {}]   ;;  %s3473_s3 = inlined_call_operand.vmem [shape: f32[8,1], index: 3, kind: input, shape index: {}]   ;;  %s3474_s4 = inlined_call_operand.<no memory space> [shape: f32[1,1], index: 4, kind: input, shape index: {}]   ;;  %s3475_s5 = inlined_call_operand.vmem [shape: f32[2,2,8,64], index: 5, kind: output, shape index: {}]  }
   0x1   :  { %v10_v0 = vstv %s3474_s4  ;;  %s2876_s22 = smov 0  }
   0x2   :  { %11 = vst [vmem:[#allocation2] sm:$0x1] %v10_v0 }
   0x3 LB: > { %s29_s4 = sadd.s32 1, %s2832_s21  ;;  %p2225_p0 = scmp.ge.s32.totalorder %s2836_s22, 1  ;;  %s2836_s22 = sphi %s2876_s22, %s17_s22   ;;  %s2832_s21 = sphi %s2874_s21, %s3479_s21   ;;  %s2828_s20 = sphi %s2872_s20, %s3478_s20  }
   0x4   : > { %p31_p1 = scmp.ge.s32.totalorder %s29_s4, 2  ;;  %p208_p2 = scmp.lt.s32.totalorder %s2836_s22, 3 }
   0x6   : > { %s3481_s4 = smov (%p31_p1, %s29_s4), 0  ;;  %p209_p3 = pnand %p2225_p0, %p208_p2 }
   0x7   : > { %p242_p4 = scmp.lt.s32.totalorder (!%p209_p3), %s2828_s20, 1 }
   0x8   : > { %212 = sbr.rel (%p209_p3) target bundleno = 3772 (0xebc), region = 40 }
   0xd   : > { %vm458_vm0 = vcmask 146432   ;;  %s3483_s20 = smov (!%p242_p4, %s2828_s20), 1  ;;  %v2895_v1 = vld [vmem:[%s3471_s1] sm:$0xff]   ;;  %v2838_v2 = vmov 0   ;;  %v402_v4 = vld [vmem:[%s3472_s2 + $0x10] sm:$0xff]  ;;  %v401_v5 = vld [vmem:[%s3472_s2 + $0x8] sm:$0xff] }
   0xe   : > { %2543 = vset.pattern.permute.xlu0 %v2838_v2  ;;  %2544 = vset.pattern.permute.xlu1 %v2838_v2  ;;  %v400_v3 = vld [vmem:[%s3472_s2] sm:$0xff]  ;;  %s2314_s27 = sshll.u32 %s3483_s20, 6  ;;  %v403_v8 = vld [vmem:[%s3472_s2 + $0x18] sm:$0xff]  ;;  %vm324_vm1 = vcmask 523264   ;;  %vm419_vm2 = vcmask 1044480   ;;  %vm414_vm4 = vcmask 1043456  }
   0xf   : > { %2380 = vmatprep.mubr.msk.bf16.mxu0 %vm458_vm0, %v2895_v1  ;;  %430 = vperm.xlu0 %2543, %v400_v3   ;;  %s2909_s7 = scalar_lea.vmem %s3470_s0, %s2314_s27  ;;  %v404_v12 = vld [vmem:[%s3473_s3] sm:$0xff]  ;;  %vm420_vm3 = vsmask.f32 4352  ;;  %v2944_v38 = vld [vmem:[%s3471_s1 + $0x8] sm:$0xff]   ;;  %vm465_vm6 = vcmask 1040384   ;;  %vm1293_vm7 = vcmask 1041408  }
  0x10   : > { %440 = vperm.xlu1 %2544, %v402_v4   ;;  %2388 = vmatprep.mubr.msk.bf16.mxu1 %vm458_vm0, %v2895_v1  ;;  %v259_v6 = vld [vmem:[%s2909_s7] sm:$0xf]  ;;  %vm2931_vm5 = vmand %vm419_vm2, %vm420_vm3  ;;  %v2951_v39 = vld [vmem:[%s2909_s7 + $0x4] sm:$0xf]  ;;  %vm1295_vm8 = vcmask 1042432   ;;  %vm1299_vm9 = vcmask 1045504  }
  0x11   : > { %v267_v7 = vld [vmem:[%s2909_s7 + $0x20] sm:$0xf]  ;;  %v275_v9 = vunpack.c.l.bf16 %v259_v6  ;;  %v268_v40 = vld [vmem:[%s2909_s7 + $0x24] sm:$0xf]  ;;  %v276_v41 = vunpack.c.l.bf16 %v2951_v39  ;;  %s2315_s23 = sshll.u32 %s3483_s20, 4  ;;  %vm1301_vm10 = vcmask 1046528  }
  0x12   : > { %v283_v10 = vunpack.c.l.bf16 %v267_v7  ;;  %v405_v13 = vld [vmem:[#allocation2] sm:$0x1]  ;;  %v284_v42 = vunpack.c.l.bf16 %v268_v40  ;;  %s3297_s26 = scalar_lea.vmem %s3475_s5, %s2315_s23  ;;  %v2813_v34 = vld [vmem:[%s3471_s1 + $0x8] sm:$0xff]  }
  0x13   : > { %435 = vperm.xlu0 %2543, %v401_v5  }
  0x14   : > { %v291_v11 = vadd.f32 %v283_v10, %v275_v9  ;;  %445 = vperm.xlu1 %2544, %v403_v8   ;;  %v292_v43 = vadd.f32 %v284_v42, %v276_v41 }
  0x16   : > { %v299_v14 = vmul.f32 0.5, %v291_v11  ;;  %v300_v44 = vmul.f32 0.5, %v292_v43 }
  0x17   : > { %543 = vperm.xlu0 %2543, %v404_v12  }
  0x18   : > { %v307_v15 = vmul.f32 %v299_v14, %v275_v9  ;;  %v2924_v16 = vmul.f32 %v299_v14, %v283_v10  ;;  %v323_v17 = vmul.f32 %v299_v14, %v299_v14  ;;  %556 = vperm.xlu1 %2544, %v405_v13   ;;  %v2955_v45 = vmul.f32 %v300_v44, %v284_v42  ;;  %v269_v42 = vld [vmem:[%s2909_s7 + $0x28] sm:$0xf] }
  0x19   : > { %v308_v0 = vmul.f32 %v300_v44, %v276_v41  ;;  %v333_v3 = vmul.f32 %v300_v44, %v300_v44  ;;  %v285_v44 = vunpack.c.l.bf16 %v269_v42 }
  0x1a   : > { %v325_v18 = vsel %vm324_vm1, %v323_v17, 0.0  ;;  %v406_v19 = vsel %vm324_vm1, %v307_v15, 0.0 }
  0x1b   : > { %v326_v20 = vrot.slane %v325_v18, 4  ;;  %v407_v21 = vrot.slane %v406_v19, 4  ;;  %v564_v4 = vsel %vm324_vm1, %v308_v0, 0.0  ;;  %v334_v5 = vsel %vm324_vm1, %v333_v3, 0.0 }
  0x1c   : > { %v335_v7 = vrot.slane %v334_v5, 4 }
  0x1d   : > { %v327_v22 = vadd.f32 %v326_v20, %v325_v18  ;;  %v408_v23 = vadd.f32 %v407_v21, %v406_v19 }
  0x1e   : > { %v336_v11 = vadd.f32 %v335_v7, %v334_v5 }
  0x1f   : > { %v328_v24 = vrot.slane %v327_v22, 2  ;;  %v409_v25 = vrot.slane %v408_v23, 2 }
  0x20   : > { %v337_v19 = vrot.slane %v336_v11, 2 }
  0x21   : > { %v329_v26 = vadd.f32 %v328_v24, %v327_v22  ;;  %v410_v27 = vadd.f32 %v409_v25, %v408_v23 }
  0x22   : > { %v338_v22 = vadd.f32 %v337_v19, %v336_v11 }
  0x23   : > { %v330_v28 = vrot.slane %v329_v26, 1  ;;  %v411_v29 = vrot.slane %v410_v27, 1 }
  0x24   : > { %v339_v24 = vrot.slane %v338_v22, 1 }
  0x25   : > { %v331_v30 = vadd.f32 %v330_v28, %v329_v26  ;;  %v412_v31 = vadd.f32 %v411_v29, %v410_v27 }
  0x26   : > { %v340_v26 = vadd.f32 %v339_v24, %v338_v22 }
  0x27   : > { %v2928_v32 = vpack.c.bf16 %v331_v30, %v331_v30  ;;  %v413_v33 = vpack.c.bf16 %v412_v31, %v412_v31 }
  0x28   : > { %v2974_v30 = vpack.c.bf16 %v340_v26, %v340_v26 }
  0x29   : > { %v417_v35 = vsel %vm414_vm4, %v259_v6, %v413_v33  ;;  %v565_v6 = vrot.slane %v564_v4, 4 }
  0x2a   : > { %v422_v36 = vsel %vm2931_vm5, %v417_v35, %v2928_v32 }
  0x2b   : > { %2502 = vmatprep.subr.msk.bf16.mxu0 %vm419_vm2, %v422_v36  ;;  %v426_v37 = vsel %vm419_vm2, %v422_v36, 0  ;;  %v566_v8 = vadd.f32 %v565_v6, %v564_v4 }
  0x2c   : > { %2379 = vmatpush3.bf16.msra.mxu0 %v426_v37 }
  0x2d   : > { %v567_v13 = vrot.slane %v566_v8, 2 }
  0x2f   : > { %2381 = vmatmul.mubr.msk.bf16.vlgmr.msra.gmra.mxu0 %vm458_vm0, %v2944_v38  ;;  %v568_v21 = vadd.f32 %v567_v13, %v566_v8 }
  0x30   : > { %2396 = vmatprep.mubr.msk.bf16.mxu0 %vm458_vm0, %v2895_v1 }
  0x31   : > { %v569_v23 = vrot.slane %v568_v21, 1 }
  0x33   : > { %v570_v25 = vadd.f32 %v569_v23, %v568_v21 }
  0x35   : > { %v571_v27 = vpack.c.bf16 %v570_v25, %v570_v25 }
  0x37   : > { %v577_v33 = vsel %vm414_vm4, %v2951_v39, %v571_v27  ;;  %v2993_v39 = vld [vmem:[%s2909_s7 + $0x8] sm:$0xf] }
  0x38   : > { %v579_v36 = vsel %vm2931_vm5, %v577_v33, %v2974_v30  ;;  %v277_v43 = vunpack.c.l.bf16 %v2993_v39 }
  0x8a   : > { %v2957_v46 = vpop.permute.xlu0 %430 }
  0x8b   : > { %v2963_v56 = vpop.permute.xlu1 %440 }
  0x8e   : > { %v2960_v52 = vpop.permute.xlu0 %435 }
  0x8f   : > { %v2966_v58 = vpop.permute.xlu1 %445 }
  0x92   : > { %v3008_v26 = vpop.permute.xlu0 %543 }
  0xef   : > { %v2382_v47 = vpop.f32.mrf.mxu0 }
  0xf0   : > { %v511_v57 = vadd.f32 %v2382_v47, %v2963_v56  ;;  %v293_v47 = vadd.f32 %v285_v44, %v277_v43 }
  0xf1   : > { %v502_v48 = vpop.f32.mrf.mxu0 }
  0xf2   : > { %v503_v49 = vadd.f32 %v502_v48, %v2957_v46  ;;  %v2236_v60 = vmul.f32 -1.442695, %v511_v57  ;;  %v301_v48 = vmul.f32 0.5, %v293_v47 }
  0xf3   : > { %v2383_v50 = vpop.f32.mrf.mxu0 }
  0xf4   : > { %v2235_v51 = vmul.f32 -1.442695, %v503_v49  ;;  %v514_v62 = vadd.f32 %v2383_v50, %v2966_v58  ;;  %v2997_v49 = vmul.f32 %v301_v48, %v285_v44  ;;  %v309_v4 = vmul.f32 %v301_v48, %v277_v43 }
  0xf5   : > { %v505_v53 = vpop.f32.mrf.mxu0  ;;  %v342_v6 = vmul.f32 %v301_v48, %v301_v48 }
  0xf6   : > { %2547 = vpow2.f32 %v2235_v51  ;;  %v506_v54 = vadd.f32 %v505_v53, %v2960_v52  ;;  %v668_v7 = vsel %vm324_vm1, %v309_v4, 0.0 }
  0xf7   : > { %v343_v8 = vsel %vm324_vm1, %v342_v6, 0.0 }
  0xf8   : > { %v2234_v55 = vmul.f32 -1.442695, %v506_v54 }
  0xfa   : > { %2549 = vpow2.f32 %v2234_v55 }
  0xfb   : > { %2551 = vpow2.f32 %v2236_v60 }
 0x103   : > { %v2548_v59 = vpop.eup %2547 }
 0x104   : > { %v527_v61 = vadd.f32 1.0, %v2548_v59 }
 0x106   : > { %2553 = vrcp.f32 %v527_v61 }
 0x107   : > { %v2550_v63 = vpop.eup %2549  ;;  %2555 = vtanh.f32 %v514_v62 }
 0x108   : > { %v520_v2 = vadd.f32 1.0, %v2550_v63  ;;  %v2552_v9 = vpop.eup %2551 }
 0x109   : > { %v536_v15 = vadd.f32 1.0, %v2552_v9  ;;  %v669_v9 = vrot.slane %v668_v7, 4 }
 0x10a   : > { %2557 = vrcp.f32 %v520_v2 }
 0x10b   : > { %2559 = vrcp.f32 %v536_v15  ;;  %v670_v11 = vadd.f32 %v669_v9, %v668_v7 }
 0x113   : > { %v2554_v10 = vpop.eup %2553 }
 0x114   : > { %v2556_v12 = vpop.eup %2555 }
 0x115   : > { %v531_v18 = vmul.f32 %v2556_v12, %v2554_v10  ;;  %v344_v10 = vrot.slane %v343_v8, 4 }
 0x117   : > { %v2558_v14 = vpop.eup %2557 }
 0x118   : > { %v523_v17 = vmul.f32 0.0, %v2558_v14  ;;  %v2560_v28 = vpop.eup %2559  ;;  %v345_v14 = vadd.f32 %v344_v10, %v343_v8 }
 0x11a   : > { %v2971_v20 = vadd.f32 %v531_v18, %v523_v17  ;;  %v671_v17 = vrot.slane %v670_v11, 2  ;;  %v346_v23 = vrot.slane %v345_v14, 2 }
 0x11c   : > { %2561 = vtanh.f32 %v2971_v20  ;;  %v672_v25 = vadd.f32 %v671_v17, %v670_v11 }
 0x129   : > { %v2562_v29 = vpop.eup %2561 }
 0x12a   : > { %v2976_v31 = vmul.f32 %v2562_v29, %v2560_v28  ;;  %v347_v28 = vadd.f32 %v346_v23, %v345_v14  ;;  %v673_v29 = vrot.slane %v672_v25, 1  ;;  %v270_v14 = vld [vmem:[%s2909_s7 + $0x2c] sm:$0xf] }
 0x12b   : > { %v286_v17 = vunpack.c.l.bf16 %v270_v14 }
 0x12c   : > { %v572_v35 = vpack.c.bf16 %v2976_v31, %v2976_v31  ;;  %v546_v27 = vmul.f32 %v3008_v26, %v2976_v31 }
 0x12e   : > { %v574_v37 = vrot.slane %v572_v35, 3  ;;  %v547_v33 = vsel %vm324_vm1, %v546_v27, 0.0  ;;  %v348_v35 = vrot.slane %v347_v28, 1 }
 0x130   : > { %2503 = vmatprep.subr.msk.bf16.mxu1 %vm465_vm6, %v574_v37  ;;  %v584_v40 = vsel %vm465_vm6, %v574_v37, 0  ;;  %v582_v41 = vsel %vm419_vm2, %v579_v36, %v574_v37  ;;  %v674_v36 = vadd.f32 %v673_v29, %v672_v25  ;;  %v548_v37 = vrot.slane %v547_v33, 4 }
 0x131   : > { %2385 = vmatpush3.bf16.msra.mxu1 %v584_v40 }
 0x132   : > { %2386 = vmatprep.subr.bf16.mxu1 %v582_v41  ;;  %v675_v40 = vpack.c.bf16 %v674_v36, %v674_v36 }
 0x134   : > { %v681_v31 = vsel %vm414_vm4, %v2993_v39, %v675_v40 }
 0x135   : > { %2387 = vmatpush3.bf16.msra.mxu1 %v582_v41  ;;  %v549_v41 = vadd.f32 %v548_v37, %v547_v33 }
 0x137   : > { %v550_v48 = vrot.slane %v549_v41, 2 }
 0x138   : > { %2389 = vmatmul.mubr.msk.bf16.vlgmr.msra.gmra.mxu1 %vm458_vm0, %v2944_v38 }
 0x139   : > { %2404 = vmatprep.mubr.msk.bf16.mxu1 %vm458_vm0, %v2895_v1 }
 0x1f8   : > { %v2390_v50 = vpop.f32.mrf.mxu1 }
 0x1f9   : > { %v629_v61 = vadd.f32 %v2390_v50, %v2963_v56 }
 0x1fa   : > { %v620_v51 = vpop.f32.mrf.mxu1 }
 0x1fb   : > { %v621_v53 = vadd.f32 %v620_v51, %v2957_v46  ;;  %v2241_v63 = vmul.f32 -1.442695, %v629_v61 }
 0x1fc   : > { %v2391_v54 = vpop.f32.mrf.mxu1 }
 0x1fd   : > { %v2240_v55 = vmul.f32 -1.442695, %v621_v53  ;;  %v632_v2 = vadd.f32 %v2391_v54, %v2966_v58  ;;  %v559_v53 = vlaneseq }
 0x1fe   : > { %v623_v57 = vpop.f32.mrf.mxu1 }
 0x1ff   : > { %2563 = vpow2.f32 %v2240_v55  ;;  %v624_v59 = vadd.f32 %v623_v57, %v2960_v52 }
 0x201   : > { %v2239_v60 = vmul.f32 -1.442695, %v624_v59  ;;  %v551_v59 = vadd.f32 %v550_v48, %v549_v41 }
 0x203   : > { %2565 = vpow2.f32 %v2239_v60 }
 0x204   : > { %2567 = vpow2.f32 %v2241_v63 }
 0x20c   : > { %v2564_v62 = vpop.eup %2563 }
 0x20d   : > { %v645_v0 = vadd.f32 1.0, %v2564_v62  ;;  %v560_v62 = vshrl.u32 %v559_v53, 7 }
 0x20f   : > { %2569 = vrcp.f32 %v645_v0  ;;  %v552_v0 = vrot.slane %v551_v59, 1 }
 0x210   : > { %v2566_v3 = vpop.eup %2565  ;;  %2571 = vtanh.f32 %v632_v2 }
 0x211   : > { %v638_v5 = vadd.f32 1.0, %v2566_v3  ;;  %v2568_v12 = vpop.eup %2567  ;;  %v561_v3 = vsub.s32 0, %v560_v62  ;;  %v553_v6 = vadd.f32 %v552_v0, %v551_v59 }
 0x212   : > { %v654_v19 = vadd.f32 1.0, %v2568_v12 }
 0x213   : > { %2573 = vrcp.f32 %v638_v5  ;;  %v557_v5 = vpop.permute.xlu1 %556 }
 0x214   : > { %2575 = vrcp.f32 %v654_v19  ;;  %v3028_v8 = vrot.slane %v557_v5, %v561_v3 }
 0x216   : > { %v563_v10 = vadd.f32 %v3028_v8, %v553_v6 }
 0x21c   : > { %v2570_v13 = vpop.eup %2569 }
 0x21d   : > { %v2572_v15 = vpop.eup %2571 }
 0x21e   : > { %v649_v21 = vmul.f32 %v2572_v15, %v2570_v13  ;;  %v262_v13 = vld [vmem:[%s2909_s7 + $0xc] sm:$0xf] }
 0x21f   : > { %v278_v15 = vunpack.c.l.bf16 %v262_v13 }
 0x220   : > { %v2574_v18 = vpop.eup %2573 }
 0x221   : > { %v641_v22 = vmul.f32 %v2574_v18, %v2971_v20  ;;  %v349_v20 = vadd.f32 %v348_v35, %v347_v28  ;;  %v2576_v42 = vpop.eup %2575  ;;  %v294_v18 = vadd.f32 %v286_v17, %v278_v15 }
 0x223   : > { %v3006_v24 = vadd.f32 %v649_v21, %v641_v22  ;;  %v3014_v44 = vpack.c.bf16 %v349_v20, %v349_v20  ;;  %v302_v19 = vmul.f32 0.5, %v294_v18 }
 0x225   : > { %2577 = vtanh.f32 %v3006_v24  ;;  %v683_v54 = vsel %vm2931_vm5, %v681_v31, %v3014_v44  ;;  %v3039_v21 = vmul.f32 %v302_v19, %v286_v17  ;;  %v351_v31 = vmul.f32 %v302_v19, %v302_v19 }
 0x232   : > { %v2578_v43 = vpop.eup %2577 }
 0x233   : > { %v658_v47 = vmul.f32 %v2578_v43, %v2576_v42  ;;  %v310_v43 = vmul.f32 %v302_v19, %v278_v15 }
 0x235   : > { %v659_v50 = vmul.f32 %v658_v47, %v3008_v26  ;;  %v676_v51 = vpack.c.bf16 %v658_v47, %v658_v47  ;;  %v772_v48 = vsel %vm324_vm1, %v310_v43, 0.0  ;;  %v271_v43 = vld [vmem:[%s2909_s7 + $0x30] sm:$0xf] }
 0x237   : > { %v660_v55 = vsel %vm324_vm1, %v659_v50, 0.0  ;;  %v678_v57 = vrot.slane %v676_v51, 3  ;;  %v352_v50 = vsel %vm324_vm1, %v351_v31, 0.0  ;;  %v773_v51 = vrot.slane %v772_v48, 4 }
 0x238   : > { %v661_v60 = vrot.slane %v660_v55, 4  ;;  %v353_v53 = vrot.slane %v352_v50, 4  ;;  %v287_v31 = vunpack.c.l.bf16 %v271_v43 }
 0x239   : > { %2504 = vmatprep.subr.msk.bf16.mxu0 %vm465_vm6, %v678_v57  ;;  %v688_v61 = vsel %vm465_vm6, %v678_v57, 0  ;;  %v686_v39 = vsel %vm419_vm2, %v683_v54, %v678_v57  ;;  %v774_v54 = vadd.f32 %v773_v51, %v772_v48 }
 0x23a   : > { %v662_v63 = vadd.f32 %v661_v60, %v660_v55  ;;  %2393 = vmatpush3.bf16.msra.mxu0 %v688_v61  ;;  %v354_v59 = vadd.f32 %v353_v53, %v352_v50 }
 0x23b   : > { %2394 = vmatprep.subr.bf16.mxu0 %v686_v39  ;;  %v775_v61 = vrot.slane %v774_v54, 2 }
 0x23c   : > { %v663_v2 = vrot.slane %v662_v63, 2 }
 0x23e   : > { %v664_v4 = vadd.f32 %v663_v2, %v662_v63  ;;  %2395 = vmatpush3.bf16.msra.mxu0 %v686_v39  ;;  %v355_v2 = vrot.slane %v354_v59, 2 }
 0x240   : > { %v665_v7 = vrot.slane %v664_v4, 1  ;;  %v356_v5 = vadd.f32 %v355_v2, %v354_v59 }
 0x241   : > { %2397 = vmatmul.mubr.msk.bf16.vlgmr.msra.gmra.mxu0 %vm458_vm0, %v2944_v38 }
 0x242   : > { %v666_v9 = vadd.f32 %v665_v7, %v664_v4  ;;  %2412 = vmatprep.mubr.msk.bf16.mxu0 %vm458_vm0, %v2895_v1  ;;  %v776_v4 = vadd.f32 %v775_v61, %v774_v54  ;;  %v357_v7 = vrot.slane %v356_v5, 1 }
 0x244   : > { %v667_v11 = vadd.f32 %v666_v9, %v3028_v8  ;;  %v777_v6 = vrot.slane %v776_v4, 1 }
 0x246   : > { %v3035_v12 = vsel %vm465_vm6, %v563_v10, %v667_v11  ;;  %v778_v9 = vadd.f32 %v777_v6, %v776_v4  ;;  %v358_v10 = vadd.f32 %v357_v7, %v356_v5 }
 0x248   : > { %v779_v11 = vpack.c.bf16 %v778_v9, %v778_v9  ;;  %v3051_v17 = vpack.c.bf16 %v358_v10, %v358_v10 }
 0x301   : > { %v2398_v22 = vpop.f32.mrf.mxu0 }
 0x302   : > { %v733_v36 = vadd.f32 %v2398_v22, %v2963_v56 }
 0x303   : > { %v724_v23 = vpop.f32.mrf.mxu0 }
 0x304   : > { %v725_v25 = vadd.f32 %v724_v23, %v2957_v46  ;;  %v2246_v20 = vmul.f32 -1.442695, %v733_v36 }
 0x305   : > { %v2399_v27 = vpop.f32.mrf.mxu0 }
 0x306   : > { %v2245_v28 = vmul.f32 -1.442695, %v725_v25  ;;  %v736_v41 = vadd.f32 %v2399_v27, %v2966_v58 }
 0x307   : > { %v727_v29 = vpop.f32.mrf.mxu0 }
 0x308   : > { %2579 = vpow2.f32 %v2245_v28  ;;  %v728_v33 = vadd.f32 %v727_v29, %v2960_v52 }
 0x30a   : > { %v2244_v35 = vmul.f32 -1.442695, %v728_v33 }
 0x30c   : > { %2581 = vpow2.f32 %v2244_v35 }
 0x30d   : > { %2583 = vpow2.f32 %v2246_v20 }
 0x315   : > { %v2580_v37 = vpop.eup %2579 }
 0x316   : > { %v749_v40 = vadd.f32 1.0, %v2580_v37 }
 0x318   : > { %2585 = vrcp.f32 %v749_v40 }
 0x319   : > { %v2582_v42 = vpop.eup %2581  ;;  %2587 = vtanh.f32 %v736_v41 }
 0x31a   : > { %v742_v47 = vadd.f32 1.0, %v2582_v42  ;;  %v2584_v55 = vpop.eup %2583  ;;  %v263_v42 = vld [vmem:[%s2909_s7 + $0x10] sm:$0xf] }
 0x31b   : > { %v758_v62 = vadd.f32 1.0, %v2584_v55 }
 0x31c   : > { %2589 = vrcp.f32 %v742_v47  ;;  %v279_v47 = vunpack.c.l.bf16 %v263_v42 }
 0x31d   : > { %2591 = vrcp.f32 %v758_v62 }
 0x31e   : > { %v295_v48 = vadd.f32 %v287_v31, %v279_v47 }
 0x320   : > { %v303_v50 = vmul.f32 0.5, %v295_v48 }
 0x322   : > { %v3073_v51 = vmul.f32 %v303_v50, %v287_v31  ;;  %v311_v5 = vmul.f32 %v303_v50, %v279_v47  ;;  %v360_v7 = vmul.f32 %v303_v50, %v303_v50 }
 0x324   : > { %v876_v9 = vsel %vm324_vm1, %v311_v5, 0.0  ;;  %v361_v10 = vsel %vm324_vm1, %v360_v7, 0.0  ;;  %v272_v7 = vld [vmem:[%s2909_s7 + $0x34] sm:$0xf] }
 0x325   : > { %v2586_v57 = vpop.eup %2585 }
 0x326   : > { %v2588_v60 = vpop.eup %2587 }
 0x327   : > { %v753_v63 = vmul.f32 %v2588_v60, %v2586_v57 }
 0x329   : > { %v2590_v39 = vpop.eup %2589 }
 0x32a   : > { %v745_v0 = vmul.f32 %v2590_v39, %v3006_v24  ;;  %v2592_v14 = vpop.eup %2591  ;;  %v785_v24 = vsel %vm414_vm4, %v262_v13, %v779_v11  ;;  %v877_v11 = vrot.slane %v876_v9, 4 }
 0x32b   : > { %v787_v23 = vsel %vm2931_vm5, %v785_v24, %v3051_v17 }
 0x32c   : > { %v3048_v3 = vadd.f32 %v753_v63, %v745_v0 }
 0x32e   : > { %2593 = vtanh.f32 %v3048_v3 }
 0x33b   : > { %v2594_v15 = vpop.eup %2593 }
 0x33c   : > { %v762_v18 = vmul.f32 %v2594_v15, %v2592_v14  ;;  %v362_v14 = vrot.slane %v361_v10, 4  ;;  %v878_v15 = vadd.f32 %v877_v11, %v876_v9 }
 0x33e   : > { %v763_v19 = vmul.f32 %v762_v18, %v3008_v26  ;;  %v780_v22 = vpack.c.bf16 %v762_v18, %v762_v18 }
 0x340   : > { %v764_v25 = vsel %vm324_vm1, %v763_v19, 0.0  ;;  %v782_v27 = vrot.slane %v780_v22, 3  ;;  %v363_v19 = vadd.f32 %v362_v14, %v361_v10  ;;  %v288_v10 = vunpack.c.l.bf16 %v272_v7 }
 0x341   : > { %v765_v28 = vrot.slane %v764_v25, 4 }
 0x342   : > { %2505 = vmatprep.subr.msk.bf16.mxu1 %vm465_vm6, %v782_v27  ;;  %v792_v29 = vsel %vm465_vm6, %v782_v27, 0  ;;  %v790_v33 = vsel %vm419_vm2, %v787_v23, %v782_v27  ;;  %v879_v23 = vrot.slane %v878_v15, 2 }
 0x343   : > { %v766_v13 = vadd.f32 %v765_v28, %v764_v25  ;;  %2401 = vmatpush3.bf16.msra.mxu1 %v792_v29 }
 0x344   : > { %2402 = vmatprep.subr.bf16.mxu1 %v790_v33 }
 0x345   : > { %v767_v35 = vrot.slane %v766_v13, 2 }
 0x347   : > { %v768_v36 = vadd.f32 %v767_v35, %v766_v13  ;;  %2403 = vmatpush3.bf16.msra.mxu1 %v790_v33  ;;  %v364_v33 = vrot.slane %v363_v19, 2  ;;  %v880_v35 = vadd.f32 %v879_v23, %v878_v15 }
 0x349   : > { %v769_v37 = vrot.slane %v768_v36, 1 }
 0x34a   : > { %2405 = vmatmul.mubr.msk.bf16.vlgmr.msra.gmra.mxu1 %vm458_vm0, %v2944_v38 }
 0x34b   : > { %v770_v20 = vadd.f32 %v769_v37, %v768_v36  ;;  %2420 = vmatprep.mubr.msk.bf16.mxu1 %vm458_vm0, %v2895_v1  ;;  %v365_v36 = vadd.f32 %v364_v33, %v363_v19  ;;  %v881_v37 = vrot.slane %v880_v35, 1 }
 0x34d   : > { %v771_v40 = vadd.f32 %v770_v20, %v3028_v8  ;;  %v366_v20 = vrot.slane %v365_v36, 1 }
 0x34f   : > { %v3069_v41 = vsel %vm1293_vm7, %v3035_v12, %v771_v40  ;;  %v882_v40 = vadd.f32 %v881_v37, %v880_v35  ;;  %v367_v43 = vadd.f32 %v366_v20, %v365_v36 }
 0x351   : > { %v883_v47 = vpack.c.bf16 %v882_v40, %v882_v40  ;;  %v3085_v50 = vpack.c.bf16 %v367_v43, %v367_v43 }
 0x40a   : > { %v2406_v53 = vpop.f32.mrf.mxu1 }
 0x40b   : > { %v837_v39 = vadd.f32 %v2406_v53, %v2963_v56 }
 0x40c   : > { %v828_v54 = vpop.f32.mrf.mxu1 }
 0x40d   : > { %v829_v55 = vadd.f32 %v828_v54, %v2957_v46  ;;  %v2251_v63 = vmul.f32 -1.442695, %v837_v39 }
 0x40e   : > { %v2407_v57 = vpop.f32.mrf.mxu1 }
 0x40f   : > { %v2250_v59 = vmul.f32 -1.442695, %v829_v55  ;;  %v840_v2 = vadd.f32 %v2407_v57, %v2966_v58 }
 0x410   : > { %v831_v60 = vpop.f32.mrf.mxu1 }
 0x411   : > { %2595 = vpow2.f32 %v2250_v59  ;;  %v832_v61 = vadd.f32 %v831_v60, %v2960_v52 }
 0x413   : > { %v2249_v12 = vmul.f32 -1.442695, %v832_v61 }
 0x415   : > { %2597 = vpow2.f32 %v2249_v12 }
 0x416   : > { %2599 = vpow2.f32 %v2251_v63 }
 0x41e   : > { %v2596_v62 = vpop.eup %2595 }
 0x41f   : > { %v853_v0 = vadd.f32 1.0, %v2596_v62 }
 0x421   : > { %2601 = vrcp.f32 %v853_v0 }
 0x422   : > { %v2598_v4 = vpop.eup %2597  ;;  %2603 = vtanh.f32 %v840_v2 }
 0x423   : > { %v846_v6 = vadd.f32 1.0, %v2598_v4  ;;  %v2600_v18 = vpop.eup %2599 }
 0x424   : > { %v862_v27 = vadd.f32 1.0, %v2600_v18 }
 0x425   : > { %2605 = vrcp.f32 %v846_v6  ;;  %v264_v6 = vld [vmem:[%s2909_s7 + $0x14] sm:$0xf] }
 0x426   : > { %2607 = vrcp.f32 %v862_v27  ;;  %v280_v9 = vunpack.c.l.bf16 %v264_v6 }
 0x428   : > { %v296_v11 = vadd.f32 %v288_v10, %v280_v9 }
 0x42a   : > { %v304_v14 = vmul.f32 0.5, %v296_v11 }
 0x42c   : > { %v3107_v15 = vmul.f32 %v304_v14, %v288_v10  ;;  %v312_v20 = vmul.f32 %v304_v14, %v280_v9  ;;  %v369_v43 = vmul.f32 %v304_v14, %v304_v14 }
 0x42e   : > { %v2602_v24 = vpop.eup %2601 }
 0x42f   : > { %v2604_v22 = vpop.eup %2603 }
 0x430   : > { %v857_v28 = vmul.f32 %v2604_v22, %v2602_v24 }
 0x432   : > { %v2606_v25 = vpop.eup %2605 }
 0x433   : > { %v849_v29 = vmul.f32 %v2606_v25, %v3048_v3  ;;  %v2608_v31 = vpop.eup %2607  ;;  %v889_v3 = vsel %vm414_vm4, %v263_v42, %v883_v47  ;;  %v980_v47 = vsel %vm324_vm1, %v312_v20, 0.0 }
 0x434   : > { %v891_v57 = vsel %vm2931_vm5, %v889_v3, %v3085_v50 }
 0x435   : > { %v3082_v13 = vadd.f32 %v857_v28, %v849_v29 }
 0x437   : > { %2609 = vtanh.f32 %v3082_v13 }
 0x444   : > { %v2610_v48 = vpop.eup %2609 }
 0x445   : > { %v866_v53 = vmul.f32 %v2610_v48, %v2608_v31  ;;  %v370_v31 = vsel %vm324_vm1, %v369_v43, 0.0  ;;  %v981_v48 = vrot.slane %v980_v47, 4 }
 0x447   : > { %v867_v54 = vmul.f32 %v866_v53, %v3008_v26  ;;  %v884_v55 = vpack.c.bf16 %v866_v53, %v866_v53  ;;  %v371_v53 = vrot.slane %v370_v31, 4  ;;  %v982_v3 = vadd.f32 %v981_v48, %v980_v47  ;;  %v3140_v47 = vld [vmem:[%s2909_s7 + $0x18] sm:$0xf] }
 0x448   : > { %v281_v48 = vunpack.c.l.bf16 %v3140_v47 }
 0x449   : > { %v868_v59 = vsel %vm324_vm1, %v867_v54, 0.0  ;;  %v886_v60 = vrot.slane %v884_v55, 3 }
 0x44a   : > { %v869_v61 = vrot.slane %v868_v59, 4 }
 0x44b   : > { %2506 = vmatprep.subr.msk.bf16.mxu0 %vm465_vm6, %v886_v60  ;;  %v896_v12 = vsel %vm465_vm6, %v886_v60, 0  ;;  %v894_v39 = vsel %vm419_vm2, %v891_v57, %v886_v60  ;;  %v372_v57 = vadd.f32 %v371_v53, %v370_v31  ;;  %v983_v60 = vrot.slane %v982_v3, 2  ;;  %v273_v31 = vld [vmem:[%s2909_s7 + $0x38] sm:$0xf] }
 0x44c   : > { %v870_v42 = vadd.f32 %v869_v61, %v868_v59  ;;  %2409 = vmatpush3.bf16.msra.mxu0 %v896_v12  ;;  %v289_v53 = vunpack.c.l.bf16 %v273_v31 }
 0x44d   : > { %2410 = vmatprep.subr.bf16.mxu0 %v894_v39 }
 0x44e   : > { %v871_v62 = vrot.slane %v870_v42, 2 }
 0x450   : > { %v872_v63 = vadd.f32 %v871_v62, %v870_v42  ;;  %2411 = vmatpush3.bf16.msra.mxu0 %v894_v39  ;;  %v373_v62 = vrot.slane %v372_v57, 2 }
 0x452   : > { %v873_v0 = vrot.slane %v872_v63, 1 }
 0x453   : > { %2413 = vmatmul.mubr.msk.bf16.vlgmr.msra.gmra.mxu0 %vm458_vm0, %v2944_v38 }
 0x454   : > { %v874_v2 = vadd.f32 %v873_v0, %v872_v63  ;;  %2428 = vmatprep.mubr.msk.bf16.mxu0 %vm458_vm0, %v2895_v1  ;;  %v984_v0 = vadd.f32 %v983_v60, %v982_v3  ;;  %v297_v3 = vadd.f32 %v289_v53, %v281_v48 }
 0x456   : > { %v875_v4 = vadd.f32 %v874_v2, %v3028_v8  ;;  %v374_v2 = vadd.f32 %v373_v62, %v372_v57 }
 0x458   : > { %v3103_v5 = vsel %vm1295_vm8, %v3069_v41, %v875_v4  ;;  %v985_v4 = vrot.slane %v984_v0, 1  ;;  %v375_v7 = vrot.slane %v374_v2, 1 }
 0x45a   : > { %v986_v9 = vadd.f32 %v985_v4, %v984_v0  ;;  %v376_v10 = vadd.f32 %v375_v7, %v374_v2 }
 0x45c   : > { %v987_v11 = vpack.c.bf16 %v986_v9, %v986_v9 }
 0x513   : > { %v2414_v18 = vpop.f32.mrf.mxu0 }
 0x514   : > { %v941_v28 = vadd.f32 %v2414_v18, %v2963_v56 }
 0x515   : > { %v932_v24 = vpop.f32.mrf.mxu0 }
 0x516   : > { %v933_v19 = vadd.f32 %v932_v24, %v2957_v46  ;;  %v2256_v33 = vmul.f32 -1.442695, %v941_v28  ;;  %v3119_v24 = vpack.c.bf16 %v376_v10, %v376_v10 }
 0x517   : > { %v2415_v22 = vpop.f32.mrf.mxu0 }
 0x518   : > { %v2255_v23 = vmul.f32 -1.442695, %v933_v19  ;;  %v944_v36 = vadd.f32 %v2415_v22, %v2966_v58 }
 0x519   : > { %v935_v25 = vpop.f32.mrf.mxu0 }
 0x51a   : > { %2611 = vpow2.f32 %v2255_v23  ;;  %v936_v27 = vadd.f32 %v935_v25, %v2960_v52 }
 0x51c   : > { %v2254_v41 = vmul.f32 -1.442695, %v936_v27 }
 0x51e   : > { %2613 = vpow2.f32 %v2254_v41 }
 0x51f   : > { %2615 = vpow2.f32 %v2256_v33 }
 0x527   : > { %v2612_v29 = vpop.eup %2611 }
 0x528   : > { %v957_v35 = vadd.f32 1.0, %v2612_v29 }
 0x52a   : > { %2617 = vrcp.f32 %v957_v35 }
 0x52b   : > { %v2614_v37 = vpop.eup %2613  ;;  %2619 = vtanh.f32 %v944_v36 }
 0x52c   : > { %v950_v40 = vadd.f32 1.0, %v2614_v37  ;;  %v2616_v54 = vpop.eup %2615 }
 0x52d   : > { %v966_v12 = vadd.f32 1.0, %v2616_v54  ;;  %v305_v54 = vmul.f32 0.5, %v297_v3 }
 0x52e   : > { %2621 = vrcp.f32 %v950_v40 }
 0x52f   : > { %2623 = vrcp.f32 %v966_v12  ;;  %v313_v9 = vmul.f32 %v305_v54, %v281_v48 }
 0x537   : > { %v2618_v55 = vpop.eup %2617 }
 0x538   : > { %v2620_v59 = vpop.eup %2619 }
 0x539   : > { %v961_v39 = vmul.f32 %v2620_v59, %v2618_v55  ;;  %v3144_v55 = vmul.f32 %v305_v54, %v289_v53 }
 0x53b   : > { %v2622_v61 = vpop.eup %2621 }
 0x53c   : > { %v953_v42 = vmul.f32 %v2622_v61, %v3082_v13  ;;  %v2624_v14 = vpop.eup %2623  ;;  %v993_v13 = vsel %vm414_vm4, %v264_v6, %v987_v11  ;;  %v378_v11 = vmul.f32 %v305_v54, %v305_v54 }
 0x53d   : > { %v995_v25 = vsel %vm2931_vm5, %v993_v13, %v3119_v24  ;;  %v1303_v13 = vsel %vm324_vm1, %v2924_v16, 0.0 }
 0x53e   : > { %v3116_v63 = vadd.f32 %v961_v39, %v953_v42 }
 0x540   : > { %2625 = vtanh.f32 %v3116_v63 }
 0x54d   : > { %v2626_v18 = vpop.eup %2625 }
 0x54e   : > { %v970_v19 = vmul.f32 %v2626_v18, %v2624_v14  ;;  %v1084_v14 = vsel %vm324_vm1, %v313_v9, 0.0  ;;  %v379_v18 = vsel %vm324_vm1, %v378_v11, 0.0 }
 0x550   : > { %v971_v22 = vmul.f32 %v970_v19, %v3008_v26  ;;  %v988_v23 = vpack.c.bf16 %v970_v19, %v970_v19  ;;  %v1085_v19 = vrot.slane %v1084_v14, 4 }
 0x552   : > { %v972_v27 = vsel %vm324_vm1, %v971_v22, 0.0  ;;  %v990_v41 = vrot.slane %v988_v23, 3  ;;  %v380_v22 = vrot.slane %v379_v18, 4  ;;  %v1086_v23 = vadd.f32 %v1085_v19, %v1084_v14  ;;  %v2803_v19 = vld [vmem:[%s2909_s7 + $0x20] sm:$0xf] }
 0x553   : > { %v973_v28 = vrot.slane %v972_v27, 4 }
 0x554   : > { %2507 = vmatprep.subr.msk.bf16.mxu1 %vm465_vm6, %v990_v41  ;;  %v1000_v29 = vsel %vm465_vm6, %v990_v41, 0  ;;  %v998_v33 = vsel %vm419_vm2, %v995_v25, %v990_v41 }
 0x555   : > { %v974_v6 = vadd.f32 %v973_v28, %v972_v27  ;;  %2417 = vmatpush3.bf16.msra.mxu1 %v1000_v29  ;;  %v1304_v27 = vrot.slane %v1303_v13, 4  ;;  %v381_v28 = vadd.f32 %v380_v22, %v379_v18 }
 0x556   : > { %2418 = vmatprep.subr.bf16.mxu1 %v998_v33 }
 0x557   : > { %v975_v35 = vrot.slane %v974_v6, 2 }
 0x559   : > { %v976_v36 = vadd.f32 %v975_v35, %v974_v6  ;;  %2419 = vmatpush3.bf16.msra.mxu1 %v998_v33  ;;  %v1087_v33 = vrot.slane %v1086_v23, 2 }
 0x55b   : > { %v977_v37 = vrot.slane %v976_v36, 1  ;;  %v1088_v48 = vadd.f32 %v1087_v33, %v1086_v23 }
 0x55c   : > { %2421 = vmatmul.mubr.msk.bf16.vlgmr.msra.gmra.mxu1 %vm458_vm0, %v2944_v38 }
 0x55d   : > { %v978_v20 = vadd.f32 %v977_v37, %v976_v36  ;;  %2436 = vmatprep.mubr.msk.bf16.mxu1 %vm458_vm0, %v2895_v1  ;;  %v1089_v3 = vrot.slane %v1088_v48, 1 }
 0x55f   : > { %v979_v40 = vadd.f32 %v978_v20, %v3028_v8  ;;  %v1305_v20 = vadd.f32 %v1304_v27, %v1303_v13 }
 0x561   : > { %v3137_v43 = vsel %vm414_vm4, %v3103_v5, %v979_v40  ;;  %v382_v40 = vrot.slane %v381_v28, 2  ;;  %v1306_v16 = vrot.slane %v1305_v20, 2 }
 0x563   : > { %v383_v53 = vadd.f32 %v382_v40, %v381_v28  ;;  %v1307_v54 = vadd.f32 %v1306_v16, %v1305_v20 }
 0x61c   : > { %v2422_v57 = vpop.f32.mrf.mxu1 }
 0x61d   : > { %v1045_v42 = vadd.f32 %v2422_v57, %v2963_v56  ;;  %v384_v57 = vrot.slane %v383_v53, 1 }
 0x61e   : > { %v1036_v59 = vpop.f32.mrf.mxu1 }
 0x61f   : > { %v1037_v1 = vadd.f32 %v1036_v59, %v2957_v46  ;;  %v2261_v0 = vmul.f32 -1.442695, %v1045_v42  ;;  %v1090_v59 = vadd.f32 %v1089_v3, %v1088_v48 }
 0x620   : > { %v2423_v60 = vpop.f32.mrf.mxu1 }
 0x621   : > { %v2260_v61 = vmul.f32 -1.442695, %v1037_v1  ;;  %v1048_v4 = vadd.f32 %v2423_v60, %v2966_v58  ;;  %v1308_v1 = vrot.slane %v1307_v54, 1  ;;  %v385_v60 = vadd.f32 %v384_v57, %v383_v53 }
 0x622   : > { %v1039_v12 = vpop.f32.mrf.mxu1 }
 0x623   : > { %2627 = vpow2.f32 %v2260_v61  ;;  %v1040_v5 = vadd.f32 %v1039_v12, %v2960_v52  ;;  %v1091_v61 = vpack.c.bf16 %v1090_v59, %v1090_v59 }
 0x625   : > { %v2259_v39 = vmul.f32 -1.442695, %v1040_v5 }
 0x627   : > { %2629 = vpow2.f32 %v2259_v39  ;;  %v3158_v39 = vpack.c.bf16 %v385_v60, %v385_v60 }
 0x628   : > { %2631 = vpow2.f32 %v2261_v0 }
 0x630   : > { %v2628_v62 = vpop.eup %2627 }
 0x631   : > { %v1061_v2 = vadd.f32 1.0, %v2628_v62  ;;  %v1097_v62 = vsel %vm414_vm4, %v3140_v47, %v1091_v61 }
 0x633   : > { %2633 = vrcp.f32 %v1061_v2 }
 0x634   : > { %v2630_v7 = vpop.eup %2629  ;;  %2635 = vtanh.f32 %v1048_v4 }
 0x635   : > { %v1054_v10 = vadd.f32 1.0, %v2630_v7  ;;  %v2632_v25 = vpop.eup %2631  ;;  %v1099_v7 = vsel %vm2931_vm5, %v1097_v62, %v3158_v39 }
 0x636   : > { %v1070_v35 = vadd.f32 1.0, %v2632_v25 }
 0x637   : > { %2637 = vrcp.f32 %v1054_v10 }
 0x638   : > { %2639 = vrcp.f32 %v1070_v35  ;;  %v274_v35 = vld [vmem:[%s2909_s7 + $0x3c] sm:$0xf] }
 0x640   : > { %v2634_v41 = vpop.eup %2633 }
 0x641   : > { %v2636_v29 = vpop.eup %2635 }
 0x642   : > { %v1065_v36 = vmul.f32 %v2636_v29, %v2634_v41  ;;  %v3182_v29 = vld [vmem:[%s3471_s1] sm:$0xff]  }
 0x644   : > { %v2638_v6 = vpop.eup %2637 }
 0x645   : > { %v1057_v37 = vmul.f32 %v2638_v6, %v3116_v63  ;;  %v2640_v12 = vpop.eup %2639  ;;  %v1309_v63 = vadd.f32 %v1308_v1, %v1307_v54  ;;  %v3201_v6 = vld [vmem:[%s2909_s7 + $0x1c] sm:$0xf] }
 0x647   : > { %v3155_v31 = vadd.f32 %v1065_v36, %v1057_v37  ;;  %v1310_v4 = vpack.c.bf16 %v1309_v63, %v1309_v63  ;;  %v282_v36 = vunpack.c.l.bf16 %v3201_v6  ;;  %v290_v37 = vunpack.c.l.bf16 %v274_v35 }
 0x649   : > { %2641 = vtanh.f32 %v3155_v31  ;;  %v1313_v47 = vsel %vm414_vm4, %v2803_v19, %v1310_v4  ;;  %v298_v20 = vadd.f32 %v290_v37, %v282_v36 }
 0x64a   : > { %v1315_v23 = vsel %vm2931_vm5, %v1313_v47, %v2928_v32 }
 0x64b   : > { %v1317_v27 = vsel %vm419_vm2, %v1315_v23, 0 }
 0x656   : > { %v2642_v5 = vpop.eup %2641 }
 0x657   : > { %v1074_v42 = vmul.f32 %v2642_v5, %v2640_v12 }
 0x659   : > { %v1075_v0 = vmul.f32 %v1074_v42, %v3008_v26  ;;  %v1092_v2 = vpack.c.bf16 %v1074_v42, %v1074_v42 }
 0x65b   : > { %v1076_v9 = vsel %vm324_vm1, %v1075_v0, 0.0  ;;  %v1094_v10 = vrot.slane %v1092_v2, 3 }
 0x65c   : > { %v1077_v11 = vrot.slane %v1076_v9, 4 }
 0x65d   : > { %2508 = vmatprep.subr.msk.bf16.mxu0 %vm465_vm6, %v1094_v10  ;;  %v1104_v14 = vsel %vm465_vm6, %v1094_v10, 0  ;;  %v1102_v18 = vsel %vm419_vm2, %v1099_v7, %v1094_v10 }
 0x65e   : > { %v1078_v13 = vadd.f32 %v1077_v11, %v1076_v9  ;;  %2425 = vmatpush3.bf16.msra.mxu0 %v1104_v14 }
 0x65f   : > { %2426 = vmatprep.subr.bf16.mxu0 %v1102_v18 }
 0x660   : > { %v1079_v22 = vrot.slane %v1078_v13, 2 }
 0x662   : > { %v1080_v25 = vadd.f32 %v1079_v22, %v1078_v13  ;;  %2427 = vmatpush3.bf16.msra.mxu0 %v1102_v18 }
 0x663   : > { %2510 = vmatprep.subr.msk.bf16.mxu0 %vm419_vm2, %v1315_v23 }
 0x664   : > { %v1081_v41 = vrot.slane %v1080_v25, 1 }
 0x665   : > { %2429 = vmatmul.mubr.msk.bf16.vlgmr.msra.gmra.mxu0 %vm458_vm0, %v2944_v38  ;;  %v3194_v38 = vld [vmem:[%s3471_s1 + $0x8] sm:$0xff]  }
 0x666   : > { %v1082_v28 = vadd.f32 %v1081_v41, %v1080_v25  ;;  %2441 = vmatpush3.bf16.msra.mxu0 %v1317_v27  ;;  %2442 = vmatprep.mubr.msk.bf16.mxu0 %vm458_vm0, %v3182_v29 }
 0x668   : > { %v1083_v32 = vadd.f32 %v1082_v28, %v3028_v8 }
 0x66a   : > { %v3189_v33 = vsel %vm419_vm2, %v3137_v43, %v1083_v32  ;;  %v306_v43 = vmul.f32 0.5, %v298_v20  ;;  %v1401_v20 = vsel %vm324_vm1, %v2955_v45, 0.0 }
 0x66c   : > { %v3205_v40 = vmul.f32 %v306_v43, %v290_v37  ;;  %v314_v18 = vmul.f32 %v306_v43, %v282_v36  ;;  %v387_v47 = vmul.f32 %v306_v43, %v306_v43 }
 0x66d   : > { %2443 = vmatmul.mubr.msk.bf16.vlgmr.msra.gmra.mxu0 %vm458_vm0, %v3194_v38 }
 0x66e   : > { %2458 = vmatprep.mubr.msk.bf16.mxu0 %vm458_vm0, %v3182_v29  ;;  %v1188_v23 = vsel %vm324_vm1, %v314_v18, 0.0  ;;  %v388_v41 = vsel %vm324_vm1, %v387_v47, 0.0 }
 0x66f   : > { %v1189_v28 = vrot.slane %v1188_v23, 4  ;;  %v389_v36 = vrot.slane %v388_v41, 4 }
 0x671   : > { %v1190_v37 = vadd.f32 %v1189_v28, %v1188_v23 }
 0x725   : > { %v2430_v48 = vpop.f32.mrf.mxu0 }
 0x726   : > { %v1149_v0 = vadd.f32 %v2430_v48, %v2963_v56 }
 0x727   : > { %v1140_v16 = vpop.f32.mrf.mxu0 }
 0x728   : > { %v1141_v53 = vadd.f32 %v1140_v16, %v2957_v46  ;;  %v2266_v7 = vmul.f32 -1.442695, %v1149_v0  ;;  %v390_v16 = vadd.f32 %v389_v36, %v388_v41 }
 0x729   : > { %v2431_v3 = vpop.f32.mrf.mxu0 }
 0x72a   : > { %v2265_v54 = vmul.f32 -1.442695, %v1141_v53  ;;  %v1152_v10 = vadd.f32 %v2431_v3, %v2966_v58  ;;  %v1191_v3 = vrot.slane %v1190_v37, 2 }
 0x72b   : > { %v1143_v57 = vpop.f32.mrf.mxu0 }
 0x72c   : > { %2643 = vpow2.f32 %v2265_v54  ;;  %v1144_v59 = vadd.f32 %v1143_v57, %v2960_v52  ;;  %v1402_v54 = vrot.slane %v1401_v20, 4 }
 0x72d   : > { %v2444_v1 = vpop.f32.mrf.mxu0 }
 0x72e   : > { %v2264_v60 = vmul.f32 -1.442695, %v1144_v59  ;;  %v1362_v14 = vadd.f32 %v2444_v1, %v2963_v56 }
 0x72f   : > { %v1353_v61 = vpop.f32.mrf.mxu0 }
 0x730   : > { %2645 = vpow2.f32 %v2264_v60  ;;  %v1354_v12 = vadd.f32 %v1353_v61, %v2957_v46  ;;  %v2276_v22 = vmul.f32 -1.442695, %v1362_v14  ;;  %v391_v61 = vrot.slane %v390_v16, 2 }
 0x731   : > { %v2445_v63 = vpop.f32.mrf.mxu0 }
 0x732   : > { %v2275_v5 = vmul.f32 -1.442695, %v1354_v12  ;;  %v1365_v27 = vadd.f32 %v2445_v63, %v2966_v58  ;;  %v1192_v63 = vadd.f32 %v1191_v3, %v1190_v37 }
 0x733   : > { %v1356_v42 = vpop.f32.mrf.mxu0 }
 0x734   : > { %2647 = vpow2.f32 %v2275_v5  ;;  %v1357_v62 = vadd.f32 %v1356_v42, %v2960_v52  ;;  %v1403_v5 = vadd.f32 %v1402_v54, %v1401_v20 }
 0x736   : > { %v2274_v2 = vmul.f32 -1.442695, %v1357_v62  ;;  %v392_v62 = vadd.f32 %v391_v61, %v390_v16 }
 0x738   : > { %2649 = vpow2.f32 %v2274_v2  ;;  %v1193_v2 = vrot.slane %v1192_v63, 1  ;;  %v393_v14 = vrot.slane %v392_v62, 1 }
 0x739   : > { %v2644_v4 = vpop.eup %2643  ;;  %2651 = vpow2.f32 %v2266_v7 }
 0x73a   : > { %v1165_v9 = vadd.f32 1.0, %v2644_v4  ;;  %v1404_v4 = vrot.slane %v1403_v5, 2  ;;  %v1194_v18 = vadd.f32 %v1193_v2, %v1192_v63  ;;  %v394_v47 = vadd.f32 %v393_v14, %v392_v62 }
 0x73c   : > { %2653 = vrcp.f32 %v1165_v9 }
 0x73d   : > { %v2646_v11 = vpop.eup %2645  ;;  %2655 = vtanh.f32 %v1152_v10 }
 0x73e   : > { %v1158_v19 = vadd.f32 1.0, %v2646_v11 }
 0x740   : > { %2657 = vrcp.f32 %v1158_v19  ;;  %v1405_v19 = vadd.f32 %v1404_v4, %v1403_v5 }
 0x741   : > { %v2648_v13 = vpop.eup %2647  ;;  %2659 = vpow2.f32 %v2276_v22 }
 0x742   : > { %v1378_v25 = vadd.f32 1.0, %v2648_v13  ;;  %v1195_v13 = vpack.c.bf16 %v1194_v18, %v1194_v18  ;;  %v1406_v22 = vrot.slane %v1405_v19, 1 }
 0x744   : > { %2661 = vrcp.f32 %v1378_v25  ;;  %v1201_v28 = vsel %vm414_vm4, %v3201_v6, %v1195_v13 }
 0x745   : > { %v2650_v32 = vpop.eup %2649  ;;  %2663 = vtanh.f32 %v1365_v27  ;;  %v3226_v27 = vpack.c.bf16 %v394_v47, %v394_v47 }
 0x746   : > { %v1371_v35 = vadd.f32 1.0, %v2650_v32  ;;  %v2652_v43 = vpop.eup %2651  ;;  %v1407_v32 = vadd.f32 %v1406_v22, %v1405_v19 }
 0x747   : > { %v1174_v59 = vadd.f32 1.0, %v2652_v43  ;;  %v1203_v37 = vsel %vm2931_vm5, %v1201_v28, %v3226_v27 }
 0x748   : > { %2665 = vrcp.f32 %v1371_v35 }
 0x749   : > { %v2654_v48 = vpop.eup %2653  ;;  %2667 = vrcp.f32 %v1174_v59 }
 0x74a   : > { %v2656_v53 = vpop.eup %2655 }
 0x74b   : > { %v1169_v1 = vmul.f32 %v2656_v53, %v2654_v48  ;;  %v1408_v48 = vpack.c.bf16 %v1407_v32, %v1407_v32 }
 0x74d   : > { %v2658_v57 = vpop.eup %2657 }
 0x74e   : > { %v1161_v60 = vmul.f32 %v2658_v57, %v3155_v31  ;;  %v2660_v42 = vpop.eup %2659 }
 0x74f   : > { %v1387_v9 = vadd.f32 1.0, %v2660_v42 }
 0x750   : > { %v3220_v12 = vadd.f32 %v1169_v1, %v1161_v60  ;;  %v2806_v1 = vld [vmem:[%s2909_s7 + $0x24] sm:$0xf] }
 0x751   : > { %v2662_v45 = vpop.eup %2661  ;;  %v1414_v60 = vsel %vm414_vm4, %v2806_v1, %v1408_v48 }
 0x752   : > { %2669 = vtanh.f32 %v3220_v12  ;;  %v2664_v0 = vpop.eup %2663  ;;  %v1416_v42 = vsel %vm2931_vm5, %v1414_v60, %v2974_v30 }
 0x753   : > { %v1382_v11 = vmul.f32 %v2664_v0, %v2662_v45  ;;  %2671 = vrcp.f32 %v1387_v9 }
 0x755   : > { %v2666_v7 = vpop.eup %2665 }
 0x756   : > { %v1374_v10 = vmul.f32 0.0, %v2666_v7  ;;  %v2668_v23 = vpop.eup %2667 }
 0x758   : > { %v3223_v31 = vadd.f32 %v1382_v11, %v1374_v10 }
 0x75a   : > { %2673 = vtanh.f32 %v3223_v31 }
 0x75f   : > { %v2670_v25 = vpop.eup %2669 }
 0x760   : > { %v1178_v41 = vmul.f32 %v2670_v25, %v2668_v23  ;;  %v2672_v53 = vpop.eup %2671 }
 0x762   : > { %v1179_v35 = vmul.f32 %v1178_v41, %v3008_v26  ;;  %v1196_v36 = vpack.c.bf16 %v1178_v41, %v1178_v41 }
 0x764   : > { %v1180_v20 = vsel %vm324_vm1, %v1179_v35, 0.0  ;;  %v1198_v43 = vrot.slane %v1196_v36, 3 }
 0x765   : > { %v1181_v16 = vrot.slane %v1180_v20, 4 }
 0x766   : > { %2509 = vmatprep.subr.msk.bf16.mxu1 %vm465_vm6, %v1198_v43  ;;  %v1208_v3 = vsel %vm465_vm6, %v1198_v43, 0  ;;  %v1206_v6 = vsel %vm419_vm2, %v1203_v37, %v1198_v43 }
 0x767   : > { %v2674_v54 = vpop.eup %2673  ;;  %v1182_v57 = vadd.f32 %v1181_v16, %v1180_v20  ;;  %2433 = vmatpush3.bf16.msra.mxu1 %v1208_v3 }
 0x768   : > { %2434 = vmatprep.subr.bf16.mxu1 %v1206_v6  ;;  %v3238_v59 = vmul.f32 %v2674_v54, %v2672_v53 }
 0x769   : > { %v1183_v61 = vrot.slane %v1182_v57, 2 }
 0x76a   : > { %v1409_v63 = vpack.c.bf16 %v3238_v59, %v3238_v59 }
 0x76b   : > { %v1184_v5 = vadd.f32 %v1183_v61, %v1182_v57  ;;  %2435 = vmatpush3.bf16.msra.mxu1 %v1206_v6 }
 0x76c   : > { %v1411_v45 = vrot.slane %v1409_v63, 3  ;;  %v1505_v63 = vsel %vm324_vm1, %v2997_v49, 0.0 }
 0x76d   : > { %v1185_v62 = vrot.slane %v1184_v5, 1 }
 0x76e   : > { %2437 = vmatmul.mubr.msk.bf16.vlgmr.msra.gmra.mxu1 %vm458_vm0, %v3194_v38  ;;  %2511 = vmatprep.subr.msk.bf16.mxu1 %vm465_vm6, %v1411_v45  ;;  %v1421_v0 = vsel %vm465_vm6, %v1411_v45, 0  ;;  %v1419_v2 = vsel %vm419_vm2, %v1416_v42, %v1411_v45 }
 0x76f   : > { %v1186_v4 = vadd.f32 %v1185_v62, %v1184_v5  ;;  %2447 = vmatpush3.bf16.msra.mxu1 %v1421_v0  ;;  %2450 = vmatprep.mubr.msk.bf16.mxu1 %vm458_vm0, %v3182_v29  ;;  %v1506_v62 = vrot.slane %v1505_v63, 4 }
 0x770   : > { %2448 = vmatprep.subr.bf16.mxu1 %v1419_v2 }
 0x771   : > { %v1187_v30 = vadd.f32 %v1186_v4, %v3028_v8 }
 0x773   : > { %v3257_v7 = vsel %vm1299_vm9, %v3189_v33, %v1187_v30  ;;  %2449 = vmatpush3.bf16.msra.mxu1 %v1419_v2 }
 0x776   : > { %2451 = vmatmul.mubr.msk.bf16.vlgmr.msra.gmra.mxu1 %vm458_vm0, %v3194_v38 }
 0x777   : > { %2466 = vmatprep.mubr.msk.bf16.mxu1 %vm458_vm0, %v3182_v29 }
 0x82e   : > { %v2438_v9 = vpop.f32.mrf.mxu1 }
 0x82f   : > { %v1253_v35 = vadd.f32 %v2438_v9, %v2963_v56 }
 0x830   : > { %v1244_v10 = vpop.f32.mrf.mxu1 }
 0x831   : > { %v1245_v11 = vadd.f32 %v1244_v10, %v2957_v46  ;;  %v2271_v20 = vmul.f32 -1.442695, %v1253_v35  ;;  %v1507_v10 = vadd.f32 %v1506_v62, %v1505_v63 }
 0x832   : > { %v2439_v14 = vpop.f32.mrf.mxu1 }
 0x833   : > { %v2270_v18 = vmul.f32 -1.442695, %v1245_v11  ;;  %v1256_v48 = vadd.f32 %v2439_v14, %v2966_v58 }
 0x834   : > { %v1247_v19 = vpop.f32.mrf.mxu1 }
 0x835   : > { %2675 = vpow2.f32 %v2270_v18  ;;  %v1248_v47 = vadd.f32 %v1247_v19, %v2960_v52  ;;  %v1508_v19 = vrot.slane %v1507_v10, 2 }
 0x836   : > { %v2452_v13 = vpop.f32.mrf.mxu1 }
 0x837   : > { %v2269_v33 = vmul.f32 -1.442695, %v1248_v47  ;;  %v1466_v53 = vadd.f32 %v2452_v13, %v2963_v56 }
 0x838   : > { %v1457_v22 = vpop.f32.mrf.mxu1 }
 0x839   : > { %2677 = vpow2.f32 %v2269_v33  ;;  %v1458_v23 = vadd.f32 %v1457_v22, %v2957_v46  ;;  %v2281_v54 = vmul.f32 -1.442695, %v1466_v53 }
 0x83a   : > { %v2453_v25 = vpop.f32.mrf.mxu1 }
 0x83b   : > { %v2280_v41 = vmul.f32 -1.442695, %v1458_v23  ;;  %v1469_v1 = vadd.f32 %v2453_v25, %v2966_v58  ;;  %v1509_v23 = vadd.f32 %v1508_v19, %v1507_v10 }
 0x83c   : > { %v1460_v28 = vpop.f32.mrf.mxu1 }
 0x83d   : > { %2679 = vpow2.f32 %v2280_v41  ;;  %v1461_v32 = vadd.f32 %v1460_v28, %v2960_v52  ;;  %v1510_v25 = vrot.slane %v1509_v23, 1 }
 0x83f   : > { %v2279_v36 = vmul.f32 -1.442695, %v1461_v32 }
 0x841   : > { %2681 = vpow2.f32 %v2279_v36  ;;  %v1511_v36 = vadd.f32 %v1510_v25, %v1509_v23 }
 0x842   : > { %v2676_v37 = vpop.eup %2675  ;;  %2683 = vpow2.f32 %v2271_v20 }
 0x843   : > { %v1269_v43 = vadd.f32 1.0, %v2676_v37 }
 0x845   : > { %2685 = vrcp.f32 %v1269_v43  ;;  %v1512_v43 = vpack.c.bf16 %v1511_v36, %v1511_v36 }
 0x846   : > { %v2678_v16 = vpop.eup %2677  ;;  %2687 = vtanh.f32 %v1256_v48 }
 0x847   : > { %v1262_v3 = vadd.f32 1.0, %v2678_v16 }
 0x849   : > { %2689 = vrcp.f32 %v1262_v3 }
 0x84a   : > { %v2680_v6 = vpop.eup %2679  ;;  %2691 = vpow2.f32 %v2281_v54  ;;  %v2807_v54 = vld [vmem:[%s2909_s7 + $0x28] sm:$0xf] }
 0x84b   : > { %v1482_v57 = vadd.f32 1.0, %v2680_v6 }
 0x84d   : > { %2693 = vrcp.f32 %v1482_v57  ;;  %v1518_v57 = vsel %vm414_vm4, %v2807_v54, %v1512_v43 }
 0x84e   : > { %v2682_v60 = vpop.eup %2681  ;;  %2695 = vtanh.f32 %v1469_v1 }
 0x84f   : > { %v1475_v61 = vadd.f32 1.0, %v2682_v60  ;;  %v2684_v5 = vpop.eup %2683 }
 0x850   : > { %v1278_v2 = vadd.f32 1.0, %v2684_v5 }
 0x851   : > { %2697 = vrcp.f32 %v1475_v61 }
 0x852   : > { %v2686_v42 = vpop.eup %2685  ;;  %2699 = vrcp.f32 %v1278_v2 }
 0x853   : > { %v2688_v45 = vpop.eup %2687 }
 0x854   : > { %v1273_v4 = vmul.f32 %v2688_v45, %v2686_v42  ;;  %v1520_v42 = vsel %vm2931_vm5, %v1518_v57, %v3014_v44 }
 0x856   : > { %v2690_v0 = vpop.eup %2689 }
 0x857   : > { %v1265_v30 = vmul.f32 %v2690_v0, %v3220_v12  ;;  %v2692_v11 = vpop.eup %2691  ;;  %v1392_v12 = vmul.f32 %v3238_v59, %v3008_v26 }
 0x858   : > { %v1491_v13 = vadd.f32 1.0, %v2692_v11 }
 0x859   : > { %v1274_v9 = vadd.f32 %v1273_v4, %v1265_v30  ;;  %v1393_v28 = vsel %vm324_vm1, %v1392_v12, 0.0 }
 0x85a   : > { %v2694_v14 = vpop.eup %2693  ;;  %v1394_v37 = vrot.slane %v1393_v28, 4 }
 0x85b   : > { %2701 = vtanh.f32 %v1274_v9  ;;  %v2696_v18 = vpop.eup %2695 }
 0x85c   : > { %v1486_v49 = vmul.f32 %v2696_v18, %v2694_v14  ;;  %2703 = vrcp.f32 %v1491_v13  ;;  %v1395_v48 = vadd.f32 %v1394_v37, %v1393_v28 }
 0x85e   : > { %v2698_v47 = vpop.eup %2697  ;;  %v1396_v1 = vrot.slane %v1395_v48, 2 }
 0x85f   : > { %v1478_v33 = vmul.f32 %v2698_v47, %v3223_v31  ;;  %v2700_v41 = vpop.eup %2699 }
 0x860   : > { %v1397_v0 = vadd.f32 %v1396_v1, %v1395_v48 }
 0x861   : > { %v3275_v22 = vadd.f32 %v1486_v49, %v1478_v33 }
 0x862   : > { %v1398_v14 = vrot.slane %v1397_v0, 1 }
 0x863   : > { %2705 = vtanh.f32 %v3275_v22 }
 0x864   : > { %v1399_v13 = vadd.f32 %v1398_v14, %v1397_v0  ;;  %v2808_v14 = vld [vmem:[%s2909_s7 + $0x2c] sm:$0xf] }
 0x866   : > { %v1400_v23 = vadd.f32 %v1399_v13, %v3028_v8 }
 0x868   : > { %v2702_v32 = vpop.eup %2701 }
 0x869   : > { %v1282_v35 = vmul.f32 %v2702_v32, %v2700_v41  ;;  %v2704_v53 = vpop.eup %2703 }
 0x86b   : > { %v1283_v31 = vmul.f32 %v1282_v35, %v3008_v26 }
 0x86d   : > { %v1284_v20 = vsel %vm324_vm1, %v1283_v31, 0.0 }
 0x86e   : > { %v1285_v16 = vrot.slane %v1284_v20, 4 }
 0x870   : > { %v2706_v59 = vpop.eup %2705  ;;  %v1286_v3 = vadd.f32 %v1285_v16, %v1284_v20 }
 0x871   : > { %v1495_v6 = vmul.f32 %v2706_v59, %v2704_v53 }
 0x872   : > { %v1287_v60 = vrot.slane %v1286_v3, 2 }
 0x873   : > { %v1496_v61 = vmul.f32 %v1495_v6, %v3008_v26  ;;  %v1513_v63 = vpack.c.bf16 %v1495_v6, %v1495_v6  ;;  %v1609_v6 = vsel %vm324_vm1, %v3039_v21, 0.0 }
 0x874   : > { %v1288_v5 = vadd.f32 %v1287_v60, %v1286_v3  ;;  %v1610_v54 = vrot.slane %v1609_v6, 4 }
 0x875   : > { %v1497_v45 = vsel %vm324_vm1, %v1496_v61, 0.0  ;;  %v1515_v62 = vrot.slane %v1513_v63, 3 }
 0x876   : > { %v1289_v2 = vrot.slane %v1288_v5, 1  ;;  %v1498_v4 = vrot.slane %v1497_v45, 4  ;;  %v1611_v57 = vadd.f32 %v1610_v54, %v1609_v6 }
 0x877   : > { %2512 = vmatprep.subr.msk.bf16.mxu0 %vm465_vm6, %v1515_v62  ;;  %v1525_v30 = vsel %vm465_vm6, %v1515_v62, 0  ;;  %v1523_v9 = vsel %vm419_vm2, %v1520_v42, %v1515_v62 }
 0x878   : > { %v1290_v10 = vadd.f32 %v1289_v2, %v1288_v5  ;;  %v1499_v11 = vadd.f32 %v1498_v4, %v1497_v45  ;;  %2455 = vmatpush3.bf16.msra.mxu0 %v1525_v30  ;;  %v1612_v63 = vrot.slane %v1611_v57, 2 }
 0x879   : > { %2456 = vmatprep.subr.bf16.mxu0 %v1523_v9 }
 0x87a   : > { %v1291_v44 = vadd.f32 %v1290_v10, %v3028_v8  ;;  %v1500_v18 = vrot.slane %v1499_v11, 2  ;;  %v1613_v2 = vadd.f32 %v1612_v63, %v1611_v57 }
 0x87c   : > { %v1302_v19 = vsel %vm1301_vm10, %v3257_v7, %v1291_v44  ;;  %v1501_v47 = vadd.f32 %v1500_v18, %v1499_v11  ;;  %2457 = vmatpush3.bf16.msra.mxu0 %v1523_v9  ;;  %v1614_v4 = vrot.slane %v1613_v2, 1 }
 0x87d   : > { %2136 = vst.msk [vmem:[%s3297_s26] sm:$0xff] %vm324_vm1, %v1302_v19 }
 0x87e   : > { %v1502_v49 = vrot.slane %v1501_v47, 1  ;;  %v1615_v21 = vadd.f32 %v1614_v4, %v1613_v2 }
 0x87f   : > { %2459 = vmatmul.mubr.msk.bf16.vlgmr.msra.gmra.mxu0 %vm458_vm0, %v3194_v38 }
 0x880   : > { %v1503_v33 = vadd.f32 %v1502_v49, %v1501_v47  ;;  %2474 = vmatprep.mubr.msk.bf16.mxu0 %vm458_vm0, %v3182_v29  ;;  %v1616_v30 = vpack.c.bf16 %v1615_v21, %v1615_v21 }
 0x882   : > { %v1504_v12 = vadd.f32 %v1503_v33, %v3028_v8  ;;  %v1622_v44 = vsel %vm414_vm4, %v2808_v14, %v1616_v30 }
 0x884   : > { %v3311_v25 = vsel %vm465_vm6, %v1400_v23, %v1504_v12 }
 0x93f   : > { %v2460_v7 = vpop.f32.mrf.mxu0 }
 0x940   : > { %v1570_v20 = vadd.f32 %v2460_v7, %v2963_v56 }
 0x941   : > { %v1561_v41 = vpop.f32.mrf.mxu0 }
 0x942   : > { %v1562_v28 = vadd.f32 %v1561_v41, %v2957_v46  ;;  %v2286_v48 = vmul.f32 -1.442695, %v1570_v20 }
 0x943   : > { %v2461_v32 = vpop.f32.mrf.mxu0 }
 0x944   : > { %v2285_v35 = vmul.f32 -1.442695, %v1562_v28  ;;  %v1573_v53 = vadd.f32 %v2461_v32, %v2966_v58 }
 0x945   : > { %v1564_v36 = vpop.f32.mrf.mxu0 }
 0x946   : > { %2707 = vpow2.f32 %v2285_v35  ;;  %v1565_v37 = vadd.f32 %v1564_v36, %v2960_v52 }
 0x948   : > { %v2284_v31 = vmul.f32 -1.442695, %v1565_v37 }
 0x94a   : > { %2709 = vpow2.f32 %v2284_v31 }
 0x94b   : > { %2711 = vpow2.f32 %v2286_v48 }
 0x953   : > { %v2708_v43 = vpop.eup %2707 }
 0x954   : > { %v1586_v16 = vadd.f32 1.0, %v2708_v43 }
 0x956   : > { %2713 = vrcp.f32 %v1586_v16 }
 0x957   : > { %v2710_v59 = vpop.eup %2709  ;;  %2715 = vtanh.f32 %v1573_v53 }
 0x958   : > { %v1579_v3 = vadd.f32 1.0, %v2710_v59  ;;  %v2712_v1 = vpop.eup %2711 }
 0x959   : > { %v1595_v42 = vadd.f32 1.0, %v2712_v1 }
 0x95a   : > { %2717 = vrcp.f32 %v1579_v3 }
 0x95b   : > { %2719 = vrcp.f32 %v1595_v42 }
 0x963   : > { %v2714_v60 = vpop.eup %2713 }
 0x964   : > { %v2716_v61 = vpop.eup %2715 }
 0x965   : > { %v1590_v45 = vmul.f32 %v2716_v61, %v2714_v60  ;;  %v1713_v60 = vsel %vm324_vm1, %v3073_v51, 0.0 }
 0x966   : > { %v1714_v61 = vrot.slane %v1713_v60, 4 }
 0x967   : > { %v2718_v5 = vpop.eup %2717 }
 0x968   : > { %v1582_v62 = vmul.f32 %v2718_v5, %v3275_v22  ;;  %v2720_v9 = vpop.eup %2719  ;;  %v1624_v22 = vsel %vm2931_vm5, %v1622_v44, %v3051_v17  ;;  %v1715_v63 = vadd.f32 %v1714_v61, %v1713_v60 }
 0x96a   : > { %v3320_v0 = vadd.f32 %v1590_v45, %v1582_v62  ;;  %v1716_v62 = vrot.slane %v1715_v63, 2 }
 0x96c   : > { %2721 = vtanh.f32 %v3320_v0 }
 0x979   : > { %v2722_v10 = vpop.eup %2721 }
 0x97a   : > { %v1599_v11 = vmul.f32 %v2722_v10, %v2720_v9  ;;  %v1717_v10 = vadd.f32 %v1716_v62, %v1715_v63  ;;  %v1817_v63 = vsel %vm324_vm1, %v3107_v15, 0.0 }
 0x97c   : > { %v1600_v18 = vmul.f32 %v1599_v11, %v3008_v26  ;;  %v1617_v19 = vpack.c.bf16 %v1599_v11, %v1599_v11  ;;  %v1718_v11 = vrot.slane %v1717_v10, 1 }
 0x97e   : > { %v1601_v47 = vsel %vm324_vm1, %v1600_v18, 0.0  ;;  %v1619_v13 = vrot.slane %v1617_v19, 3  ;;  %v1719_v51 = vadd.f32 %v1718_v11, %v1717_v10 }
 0x97f   : > { %v1602_v49 = vrot.slane %v1601_v47, 4 }
 0x980   : > { %2513 = vmatprep.subr.msk.bf16.mxu1 %vm465_vm6, %v1619_v13  ;;  %v1629_v33 = vsel %vm465_vm6, %v1619_v13, 0  ;;  %v1627_v23 = vsel %vm419_vm2, %v1624_v22, %v1619_v13  ;;  %v1720_v14 = vpack.c.bf16 %v1719_v51, %v1719_v51  ;;  %v2809_v22 = vld [vmem:[%s2909_s7 + $0x30] sm:$0xf] }
 0x981   : > { %v1603_v12 = vadd.f32 %v1602_v49, %v1601_v47  ;;  %2463 = vmatpush3.bf16.msra.mxu1 %v1629_v33 }
 0x982   : > { %2464 = vmatprep.subr.bf16.mxu1 %v1627_v23  ;;  %v1726_v47 = vsel %vm414_vm4, %v2809_v22, %v1720_v14 }
 0x983   : > { %v1604_v7 = vrot.slane %v1603_v12, 2 }
 0x985   : > { %v1605_v41 = vadd.f32 %v1604_v7, %v1603_v12  ;;  %2465 = vmatpush3.bf16.msra.mxu1 %v1627_v23 }
 0x987   : > { %v1606_v28 = vrot.slane %v1605_v41, 1 }
 0x988   : > { %2467 = vmatmul.mubr.msk.bf16.vlgmr.msra.gmra.mxu1 %vm458_vm0, %v3194_v38 }
 0x989   : > { %v1607_v17 = vadd.f32 %v1606_v28, %v1605_v41  ;;  %2482 = vmatprep.mubr.msk.bf16.mxu1 %vm458_vm0, %v3182_v29 }
 0x98b   : > { %v1608_v32 = vadd.f32 %v1607_v17, %v3028_v8 }
 0x98d   : > { %v3340_v35 = vsel %vm1293_vm7, %v3311_v25, %v1608_v32 }
 0xa48   : > { %v2468_v36 = vpop.f32.mrf.mxu1 }
 0xa49   : > { %v1674_v59 = vadd.f32 %v2468_v36, %v2963_v56 }
 0xa4a   : > { %v1665_v37 = vpop.f32.mrf.mxu1 }
 0xa4b   : > { %v1666_v31 = vadd.f32 %v1665_v37, %v2957_v46  ;;  %v2291_v6 = vmul.f32 -1.442695, %v1674_v59 }
 0xa4c   : > { %v2469_v20 = vpop.f32.mrf.mxu1 }
 0xa4d   : > { %v2290_v43 = vmul.f32 -1.442695, %v1666_v31  ;;  %v1677_v25 = vadd.f32 %v2469_v20, %v2966_v58 }
 0xa4e   : > { %v1668_v48 = vpop.f32.mrf.mxu1 }
 0xa4f   : > { %2723 = vpow2.f32 %v2290_v43  ;;  %v1669_v16 = vadd.f32 %v1668_v48, %v2960_v52 }
 0xa51   : > { %v2289_v53 = vmul.f32 -1.442695, %v1669_v16 }
 0xa53   : > { %2725 = vpow2.f32 %v2289_v53 }
 0xa54   : > { %2727 = vpow2.f32 %v2291_v6 }
 0xa5c   : > { %v2724_v3 = vpop.eup %2723 }
 0xa5d   : > { %v1690_v54 = vadd.f32 1.0, %v2724_v3 }
 0xa5f   : > { %2729 = vrcp.f32 %v1690_v54 }
 0xa60   : > { %v2726_v57 = vpop.eup %2725  ;;  %2731 = vtanh.f32 %v1677_v25 }
 0xa61   : > { %v1683_v1 = vadd.f32 1.0, %v2726_v57  ;;  %v2728_v5 = vpop.eup %2727 }
 0xa62   : > { %v1699_v4 = vadd.f32 1.0, %v2728_v5  ;;  %v1818_v5 = vrot.slane %v1817_v63, 4 }
 0xa63   : > { %2733 = vrcp.f32 %v1683_v1 }
 0xa64   : > { %2735 = vrcp.f32 %v1699_v4 }
 0xa6c   : > { %v2730_v42 = vpop.eup %2729 }
 0xa6d   : > { %v2732_v45 = vpop.eup %2731 }
 0xa6e   : > { %v1694_v21 = vmul.f32 %v2732_v45, %v2730_v42  ;;  %v1819_v42 = vadd.f32 %v1818_v5, %v1817_v63 }
 0xa70   : > { %v2734_v2 = vpop.eup %2733  ;;  %v1820_v4 = vrot.slane %v1819_v42, 2 }
 0xa71   : > { %v1686_v30 = vmul.f32 %v2734_v2, %v3320_v0  ;;  %v2736_v44 = vpop.eup %2735  ;;  %v1728_v0 = vsel %vm2931_vm5, %v1726_v47, %v3085_v50 }
 0xa72   : > { %v1821_v14 = vadd.f32 %v1820_v4, %v1819_v42 }
 0xa73   : > { %v3349_v9 = vadd.f32 %v1694_v21, %v1686_v30 }
 0xa75   : > { %2737 = vtanh.f32 %v3349_v9 }
 0xa82   : > { %v2738_v18 = vpop.eup %2737 }
 0xa83   : > { %v1703_v19 = vmul.f32 %v2738_v18, %v2736_v44  ;;  %v1822_v44 = vrot.slane %v1821_v14, 1 }
 0xa85   : > { %v1704_v13 = vmul.f32 %v1703_v19, %v3008_v26  ;;  %v1721_v49 = vpack.c.bf16 %v1703_v19, %v1703_v19  ;;  %v1823_v15 = vadd.f32 %v1822_v44, %v1821_v14 }
 0xa87   : > { %v1705_v33 = vsel %vm324_vm1, %v1704_v13, 0.0  ;;  %v1723_v23 = vrot.slane %v1721_v49, 3  ;;  %v1824_v18 = vpack.c.bf16 %v1823_v15, %v1823_v15  ;;  %v2810_v13 = vld [vmem:[%s2909_s7 + $0x34] sm:$0xf] }
 0xa88   : > { %v1706_v12 = vrot.slane %v1705_v33, 4 }
 0xa89   : > { %2514 = vmatprep.subr.msk.bf16.mxu0 %vm465_vm6, %v1723_v23  ;;  %v1733_v7 = vsel %vm465_vm6, %v1723_v23, 0  ;;  %v1731_v41 = vsel %vm419_vm2, %v1728_v0, %v1723_v23  ;;  %v1830_v49 = vsel %vm414_vm4, %v2810_v13, %v1824_v18 }
 0xa8a   : > { %v1707_v28 = vadd.f32 %v1706_v12, %v1705_v33  ;;  %2471 = vmatpush3.bf16.msra.mxu0 %v1733_v7 }
 0xa8b   : > { %2472 = vmatprep.subr.bf16.mxu0 %v1731_v41 }
 0xa8c   : > { %v1708_v17 = vrot.slane %v1707_v28, 2 }
 0xa8e   : > { %v1709_v32 = vadd.f32 %v1708_v17, %v1707_v28  ;;  %2473 = vmatpush3.bf16.msra.mxu0 %v1731_v41 }
 0xa90   : > { %v1710_v36 = vrot.slane %v1709_v32, 1 }
 0xa91   : > { %2475 = vmatmul.mubr.msk.bf16.vlgmr.msra.gmra.mxu0 %vm458_vm0, %v3194_v38 }
 0xa92   : > { %v1711_v50 = vadd.f32 %v1710_v36, %v1709_v32  ;;  %2490 = vmatprep.mubr.msk.bf16.mxu0 %vm458_vm0, %v3182_v29 }
 0xa94   : > { %v1712_v37 = vadd.f32 %v1711_v50, %v3028_v8 }
 0xa96   : > { %v3369_v31 = vsel %vm1295_vm8, %v3340_v35, %v1712_v37 }
 0xb51   : > { %v2476_v20 = vpop.f32.mrf.mxu0 }
 0xb52   : > { %v1778_v54 = vadd.f32 %v2476_v20, %v2963_v56 }
 0xb53   : > { %v1769_v43 = vpop.f32.mrf.mxu0 }
 0xb54   : > { %v1770_v48 = vadd.f32 %v1769_v43, %v2957_v46  ;;  %v2296_v57 = vmul.f32 -1.442695, %v1778_v54 }
 0xb55   : > { %v2477_v16 = vpop.f32.mrf.mxu0 }
 0xb56   : > { %v2295_v53 = vmul.f32 -1.442695, %v1770_v48  ;;  %v1781_v35 = vadd.f32 %v2477_v16, %v2966_v58 }
 0xb57   : > { %v1772_v59 = vpop.f32.mrf.mxu0 }
 0xb58   : > { %2739 = vpow2.f32 %v2295_v53  ;;  %v1773_v3 = vadd.f32 %v1772_v59, %v2960_v52 }
 0xb5a   : > { %v2294_v6 = vmul.f32 -1.442695, %v1773_v3 }
 0xb5c   : > { %2741 = vpow2.f32 %v2294_v6 }
 0xb5d   : > { %2743 = vpow2.f32 %v2296_v57 }
 0xb65   : > { %v2740_v25 = vpop.eup %2739 }
 0xb66   : > { %v1794_v1 = vadd.f32 1.0, %v2740_v25 }
 0xb68   : > { %2745 = vrcp.f32 %v1794_v1 }
 0xb69   : > { %v2742_v60 = vpop.eup %2741  ;;  %2747 = vtanh.f32 %v1781_v35 }
 0xb6a   : > { %v1787_v61 = vadd.f32 1.0, %v2742_v60  ;;  %v2744_v45 = vpop.eup %2743 }
 0xb6b   : > { %v1803_v30 = vadd.f32 1.0, %v2744_v45 }
 0xb6c   : > { %2749 = vrcp.f32 %v1787_v61  ;;  %v1921_v61 = vsel %vm324_vm1, %v3144_v55, 0.0 }
 0xb6d   : > { %2751 = vrcp.f32 %v1803_v30  ;;  %v1922_v63 = vrot.slane %v1921_v61, 4 }
 0xb6f   : > { %v1923_v5 = vadd.f32 %v1922_v63, %v1921_v61 }
 0xb75   : > { %v2746_v62 = vpop.eup %2745 }
 0xb76   : > { %v2748_v2 = vpop.eup %2747 }
 0xb77   : > { %v1798_v10 = vmul.f32 %v2748_v2, %v2746_v62  ;;  %v1924_v2 = vrot.slane %v1923_v5, 2 }
 0xb79   : > { %v2750_v21 = vpop.eup %2749  ;;  %v1925_v14 = vadd.f32 %v1924_v2, %v1923_v5 }
 0xb7a   : > { %v1790_v11 = vmul.f32 %v2750_v21, %v3349_v9  ;;  %v2752_v19 = vpop.eup %2751  ;;  %v1832_v9 = vsel %vm2931_vm5, %v1830_v49, %v3119_v24 }
 0xb7b   : > { %v1926_v44 = vrot.slane %v1925_v14, 1 }
 0xb7c   : > { %v3378_v51 = vadd.f32 %v1798_v10, %v1790_v11 }
 0xb7d   : > { %v1927_v55 = vadd.f32 %v1926_v44, %v1925_v14 }
 0xb7e   : > { %2753 = vtanh.f32 %v3378_v51 }
 0xb7f   : > { %v1928_v15 = vpack.c.bf16 %v1927_v55, %v1927_v55 }
 0xb8b   : > { %v2754_v22 = vpop.eup %2753 }
 0xb8c   : > { %v1807_v47 = vmul.f32 %v2754_v22, %v2752_v19 }
 0xb8e   : > { %v1808_v0 = vmul.f32 %v1807_v47, %v3008_v26  ;;  %v1825_v33 = vpack.c.bf16 %v1807_v47, %v1807_v47  ;;  %v2811_v47 = vld [vmem:[%s2909_s7 + $0x38] sm:$0xf] }
 0xb8f   : > { %v1934_v13 = vsel %vm414_vm4, %v2811_v47, %v1928_v15  ;;  %v2812_v15 = vld [vmem:[%s2909_s7 + $0x3c] sm:$0xf] }
 0xb90   : > { %v1809_v23 = vsel %vm324_vm1, %v1808_v0, 0.0  ;;  %v1827_v12 = vrot.slane %v1825_v33, 3 }
 0xb91   : > { %v1810_v7 = vrot.slane %v1809_v23, 4 }
 0xb92   : > { %2515 = vmatprep.subr.msk.bf16.mxu1 %vm465_vm6, %v1827_v12  ;;  %v1837_v41 = vsel %vm465_vm6, %v1827_v12, 0  ;;  %v1835_v28 = vsel %vm419_vm2, %v1832_v9, %v1827_v12 }
 0xb93   : > { %v1811_v17 = vadd.f32 %v1810_v7, %v1809_v23  ;;  %2479 = vmatpush3.bf16.msra.mxu1 %v1837_v41 }
 0xb94   : > { %2480 = vmatprep.subr.bf16.mxu1 %v1835_v28 }
 0xb95   : > { %v1812_v32 = vrot.slane %v1811_v17, 2 }
 0xb97   : > { %v1813_v36 = vadd.f32 %v1812_v32, %v1811_v17  ;;  %2481 = vmatpush3.bf16.msra.mxu1 %v1835_v28 }
 0xb99   : > { %v1814_v50 = vrot.slane %v1813_v36, 1 }
 0xb9a   : > { %2483 = vmatmul.mubr.msk.bf16.vlgmr.msra.gmra.mxu1 %vm458_vm0, %v3194_v38 }
 0xb9b   : > { %v1815_v24 = vadd.f32 %v1814_v50, %v1813_v36  ;;  %2498 = vmatprep.mubr.msk.bf16.mxu1 %vm458_vm0, %v3182_v29 }
 0xb9d   : > { %v1816_v37 = vadd.f32 %v1815_v24, %v3028_v8 }
 0xb9f   : > { %v3398_v20 = vsel %vm414_vm4, %v3369_v31, %v1816_v37 }
 0xc5a   : > { %v2484_v43 = vpop.f32.mrf.mxu1 }
 0xc5b   : > { %v1882_v29 = vadd.f32 %v2484_v43, %v2963_v56 }
 0xc5c   : > { %v1873_v48 = vpop.f32.mrf.mxu1 }
 0xc5d   : > { %v1874_v16 = vadd.f32 %v1873_v48, %v2957_v46  ;;  %v2301_v57 = vmul.f32 -1.442695, %v1882_v29 }
 0xc5e   : > { %v2485_v53 = vpop.f32.mrf.mxu1 }
 0xc5f   : > { %v2300_v59 = vmul.f32 -1.442695, %v1874_v16  ;;  %v1885_v31 = vadd.f32 %v2485_v53, %v2966_v58 }
 0xc60   : > { %v1876_v3 = vpop.f32.mrf.mxu1 }
 0xc61   : > { %2755 = vpow2.f32 %v2300_v59  ;;  %v1877_v6 = vadd.f32 %v1876_v3, %v2960_v52 }
 0xc63   : > { %v2299_v54 = vmul.f32 -1.442695, %v1877_v6 }
 0xc65   : > { %2757 = vpow2.f32 %v2299_v54 }
 0xc66   : > { %2759 = vpow2.f32 %v2301_v57 }
 0xc6e   : > { %v2756_v25 = vpop.eup %2755 }
 0xc6f   : > { %v1898_v1 = vadd.f32 1.0, %v2756_v25 }
 0xc71   : > { %2761 = vrcp.f32 %v1898_v1  ;;  %v2025_v1 = vsel %vm324_vm1, %v3205_v40, 0.0 }
 0xc72   : > { %v2758_v35 = vpop.eup %2757  ;;  %2763 = vtanh.f32 %v1885_v31  ;;  %v2026_v31 = vrot.slane %v2025_v1, 4 }
 0xc73   : > { %v1891_v60 = vadd.f32 1.0, %v2758_v35  ;;  %v2760_v42 = vpop.eup %2759 }
 0xc74   : > { %v1907_v21 = vadd.f32 1.0, %v2760_v42  ;;  %v2027_v35 = vadd.f32 %v2026_v31, %v2025_v1 }
 0xc75   : > { %2765 = vrcp.f32 %v1891_v60 }
 0xc76   : > { %2767 = vrcp.f32 %v1907_v21  ;;  %v2028_v5 = vrot.slane %v2027_v35, 2 }
 0xc78   : > { %v2029_v21 = vadd.f32 %v2028_v5, %v2027_v35 }
 0xc7e   : > { %v2762_v45 = vpop.eup %2761 }
 0xc7f   : > { %v2764_v62 = vpop.eup %2763 }
 0xc80   : > { %v1902_v30 = vmul.f32 %v2764_v62, %v2762_v45 }
 0xc82   : > { %v2766_v4 = vpop.eup %2765 }
 0xc83   : > { %v1894_v10 = vmul.f32 %v2766_v4, %v3378_v51  ;;  %v2768_v18 = vpop.eup %2767  ;;  %v1936_v51 = vsel %vm2931_vm5, %v1934_v13, %v3158_v39 }
 0xc85   : > { %v3407_v11 = vadd.f32 %v1902_v30, %v1894_v10  ;;  %v2030_v30 = vrot.slane %v2029_v21, 1 }
 0xc87   : > { %2769 = vtanh.f32 %v3407_v11  ;;  %v2031_v10 = vadd.f32 %v2030_v30, %v2029_v21 }
 0xc89   : > { %v2032_v14 = vpack.c.bf16 %v2031_v10, %v2031_v10 }
 0xc94   : > { %v2770_v19 = vpop.eup %2769 }
 0xc95   : > { %v1911_v22 = vmul.f32 %v2770_v19, %v2768_v18  ;;  %v2038_v18 = vsel %vm414_vm4, %v2812_v15, %v2032_v14 }
 0xc97   : > { %v1912_v49 = vmul.f32 %v1911_v22, %v3008_v26  ;;  %v1929_v0 = vpack.c.bf16 %v1911_v22, %v1911_v22 }
 0xc99   : > { %v1913_v33 = vsel %vm324_vm1, %v1912_v49, 0.0  ;;  %v1931_v9 = vrot.slane %v1929_v0, 3 }
 0xc9a   : > { %v1914_v23 = vrot.slane %v1913_v33, 4 }
 0xc9b   : > { %2516 = vmatprep.subr.msk.bf16.mxu0 %vm465_vm6, %v1931_v9  ;;  %v1941_v12 = vsel %vm465_vm6, %v1931_v9, 0  ;;  %v1939_v7 = vsel %vm419_vm2, %v1936_v51, %v1931_v9 }
 0xc9c   : > { %v1915_v41 = vadd.f32 %v1914_v23, %v1913_v33  ;;  %2487 = vmatpush3.bf16.msra.mxu0 %v1941_v12 }
 0xc9d   : > { %2488 = vmatprep.subr.bf16.mxu0 %v1939_v7 }
 0xc9e   : > { %v1916_v28 = vrot.slane %v1915_v41, 2 }
 0xca0   : > { %v1917_v17 = vadd.f32 %v1916_v28, %v1915_v41  ;;  %2489 = vmatpush3.bf16.msra.mxu0 %v1939_v7 }
 0xca2   : > { %v1918_v32 = vrot.slane %v1917_v17, 1 }
 0xca3   : > { %2491 = vmatmul.mubr.msk.bf16.vlgmr.msra.gmra.mxu0 %vm458_vm0, %v3194_v38 }
 0xca4   : > { %v1919_v39 = vadd.f32 %v1918_v32, %v1917_v17 }
 0xca6   : > { %v1920_v36 = vadd.f32 %v1919_v39, %v3028_v8 }
 0xca8   : > { %v3425_v50 = vsel %vm419_vm2, %v3398_v20, %v1920_v36 }
 0xd63   : > { %v2492_v24 = vpop.f32.mrf.mxu0 }
 0xd64   : > { %v1986_v38 = vadd.f32 %v2492_v24, %v2963_v56 }
 0xd65   : > { %v1977_v37 = vpop.f32.mrf.mxu0 }
 0xd66   : > { %v1978_v43 = vadd.f32 %v1977_v37, %v2957_v46  ;;  %v2306_v54 = vmul.f32 -1.442695, %v1986_v38 }
 0xd67   : > { %v2493_v48 = vpop.f32.mrf.mxu0 }
 0xd68   : > { %v2305_v16 = vmul.f32 -1.442695, %v1978_v43  ;;  %v1989_v20 = vadd.f32 %v2493_v48, %v2966_v58 }
 0xd69   : > { %v1980_v53 = vpop.f32.mrf.mxu0 }
 0xd6a   : > { %2771 = vpow2.f32 %v2305_v16  ;;  %v1981_v59 = vadd.f32 %v1980_v53, %v2960_v52 }
 0xd6c   : > { %v2304_v3 = vmul.f32 -1.442695, %v1981_v59 }
 0xd6e   : > { %2773 = vpow2.f32 %v2304_v3 }
 0xd6f   : > { %2775 = vpow2.f32 %v2306_v54 }
 0xd77   : > { %v2772_v6 = vpop.eup %2771 }
 0xd78   : > { %v2002_v29 = vadd.f32 1.0, %v2772_v6 }
 0xd7a   : > { %2777 = vrcp.f32 %v2002_v29 }
 0xd7b   : > { %v2774_v25 = vpop.eup %2773  ;;  %2779 = vtanh.f32 %v1989_v20 }
 0xd7c   : > { %v1995_v57 = vadd.f32 1.0, %v2774_v25  ;;  %v2776_v60 = vpop.eup %2775 }
 0xd7d   : > { %v2011_v45 = vadd.f32 1.0, %v2776_v60 }
 0xd7e   : > { %2781 = vrcp.f32 %v1995_v57 }
 0xd7f   : > { %2783 = vrcp.f32 %v2011_v45 }
 0xd87   : > { %v2778_v61 = vpop.eup %2777 }
 0xd88   : > { %v2780_v63 = vpop.eup %2779 }
 0xd89   : > { %v2006_v62 = vmul.f32 %v2780_v63, %v2778_v61 }
 0xd8b   : > { %v2782_v42 = vpop.eup %2781 }
 0xd8c   : > { %v1998_v2 = vmul.f32 %v2782_v42, %v3407_v11  ;;  %v2784_v40 = vpop.eup %2783  ;;  %v2040_v11 = vsel %vm2931_vm5, %v2038_v18, %v3226_v27 }
 0xd8e   : > { %v2007_v4 = vadd.f32 %v2006_v62, %v1998_v2 }
 0xd90   : > { %2785 = vtanh.f32 %v2007_v4 }
 0xd9d   : > { %v2786_v44 = vpop.eup %2785 }
 0xd9e   : > { %v2015_v55 = vmul.f32 %v2786_v44, %v2784_v40 }
 0xda0   : > { %v2016_v19 = vmul.f32 %v2015_v55, %v3008_v26  ;;  %v2033_v22 = vpack.c.bf16 %v2015_v55, %v2015_v55 }
 0xda2   : > { %v2017_v47 = vsel %vm324_vm1, %v2016_v19, 0.0  ;;  %v2035_v13 = vrot.slane %v2033_v22, 3 }
 0xda3   : > { %v2018_v49 = vrot.slane %v2017_v47, 4 }
 0xda4   : > { %2517 = vmatprep.subr.msk.bf16.mxu1 %vm465_vm6, %v2035_v13  ;;  %v2045_v0 = vsel %vm465_vm6, %v2035_v13, 0  ;;  %v2043_v51 = vsel %vm419_vm2, %v2040_v11, %v2035_v13 }
 0xda5   : > { %v2019_v33 = vadd.f32 %v2018_v49, %v2017_v47  ;;  %2495 = vmatpush3.bf16.msra.mxu1 %v2045_v0 }
 0xda6   : > { %2496 = vmatprep.subr.bf16.mxu1 %v2043_v51 }
 0xda7   : > { %v2020_v9 = vrot.slane %v2019_v33, 2 }
 0xda9   : > { %v2021_v23 = vadd.f32 %v2020_v9, %v2019_v33  ;;  %2497 = vmatpush3.bf16.msra.mxu1 %v2043_v51 }
 0xdab   : > { %v2022_v12 = vrot.slane %v2021_v23, 1 }
 0xdac   : > { %2499 = vmatmul.mubr.msk.bf16.vlgmr.msra.gmra.mxu1 %vm458_vm0, %v2813_v34 }
 0xdad   : > { %v2023_v27 = vadd.f32 %v2022_v12, %v2021_v23 }
 0xdaf   : > { %v2024_v7 = vadd.f32 %v2023_v27, %v3028_v8 }
 0xdb1   : > { %v2134_v41 = vsel %vm1299_vm9, %v3425_v50, %v2024_v7 }
 0xe6c   : > { %v2500_v28 = vpop.f32.mrf.mxu1 }
 0xe6d   : > { %v2090_v48 = vadd.f32 %v2500_v28, %v2963_v56 }
 0xe6e   : > { %v2081_v17 = vpop.f32.mrf.mxu1 }
 0xe6f   : > { %v2082_v32 = vadd.f32 %v2081_v17, %v2957_v46  ;;  %v2311_v53 = vmul.f32 -1.442695, %v2090_v48 }
 0xe70   : > { %v2501_v39 = vpop.f32.mrf.mxu1 }
 0xe71   : > { %v2310_v36 = vmul.f32 -1.442695, %v2082_v32  ;;  %v2093_v3 = vadd.f32 %v2501_v39, %v2966_v58 }
 0xe72   : > { %v2084_v24 = vpop.f32.mrf.mxu1 }
 0xe73   : > { %2787 = vpow2.f32 %v2310_v36  ;;  %v2085_v37 = vadd.f32 %v2084_v24, %v2960_v52 }
 0xe75   : > { %v2309_v43 = vmul.f32 -1.442695, %v2085_v37 }
 0xe77   : > { %2789 = vpow2.f32 %v2309_v43 }
 0xe78   : > { %2791 = vpow2.f32 %v2311_v53 }
 0xe80   : > { %v2788_v16 = vpop.eup %2787 }
 0xe81   : > { %v2106_v59 = vadd.f32 1.0, %v2788_v16 }
 0xe83   : > { %2793 = vrcp.f32 %v2106_v59 }
 0xe84   : > { %v2790_v50 = vpop.eup %2789  ;;  %2795 = vtanh.f32 %v2093_v3 }
 0xe85   : > { %v2099_v38 = vadd.f32 1.0, %v2790_v50  ;;  %v2792_v46 = vpop.eup %2791 }
 0xe86   : > { %v2115_v52 = vadd.f32 1.0, %v2792_v46 }
 0xe87   : > { %2797 = vrcp.f32 %v2099_v38 }
 0xe88   : > { %2799 = vrcp.f32 %v2115_v52 }
 0xe90   : > { %v2794_v6 = vpop.eup %2793 }
 0xe91   : > { %v2796_v54 = vpop.eup %2795 }
 0xe92   : > { %v2110_v20 = vmul.f32 %v2796_v54, %v2794_v6 }
 0xe94   : > { %v2798_v29 = vpop.eup %2797 }
 0xe95   : > { %v2102_v25 = vmul.f32 %v2798_v29, %v2007_v4  ;;  %v2800_v56 = vpop.eup %2799 }
 0xe97   : > { %v2111_v57 = vadd.f32 %v2110_v20, %v2102_v25 }
 0xe99   : > { %2801 = vtanh.f32 %v2111_v57 }
 0xea6   : > { %v2802_v1 = vpop.eup %2801 }
 0xea7   : > { %v2119_v58 = vmul.f32 %v2802_v1, %v2800_v56 }
 0xea9   : > { %v2120_v31 = vmul.f32 %v2119_v58, %v3008_v26 }
 0xeab   : > { %v2121_v35 = vsel %vm324_vm1, %v2120_v31, 0.0 }
 0xeac   : > { %v2122_v60 = vrot.slane %v2121_v35, 4 }
 0xeae   : > { %v2123_v61 = vadd.f32 %v2122_v60, %v2121_v35 }
 0xeb0   : > { %v2124_v63 = vrot.slane %v2123_v61, 2 }
 0xeb2   : > { %v2125_v5 = vadd.f32 %v2124_v63, %v2123_v61 }
 0xeb4   : > { %v2126_v42 = vrot.slane %v2125_v5, 1 }
 0xeb6   : > { %v2127_v45 = vadd.f32 %v2126_v42, %v2125_v5 }
 0xeb8   : > { %v2128_v62 = vadd.f32 %v2127_v45, %v3028_v8 }
 0xeba   : > { %v2135_v2 = vsel %vm1301_vm10, %v2134_v41, %v2128_v62 }
 0xebb   : > { %2137 = vst.msk [vmem:[%s3297_s26 + $0x8] sm:$0xff] %vm324_vm1, %v2135_v2 }
 0xebc PF: > { %s17_s22 = sadd.s32 1, %s2836_s22   ;;  %s3478_s20 = smov %s2832_s21 }
 0xebd   : > { %p14_p5 = scmp.ge.s32.totalorder %s17_s22, 4   ;;  %s3479_s21 = smov %s3481_s4 }
 0xebf   :  { %16 = sbr.rel (!%p14_p5) target bundleno = 3 (0x3), region = 70 }

</bundles_post_ra>
